<compile_context>
chip_gen: v7x
topology: tpu7x:2x2x1
jax: 0.10.0
libtpu: 0.0.40
codegen_flags: <defaults>
</compile_context>

<pallas_src>
import numpy as np
import jax
import jax.numpy as jnp
from jax.experimental import pallas as pl
from jax.experimental.pallas import tpu as pltpu

OUT_H, OUT_W = 530, 730          # fixed by nn.Upsample((530, 730)) in the module
LANE = 128


# ---------------------------------------------------------------------------
# In-kernel helper: 2x2 max pool of a conv output in (h, w*c)-flattened form
# whose columns are ordered [even output widths | odd output widths]
# (the "pool swizzle", baked into the conv operator at build time).
# Result is in standard (w, c)-flattened order.
# ---------------------------------------------------------------------------
def _pool2x2_swizzled(y):
    h_out, wc = y.shape[0] // 2, y.shape[1]
    r = y.reshape(h_out, 2, wc)                       # leading-dim regroup only
    ym = jnp.maximum(r[:, 0, :], r[:, 1, :])          # height pool
    return jnp.maximum(ym[:, :wc // 2], ym[:, wc // 2:])   # width pool (lane-aligned halves)


# ---------------------------------------------------------------------------
# Kernel 1 (fused): layer1 + layer2 + drop_out(eval) + up1, one image per grid step.
# ---------------------------------------------------------------------------
def _front_kernel(xp_ref, k1_ref, bn1_ref, k2_ref, bn2_ref, ku1_ref, r1_ref, bu1_ref,
                  o_ref, p2_ref, u_ref):
    # xp_ref : (1, H+4, W*Cin)          f32  height-padded, (w,c)-flattened input
    # k1_ref : (5, W*Cin, W*C1)         bf16 conv1 operator (kx folded, cols pool-swizzled)
    # bn1_ref: (3, W*C1)                f32  rows = conv bias / BN scale / BN shift
    # k2_ref : (5, (W/2)*C1, (W/2)*C2)  bf16 conv2 operator (kx folded, cols pool-swizzled)
    # bn2_ref: (3, (W/2)*C2)            f32
    # ku1_ref: (5, (W/4)*C2, up1_w*C3)  bf16 fused width-interp x 5x5-conv operator of up1
    # r1_ref : (up1_h, 5*HinP)          bf16 reassociated height-interp operator of up1
    # bu1_ref: (1, up1_w*C3)            f32  conv bias tiled over (w, c)
    # o_ref  : (1, up1_h, up1_w*C3)     f32
    # p2_ref : ((H/2)+4, (W/2)*C1)      f32  scratch: height-padded layer2 input
    # u_ref  : (5*HinP, up1_w*C3)       f32  scratch: stacked U_ky = h2 @ Ku1_ky
    H = xp_ref.shape[1] - 4
    H1, H2 = H // 2, H // 4
    hin_p = u_ref.shape[0] // 5

    # ---- layer1: Conv2d(5x5, pad 2) + bias + ReLU + BatchNorm(eval) + MaxPool(2x2) ----
    xp = xp_ref[0].astype(jnp.bfloat16)
    acc = jnp.zeros((H, k1_ref.shape[2]), jnp.float32)
    for ky in range(5):                                   # kx folded into the operator
        acc = acc + jnp.dot(xp[ky:ky + H, :], k1_ref[ky],
                            preferred_element_type=jnp.float32)
    y1 = jnp.maximum(acc + bn1_ref[0:1, :], 0.0) * bn1_ref[1:2, :] + bn1_ref[2:3, :]
    h1 = _pool2x2_swizzled(y1)                            # (H1, (W/2)*C1), standard (w,c)

    # ---- layer2 input: zero height-pad in VMEM (width pad folded into k2) ----
    p2_ref[...] = jnp.zeros_like(p2_ref)
    p2_ref[pl.ds(2, H1), :] = h1

    # ---- layer2: Conv2d(5x5, pad 2) + bias + ReLU + BatchNorm(eval) + MaxPool(2x2) ----
    xp2 = p2_ref[...].astype(jnp.bfloat16)
    acc2 = jnp.zeros((H1, k2_ref.shape[2]), jnp.float32)
    for ky in range(5):
        acc2 = acc2 + jnp.dot(xp2[ky:ky + H1, :], k2_ref[ky],
                              preferred_element_type=jnp.float32)
    y2 = jnp.maximum(acc2 + bn2_ref[0:1, :], 0.0) * bn2_ref[1:2, :] + bn2_ref[2:3, :]
    h2 = _pool2x2_swizzled(y2)                            # (H2, (W/4)*C2)

    # drop_out: eval-mode identity.
    # TODO(synk): training-mode Dropout (random mask) is not implemented.

    # ---- up1: bilinear x2 + Conv2d(5x5, pad 2), reassociated low-height form ----
    z = h2.astype(jnp.bfloat16)
    if H2 != hin_p:
        u_ref[...] = jnp.zeros_like(u_ref)                # zero the padded U rows
    for ky in range(5):
        u_ref[pl.ds(ky * hin_p, H2), :] = jnp.dot(z, ku1_ref[ky],
                                                  preferred_element_type=jnp.float32)
    o_ref[0] = (jnp.dot(r1_ref[...], u_ref[...].astype(jnp.bfloat16),
                        preferred_element_type=jnp.float32) + bu1_ref[...])


def fused_front(xp, k1, bn1, k2, bn2, ku1, r1, bu1):
    N, hp4, wcin = xp.shape
    h1_rows = (hp4 - 4) // 2
    up1_h = r1.shape[0]
    hin_p = r1.shape[1] // 5
    up1_wc = ku1.shape[2]
    half1 = k1.shape[2] // 2                              # (W/2)*C1 = layer2 input width
    return pl.pallas_call(
        _front_kernel,
        out_shape=jax.ShapeDtypeStruct((N, up1_h, up1_wc), jnp.float32),
        grid=(N,),
        in_specs=[
            pl.BlockSpec((1, hp4, wcin), lambda n: (n, 0, 0)),
            pl.BlockSpec(k1.shape, lambda n: (0, 0, 0)),
            pl.BlockSpec(bn1.shape, lambda n: (0, 0)),
            pl.BlockSpec(k2.shape, lambda n: (0, 0, 0)),
            pl.BlockSpec(bn2.shape, lambda n: (0, 0)),
            pl.BlockSpec(ku1.shape, lambda n: (0, 0, 0)),
            pl.BlockSpec(r1.shape, lambda n: (0, 0)),
            pl.BlockSpec(bu1.shape, lambda n: (0, 0)),
        ],
        out_specs=pl.BlockSpec((1, up1_h, up1_wc), lambda n: (n, 0, 0)),
        scratch_shapes=[
            pltpu.VMEM((h1_rows + 4, half1), jnp.float32),     # padded layer2 input
            pltpu.VMEM((5 * hin_p, up1_wc), jnp.float32),      # stacked U for up1
        ],
        compiler_params=pltpu.CompilerParams(
            dimension_semantics=("parallel",),                 # megacore over batch
            vmem_limit_bytes=32 * 1024 * 1024),
    )(xp, k1, bn1, k2, bn2, ku1, r1, bu1)


# ---------------------------------------------------------------------------
# Kernel 2: bilinear Upsample(align_corners=False) + Conv2d(5x5, pad 2), reassociated:
#           out = R @ stack_ky(z @ K_ky) + bias
# ---------------------------------------------------------------------------
def _upconv_kernel(z_ref, k_ref, r_ref, b_ref, o_ref, u_ref):
    # z_ref: (1, Hin, Win*Cin)   f32  (w,c)-flattened input rows
    # k_ref: (5, Win*Cin, WCout) bf16 fused (width-interp x 5x5 conv) operator per ky
    # r_ref: (TH, 5*HinP)        bf16 reassociated height-interp operator
    # b_ref: (1, WCout)          f32  conv bias tiled over (w_out, c_out), zero in lane pad
    # o_ref: (1, TH, WCout)      f32
    # u_ref: (5*HinP, WCout)     f32  scratch: stacked U_ky = z @ K_ky
    hin = z_ref.shape[1]
    hin_p = u_ref.shape[0] // 5
    z = z_ref[0].astype(jnp.bfloat16)
    if hin != hin_p:
        u_ref[...] = jnp.zeros_like(u_ref)                # zero the padded U rows
    for ky in range(5):
        u_ref[pl.ds(ky * hin_p, hin), :] = jnp.dot(z, k_ref[ky],
                                                   preferred_element_type=jnp.float32)
    o_ref[0] = (jnp.dot(r_ref[...], u_ref[...].astype(jnp.bfloat16),
                        preferred_element_type=jnp.float32) + b_ref[...])


def upsample_bilinear_conv(z, k_op, r_op, b_row):
    N, hin, wc_in = z.shape
    th, wc_out = r_op.shape[0], k_op.shape[2]
    hin_p = r_op.shape[1] // 5
    return pl.pallas_call(
        _upconv_kernel,
        out_shape=jax.ShapeDtypeStruct((N, th, wc_out), jnp.float32),
        grid=(N,),
        in_specs=[
            pl.BlockSpec((1, hin, wc_in), lambda n: (n, 0, 0)),
            pl.BlockSpec(k_op.shape, lambda n: (0, 0, 0)),
            pl.BlockSpec(r_op.shape, lambda n: (0, 0)),
            pl.BlockSpec(b_row.shape, lambda n: (0, 0)),
        ],
        out_specs=pl.BlockSpec((1, th, wc_out), lambda n: (n, 0, 0)),
        scratch_shapes=[pltpu.VMEM((5 * hin_p, wc_out), jnp.float32)],
        compiler_params=pltpu.CompilerParams(
            dimension_semantics=("parallel",),
            vmem_limit_bytes=32 * 1024 * 1024),
    )(z, k_op, r_op, b_row)


# ---------------------------------------------------------------------------
# One-time operator construction (called once in build_ops, NOT per forward).
# ---------------------------------------------------------------------------
def _bilinear_matrix(out_size, in_size):
    # PyTorch nn.Upsample(mode='bilinear', align_corners=False) 1-D weights.
    scale = in_size / out_size
    dst = np.arange(out_size, dtype=np.float64)
    src = np.maximum(scale * (dst + 0.5) - 0.5, 0.0)
    i0 = np.minimum(np.floor(src).astype(np.int64), in_size - 1)
    frac = src - i0
    i1 = np.minimum(i0 + 1, in_size - 1)
    m = np.zeros((out_size, in_size), np.float32)
    m[np.arange(out_size), i0] += (1.0 - frac).astype(np.float32)
    m[np.arange(out_size), i1] += frac.astype(np.float32)
    return m


def _height_reassoc_operator(out_h, in_h):
    # (out_h, 5*hin_p) bf16: column block ky holds rows ky..ky+out_h of the
    # conv-padded bilinear height matrix (rows 2..out_h+1 = bilinear, rest zero).
    hin_p = -(-in_h // 8) * 8
    full = np.zeros((out_h + 4, in_h), np.float32)
    full[2:2 + out_h] = _bilinear_matrix(out_h, in_h)
    r = np.zeros((out_h, 5 * hin_p), np.float32)
    for ky in range(5):
        r[:, ky * hin_p: ky * hin_p + in_h] = full[ky:ky + out_h, :]
    return jnp.asarray(r).astype(jnp.bfloat16)


def _conv_width_operator(out_w, in_w, w_conv, bias, width_map=None, out_perm=None,
                         lane_pad_to=LANE):
    # Fused (width-map x 5x5 conv) operator, rows = (w_in, ci), cols = (w_out, co).
    # width_map: (out_w, in_w) width-linear map (bilinear interp by default; identity
    # for the plain conv layers).  Width zero-padding of the conv is folded in.
    # out_perm optionally permutes the w_out ordering of the columns (pool swizzle).
    cin, cout = int(w_conv.shape[2]), int(w_conv.shape[3])
    if width_map is None:
        width_map = _bilinear_matrix(out_w, in_w)
    rw = np.zeros((out_w + 4, in_w), np.float32)
    rw[2:2 + out_w] = width_map
    shif = np.stack([rw[kx:kx + out_w] for kx in range(5)])        # (5, out_w, in_w)
    k = jnp.einsum('xjw,yxio->ywijo', jnp.asarray(shif), w_conv)   # (5, w_in, ci, w_out, co)
    b = jnp.broadcast_to(bias[None, :], (out_w, cout))
    if out_perm is not None:
        k = k[:, :, :, out_perm, :]
        b = b[out_perm, :]
    k = k.reshape(5, in_w * cin, out_w * cout)
    b = b.reshape(out_w * cout)
    wc = out_w * cout
    wc_pad = -(-wc // lane_pad_to) * lane_pad_to                   # lane-dense output width
    if wc_pad != wc:
        k = jnp.pad(k, ((0, 0), (0, 0), (0, wc_pad - wc)))
        b = jnp.pad(b, (0, wc_pad - wc))
    return k.astype(jnp.bfloat16), b.astype(jnp.float32).reshape(1, wc_pad)


def _layer_param_rows(bias, scale, shift, out_w):
    # (3, out_w*c): conv-bias / BN-scale / BN-shift rows tiled over (w, c).
    # (Per-channel params are invariant under the pool swizzle.)
    return jnp.stack([jnp.tile(bias, out_w), jnp.tile(scale, out_w),
                      jnp.tile(shift, out_w)]).astype(jnp.float32)


# ---------------------------------------------------------------------------
# Parameters (deterministic synthetic init; shapes follow DemoNet.__init__)
# ---------------------------------------------------------------------------
def init_params(key, in_channels=3, out_channels=1):
    ks = jax.random.split(key, 10)

    def conv_w(k, cin, cout):
        return jax.random.normal(k, (5, 5, cin, cout), jnp.float32) / np.sqrt(25 * cin)

    def conv_b(k, cout):
        return 0.1 * jax.random.normal(k, (cout,), jnp.float32)

    def bn(k, c):
        k1, k2, k3, k4 = jax.random.split(k, 4)
        gamma = 1.0 + 0.1 * jax.random.normal(k1, (c,), jnp.float32)
        beta = 0.1 * jax.random.normal(k2, (c,), jnp.float32)
        mean = 0.1 * jax.random.normal(k3, (c,), jnp.float32)
        var = jax.random.uniform(k4, (c,), jnp.float32, minval=0.5, maxval=1.5)
        scale = gamma / jnp.sqrt(var + 1e-5)
        shift = beta - mean * scale
        return scale, shift

    w1, b1 = conv_w(ks[0], in_channels, 32), conv_b(ks[1], 32)
    bn1_scale, bn1_shift = bn(ks[2], 32)
    w2, b2 = conv_w(ks[3], 32, 64), conv_b(ks[4], 64)
    bn2_scale, bn2_shift = bn(ks[5], 64)
    wu1, bu1 = conv_w(ks[6], 64, 32), conv_b(ks[7], 32)
    wu2, bu2 = conv_w(ks[8], 32, out_channels), conv_b(ks[9], out_channels)
    return dict(w1=w1, b1=b1, bn1_scale=bn1_scale, bn1_shift=bn1_shift,
                w2=w2, b2=b2, bn2_scale=bn2_scale, bn2_shift=bn2_shift,
                wu1=wu1, bu1=bu1, wu2=wu2, bu2=bu2)


def build_ops(params, in_h, in_w):
    """One-time construction of every kernel operand (device arrays only)."""
    assert in_h % 4 == 0 and in_w % 8 == 0, "input spatial dims must be /4 and /8"
    c1, c2, c3 = (int(params['w1'].shape[3]), int(params['w2'].shape[3]),
                  int(params['wu1'].shape[3]))
    w1_, w2_ = in_w, in_w // 2                 # widths entering layer1 / layer2
    h2_h, h2_w = in_h // 4, in_w // 4          # after layer1 + layer2 pooling
    up1_h, up1_w = 2 * h2_h, 2 * h2_w
    assert (w1_ * c1) % LANE == 0 and (w2_ * c2) % LANE == 0
    assert (up1_w * c3) % LANE == 0            # up1 output feeds up2 (w,c)-flattened

    def pool_perm(w):                          # even output widths first, then odd
        return np.concatenate([np.arange(0, w, 2), np.arange(1, w, 2)])

    k1, _ = _conv_width_operator(w1_, w1_, params['w1'], params['b1'],
                                 width_map=np.eye(w1_, dtype=np.float32),
                                 out_perm=pool_perm(w1_))
    k2, _ = _conv_width_operator(w2_, w2_, params['w2'], params['b2'],
                                 width_map=np.eye(w2_, dtype=np.float32),
                                 out_perm=pool_perm(w2_))
    ku1, bu1r = _conv_width_operator(up1_w, h2_w, params['wu1'], params['bu1'])
    ku2, bu2r = _conv_width_operator(OUT_W, up1_w, params['wu2'], params['bu2'])

    bn1 = _layer_param_rows(params['b1'], params['bn1_scale'], params['bn1_shift'], w1_)
    bn2 = _layer_param_rows(params['b2'], params['bn2_scale'], params['bn2_shift'], w2_)
    return dict(
        k1=k1, bn1=bn1, k2=k2, bn2=bn2,
        ku1=ku1, r1=_height_reassoc_operator(up1_h, h2_h), bu1=bu1r,
        ku2=ku2, r2=_height_reassoc_operator(OUT_H, up1_h), bu2=bu2r,
    )


# ---------------------------------------------------------------------------
# Forward pass (matches DemoNet.forward, eval-mode semantics).  Fully jittable.
# ---------------------------------------------------------------------------
def demo_net_forward(x_nchw, ops, out_channels=1):
    x = jnp.transpose(x_nchw, (0, 2, 3, 1)).astype(jnp.float32)       # NCHW -> NHWC
    N, H, W, Cin = x.shape
    # Height-only zero pad (width padding is folded into the conv operators), (w,c)-flatten.
    xp = jnp.pad(x, ((0, 0), (2, 2), (0, 0), (0, 0))).reshape(N, H + 4, W * Cin)

    # layer1 + layer2 + drop_out(eval identity) + up1, fused into ONE pallas_call.
    o1 = fused_front(xp, ops['k1'], ops['bn1'], ops['k2'], ops['bn2'],
                     ops['ku1'], ops['r1'], ops['bu1'])               # (N, up1_h, up1_w*32)

    # up2: bilinear upsample to (530, 730) + Conv2d(32 -> out_channels), lane-padded width.
    o2 = upsample_bilinear_conv(o1, ops['ku2'], ops['r2'], ops['bu2'])  # (N, 530, 768)
    o2 = o2[:, :, :OUT_W * out_channels].reshape(N, OUT_H, OUT_W, out_channels)
    return jnp.transpose(o2, (0, 3, 1, 2))                            # NHWC -> NCHW


if __name__ == "__main__":
    key = jax.random.PRNGKey(0)
    pkey, xkey = jax.random.split(key)
    params = init_params(pkey, in_channels=3, out_channels=1)
    x = jax.random.normal(xkey, (2, 3, 16, 16), jnp.float32)          # NCHW, like PyTorch

    ops = build_ops(params, in_h=16, in_w=16)                         # one-time glue
    fwd = jax.jit(demo_net_forward, static_argnames=("out_channels",))

    out = jax.block_until_ready(fwd(x, ops))
    assert out.shape == (2, 1, 530, 730), out.shape
    assert bool(jnp.all(jnp.isfinite(out)))
    print("KERNEL_OK")
</pallas_src>

<mosaic_0001>
module attributes {stable_mosaic.version = 11 : i64} {
  func.func @_front_kernel(%arg0: i32, %arg1: memref<1x20x48xf32, #tpu.memory_space<vmem>>, %arg2: memref<5x48x512xbf16, #tpu.memory_space<vmem>>, %arg3: memref<3x512xf32, #tpu.memory_space<vmem>>, %arg4: memref<5x256x512xbf16, #tpu.memory_space<vmem>>, %arg5: memref<3x512xf32, #tpu.memory_space<vmem>>, %arg6: memref<5x256x256xbf16, #tpu.memory_space<vmem>>, %arg7: memref<8x40xbf16, #tpu.memory_space<vmem>>, %arg8: memref<1x256xf32, #tpu.memory_space<vmem>>, %arg9: memref<1x8x256xf32, #tpu.memory_space<vmem>>, %arg10: memref<12x256xf32, #tpu.memory_space<vmem>>, %arg11: memref<40x256xf32, #tpu.memory_space<vmem>>) attributes {dimension_semantics = [#tpu.dimension_semantics<parallel>], iteration_bounds = array<i64: 2>, scalar_prefetch = 0 : i64, scratch_operands = 2 : i64, tpu.core_type = #tpu.core_type<tc>, window_params = [{transform_indices = @transform_0, window_bounds = array<i64: 1, 20, 48>}, {pipeline_mode = #tpu.pipeline_mode<synchronous>, transform_indices = @transform_1, window_bounds = array<i64: 5, 48, 512>}, {pipeline_mode = #tpu.pipeline_mode<synchronous>, transform_indices = @transform_2, window_bounds = array<i64: 3, 512>}, {pipeline_mode = #tpu.pipeline_mode<synchronous>, transform_indices = @transform_3, window_bounds = array<i64: 5, 256, 512>}, {pipeline_mode = #tpu.pipeline_mode<synchronous>, transform_indices = @transform_4, window_bounds = array<i64: 3, 512>}, {pipeline_mode = #tpu.pipeline_mode<synchronous>, transform_indices = @transform_5, window_bounds = array<i64: 5, 256, 256>}, {pipeline_mode = #tpu.pipeline_mode<synchronous>, transform_indices = @transform_6, window_bounds = array<i64: 8, 40>}, {pipeline_mode = #tpu.pipeline_mode<synchronous>, transform_indices = @transform_7, window_bounds = array<i64: 1, 256>}, {transform_indices = @transform_8, window_bounds = array<i64: 1, 8, 256>}]} {
    %c0 = arith.constant 0 : index
    %c0_0 = arith.constant 0 : index
    %c0_1 = arith.constant 0 : index
    %0 = vector.load %arg1[%c0, %c0_0, %c0_1] : memref<1x20x48xf32, #tpu.memory_space<vmem>>, vector<1x20x48xf32>
    %1 = vector.shape_cast %0 : vector<1x20x48xf32> to vector<20x48xf32>
    %2 = arith.truncf %1 : vector<20x48xf32> to vector<20x48xbf16>
    %cst = arith.constant 0.000000e+00 : f32
    %3 = vector.broadcast %cst : f32 to vector<16x512xf32>
    %4 = vector.extract_strided_slice %2 {offsets = [0, 0], sizes = [16, 48], strides = [1, 1]} : vector<20x48xbf16> to vector<16x48xbf16>
    %c0_2 = arith.constant 0 : index
    %c0_3 = arith.constant 0 : index
    %c0_4 = arith.constant 0 : index
    %5 = vector.load %arg2[%c0_2, %c0_3, %c0_4] : memref<5x48x512xbf16, #tpu.memory_space<vmem>>, vector<1x48x512xbf16>
    %6 = vector.shape_cast %5 : vector<1x48x512xbf16> to vector<48x512xbf16>
    %cst_5 = arith.constant dense<0.000000e+00> : vector<16x512xf32>
    %7 = tpu.matmul %4, %6, %cst_5 {dimension_numbers = #tpu.dot_dimension_numbers<[1], [0], [0], [1], [0, 0, 1, 1], [], []>} : vector<16x48xbf16>, vector<48x512xbf16>, vector<16x512xf32> -> vector<16x512xf32>
    %8 = arith.addf %3, %7 : vector<16x512xf32>
    %9 = vector.extract_strided_slice %2 {offsets = [1, 0], sizes = [16, 48], strides = [1, 1]} : vector<20x48xbf16> to vector<16x48xbf16>
    %c1 = arith.constant 1 : index
    %c0_6 = arith.constant 0 : index
    %c0_7 = arith.constant 0 : index
    %10 = vector.load %arg2[%c1, %c0_6, %c0_7] : memref<5x48x512xbf16, #tpu.memory_space<vmem>>, vector<1x48x512xbf16>
    %11 = vector.shape_cast %10 : vector<1x48x512xbf16> to vector<48x512xbf16>
    %cst_8 = arith.constant dense<0.000000e+00> : vector<16x512xf32>
    %12 = tpu.matmul %9, %11, %cst_8 {dimension_numbers = #tpu.dot_dimension_numbers<[1], [0], [0], [1], [0, 0, 1, 1], [], []>} : vector<16x48xbf16>, vector<48x512xbf16>, vector<16x512xf32> -> vector<16x512xf32>
    %13 = arith.addf %8, %12 : vector<16x512xf32>
    %14 = vector.extract_strided_slice %2 {offsets = [2, 0], sizes = [16, 48], strides = [1, 1]} : vector<20x48xbf16> to vector<16x48xbf16>
    %c2 = arith.constant 2 : index
    %c0_9 = arith.constant 0 : index
    %c0_10 = arith.constant 0 : index
    %15 = vector.load %arg2[%c2, %c0_9, %c0_10] : memref<5x48x512xbf16, #tpu.memory_space<vmem>>, vector<1x48x512xbf16>
    %16 = vector.shape_cast %15 : vector<1x48x512xbf16> to vector<48x512xbf16>
    %cst_11 = arith.constant dense<0.000000e+00> : vector<16x512xf32>
    %17 = tpu.matmul %14, %16, %cst_11 {dimension_numbers = #tpu.dot_dimension_numbers<[1], [0], [0], [1], [0, 0, 1, 1], [], []>} : vector<16x48xbf16>, vector<48x512xbf16>, vector<16x512xf32> -> vector<16x512xf32>
    %18 = arith.addf %13, %17 : vector<16x512xf32>
    %19 = vector.extract_strided_slice %2 {offsets = [3, 0], sizes = [16, 48], strides = [1, 1]} : vector<20x48xbf16> to vector<16x48xbf16>
    %c3 = arith.constant 3 : index
    %c0_12 = arith.constant 0 : index
    %c0_13 = arith.constant 0 : index
    %20 = vector.load %arg2[%c3, %c0_12, %c0_13] : memref<5x48x512xbf16, #tpu.memory_space<vmem>>, vector<1x48x512xbf16>
    %21 = vector.shape_cast %20 : vector<1x48x512xbf16> to vector<48x512xbf16>
    %cst_14 = arith.constant dense<0.000000e+00> : vector<16x512xf32>
    %22 = tpu.matmul %19, %21, %cst_14 {dimension_numbers = #tpu.dot_dimension_numbers<[1], [0], [0], [1], [0, 0, 1, 1], [], []>} : vector<16x48xbf16>, vector<48x512xbf16>, vector<16x512xf32> -> vector<16x512xf32>
    %23 = arith.addf %18, %22 : vector<16x512xf32>
    %24 = vector.extract_strided_slice %2 {offsets = [4, 0], sizes = [16, 48], strides = [1, 1]} : vector<20x48xbf16> to vector<16x48xbf16>
    %c4 = arith.constant 4 : index
    %c0_15 = arith.constant 0 : index
    %c0_16 = arith.constant 0 : index
    %25 = vector.load %arg2[%c4, %c0_15, %c0_16] : memref<5x48x512xbf16, #tpu.memory_space<vmem>>, vector<1x48x512xbf16>
    %26 = vector.shape_cast %25 : vector<1x48x512xbf16> to vector<48x512xbf16>
    %cst_17 = arith.constant dense<0.000000e+00> : vector<16x512xf32>
    %27 = tpu.matmul %24, %26, %cst_17 {dimension_numbers = #tpu.dot_dimension_numbers<[1], [0], [0], [1], [0, 0, 1, 1], [], []>} : vector<16x48xbf16>, vector<48x512xbf16>, vector<16x512xf32> -> vector<16x512xf32>
    %28 = arith.addf %23, %27 : vector<16x512xf32>
    %c0_18 = arith.constant 0 : index
    %c0_19 = arith.constant 0 : index
    %29 = vector.load %arg3[%c0_18, %c0_19] : memref<3x512xf32, #tpu.memory_space<vmem>>, vector<1x512xf32>
    %30 = vector.broadcast %29 : vector<1x512xf32> to vector<16x512xf32>
    %31 = arith.addf %28, %30 : vector<16x512xf32>
    %cst_20 = arith.constant 0.000000e+00 : f32
    %32 = vector.broadcast %cst_20 : f32 to vector<16x512xf32>
    %33 = arith.maximumf %31, %32 : vector<16x512xf32>
    %c1_21 = arith.constant 1 : index
    %c0_22 = arith.constant 0 : index
    %34 = vector.load %arg3[%c1_21, %c0_22] : memref<3x512xf32, #tpu.memory_space<vmem>>, vector<1x512xf32>
    %35 = vector.broadcast %34 : vector<1x512xf32> to vector<16x512xf32>
    %36 = arith.mulf %33, %35 : vector<16x512xf32>
    %c2_23 = arith.constant 2 : index
    %c0_24 = arith.constant 0 : index
    %37 = vector.load %arg3[%c2_23, %c0_24] : memref<3x512xf32, #tpu.memory_space<vmem>>, vector<1x512xf32>
    %38 = vector.broadcast %37 : vector<1x512xf32> to vector<16x512xf32>
    %39 = arith.addf %36, %38 : vector<16x512xf32>
    %40 = vector.shape_cast %39 : vector<16x512xf32> to vector<8x2x512xf32>
    %41 = vector.extract_strided_slice %40 {offsets = [0, 0, 0], sizes = [8, 1, 512], strides = [1, 1, 1]} : vector<8x2x512xf32> to vector<8x1x512xf32>
    %42 = vector.shape_cast %41 : vector<8x1x512xf32> to vector<8x512xf32>
    %43 = vector.extract_strided_slice %40 {offsets = [0, 1, 0], sizes = [8, 1, 512], strides = [1, 1, 1]} : vector<8x2x512xf32> to vector<8x1x512xf32>
    %44 = vector.shape_cast %43 : vector<8x1x512xf32> to vector<8x512xf32>
    %45 = arith.maximumf %42, %44 : vector<8x512xf32>
    %46 = vector.extract_strided_slice %45 {offsets = [0, 0], sizes = [8, 256], strides = [1, 1]} : vector<8x512xf32> to vector<8x256xf32>
    %47 = vector.extract_strided_slice %45 {offsets = [0, 256], sizes = [8, 256], strides = [1, 1]} : vector<8x512xf32> to vector<8x256xf32>
    %48 = arith.maximumf %46, %47 : vector<8x256xf32>
    %cst_25 = arith.constant 0.000000e+00 : f32
    %49 = vector.broadcast %cst_25 : f32 to vector<12x256xf32>
    %c0_26 = arith.constant 0 : index
    %c0_27 = arith.constant 0 : index
    %50 = vector.load %arg10[%c0_26, %c0_27] : memref<12x256xf32, #tpu.memory_space<vmem>>, vector<12x256xf32>
    tpu.vector_store %arg10[%c0_26, %c0_27], %49 {strides = array<i32>} : memref<12x256xf32, #tpu.memory_space<vmem>>, vector<12x256xf32>,
    %c2_28 = arith.constant 2 : index
    %c0_29 = arith.constant 0 : index
    %51 = vector.load %arg10[%c2_28, %c0_29] : memref<12x256xf32, #tpu.memory_space<vmem>>, vector<8x256xf32>
    tpu.vector_store %arg10[%c2_28, %c0_29], %48 {strides = array<i32>} : memref<12x256xf32, #tpu.memory_space<vmem>>, vector<8x256xf32>,
    %c0_30 = arith.constant 0 : index
    %c0_31 = arith.constant 0 : index
    %52 = vector.load %arg10[%c0_30, %c0_31] : memref<12x256xf32, #tpu.memory_space<vmem>>, vector<12x256xf32>
    %53 = arith.truncf %52 : vector<12x256xf32> to vector<12x256xbf16>
    %cst_32 = arith.constant 0.000000e+00 : f32
    %54 = vector.broadcast %cst_32 : f32 to vector<8x512xf32>
    %55 = vector.extract_strided_slice %53 {offsets = [0, 0], sizes = [8, 256], strides = [1, 1]} : vector<12x256xbf16> to vector<8x256xbf16>
    %c0_33 = arith.constant 0 : index
    %c0_34 = arith.constant 0 : index
    %c0_35 = arith.constant 0 : index
    %56 = vector.load %arg4[%c0_33, %c0_34, %c0_35] : memref<5x256x512xbf16, #tpu.memory_space<vmem>>, vector<1x256x512xbf16>
    %57 = vector.shape_cast %56 : vector<1x256x512xbf16> to vector<256x512xbf16>
    %cst_36 = arith.constant dense<0.000000e+00> : vector<8x512xf32>
    %58 = tpu.matmul %55, %57, %cst_36 {dimension_numbers = #tpu.dot_dimension_numbers<[1], [0], [0], [1], [0, 0, 1, 1], [], []>} : vector<8x256xbf16>, vector<256x512xbf16>, vector<8x512xf32> -> vector<8x512xf32>
    %59 = arith.addf %54, %58 : vector<8x512xf32>
    %60 = vector.extract_strided_slice %53 {offsets = [1, 0], sizes = [8, 256], strides = [1, 1]} : vector<12x256xbf16> to vector<8x256xbf16>
    %c1_37 = arith.constant 1 : index
    %c0_38 = arith.constant 0 : index
    %c0_39 = arith.constant 0 : index
    %61 = vector.load %arg4[%c1_37, %c0_38, %c0_39] : memref<5x256x512xbf16, #tpu.memory_space<vmem>>, vector<1x256x512xbf16>
    %62 = vector.shape_cast %61 : vector<1x256x512xbf16> to vector<256x512xbf16>
    %cst_40 = arith.constant dense<0.000000e+00> : vector<8x512xf32>
    %63 = tpu.matmul %60, %62, %cst_40 {dimension_numbers = #tpu.dot_dimension_numbers<[1], [0], [0], [1], [0, 0, 1, 1], [], []>} : vector<8x256xbf16>, vector<256x512xbf16>, vector<8x512xf32> -> vector<8x512xf32>
    %64 = arith.addf %59, %63 : vector<8x512xf32>
    %65 = vector.extract_strided_slice %53 {offsets = [2, 0], sizes = [8, 256], strides = [1, 1]} : vector<12x256xbf16> to vector<8x256xbf16>
    %c2_41 = arith.constant 2 : index
    %c0_42 = arith.constant 0 : index
    %c0_43 = arith.constant 0 : index
    %66 = vector.load %arg4[%c2_41, %c0_42, %c0_43] : memref<5x256x512xbf16, #tpu.memory_space<vmem>>, vector<1x256x512xbf16>
    %67 = vector.shape_cast %66 : vector<1x256x512xbf16> to vector<256x512xbf16>
    %cst_44 = arith.constant dense<0.000000e+00> : vector<8x512xf32>
    %68 = tpu.matmul %65, %67, %cst_44 {dimension_numbers = #tpu.dot_dimension_numbers<[1], [0], [0], [1], [0, 0, 1, 1], [], []>} : vector<8x256xbf16>, vector<256x512xbf16>, vector<8x512xf32> -> vector<8x512xf32>
    %69 = arith.addf %64, %68 : vector<8x512xf32>
    %70 = vector.extract_strided_slice %53 {offsets = [3, 0], sizes = [8, 256], strides = [1, 1]} : vector<12x256xbf16> to vector<8x256xbf16>
    %c3_45 = arith.constant 3 : index
    %c0_46 = arith.constant 0 : index
    %c0_47 = arith.constant 0 : index
    %71 = vector.load %arg4[%c3_45, %c0_46, %c0_47] : memref<5x256x512xbf16, #tpu.memory_space<vmem>>, vector<1x256x512xbf16>
    %72 = vector.shape_cast %71 : vector<1x256x512xbf16> to vector<256x512xbf16>
    %cst_48 = arith.constant dense<0.000000e+00> : vector<8x512xf32>
    %73 = tpu.matmul %70, %72, %cst_48 {dimension_numbers = #tpu.dot_dimension_numbers<[1], [0], [0], [1], [0, 0, 1, 1], [], []>} : vector<8x256xbf16>, vector<256x512xbf16>, vector<8x512xf32> -> vector<8x512xf32>
    %74 = arith.addf %69, %73 : vector<8x512xf32>
    %75 = vector.extract_strided_slice %53 {offsets = [4, 0], sizes = [8, 256], strides = [1, 1]} : vector<12x256xbf16> to vector<8x256xbf16>
    %c4_49 = arith.constant 4 : index
    %c0_50 = arith.constant 0 : index
    %c0_51 = arith.constant 0 : index
    %76 = vector.load %arg4[%c4_49, %c0_50, %c0_51] : memref<5x256x512xbf16, #tpu.memory_space<vmem>>, vector<1x256x512xbf16>
    %77 = vector.shape_cast %76 : vector<1x256x512xbf16> to vector<256x512xbf16>
    %cst_52 = arith.constant dense<0.000000e+00> : vector<8x512xf32>
    %78 = tpu.matmul %75, %77, %cst_52 {dimension_numbers = #tpu.dot_dimension_numbers<[1], [0], [0], [1], [0, 0, 1, 1], [], []>} : vector<8x256xbf16>, vector<256x512xbf16>, vector<8x512xf32> -> vector<8x512xf32>
    %79 = arith.addf %74, %78 : vector<8x512xf32>
    %c0_53 = arith.constant 0 : index
    %c0_54 = arith.constant 0 : index
    %80 = vector.load %arg5[%c0_53, %c0_54] : memref<3x512xf32, #tpu.memory_space<vmem>>, vector<1x512xf32>
    %81 = vector.broadcast %80 : vector<1x512xf32> to vector<8x512xf32>
    %82 = arith.addf %79, %81 : vector<8x512xf32>
    %cst_55 = arith.constant 0.000000e+00 : f32
    %83 = vector.broadcast %cst_55 : f32 to vector<8x512xf32>
    %84 = arith.maximumf %82, %83 : vector<8x512xf32>
    %c1_56 = arith.constant 1 : index
    %c0_57 = arith.constant 0 : index
    %85 = vector.load %arg5[%c1_56, %c0_57] : memref<3x512xf32, #tpu.memory_space<vmem>>, vector<1x512xf32>
    %86 = vector.broadcast %85 : vector<1x512xf32> to vector<8x512xf32>
    %87 = arith.mulf %84, %86 : vector<8x512xf32>
    %c2_58 = arith.constant 2 : index
    %c0_59 = arith.constant 0 : index
    %88 = vector.load %arg5[%c2_58, %c0_59] : memref<3x512xf32, #tpu.memory_space<vmem>>, vector<1x512xf32>
    %89 = vector.broadcast %88 : vector<1x512xf32> to vector<8x512xf32>
    %90 = arith.addf %87, %89 : vector<8x512xf32>
    %91 = vector.shape_cast %90 : vector<8x512xf32> to vector<4x2x512xf32>
    %92 = vector.extract_strided_slice %91 {offsets = [0, 0, 0], sizes = [4, 1, 512], strides = [1, 1, 1]} : vector<4x2x512xf32> to vector<4x1x512xf32>
    %93 = vector.shape_cast %92 : vector<4x1x512xf32> to vector<4x512xf32>
    %94 = vector.extract_strided_slice %91 {offsets = [0, 1, 0], sizes = [4, 1, 512], strides = [1, 1, 1]} : vector<4x2x512xf32> to vector<4x1x512xf32>
    %95 = vector.shape_cast %94 : vector<4x1x512xf32> to vector<4x512xf32>
    %96 = arith.maximumf %93, %95 : vector<4x512xf32>
    %97 = vector.extract_strided_slice %96 {offsets = [0, 0], sizes = [4, 256], strides = [1, 1]} : vector<4x512xf32> to vector<4x256xf32>
    %98 = vector.extract_strided_slice %96 {offsets = [0, 256], sizes = [4, 256], strides = [1, 1]} : vector<4x512xf32> to vector<4x256xf32>
    %99 = arith.maximumf %97, %98 : vector<4x256xf32>
    %100 = arith.truncf %99 : vector<4x256xf32> to vector<4x256xbf16>
    %cst_60 = arith.constant 0.000000e+00 : f32
    %101 = vector.broadcast %cst_60 : f32 to vector<40x256xf32>
    %c0_61 = arith.constant 0 : index
    %c0_62 = arith.constant 0 : index
    %102 = vector.load %arg11[%c0_61, %c0_62] : memref<40x256xf32, #tpu.memory_space<vmem>>, vector<40x256xf32>
    tpu.vector_store %arg11[%c0_61, %c0_62], %101 {strides = array<i32>} : memref<40x256xf32, #tpu.memory_space<vmem>>, vector<40x256xf32>,
    %c0_63 = arith.constant 0 : index
    %c0_64 = arith.constant 0 : index
    %c0_65 = arith.constant 0 : index
    %103 = vector.load %arg6[%c0_63, %c0_64, %c0_65] : memref<5x256x256xbf16, #tpu.memory_space<vmem>>, vector<1x256x256xbf16>
    %104 = vector.shape_cast %103 : vector<1x256x256xbf16> to vector<256x256xbf16>
    %cst_66 = arith.constant dense<0.000000e+00> : vector<4x256xf32>
    %105 = tpu.matmul %100, %104, %cst_66 {dimension_numbers = #tpu.dot_dimension_numbers<[1], [0], [0], [1], [0, 0, 1, 1], [], []>} : vector<4x256xbf16>, vector<256x256xbf16>, vector<4x256xf32> -> vector<4x256xf32>
    %c0_67 = arith.constant 0 : index
    %c0_68 = arith.constant 0 : index
    %106 = vector.load %arg11[%c0_67, %c0_68] : memref<40x256xf32, #tpu.memory_space<vmem>>, vector<4x256xf32>
    tpu.vector_store %arg11[%c0_67, %c0_68], %105 {strides = array<i32>} : memref<40x256xf32, #tpu.memory_space<vmem>>, vector<4x256xf32>,
    %c1_69 = arith.constant 1 : index
    %c0_70 = arith.constant 0 : index
    %c0_71 = arith.constant 0 : index
    %107 = vector.load %arg6[%c1_69, %c0_70, %c0_71] : memref<5x256x256xbf16, #tpu.memory_space<vmem>>, vector<1x256x256xbf16>
    %108 = vector.shape_cast %107 : vector<1x256x256xbf16> to vector<256x256xbf16>
    %cst_72 = arith.constant dense<0.000000e+00> : vector<4x256xf32>
    %109 = tpu.matmul %100, %108, %cst_72 {dimension_numbers = #tpu.dot_dimension_numbers<[1], [0], [0], [1], [0, 0, 1, 1], [], []>} : vector<4x256xbf16>, vector<256x256xbf16>, vector<4x256xf32> -> vector<4x256xf32>
    %c8 = arith.constant 8 : index
    %c0_73 = arith.constant 0 : index
    %110 = vector.load %arg11[%c8, %c0_73] : memref<40x256xf32, #tpu.memory_space<vmem>>, vector<4x256xf32>
    tpu.vector_store %arg11[%c8, %c0_73], %109 {strides = array<i32>} : memref<40x256xf32, #tpu.memory_space<vmem>>, vector<4x256xf32>,
    %c2_74 = arith.constant 2 : index
    %c0_75 = arith.constant 0 : index
    %c0_76 = arith.constant 0 : index
    %111 = vector.load %arg6[%c2_74, %c0_75, %c0_76] : memref<5x256x256xbf16, #tpu.memory_space<vmem>>, vector<1x256x256xbf16>
    %112 = vector.shape_cast %111 : vector<1x256x256xbf16> to vector<256x256xbf16>
    %cst_77 = arith.constant dense<0.000000e+00> : vector<4x256xf32>
    %113 = tpu.matmul %100, %112, %cst_77 {dimension_numbers = #tpu.dot_dimension_numbers<[1], [0], [0], [1], [0, 0, 1, 1], [], []>} : vector<4x256xbf16>, vector<256x256xbf16>, vector<4x256xf32> -> vector<4x256xf32>
    %c16 = arith.constant 16 : index
    %c0_78 = arith.constant 0 : index
    %114 = vector.load %arg11[%c16, %c0_78] : memref<40x256xf32, #tpu.memory_space<vmem>>, vector<4x256xf32>
    tpu.vector_store %arg11[%c16, %c0_78], %113 {strides = array<i32>} : memref<40x256xf32, #tpu.memory_space<vmem>>, vector<4x256xf32>,
    %c3_79 = arith.constant 3 : index
    %c0_80 = arith.constant 0 : index
    %c0_81 = arith.constant 0 : index
    %115 = vector.load %arg6[%c3_79, %c0_80, %c0_81] : memref<5x256x256xbf16, #tpu.memory_space<vmem>>, vector<1x256x256xbf16>
    %116 = vector.shape_cast %115 : vector<1x256x256xbf16> to vector<256x256xbf16>
    %cst_82 = arith.constant dense<0.000000e+00> : vector<4x256xf32>
    %117 = tpu.matmul %100, %116, %cst_82 {dimension_numbers = #tpu.dot_dimension_numbers<[1], [0], [0], [1], [0, 0, 1, 1], [], []>} : vector<4x256xbf16>, vector<256x256xbf16>, vector<4x256xf32> -> vector<4x256xf32>
    %c24 = arith.constant 24 : index
    %c0_83 = arith.constant 0 : index
    %118 = vector.load %arg11[%c24, %c0_83] : memref<40x256xf32, #tpu.memory_space<vmem>>, vector<4x256xf32>
    tpu.vector_store %arg11[%c24, %c0_83], %117 {strides = array<i32>} : memref<40x256xf32, #tpu.memory_space<vmem>>, vector<4x256xf32>,
    %c4_84 = arith.constant 4 : index
    %c0_85 = arith.constant 0 : index
    %c0_86 = arith.constant 0 : index
    %119 = vector.load %arg6[%c4_84, %c0_85, %c0_86] : memref<5x256x256xbf16, #tpu.memory_space<vmem>>, vector<1x256x256xbf16>
    %120 = vector.shape_cast %119 : vector<1x256x256xbf16> to vector<256x256xbf16>
    %cst_87 = arith.constant dense<0.000000e+00> : vector<4x256xf32>
    %121 = tpu.matmul %100, %120, %cst_87 {dimension_numbers = #tpu.dot_dimension_numbers<[1], [0], [0], [1], [0, 0, 1, 1], [], []>} : vector<4x256xbf16>, vector<256x256xbf16>, vector<4x256xf32> -> vector<4x256xf32>
    %c32 = arith.constant 32 : index
    %c0_88 = arith.constant 0 : index
    %122 = vector.load %arg11[%c32, %c0_88] : memref<40x256xf32, #tpu.memory_space<vmem>>, vector<4x256xf32>
    tpu.vector_store %arg11[%c32, %c0_88], %121 {strides = array<i32>} : memref<40x256xf32, #tpu.memory_space<vmem>>, vector<4x256xf32>,
    %c0_89 = arith.constant 0 : index
    %c0_90 = arith.constant 0 : index
    %123 = vector.load %arg7[%c0_89, %c0_90] : memref<8x40xbf16, #tpu.memory_space<vmem>>, vector<8x40xbf16>
    %c0_91 = arith.constant 0 : index
    %c0_92 = arith.constant 0 : index
    %124 = vector.load %arg11[%c0_91, %c0_92] : memref<40x256xf32, #tpu.memory_space<vmem>>, vector<40x256xf32>
    %125 = arith.truncf %124 : vector<40x256xf32> to vector<40x256xbf16>
    %cst_93 = arith.constant dense<0.000000e+00> : vector<8x256xf32>
    %126 = tpu.matmul %123, %125, %cst_93 {dimension_numbers = #tpu.dot_dimension_numbers<[1], [0], [0], [1], [0, 0, 1, 1], [], []>} : vector<8x40xbf16>, vector<40x256xbf16>, vector<8x256xf32> -> vector<8x256xf32>
    %c0_94 = arith.constant 0 : index
    %c0_95 = arith.constant 0 : index
    %127 = vector.load %arg8[%c0_94, %c0_95] : memref<1x256xf32, #tpu.memory_space<vmem>>, vector<1x256xf32>
    %128 = vector.broadcast %127 : vector<1x256xf32> to vector<8x256xf32>
    %129 = arith.addf %126, %128 : vector<8x256xf32>
    %c0_96 = arith.constant 0 : index
    %c0_97 = arith.constant 0 : index
    %c0_98 = arith.constant 0 : index
    %130 = vector.load %arg9[%c0_96, %c0_97, %c0_98] : memref<1x8x256xf32, #tpu.memory_space<vmem>>, vector<1x8x256xf32>
    %131 = vector.shape_cast %130 : vector<1x8x256xf32> to vector<8x256xf32>
    %132 = vector.shape_cast %129 : vector<8x256xf32> to vector<1x8x256xf32>
    tpu.vector_store %arg9[%c0_96, %c0_97, %c0_98], %132 {strides = array<i32>} : memref<1x8x256xf32, #tpu.memory_space<vmem>>, vector<1x8x256xf32>,
    return
  }
  func.func @transform_0(%arg0: i32) -> (i32, i32, i32) {
    %c0_i32 = arith.constant 0 : i32
    %c0_i32_0 = arith.constant 0 : i32
    %c0_i32_1 = arith.constant 0 : i32
    return %arg0, %c0_i32, %c0_i32_0 : i32, i32, i32
  }
  func.func @transform_1(%arg0: i32) -> (i32, i32, i32) {
    %c0_i32 = arith.constant 0 : i32
    %c0_i32_0 = arith.constant 0 : i32
    %c0_i32_1 = arith.constant 0 : i32
    %c0_i32_2 = arith.constant 0 : i32
    return %c0_i32, %c0_i32_0, %c0_i32_1 : i32, i32, i32
  }
  func.func @transform_2(%arg0: i32) -> (i32, i32) {
    %c0_i32 = arith.constant 0 : i32
    %c0_i32_0 = arith.constant 0 : i32
    %c0_i32_1 = arith.constant 0 : i32
    return %c0_i32, %c0_i32_0 : i32, i32
  }
  func.func @transform_3(%arg0: i32) -> (i32, i32, i32) {
    %c0_i32 = arith.constant 0 : i32
    %c0_i32_0 = arith.constant 0 : i32
    %c0_i32_1 = arith.constant 0 : i32
    %c0_i32_2 = arith.constant 0 : i32
    return %c0_i32, %c0_i32_0, %c0_i32_1 : i32, i32, i32
  }
  func.func @transform_4(%arg0: i32) -> (i32, i32) {
    %c0_i32 = arith.constant 0 : i32
    %c0_i32_0 = arith.constant 0 : i32
    %c0_i32_1 = arith.constant 0 : i32
    return %c0_i32, %c0_i32_0 : i32, i32
  }
  func.func @transform_5(%arg0: i32) -> (i32, i32, i32) {
    %c0_i32 = arith.constant 0 : i32
    %c0_i32_0 = arith.constant 0 : i32
    %c0_i32_1 = arith.constant 0 : i32
    %c0_i32_2 = arith.constant 0 : i32
    return %c0_i32, %c0_i32_0, %c0_i32_1 : i32, i32, i32
  }
  func.func @transform_6(%arg0: i32) -> (i32, i32) {
    %c0_i32 = arith.constant 0 : i32
    %c0_i32_0 = arith.constant 0 : i32
    %c0_i32_1 = arith.constant 0 : i32
    return %c0_i32, %c0_i32_0 : i32, i32
  }
  func.func @transform_7(%arg0: i32) -> (i32, i32) {
    %c0_i32 = arith.constant 0 : i32
    %c0_i32_0 = arith.constant 0 : i32
    %c0_i32_1 = arith.constant 0 : i32
    return %c0_i32, %c0_i32_0 : i32, i32
  }
  func.func @transform_8(%arg0: i32) -> (i32, i32, i32) {
    %c0_i32 = arith.constant 0 : i32
    %c0_i32_0 = arith.constant 0 : i32
    %c0_i32_1 = arith.constant 0 : i32
    return %arg0, %c0_i32, %c0_i32_0 : i32, i32, i32
  }
}

module attributes {stable_mosaic.version = 11 : i64} {
  func.func @_upconv_kernel(%arg0: i32, %arg1: memref<1x8x256xf32, #tpu.memory_space<vmem>>, %arg2: memref<5x256x768xbf16, #tpu.memory_space<vmem>>, %arg3: memref<530x40xbf16, #tpu.memory_space<vmem>>, %arg4: memref<1x768xf32, #tpu.memory_space<vmem>>, %arg5: memref<1x530x768xf32, #tpu.memory_space<vmem>>, %arg6: memref<40x768xf32, #tpu.memory_space<vmem>>) attributes {dimension_semantics = [#tpu.dimension_semantics<parallel>], iteration_bounds = array<i64: 2>, scalar_prefetch = 0 : i64, scratch_operands = 1 : i64, tpu.core_type = #tpu.core_type<tc>, window_params = [{transform_indices = @transform_0, window_bounds = array<i64: 1, 8, 256>}, {pipeline_mode = #tpu.pipeline_mode<synchronous>, transform_indices = @transform_1, window_bounds = array<i64: 5, 256, 768>}, {pipeline_mode = #tpu.pipeline_mode<synchronous>, transform_indices = @transform_2, window_bounds = array<i64: 530, 40>}, {pipeline_mode = #tpu.pipeline_mode<synchronous>, transform_indices = @transform_3, window_bounds = array<i64: 1, 768>}, {transform_indices = @transform_4, window_bounds = array<i64: 1, 530, 768>}]} {
    %c0 = arith.constant 0 : index
    %c0_0 = arith.constant 0 : index
    %c0_1 = arith.constant 0 : index
    %0 = vector.load %arg1[%c0, %c0_0, %c0_1] : memref<1x8x256xf32, #tpu.memory_space<vmem>>, vector<1x8x256xf32>
    %1 = vector.shape_cast %0 : vector<1x8x256xf32> to vector<8x256xf32>
    %2 = arith.truncf %1 : vector<8x256xf32> to vector<8x256xbf16>
    %c0_2 = arith.constant 0 : index
    %c0_3 = arith.constant 0 : index
    %c0_4 = arith.constant 0 : index
    %3 = vector.load %arg2[%c0_2, %c0_3, %c0_4] : memref<5x256x768xbf16, #tpu.memory_space<vmem>>, vector<1x256x768xbf16>
    %4 = vector.shape_cast %3 : vector<1x256x768xbf16> to vector<256x768xbf16>
    %cst = arith.constant dense<0.000000e+00> : vector<8x768xf32>
    %5 = tpu.matmul %2, %4, %cst {dimension_numbers = #tpu.dot_dimension_numbers<[1], [0], [0], [1], [0, 0, 1, 1], [], []>} : vector<8x256xbf16>, vector<256x768xbf16>, vector<8x768xf32> -> vector<8x768xf32>
    %c0_5 = arith.constant 0 : index
    %c0_6 = arith.constant 0 : index
    %6 = vector.load %arg6[%c0_5, %c0_6] : memref<40x768xf32, #tpu.memory_space<vmem>>, vector<8x768xf32>
    tpu.vector_store %arg6[%c0_5, %c0_6], %5 {strides = array<i32>} : memref<40x768xf32, #tpu.memory_space<vmem>>, vector<8x768xf32>,
    %c1 = arith.constant 1 : index
    %c0_7 = arith.constant 0 : index
    %c0_8 = arith.constant 0 : index
    %7 = vector.load %arg2[%c1, %c0_7, %c0_8] : memref<5x256x768xbf16, #tpu.memory_space<vmem>>, vector<1x256x768xbf16>
    %8 = vector.shape_cast %7 : vector<1x256x768xbf16> to vector<256x768xbf16>
    %cst_9 = arith.constant dense<0.000000e+00> : vector<8x768xf32>
    %9 = tpu.matmul %2, %8, %cst_9 {dimension_numbers = #tpu.dot_dimension_numbers<[1], [0], [0], [1], [0, 0, 1, 1], [], []>} : vector<8x256xbf16>, vector<256x768xbf16>, vector<8x768xf32> -> vector<8x768xf32>
    %c8 = arith.constant 8 : index
    %c0_10 = arith.constant 0 : index
    %10 = vector.load %arg6[%c8, %c0_10] : memref<40x768xf32, #tpu.memory_space<vmem>>, vector<8x768xf32>
    tpu.vector_store %arg6[%c8, %c0_10], %9 {strides = array<i32>} : memref<40x768xf32, #tpu.memory_space<vmem>>, vector<8x768xf32>,
    %c2 = arith.constant 2 : index
    %c0_11 = arith.constant 0 : index
    %c0_12 = arith.constant 0 : index
    %11 = vector.load %arg2[%c2, %c0_11, %c0_12] : memref<5x256x768xbf16, #tpu.memory_space<vmem>>, vector<1x256x768xbf16>
    %12 = vector.shape_cast %11 : vector<1x256x768xbf16> to vector<256x768xbf16>
    %cst_13 = arith.constant dense<0.000000e+00> : vector<8x768xf32>
    %13 = tpu.matmul %2, %12, %cst_13 {dimension_numbers = #tpu.dot_dimension_numbers<[1], [0], [0], [1], [0, 0, 1, 1], [], []>} : vector<8x256xbf16>, vector<256x768xbf16>, vector<8x768xf32> -> vector<8x768xf32>
    %c16 = arith.constant 16 : index
    %c0_14 = arith.constant 0 : index
    %14 = vector.load %arg6[%c16, %c0_14] : memref<40x768xf32, #tpu.memory_space<vmem>>, vector<8x768xf32>
    tpu.vector_store %arg6[%c16, %c0_14], %13 {strides = array<i32>} : memref<40x768xf32, #tpu.memory_space<vmem>>, vector<8x768xf32>,
    %c3 = arith.constant 3 : index
    %c0_15 = arith.constant 0 : index
    %c0_16 = arith.constant 0 : index
    %15 = vector.load %arg2[%c3, %c0_15, %c0_16] : memref<5x256x768xbf16, #tpu.memory_space<vmem>>, vector<1x256x768xbf16>
    %16 = vector.shape_cast %15 : vector<1x256x768xbf16> to vector<256x768xbf16>
    %cst_17 = arith.constant dense<0.000000e+00> : vector<8x768xf32>
    %17 = tpu.matmul %2, %16, %cst_17 {dimension_numbers = #tpu.dot_dimension_numbers<[1], [0], [0], [1], [0, 0, 1, 1], [], []>} : vector<8x256xbf16>, vector<256x768xbf16>, vector<8x768xf32> -> vector<8x768xf32>
    %c24 = arith.constant 24 : index
    %c0_18 = arith.constant 0 : index
    %18 = vector.load %arg6[%c24, %c0_18] : memref<40x768xf32, #tpu.memory_space<vmem>>, vector<8x768xf32>
    tpu.vector_store %arg6[%c24, %c0_18], %17 {strides = array<i32>} : memref<40x768xf32, #tpu.memory_space<vmem>>, vector<8x768xf32>,
    %c4 = arith.constant 4 : index
    %c0_19 = arith.constant 0 : index
    %c0_20 = arith.constant 0 : index
    %19 = vector.load %arg2[%c4, %c0_19, %c0_20] : memref<5x256x768xbf16, #tpu.memory_space<vmem>>, vector<1x256x768xbf16>
    %20 = vector.shape_cast %19 : vector<1x256x768xbf16> to vector<256x768xbf16>
    %cst_21 = arith.constant dense<0.000000e+00> : vector<8x768xf32>
    %21 = tpu.matmul %2, %20, %cst_21 {dimension_numbers = #tpu.dot_dimension_numbers<[1], [0], [0], [1], [0, 0, 1, 1], [], []>} : vector<8x256xbf16>, vector<256x768xbf16>, vector<8x768xf32> -> vector<8x768xf32>
    %c32 = arith.constant 32 : index
    %c0_22 = arith.constant 0 : index
    %22 = vector.load %arg6[%c32, %c0_22] : memref<40x768xf32, #tpu.memory_space<vmem>>, vector<8x768xf32>
    tpu.vector_store %arg6[%c32, %c0_22], %21 {strides = array<i32>} : memref<40x768xf32, #tpu.memory_space<vmem>>, vector<8x768xf32>,
    %c0_23 = arith.constant 0 : index
    %c0_24 = arith.constant 0 : index
    %23 = vector.load %arg3[%c0_23, %c0_24] : memref<530x40xbf16, #tpu.memory_space<vmem>>, vector<530x40xbf16>
    %c0_25 = arith.constant 0 : index
    %c0_26 = arith.constant 0 : index
    %24 = vector.load %arg6[%c0_25, %c0_26] : memref<40x768xf32, #tpu.memory_space<vmem>>, vector<40x768xf32>
    %25 = arith.truncf %24 : vector<40x768xf32> to vector<40x768xbf16>
    %cst_27 = arith.constant dense<0.000000e+00> : vector<530x768xf32>
    %26 = tpu.matmul %23, %25, %cst_27 {dimension_numbers = #tpu.dot_dimension_numbers<[1], [0], [0], [1], [0, 0, 1, 1], [], []>} : vector<530x40xbf16>, vector<40x768xbf16>, vector<530x768xf32> -> vector<530x768xf32>
    %c0_28 = arith.constant 0 : index
    %c0_29 = arith.constant 0 : index
    %27 = vector.load %arg4[%c0_28, %c0_29] : memref<1x768xf32, #tpu.memory_space<vmem>>, vector<1x768xf32>
    %28 = vector.broadcast %27 : vector<1x768xf32> to vector<530x768xf32>
    %29 = arith.addf %26, %28 : vector<530x768xf32>
    %c0_30 = arith.constant 0 : index
    %c0_31 = arith.constant 0 : index
    %c0_32 = arith.constant 0 : index
    %30 = vector.load %arg5[%c0_30, %c0_31, %c0_32] : memref<1x530x768xf32, #tpu.memory_space<vmem>>, vector<1x530x768xf32>
    %31 = vector.shape_cast %30 : vector<1x530x768xf32> to vector<530x768xf32>
    %32 = vector.shape_cast %29 : vector<530x768xf32> to vector<1x530x768xf32>
    tpu.vector_store %arg5[%c0_30, %c0_31, %c0_32], %32 {strides = array<i32>} : memref<1x530x768xf32, #tpu.memory_space<vmem>>, vector<1x530x768xf32>,
    return
  }
  func.func @transform_0(%arg0: i32) -> (i32, i32, i32) {
    %c0_i32 = arith.constant 0 : i32
    %c0_i32_0 = arith.constant 0 : i32
    %c0_i32_1 = arith.constant 0 : i32
    return %arg0, %c0_i32, %c0_i32_0 : i32, i32, i32
  }
  func.func @transform_1(%arg0: i32) -> (i32, i32, i32) {
    %c0_i32 = arith.constant 0 : i32
    %c0_i32_0 = arith.constant 0 : i32
    %c0_i32_1 = arith.constant 0 : i32
    %c0_i32_2 = arith.constant 0 : i32
    return %c0_i32, %c0_i32_0, %c0_i32_1 : i32, i32, i32
  }
  func.func @transform_2(%arg0: i32) -> (i32, i32) {
    %c0_i32 = arith.constant 0 : i32
    %c0_i32_0 = arith.constant 0 : i32
    %c0_i32_1 = arith.constant 0 : i32
    return %c0_i32, %c0_i32_0 : i32, i32
  }
  func.func @transform_3(%arg0: i32) -> (i32, i32) {
    %c0_i32 = arith.constant 0 : i32
    %c0_i32_0 = arith.constant 0 : i32
    %c0_i32_1 = arith.constant 0 : i32
    return %c0_i32, %c0_i32_0 : i32, i32
  }
  func.func @transform_4(%arg0: i32) -> (i32, i32, i32) {
    %c0_i32 = arith.constant 0 : i32
    %c0_i32_0 = arith.constant 0 : i32
    %c0_i32_1 = arith.constant 0 : i32
    return %arg0, %c0_i32, %c0_i32_0 : i32, i32, i32
  }
}

</mosaic_0001>

<bundles_post_ra>
// kernel: demo_net_forward.2
= control target key start
LH: loop header
LB: loop body
LE: loop exit
PB: predicated region body
PF: predicated region fallthrough
CT: control target
= control target key end

     0   :  { %13 = vsyncpa [#allocation5], 0  ;;  %s7881_s0 = inlined_call_operand.vmem [shape: f32[2,20,48], index: 0, kind: input, shape index: {}]   ;;  %s7882_s1 = inlined_call_operand.hbm [shape: bf16[5,48,512], index: 1, kind: input, shape index: {}]   ;;  %s7883_s2 = inlined_call_operand.hbm [shape: f32[3,512], index: 2, kind: input, shape index: {}]   ;;  %s7884_s3 = inlined_call_operand.hbm [shape: bf16[5,256,512], index: 3, kind: input, shape index: {}]   ;;  %s7885_s4 = inlined_call_operand.hbm [shape: f32[3,512], index: 4, kind: input, shape index: {}]   ;;  %s7886_s5 = inlined_call_operand.hbm [shape: bf16[5,256,256], index: 5, kind: input, shape index: {}]   ;;  %s7887_s6 = inlined_call_operand.hbm [shape: bf16[8,40], index: 6, kind: input, shape index: {}]   ;;  %s7888_s7 = inlined_call_operand.hbm [shape: f32[1,256], index: 7, kind: input, shape index: {}]   ;;  %s7889_s8 = inlined_call_operand.vmem [shape: f32[2,8,256], index: 8, kind: output, shape index: {}]  }
   0x1   :  { %14 = vsyncpa [#allocation7], 0 }
   0x2   :  { %15 = vsyncpa [#allocation10], 0 }
   0x3   :  { %16 = vsyncpa [#allocation13], 0  ;;  %s7450_s27 = smov 0  }
   0x4 LB: > { %s7391_s28 = smov [#allocation6]   ;;  %s7456_s30 = sadd.s32 4294967295, %s7389_s27   ;;  %s7389_s27 = sphi %s7450_s27, %s22_s27  }
   0x5   : > { %s252_s29 = sshll.u32 %s7391_s28, 4  ;;  %p5655_p0 = scmp.ge.s32.totalorder %s7389_s27, 1  ;;  %s7461_s29 = int_to_ptr.vmem [resolvable:$true] %s252_s29 }
   0x6   : > { %p226_p1 = scmp.lt.s32.totalorder %s7389_s27, 3  ;;  %p7890_p2 = scmp.eq.s32.totalorder %s7456_s30, 0 }
   0x7   : > { %s7392_s10 = smov [#allocation9]   ;;  %s7393_s12 = smov [#allocation12]  }
   0x8   : > { %p7463_p3 = pnand %p5655_p0, %p226_p1  ;;  %s276_s11 = sshll.u32 %s7392_s10, 4  ;;  %s7469_s11 = int_to_ptr.vmem [resolvable:$true] %s276_s11 }
   0x9   : > { %s300_s13 = sshll.u32 %s7393_s12, 4  ;;  %s7394_s15 = smov [#allocation4]   ;;  %s7477_s13 = int_to_ptr.vmem [resolvable:$true] %s300_s13 }
   0xa   : > { %s7892_s9 = scalar_select %p7463_p3, 1, 0 }
   0xb   : > { %p6303_p4 = pneg %p7463_p3  ;;  %s238_s16 = sshll.u32 %s7394_s15, 4  ;;  %s7479_s16 = int_to_ptr.vmem [resolvable:$true] %s238_s16 }
   0xc   : > { %s7171_s19 = scalar_lea.hbm %s7883_s2, 256 }
   0xd   : > { %p7473_p5 = pnand %p7890_p2, %p6303_p4  ;;  %p7172_p6 = scmp.ne.s32.totalorder %s7883_s2, %s7171_s19 }
   0xe   : > { %p7178_p10 = scmp.lt.u32.totalorder %s7171_s19, %s7883_s2 }
   0xf   : > { %p7489_p7 = pneg %p7473_p5 }
  0x11   : > { %p7174_p8 = pnand %p7489_p7, %p7172_p6 }
  0x13   : > { %p7175_p9 = pneg %p7174_p8 }
  0x15   : > { %p7180_p11 = pnand %p7178_p10, %p7175_p9 }
  0x17   : > { %7183 = shalt.err (!%p7180_p11)
}
  0x18   : > { %s7184_s25 = scalar_lea.vmem %s7461_s29, 256  ;;  %p7192_p1 = scmp.lt.s32.totalorder %s7461_s29, %s7461_s29 }
  0x19   : > { %p7185_p12 = scmp.ne.s32.totalorder %s7461_s29, %s7184_s25  ;;  %p7193_p4 = scmp.lt.s32.totalorder %s7184_s25, %s7184_s25 }
  0x1b   : > { %p7187_p13 = pnand %p7185_p12, %p7489_p7  ;;  %p7194_p6 = por %p7193_p4, %p7192_p1 }
  0x1d   : > { %p7188_p0 = pneg %p7187_p13 }
  0x1f   : > { %p7195_p8 = pnand %p7194_p6, %p7188_p0 }
  0x21   : > { %7198 = shalt.err (!%p7195_p8)
}
  0x22   : > { %6309 = dma.hbm_to_vmem [thread:$0]  (!%p7473_p5), %s7883_s2, 256, %s7461_s29, [#allocation7]  }
  0x23   : > { %s7199_s15 = scalar_lea.hbm %s7885_s4, 256 }
  0x24   : > { %p7200_p9 = scmp.ne.s32.totalorder %s7885_s4, %s7199_s15  ;;  %p7206_p12 = scmp.lt.u32.totalorder %s7199_s15, %s7885_s4 }
  0x26   : > { %p7202_p10 = pnand %p7200_p9, %p7489_p7 }
  0x28   : > { %p7203_p11 = pneg %p7202_p10 }
  0x2a   : > { %p7208_p13 = pnand %p7206_p12, %p7203_p11 }
  0x2c   : > { %7211 = shalt.err (!%p7208_p13)
}
  0x2d   : > { %s7212_s29 = scalar_lea.vmem %s7469_s11, 256  ;;  %p7220_p6 = scmp.lt.s32.totalorder %s7469_s11, %s7469_s11 }
  0x2e   : > { %p7213_p0 = scmp.ne.s32.totalorder %s7469_s11, %s7212_s29  ;;  %p7221_p8 = scmp.lt.s32.totalorder %s7212_s29, %s7212_s29 }
  0x30   : > { %p7215_p1 = pnand %p7213_p0, %p7489_p7  ;;  %p7222_p9 = por %p7221_p8, %p7220_p6 }
  0x32   : > { %p7216_p4 = pneg %p7215_p1 }
  0x34   : > { %p7223_p10 = pnand %p7222_p9, %p7216_p4 }
  0x36   : > { %7226 = shalt.err (!%p7223_p10)
}
  0x37   : > { %6315 = dma.hbm_to_vmem [thread:$0]  (!%p7473_p5), %s7885_s4, 256, %s7469_s11, [#allocation10]  }
  0x38   : > { %s7227_s26 = scalar_lea.hbm %s7887_s6, 64 }
  0x39   : > { %p7228_p11 = scmp.ne.s32.totalorder %s7887_s6, %s7227_s26  ;;  %p7234_p0 = scmp.lt.u32.totalorder %s7227_s26, %s7887_s6 }
  0x3b   : > { %p7230_p12 = pnand %p7228_p11, %p7489_p7 }
  0x3d   : > { %p7231_p13 = pneg %p7230_p12 }
  0x3f   : > { %p7236_p1 = pnand %p7234_p0, %p7231_p13 }
  0x41   : > { %7239 = shalt.err (!%p7236_p1)
}
  0x42   : > { %s7240_s11 = scalar_lea.vmem %s7477_s13, 64  ;;  %p7248_p9 = scmp.lt.s32.totalorder %s7477_s13, %s7477_s13 }
  0x43   : > { %p7241_p4 = scmp.ne.s32.totalorder %s7477_s13, %s7240_s11  ;;  %p7249_p10 = scmp.lt.s32.totalorder %s7240_s11, %s7240_s11 }
  0x45   : > { %p7243_p6 = pnand %p7241_p4, %p7489_p7  ;;  %p7250_p11 = por %p7249_p10, %p7248_p9 }
  0x47   : > { %p7244_p8 = pneg %p7243_p6 }
  0x49   : > { %p7251_p12 = pnand %p7250_p11, %p7244_p8 }
  0x4b   : > { %7254 = shalt.err (!%p7251_p12)
}
  0x4c   : > { %6321 = dma.hbm_to_vmem [thread:$0]  (!%p7473_p5), %s7887_s6, 64, %s7477_s13, [#allocation13]  }
  0x4d   : > { %s7255_s29 = scalar_lea.hbm %s7882_s1, 7680 }
  0x4e   : > { %p7256_p13 = scmp.ne.s32.totalorder %s7882_s1, %s7255_s29  ;;  %p7262_p4 = scmp.lt.u32.totalorder %s7255_s29, %s7882_s1 }
  0x50   : > { %p7258_p0 = pnand %p7256_p13, %p7489_p7 }
  0x52   : > { %p7259_p1 = pneg %p7258_p0 }
  0x54   : > { %p7264_p6 = pnand %p7262_p4, %p7259_p1 }
  0x56   : > { %7267 = shalt.err (!%p7264_p6)
}
  0x57   : > { %s7268_s13 = scalar_lea.vmem %s7479_s16, 7680  ;;  %p7276_p11 = scmp.lt.s32.totalorder %s7479_s16, %s7479_s16 }
  0x58   : > { %p7269_p8 = scmp.ne.s32.totalorder %s7479_s16, %s7268_s13  ;;  %p7277_p12 = scmp.lt.s32.totalorder %s7268_s13, %s7268_s13 }
  0x5a   : > { %p7271_p9 = pnand %p7269_p8, %p7489_p7  ;;  %p7278_p13 = por %p7277_p12, %p7276_p11 }
  0x5c   : > { %p7272_p10 = pneg %p7271_p9 }
  0x5e   : > { %p7279_p0 = pnand %p7278_p13, %p7272_p10 }
  0x60   : > { %7282 = shalt.err (!%p7279_p0)
}
  0x61   : > { %s7395_s26 = smov 256   ;;  %s7396_s28 = smov 16  }
  0x62   : > { %6306 = dma.hbm_to_vmem [thread:$0]  (!%p7473_p5), %s7882_s1, 7680, %s7479_s16, [#allocation5], %s7395_s26, %s7395_s26, %s7396_s28  }
  0x63   : > { %s7397_s15 = smov [#allocation8]   ;;  %s7398_s17 = smov [#allocation11]  }
  0x64   : > { %s262_s11 = sshll.u32 %s7397_s15, 4  ;;  %s286_s18 = sshll.u32 %s7398_s17, 4  ;;  %s263_s11 = int_to_ptr.vmem [resolvable:$true] %s262_s11  ;;  %s287_s18 = int_to_ptr.vmem [resolvable:$true] %s286_s18 }
  0x65   : > { %s7283_s29 = scalar_lea.hbm %s7884_s3, 40960 }
  0x66   : > { %p7284_p1 = scmp.ne.s32.totalorder %s7884_s3, %s7283_s29  ;;  %p7290_p8 = scmp.lt.u32.totalorder %s7283_s29, %s7884_s3 }
  0x68   : > { %p7286_p4 = pnand %p7284_p1, %p7489_p7 }
  0x6a   : > { %p7287_p6 = pneg %p7286_p4 }
  0x6c   : > { %p7292_p9 = pnand %p7290_p8, %p7287_p6 }
  0x6e   : > { %7295 = shalt.err (!%p7292_p9)
}
  0x6f   : > { %s7296_s16 = scalar_lea.vmem %s263_s11, 40960  ;;  %p7304_p13 = scmp.lt.s32.totalorder %s263_s11, %s263_s11 }
  0x70   : > { %p7297_p10 = scmp.ne.s32.totalorder %s263_s11, %s7296_s16  ;;  %p7305_p0 = scmp.lt.s32.totalorder %s7296_s16, %s7296_s16 }
  0x72   : > { %p7299_p11 = pnand %p7297_p10, %p7489_p7  ;;  %p7306_p2 = por %p7305_p0, %p7304_p13 }
  0x74   : > { %p7300_p12 = pneg %p7299_p11 }
  0x76   : > { %p7307_p3 = pnand %p7306_p2, %p7300_p12 }
  0x78   : > { %7310 = shalt.err (!%p7307_p3)
}
  0x79   : > { %6312 = dma.hbm_to_vmem [thread:$0]  (!%p7473_p5), %s7884_s3, 40960, %s263_s11, [#allocation7], %s7395_s26, %s7395_s26, %s7396_s28  }
  0x7a   : > { %s7311_s17 = scalar_lea.hbm %s7886_s5, 20480 }
  0x7b   : > { %p7312_p1 = scmp.ne.s32.totalorder %s7886_s5, %s7311_s17  ;;  %p7318_p3 = scmp.lt.u32.totalorder %s7311_s17, %s7886_s5 }
  0x7d   : > { %p7314_p4 = pnand %p7312_p1, %p7489_p7 }
  0x7f   : > { %p7315_p2 = pneg %p7314_p4 }
  0x81   : > { %p7320_p6 = pnand %p7318_p3, %p7315_p2 }
  0x83   : > { %7323 = shalt.err (!%p7320_p6)
}
  0x84   : > { %s7324_s23 = scalar_lea.vmem %s287_s18, 20480  ;;  %p7332_p11 = scmp.lt.s32.totalorder %s287_s18, %s287_s18 }
  0x85   : > { %p7325_p8 = scmp.ne.s32.totalorder %s287_s18, %s7324_s23  ;;  %p7333_p12 = scmp.lt.s32.totalorder %s7324_s23, %s7324_s23 }
  0x87   : > { %p7327_p9 = pnand %p7325_p8, %p7489_p7  ;;  %p7334_p13 = por %p7333_p12, %p7332_p11 }
  0x89   : > { %p7328_p10 = pneg %p7327_p9 }
  0x8b   : > { %p7335_p0 = pnand %p7334_p13, %p7328_p10 }
  0x8d   : > { %7338 = shalt.err (!%p7335_p0)
}
  0x8e   : > { %s7399_s26 = smov 128   ;;  %s7400_s28 = smov 8  }
  0x8f   : > { %6318 = dma.hbm_to_vmem [thread:$0]  (!%p7473_p5), %s7886_s5, 20480, %s287_s18, [#allocation10], %s7399_s26, %s7399_s26, %s7400_s28  }
  0x90   : > { %s7401_s25 = smov [#allocation14]   ;;  %s7339_s12 = scalar_lea.hbm %s7888_s7, 32 }
  0x91   : > { %s311_s16 = sshll.u32 %s7401_s25, 4  ;;  %p7340_p1 = scmp.ne.s32.totalorder %s7888_s7, %s7339_s12  ;;  %s312_s16 = int_to_ptr.vmem [resolvable:$true] %s311_s16 }
  0x92   : > { %p7346_p3 = scmp.lt.u32.totalorder %s7339_s12, %s7888_s7 }
  0x93   : > { %p7342_p4 = pnand %p7340_p1, %p7489_p7 }
  0x95   : > { %p7343_p2 = pneg %p7342_p4 }
  0x97   : > { %p7348_p6 = pnand %p7346_p3, %p7343_p2 }
  0x99   : > { %7351 = shalt.err (!%p7348_p6)
}
  0x9a   : > { %s7352_s18 = scalar_lea.vmem %s312_s16, 32  ;;  %p7360_p11 = scmp.lt.s32.totalorder %s312_s16, %s312_s16 }
  0x9b   : > { %p7353_p8 = scmp.ne.s32.totalorder %s312_s16, %s7352_s18  ;;  %p7361_p12 = scmp.lt.s32.totalorder %s7352_s18, %s7352_s18 }
  0x9d   : > { %p7355_p9 = pnand %p7353_p8, %p7489_p7  ;;  %p7362_p13 = por %p7361_p12, %p7360_p11 }
  0x9f   : > { %p7356_p10 = pneg %p7355_p9 }
  0xa1   : > { %p7363_p0 = pnand %p7362_p13, %p7356_p10 }
  0xa3   : > { %7366 = shalt.err (!%p7363_p0)
}
  0xa4   : > { %6324 = dma.hbm_to_vmem [thread:$0]  (!%p7473_p5), %s7888_s7, 32, %s312_s16, [#allocation13]  }
  0xa5   : > { %p7895_p1 = scmp.ne.s32.totalorder %s7892_s9, 0 }
  0xa6   : > { %p7896_p4 = scmp.eq.s32.totalorder (!%p7895_p1), %s7456_s30, 0 }
  0xa7   : > { %332 = sbr.rel (%p7895_p1) target bundleno = 1612 (0x64c), region = 52 }
  0xae   : > { %7372 = dma.done.wait (%p7896_p4), [#allocation5], 7680   ;;  %p7897_p7 = pmov %p7896_p4 }
  0xaf   : > { %p7898_p2 = pmov %p7896_p4 }
  0xb0   : > { %7374 = vsyncadd (%p7897_p7), [#allocation5], 4294959616 }
  0xb1   : > { %7376 = dma.done.wait (%p7898_p2), [#allocation7], 41216   ;;  %p7899_p3 = pmov %p7898_p2 }
  0xb2   : > { %p7900_p6 = pmov %p7898_p2 }
  0xb3   : > { %7378 = vsyncadd (%p7899_p3), [#allocation7], 4294926080 }
  0xb4   : > { %7380 = dma.done.wait (%p7900_p6), [#allocation10], 20736   ;;  %p7901_p5 = pmov %p7898_p2 }
  0xb5   : > { %p7902_p8 = pmov %p7898_p2 }
  0xb6   : > { %7382 = vsyncadd (%p7901_p5), [#allocation10], 4294946560 }
  0xb7   : > { %7384 = dma.done.wait (%p7902_p8), [#allocation13], 96   ;;  %p7903_p9 = pmov %p7898_p2 }
  0xb8   : > { %v7402_v0 = vmov 0   ;;  %p390_p10 = scmp.lt.s32.totalorder %s7456_s30, 1  ;;  %v6361_v1 = vld [vmem:[#allocation4 + $0x64] ss:$16 sps:$4 sm:$0xff]   ;;  %v6365_v3 = vld [vmem:[#allocation4 + $0x60] ss:$16 sps:$4 sm:$0xff]  }
  0xb9   : > { %7386 = vsyncadd (%p7903_p9), [#allocation13], 4294967200  ;;  %856 = vmatprep.mubr.bf16.mxu0 %v7402_v0  ;;  %540 = vmatprep.mubr.bf16.mxu1 %v7402_v0  ;;  %v6363_v2 = vld [vmem:[#allocation4 + $0xc4] ss:$16 sps:$4 sm:$0xff]   ;;  %v6366_v4 = vld [vmem:[#allocation4 + $0xc0] ss:$16 sps:$4 sm:$0xff]  }
  0xba   : > { %s7905_s30 = smov (!%p390_p10, %s7456_s30), 1  ;;  %508 = vmatprep.subr.bf16.mxu1 %v6361_v1  ;;  %824 = vmatprep.subr.bf16.mxu0 %v6363_v2  ;;  %v6367_v5 = vld [vmem:[#allocation4 + $0x84] ss:$16 sps:$4 sm:$0xff]   ;;  %v6371_v7 = vld [vmem:[#allocation4 + $0x80] ss:$16 sps:$4 sm:$0xff]   ;;  %vm504_vm0 = vcmask 392192  }
  0xbb   : > { %s6274_s9 = smul.u32 24, %s7905_s30  ;;  %509 = vmatpush1.bf16.msra.mxu1 %v6365_v3  ;;  %825 = vmatpush1.bf16.msra.mxu0 %v6366_v4  ;;  %v6369_v6 = vld [vmem:[#allocation4 + $0xe4] ss:$16 sps:$4 sm:$0xff]   ;;  %v6372_v8 = vld [vmem:[#allocation4 + $0xe0] ss:$16 sps:$4 sm:$0xff]   ;;  %vm757_vm1 = vcmask 1046528  }
  0xbc   : > { %510 = vmatprep.subr.bf16.mxu1 %v6367_v5  ;;  %826 = vmatprep.subr.bf16.mxu0 %v6369_v6  ;;  %v6373_v9 = vld [vmem:[#allocation4 + $0xa4] ss:$16 sps:$4 sm:$0xff]   ;;  %v6377_v11 = vld [vmem:[#allocation4 + $0xa0] ss:$16 sps:$4 sm:$0xff]   ;;  %v6381_v13 = vld [vmem:[#allocation4 + $0x6c] ss:$16 sps:$4 sm:$0xff]  }
  0xbd   : > { %s394_s23 = scalar_lea.vmem %s7881_s0, %s6274_s9  ;;  %v6375_v10 = vld [vmem:[#allocation4 + $0x104] ss:$16 sps:$4 sm:$0xff]   ;;  %v6378_v12 = vld [vmem:[#allocation4 + $0x100] ss:$16 sps:$4 sm:$0xff]   ;;  %vm431_vm2 = vsmask.f32 7424 }
  0xbe   : > { %v401_v14 = vld [vmem:[%s394_s23] sm:$0xff]  ;;  %v402_v15 = vld [vmem:[%s394_s23 + $0x8] sm:$0xff]  ;;  %v403_v16 = vld [vmem:[%s394_s23 + $0x10] sm:$0xf]  ;;  %vm931_vm3 = vsmask.f32 6400 }
  0xbf   : > { %511 = vmatpush1.bf16.msra.mxu1 %v6371_v7  ;;  %827 = vmatpush1.bf16.msra.mxu0 %v6372_v8  ;;  %v7661_v17 = vpack.c.bf16 %v402_v15, %v401_v14  ;;  %v7663_v18 = vpack.c.bf16 %v403_v16, %v403_v16  ;;  %v6384_v19 = vld [vmem:[#allocation4 + $0x124] ss:$16 sps:$4 sm:$0xff]   ;;  %v6382_v24 = vld [vmem:[#allocation4 + $0x120] ss:$16 sps:$4 sm:$0xff]   ;;  %v6379_v28 = vld [vmem:[#allocation4 + $0x68] ss:$16 sps:$4 sm:$0xff]  }
  0xc0   : > { %512 = vmatprep.subr.bf16.mxu1 %v6373_v9  ;;  %828 = vmatprep.subr.bf16.mxu0 %v6375_v10  ;;  %v6390_v27 = vld [vmem:[#allocation4 + $0x144] ss:$16 sps:$4 sm:$0xff]   ;;  %v6387_v32 = vld [vmem:[#allocation4 + $0x8c] ss:$16 sps:$4 sm:$0xff]   ;;  %v6388_v36 = vld [vmem:[#allocation4 + $0x140] ss:$16 sps:$4 sm:$0xff]  }
  0xc1   : > { %v758_v20 = vrot.slane %v7661_v17, 1  ;;  %v433_v21 = vshrl.u32 %v7661_v17, 16  ;;  %v435_v22 = vshll.u32 %v7661_v17, 16  ;;  %v759_v23 = vrot.slane %v7663_v18, 1  ;;  %v6396_v39 = vld [vmem:[#allocation4 + $0x164] ss:$16 sps:$4 sm:$0xff]  }
  0xc2   : > { %v440_v25 = vshll.u32 %v7663_v18, 16  ;;  %v935_v33 = vshrl.u32 %v7663_v18, 16  ;;  %v6385_v41 = vld [vmem:[#allocation4 + $0x88] ss:$16 sps:$4 sm:$0xff]   ;;  %v6393_v42 = vld [vmem:[#allocation4 + $0xac] ss:$16 sps:$4 sm:$0xff]  }
  0xc3   : > { %513 = vmatpush1.bf16.msra.mxu1 %v6377_v11  ;;  %829 = vmatpush1.bf16.msra.mxu0 %v6378_v12  ;;  %v437_v26 = vrot.slane %v435_v22, 1  ;;  %v7670_v29 = vsel %vm757_vm1, %v758_v20, %v759_v23  ;;  %v932_v34 = vrot.slane %v433_v21, 1  ;;  %v933_v37 = vrot.slane %v435_v22, 2  ;;  %v6394_v43 = vld [vmem:[#allocation4 + $0x160] ss:$16 sps:$4 sm:$0xff]   ;;  %s6241_s26 = sshll.u32 %s7905_s30, 4 }
  0xc4   : > { %551 = vmatprep.subr.bf16.mxu1 %v6381_v13  ;;  %1004 = vmatprep.subr.bf16.mxu0 %v6384_v19  ;;  %v442_v30 = vrot.slane %v440_v25, 1  ;;  %v938_v35 = vrot.slane %v440_v25, 2  ;;  %v937_v40 = vrot.slane %v935_v33, 1  ;;  %v6402_v46 = vld [vmem:[#allocation4 + $0x184] ss:$16 sps:$4 sm:$0xff]   ;;  %v1112_v57 = vrot.slane %v7661_v17, 2  ;;  %s399_s24 = scalar_lea.vmem %s7889_s8, %s6241_s26 }
  0xc5   : > { %v438_v31 = vor.u32 %v437_v26, %v433_v21  ;;  %v934_v44 = vor.u32 %v933_v37, %v932_v34  ;;  %v6391_v47 = vld [vmem:[#allocation4 + $0xa8] ss:$16 sps:$4 sm:$0xff]   ;;  %v6399_v48 = vld [vmem:[#allocation4 + $0x4] ss:$16 sps:$4 sm:$0xff]   ;;  %v6400_v50 = vld [vmem:[#allocation4 + $0x180] ss:$16 sps:$4 sm:$0xff]  }
  0xc6   : > { %5715 = vmatmul.mubr.msk.bf16.vlgmr.msra.gmra.mrb[0].mxu0 %vm504_vm0, %v7670_v29  ;;  %v939_v45 = vor.u32 %v938_v35, %v937_v40  ;;  %v6408_v51 = vld [vmem:[#allocation4 + $0x1a4] ss:$16 sps:$4 sm:$0xff]   ;;  %v6397_v52 = vld [vmem:[#allocation4] ss:$16 sps:$4 sm:$0xff]   ;;  %v1113_v60 = vrot.slane %v7663_v18, 2  ;;  %vm1111_vm4 = vcmask 1045504  }
  0xc7   : > { %1005 = vmatpush1.bf16.msra.mxu0 %v6382_v24  ;;  %1036 = vmatprep.mubr.bf16.mxu0 %v7402_v0  ;;  %v443_v38 = vsel %vm431_vm2, %v438_v31, %v442_v30  ;;  %v6405_v53 = vld [vmem:[#allocation4 + $0x24] ss:$16 sps:$4 sm:$0xff]   ;;  %v6406_v54 = vld [vmem:[#allocation4 + $0x1a0] ss:$16 sps:$4 sm:$0xff]   ;;  %v6417_v62 = vld [vmem:[#allocation4 + $0xc] ss:$16 sps:$4 sm:$0xff]  }
  0xc8   : > { %1006 = vmatprep.subr.bf16.mxu0 %v6390_v27  ;;  %5687 = vmatmul.mubr.msk.bf16.vlgmr.msra.gmra.mrb[0].mxu1 %vm504_vm0, %v443_v38  ;;  %v7679_v49 = vsel %vm931_vm3, %v934_v44, %v939_v45  ;;  %v6414_v55 = vld [vmem:[#allocation4 + $0x1c4] ss:$16 sps:$4 sm:$0xff]   ;;  %v6403_v56 = vld [vmem:[#allocation4 + $0x20] ss:$16 sps:$4 sm:$0xff]   ;;  %v1114_v63 = vsel %vm1111_vm4, %v1112_v57, %v1113_v60  ;;  %v6415_v1 = vld [vmem:[#allocation4 + $0x8] ss:$16 sps:$4 sm:$0xff]  }
  0xc9   : > { %552 = vmatpush1.bf16.msra.mxu1 %v6379_v28  ;;  %583 = vmatprep.mubr.bf16.mxu1 %v7402_v0  ;;  %v6411_v58 = vld [vmem:[#allocation4 + $0x44] ss:$16 sps:$4 sm:$0xff]   ;;  %v6412_v59 = vld [vmem:[#allocation4 + $0x1c0] ss:$16 sps:$4 sm:$0xff]   ;;  %v6420_v2 = vld [vmem:[#allocation4 + $0x2c] ss:$16 sps:$4 sm:$0xff]  }
  0xca   : > { %553 = vmatprep.subr.bf16.mxu1 %v6387_v32  ;;  %v6409_v61 = vld [vmem:[#allocation4 + $0x40] ss:$16 sps:$4 sm:$0xff]   ;;  %v6418_v3 = vld [vmem:[#allocation4 + $0x28] ss:$16 sps:$4 sm:$0xff]   ;;  %v6423_v4 = vld [vmem:[#allocation4 + $0x4c] ss:$16 sps:$4 sm:$0xff]  }
  0xcb   : > { %1007 = vmatpush1.bf16.msra.mxu0 %v6388_v36  ;;  %v6421_v5 = vld [vmem:[#allocation4 + $0x48] ss:$16 sps:$4 sm:$0xff]   ;;  %v6426_v6 = vld [vmem:[#allocation4 + $0xcc] ss:$16 sps:$4 sm:$0xff]   ;;  %v6451_v24 = vld [vmem:[#allocation8 + $0x200] ss:$16 sps:$4 sm:$0xff]  }
  0xcc   : > { %1008 = vmatprep.subr.bf16.mxu0 %v6396_v39  ;;  %v6424_v7 = vld [vmem:[#allocation4 + $0xc8] ss:$16 sps:$4 sm:$0xff]   ;;  %v6429_v8 = vld [vmem:[#allocation4 + $0xec] ss:$16 sps:$4 sm:$0xff]   ;;  %v6453_v25 = vld [vmem:[#allocation8 + $0x204] ss:$16 sps:$4 sm:$0xff]  }
  0xcd   : > { %554 = vmatpush1.bf16.msra.mxu1 %v6385_v41  ;;  %v6427_v9 = vld [vmem:[#allocation4 + $0xe8] ss:$16 sps:$4 sm:$0xff]   ;;  %v6432_v10 = vld [vmem:[#allocation4 + $0x10c] ss:$16 sps:$4 sm:$0xff]   ;;  %v6459_v28 = vld [vmem:[#allocation8 + $0x224] ss:$16 sps:$4 sm:$0xff]  }
  0xce   : > { %555 = vmatprep.subr.bf16.mxu1 %v6393_v42  ;;  %v6430_v11 = vld [vmem:[#allocation4 + $0x108] ss:$16 sps:$4 sm:$0xff]   ;;  %v6435_v12 = vld [vmem:[#allocation4 + $0x12c] ss:$16 sps:$4 sm:$0xff]   ;;  %v6457_v30 = vld [vmem:[#allocation8 + $0x220] ss:$16 sps:$4 sm:$0xff]  }
  0xcf   : > { %1009 = vmatpush1.bf16.msra.mxu0 %v6394_v43  ;;  %v6433_v13 = vld [vmem:[#allocation4 + $0x128] ss:$16 sps:$4 sm:$0xff]   ;;  %v6438_v14 = vld [vmem:[#allocation4 + $0x14c] ss:$16 sps:$4 sm:$0xff]   ;;  %v6465_v32 = vld [vmem:[#allocation8 + $0x244] ss:$16 sps:$4 sm:$0xff]  }
  0xd0   : > { %1178 = vmatprep.subr.bf16.mxu0 %v6402_v46  ;;  %v6436_v15 = vld [vmem:[#allocation4 + $0x148] ss:$16 sps:$4 sm:$0xff]   ;;  %v6441_v16 = vld [vmem:[#allocation4 + $0x16c] ss:$16 sps:$4 sm:$0xff]   ;;  %v6463_v33 = vld [vmem:[#allocation8 + $0x240] ss:$16 sps:$4 sm:$0xff]  }
  0xd1   : > { %556 = vmatpush1.bf16.msra.mxu1 %v6391_v47  ;;  %v6444_v18 = vld [vmem:[#allocation4 + $0x18c] ss:$16 sps:$4 sm:$0xff]   ;;  %v6442_v19 = vld [vmem:[#allocation4 + $0x188] ss:$16 sps:$4 sm:$0xff]   ;;  %v6471_v36 = vld [vmem:[#allocation8 + $0x264] ss:$16 sps:$4 sm:$0xff]  }
  0xd2   : > { %5729 = vmatmul.mubr.msk.bf16.vlgmr.msra.gmra.mrb[0].mxu0 %vm504_vm0, %v7679_v49  ;;  %656 = vmatprep.subr.bf16.mxu1 %v6399_v48  ;;  %v6447_v20 = vld [vmem:[#allocation4 + $0x1ac] ss:$16 sps:$4 sm:$0xff]   ;;  %v6445_v21 = vld [vmem:[#allocation4 + $0x1a8] ss:$16 sps:$4 sm:$0xff]   ;;  %v6477_v40 = vld [vmem:[#allocation8 + $0x284] ss:$16 sps:$4 sm:$0xff]  }
  0xd3   : > { %1179 = vmatpush1.bf16.msra.mxu0 %v6400_v50  ;;  %1210 = vmatprep.mubr.bf16.mxu0 %v7402_v0  ;;  %v6450_v22 = vld [vmem:[#allocation4 + $0x1cc] ss:$16 sps:$4 sm:$0xff]   ;;  %v6448_v23 = vld [vmem:[#allocation4 + $0x1c8] ss:$16 sps:$4 sm:$0xff]   ;;  %v6475_v42 = vld [vmem:[#allocation8 + $0x280] ss:$16 sps:$4 sm:$0xff]  }
  0xd4   : > { %1180 = vmatprep.subr.bf16.mxu0 %v6408_v51  ;;  %5688 = vmatmul.mubr.msk.bf16.vlgmr.msra.gmra.mrb[4].mxu1 %vm504_vm0, %v443_v38  ;;  %v6454_v26 = vld [vmem:[#allocation8 + $0x208] ss:$16 sps:$4 sm:$0xff]   ;;  %v6456_v27 = vld [vmem:[#allocation8 + $0x20c] ss:$16 sps:$4 sm:$0xff]   ;;  %v6469_v38 = vld [vmem:[#allocation8 + $0x260] ss:$16 sps:$4 sm:$0xff]  }
  0xd5   : > { %657 = vmatpush1.bf16.msra.mxu1 %v6397_v52  ;;  %688 = vmatprep.mubr.bf16.mxu1 %v7402_v0  ;;  %v6460_v31 = vld [vmem:[#allocation8 + $0x228] ss:$16 sps:$4 sm:$0xff]   ;;  %v6468_v34 = vld [vmem:[#allocation8 + $0x24c] ss:$16 sps:$4 sm:$0xff]   ;;  %v6483_v44 = vld [vmem:[#allocation8 + $0x2a4] ss:$16 sps:$4 sm:$0xff]  }
  0xd6   : > { %658 = vmatprep.subr.bf16.mxu1 %v6405_v53  ;;  %v6466_v35 = vld [vmem:[#allocation8 + $0x248] ss:$16 sps:$4 sm:$0xff]   ;;  %v6474_v37 = vld [vmem:[#allocation8 + $0x26c] ss:$16 sps:$4 sm:$0xff]   ;;  %v6481_v46 = vld [vmem:[#allocation8 + $0x2a0] ss:$16 sps:$4 sm:$0xff]  }
  0xd7   : > { %1181 = vmatpush1.bf16.msra.mxu0 %v6406_v54  ;;  %v6472_v39 = vld [vmem:[#allocation8 + $0x268] ss:$16 sps:$4 sm:$0xff]   ;;  %v6480_v41 = vld [vmem:[#allocation8 + $0x28c] ss:$16 sps:$4 sm:$0xff]   ;;  %v6489_v48 = vld [vmem:[#allocation8 + $0x2c4] ss:$16 sps:$4 sm:$0xff]  }
  0xd8   : > { %1182 = vmatprep.subr.bf16.mxu0 %v6414_v55  ;;  %v6478_v43 = vld [vmem:[#allocation8 + $0x288] ss:$16 sps:$4 sm:$0xff]   ;;  %v6486_v45 = vld [vmem:[#allocation8 + $0x2ac] ss:$16 sps:$4 sm:$0xff]   ;;  %v6487_v50 = vld [vmem:[#allocation8 + $0x2c0] ss:$16 sps:$4 sm:$0xff]  }
  0xd9   : > { %659 = vmatpush1.bf16.msra.mxu1 %v6403_v56  ;;  %v6484_v47 = vld [vmem:[#allocation8 + $0x2a8] ss:$16 sps:$4 sm:$0xff]   ;;  %v6495_v52 = vld [vmem:[#allocation8 + $0x2e4] ss:$16 sps:$4 sm:$0xff]   ;;  %v6498_v53 = vld [vmem:[#allocation8 + $0x2ec] ss:$16 sps:$4 sm:$0xff]  }
  0xda   : > { %660 = vmatprep.subr.bf16.mxu1 %v6411_v58  ;;  %v6490_v51 = vld [vmem:[#allocation8 + $0x2c8] ss:$16 sps:$4 sm:$0xff]   ;;  %v6493_v54 = vld [vmem:[#allocation8 + $0x2e0] ss:$16 sps:$4 sm:$0xff]   ;;  %v6501_v56 = vld [vmem:[#allocation8 + $0x304] ss:$16 sps:$4 sm:$0xff]  }
  0xdb   : > { %1183 = vmatpush1.bf16.msra.mxu0 %v6412_v59  ;;  %v6496_v55 = vld [vmem:[#allocation8 + $0x2e8] ss:$16 sps:$4 sm:$0xff]   ;;  %v6504_v57 = vld [vmem:[#allocation8 + $0x30c] ss:$16 sps:$4 sm:$0xff]   ;;  %v6499_v58 = vld [vmem:[#allocation8 + $0x300] ss:$16 sps:$4 sm:$0xff]  }
  0xdc   : > { %2097 = vmatprep.subr.bf16.mxu0 %v6453_v25  ;;  %v6502_v59 = vld [vmem:[#allocation8 + $0x308] ss:$16 sps:$4 sm:$0xff]   ;;  %v6507_v60 = vld [vmem:[#allocation8 + $0x324] ss:$16 sps:$4 sm:$0xff]   ;;  %vm1600_vm5 = vcmask 1043459   ;;  %vm1602_vm6 = vcmask 1044484  }
  0xdd   : > { %661 = vmatpush1.bf16.msra.mxu1 %v6409_v61  ;;  %v6510_v61 = vld [vmem:[#allocation8 + $0x32c] ss:$16 sps:$4 sm:$0xff]   ;;  %v6544_v25 = vld [vmem:[#allocation8 + $0x3e8] ss:$16 sps:$4 sm:$0xff]   ;;  %vm1604_vm7 = vcmask 1045509   ;;  %vm1606_vm8 = vcmask 1046534  }
  0xde   : > { %5743 = vmatmul.mubr.msk.bf16.vlgmr.msra.gmra.mrb[0].mxu0 %vm504_vm0, %v1114_v63  ;;  %699 = vmatprep.subr.bf16.mxu1 %v6417_v62  ;;  %v6505_v62 = vld [vmem:[#allocation8 + $0x320] ss:$16 sps:$4 sm:$0xff]   ;;  %vm1608_vm9 = vcmask 1047559   ;;  %vm1615_vm10 = vcmask 1041409   ;;  %vm4285_vm11 = vcmask 1042434   ;;  %vm5479_vm12 = vcmask 1043456  }
  0xdf   : > { %2098 = vmatpush1.bf16.msra.mxu0 %v6451_v24  ;;  %v6541_v24 = vld [vmem:[#allocation8 + $0x3e0] ss:$16 sps:$4 sm:$0xff]   ;;  %vm5475_vm13 = vcmask 326656  }
  0xe0   : > { %5701 = vmatmul.mubr.msk.bf16.vlgmr.msra.gmra.mrb[0].mxu1 %vm504_vm0, %v7661_v17  ;;  %2099 = vmatprep.subr.bf16.mxu0 %v6459_v28  ;;  %v1274_v28 = vlaneseq }
  0xe1   : > { %700 = vmatpush1.bf16.msra.mxu1 %v6415_v1  ;;  %731 = vmatprep.mubr.bf16.mxu1 %v7402_v0  ;;  %v6513_v1 = vld [vmem:[#allocation8 + $0x344] ss:$16 sps:$4 sm:$0xff]  }
  0xe2   : > { %701 = vmatprep.subr.bf16.mxu1 %v6420_v2  ;;  %v6516_v2 = vld [vmem:[#allocation8 + $0x34c] ss:$16 sps:$4 sm:$0xff]  }
  0xe3   : > { %2100 = vmatpush1.bf16.msra.mxu0 %v6457_v30 }
  0xe4   : > { %2101 = vmatprep.subr.bf16.mxu0 %v6465_v32 }
  0xe5   : > { %702 = vmatpush1.bf16.msra.mxu1 %v6418_v3  ;;  %v6511_v3 = vld [vmem:[#allocation8 + $0x340] ss:$16 sps:$4 sm:$0xff]  }
  0xe6   : > { %703 = vmatprep.subr.bf16.mxu1 %v6423_v4  ;;  %v6514_v4 = vld [vmem:[#allocation8 + $0x348] ss:$16 sps:$4 sm:$0xff]  }
  0xe7   : > { %2102 = vmatpush1.bf16.msra.mxu0 %v6463_v33 }
  0xe8   : > { %2103 = vmatprep.subr.bf16.mxu0 %v6471_v36 }
  0xe9   : > { %704 = vmatpush1.bf16.msra.mxu1 %v6421_v5  ;;  %v7403_v5 = vmov 0.0  }
  0xea   : > { %867 = vmatprep.subr.bf16.mxu1 %v6426_v6  ;;  %1524 = vst [vmem:[#allocation2] sm:$0xff] %v7403_v5  ;;  %1525 = vst [vmem:[#allocation2 + $0x8] sm:$0xff] %v7403_v5  ;;  %v6519_v6 = vld [vmem:[#allocation8 + $0x364] ss:$16 sps:$4 sm:$0xff]  }
  0xeb   : > { %2104 = vmatpush1.bf16.msra.mxu0 %v6469_v38  ;;  %1526 = vst [vmem:[#allocation2 + $0x10] sm:$0xf] %v7403_v5  ;;  %1527 = vst [vmem:[#allocation2 + $0x18] sm:$0xf] %v7403_v5 }
  0xec   : > { %5702 = vmatmul.mubr.msk.bf16.vlgmr.msra.gmra.mrb[4].mxu1 %vm504_vm0, %v7661_v17  ;;  %v6439_v17 = vld [vmem:[#allocation4 + $0x168] ss:$16 sps:$4 sm:$0xff]   ;;  %2105 = vmatprep.subr.bf16.mxu0 %v6477_v40  ;;  %4224 = vst [vmem:[#allocation3] sm:$0xff] %v7403_v5  ;;  %4225 = vst [vmem:[#allocation3 + $0x8] sm:$0xff] %v7403_v5 }
  0xed   : > { %868 = vmatpush1.bf16.msra.mxu1 %v6424_v7  ;;  %899 = vmatprep.mubr.bf16.mxu1 %v7402_v0  ;;  %4226 = vst [vmem:[#allocation3 + $0x10] sm:$0xff] %v7403_v5  ;;  %4227 = vst [vmem:[#allocation3 + $0x18] sm:$0xff] %v7403_v5  ;;  %v6522_v7 = vld [vmem:[#allocation8 + $0x36c] ss:$16 sps:$4 sm:$0xff]  }
  0xee   : > { %869 = vmatprep.subr.bf16.mxu1 %v6429_v8  ;;  %4228 = vst [vmem:[#allocation3 + $0x20] sm:$0xff] %v7403_v5  ;;  %4229 = vst [vmem:[#allocation3 + $0x28] sm:$0xff] %v7403_v5  ;;  %v6517_v8 = vld [vmem:[#allocation8 + $0x360] ss:$16 sps:$4 sm:$0xff]  }
  0xef   : > { %2106 = vmatpush1.bf16.msra.mxu0 %v6475_v42  ;;  %4230 = vst [vmem:[#allocation3 + $0x30] sm:$0xff] %v7403_v5  ;;  %4231 = vst [vmem:[#allocation3 + $0x38] sm:$0xff] %v7403_v5  ;;  %v1311_v38 = vld [vmem:[#allocation6 + $0x1] ss:$4 sm:$0xf] }
  0xf0   : > { %2107 = vmatprep.subr.bf16.mxu0 %v6483_v44  ;;  %4232 = vst [vmem:[#allocation3 + $0x40] sm:$0xff] %v7403_v5  ;;  %4233 = vst [vmem:[#allocation3 + $0x48] sm:$0xff] %v7403_v5 }
  0xf1   : > { %870 = vmatpush1.bf16.msra.mxu1 %v6427_v9  ;;  %v6520_v9 = vld [vmem:[#allocation8 + $0x368] ss:$16 sps:$4 sm:$0xff]  }
  0xf2   : > { %871 = vmatprep.subr.bf16.mxu1 %v6432_v10  ;;  %v6523_v10 = vld [vmem:[#allocation8 + $0x380] ss:$16 sps:$4 sm:$0xff]  }
  0xf3   : > { %2108 = vmatpush1.bf16.msra.mxu0 %v6481_v46 }
  0xf4   : > { %2109 = vmatprep.subr.bf16.mxu0 %v6489_v48 }
  0xf5   : > { %872 = vmatpush1.bf16.msra.mxu1 %v6430_v11  ;;  %v6525_v11 = vld [vmem:[#allocation8 + $0x384] ss:$16 sps:$4 sm:$0xff]  }
  0xf6   : > { %1047 = vmatprep.subr.bf16.mxu1 %v6435_v12  ;;  %v6526_v12 = vld [vmem:[#allocation8 + $0x388] ss:$16 sps:$4 sm:$0xff]  }
  0xf7   : > { %2110 = vmatpush1.bf16.msra.mxu0 %v6487_v50 }
  0xf8   : > { %5716 = vmatmul.mubr.msk.bf16.vlgmr.msra.gmra.mrb[4].mxu1 %vm504_vm0, %v7670_v29  ;;  %v6462_v29 = vld [vmem:[#allocation8 + $0x22c] ss:$16 sps:$4 sm:$0xff]   ;;  %2111 = vmatprep.subr.bf16.mxu0 %v6495_v52 }
  0xf9   : > { %1048 = vmatpush1.bf16.msra.mxu1 %v6433_v13  ;;  %1079 = vmatprep.mubr.bf16.mxu1 %v7402_v0  ;;  %v6528_v13 = vld [vmem:[#allocation8 + $0x38c] ss:$16 sps:$4 sm:$0xff]  }
  0xfa   : > { %1049 = vmatprep.subr.bf16.mxu1 %v6438_v14  ;;  %v6531_v14 = vld [vmem:[#allocation8 + $0x3a4] ss:$16 sps:$4 sm:$0xff]  }
  0xfb   : > { %2112 = vmatpush1.bf16.msra.mxu0 %v6493_v54 }
  0xfc   : > { %2113 = vmatprep.subr.bf16.mxu0 %v6501_v56 }
  0xfd   : > { %1050 = vmatpush1.bf16.msra.mxu1 %v6436_v15  ;;  %v6534_v15 = vld [vmem:[#allocation8 + $0x3ac] ss:$16 sps:$4 sm:$0xff]  }
  0xfe   : > { %1051 = vmatprep.subr.bf16.mxu1 %v6441_v16  ;;  %v6529_v16 = vld [vmem:[#allocation8 + $0x3a0] ss:$16 sps:$4 sm:$0xff]  }
  0xff   : > { %2114 = vmatpush1.bf16.msra.mxu0 %v6499_v58 }
 0x100   : > { %2115 = vmatprep.subr.bf16.mxu0 %v6507_v60 }
 0x101   : > { %1052 = vmatpush1.bf16.msra.mxu1 %v6439_v17  ;;  %v6532_v17 = vld [vmem:[#allocation8 + $0x3a8] ss:$16 sps:$4 sm:$0xff]  }
 0x102   : > { %1221 = vmatprep.subr.bf16.mxu1 %v6444_v18  ;;  %v6537_v18 = vld [vmem:[#allocation8 + $0x3c4] ss:$16 sps:$4 sm:$0xff]  }
 0x103   : > { %2116 = vmatpush1.bf16.msra.mxu0 %v6505_v62 }
 0x104   : > { %5730 = vmatmul.mubr.msk.bf16.vlgmr.msra.gmra.mrb[4].mxu1 %vm504_vm0, %v7679_v49  ;;  %v6492_v49 = vld [vmem:[#allocation8 + $0x2cc] ss:$16 sps:$4 sm:$0xff]   ;;  %2117 = vmatprep.subr.bf16.mxu0 %v6513_v1 }
 0x105   : > { %1222 = vmatpush1.bf16.msra.mxu1 %v6442_v19  ;;  %1253 = vmatprep.mubr.bf16.mxu1 %v7402_v0  ;;  %v6535_v19 = vld [vmem:[#allocation8 + $0x3c0] ss:$16 sps:$4 sm:$0xff]  }
 0x106   : > { %1223 = vmatprep.subr.bf16.mxu1 %v6447_v20  ;;  %v6540_v20 = vld [vmem:[#allocation8 + $0x3cc] ss:$16 sps:$4 sm:$0xff]  }
 0x107   : > { %2118 = vmatpush1.bf16.msra.mxu0 %v6511_v3 }
 0x108   : > { %2119 = vmatprep.subr.bf16.mxu0 %v6519_v6 }
 0x109   : > { %1224 = vmatpush1.bf16.msra.mxu1 %v6445_v21  ;;  %v6538_v21 = vld [vmem:[#allocation8 + $0x3c8] ss:$16 sps:$4 sm:$0xff]  }
 0x10a   : > { %1225 = vmatprep.subr.bf16.mxu1 %v6450_v22  ;;  %v6543_v22 = vld [vmem:[#allocation8 + $0x3e4] ss:$16 sps:$4 sm:$0xff]  }
 0x10b   : > { %2120 = vmatpush1.bf16.msra.mxu0 %v6517_v8 }
 0x10c   : > { %2121 = vmatprep.subr.bf16.mxu0 %v6525_v11 }
 0x10d   : > { %1226 = vmatpush1.bf16.msra.mxu1 %v6448_v23  ;;  %v6546_v23 = vld [vmem:[#allocation8 + $0x3ec] ss:$16 sps:$4 sm:$0xff]  }
 0x10e   : > { %2138 = vmatprep.subr.bf16.mxu1 %v6456_v27  ;;  %v6552_v27 = vld [vmem:[#allocation8 + $0xc] ss:$16 sps:$4 sm:$0xff]  }
 0x10f   : > { %2122 = vmatpush1.bf16.msra.mxu0 %v6523_v10 }
 0x110   : > { %5744 = vmatmul.mubr.msk.bf16.vlgmr.msra.gmra.mrb[4].mxu1 %vm504_vm0, %v1114_v63  ;;  %v6508_v63 = vld [vmem:[#allocation8 + $0x328] ss:$16 sps:$4 sm:$0xff]   ;;  %2123 = vmatprep.subr.bf16.mxu0 %v6531_v14  ;;  %v7404_v14 = vmov 1983009808  }
 0x111   : > { %2139 = vmatpush1.bf16.msra.mxu1 %v6454_v26  ;;  %v6549_v26 = vld [vmem:[#allocation8 + $0x4] ss:$16 sps:$4 sm:$0xff]  }
 0x112   : > { %2140 = vmatprep.subr.bf16.mxu1 %v6462_v29  ;;  %v7702_v29 = vshrl.u32 %v1274_v28, 7 }
 0x113   : > { %2124 = vmatpush1.bf16.msra.mxu0 %v6529_v16 }
 0x114   : > { %2125 = vmatprep.subr.bf16.mxu0 %v6537_v18  ;;  %v7705_v30 = vsub.s32 0, %v7702_v29  ;;  %v7708_v32 = vsub.s32 1, %v7702_v29  ;;  %v7717_v10 = vsub.s32 2, %v7702_v29  ;;  %v7720_v11 = vsub.s32 3, %v7702_v29 }
 0x115   : > { %2141 = vmatpush1.bf16.msra.mxu1 %v6460_v31  ;;  %v1272_v31 = vld [vmem:[#allocation6] ss:$4 sm:$0xf] }
 0x116   : > { %2142 = vmatprep.subr.bf16.mxu1 %v6468_v34  ;;  %v1324_v18 = vrot.slane %v1311_v38, %v7717_v10 }
 0x117   : > { %2126 = vmatpush1.bf16.msra.mxu0 %v6535_v19 }
 0x118   : > { %2127 = vmatprep.subr.bf16.mxu0 %v6543_v22 }
 0x119   : > { %2143 = vmatpush1.bf16.msra.mxu1 %v6466_v35  ;;  %v1277_v35 = vrot.slane %v1272_v31, %v7705_v30 }
 0x11a   : > { %2144 = vmatprep.subr.bf16.mxu1 %v6474_v37 }
 0x11b   : > { %2128 = vmatpush1.bf16.msra.mxu0 %v6541_v24 }
 0x11c   : > { %2499 = vmatprep.subr.bf16.mxu0 %v6549_v26 }
 0x11d   : > { %2145 = vmatpush1.bf16.msra.mxu1 %v6472_v39  ;;  %v1281_v39 = vrot.slane %v1272_v31, %v7708_v32 }
 0x11e   : > { %2146 = vmatprep.subr.bf16.mxu1 %v6480_v41 }
 0x121   : > { %2147 = vmatpush1.bf16.msra.mxu1 %v6478_v43  ;;  %v1342_v43 = vld [vmem:[#allocation6 + $0x2] ss:$4 sm:$0xf] }
 0x122   : > { %2148 = vmatprep.subr.bf16.mxu1 %v6486_v45  ;;  %v1347_v54 = vrot.slane %v1342_v43, %v7705_v30 }
 0x125   : > { %2149 = vmatpush1.bf16.msra.mxu1 %v6484_v47  ;;  %v1316_v47 = vrot.slane %v1311_v38, %v7705_v30 }
 0x126   : > { %2150 = vmatprep.subr.bf16.mxu1 %v6492_v49 }
 0x129   : > { %2151 = vmatpush1.bf16.msra.mxu1 %v6490_v51  ;;  %v1320_v51 = vrot.slane %v1311_v38, %v7708_v32 }
 0x12a   : > { %2152 = vmatprep.subr.bf16.mxu1 %v6498_v53 }
 0x12d   : > { %2153 = vmatpush1.bf16.msra.mxu1 %v6496_v55 }
 0x12e   : > { %2154 = vmatprep.subr.bf16.mxu1 %v6504_v57  ;;  %v1351_v57 = vrot.slane %v1342_v43, %v7708_v32 }
 0x131   : > { %2155 = vmatpush1.bf16.msra.mxu1 %v6502_v59 }
 0x132   : > { %2156 = vmatprep.subr.bf16.mxu1 %v6510_v61 }
 0x135   : > { %2157 = vmatpush1.bf16.msra.mxu1 %v6508_v63 }
 0x136   : > { %2158 = vmatprep.subr.bf16.mxu1 %v6516_v2 }
 0x139   : > { %2159 = vmatpush1.bf16.msra.mxu1 %v6514_v4 }
 0x13a   : > { %2160 = vmatprep.subr.bf16.mxu1 %v6522_v7 }
 0x13d   : > { %2161 = vmatpush1.bf16.msra.mxu1 %v6520_v9 }
 0x13e   : > { %2162 = vmatprep.subr.bf16.mxu1 %v6528_v13  ;;  %v1289_v13 = vrot.slane %v1272_v31, %v7720_v11 }
 0x141   : > { %2163 = vmatpush1.bf16.msra.mxu1 %v6526_v12  ;;  %v1285_v12 = vrot.slane %v1272_v31, %v7717_v10  ;;  %v1359_v31 = vrot.slane %v1342_v43, %v7720_v11 }
 0x142   : > { %2164 = vmatprep.subr.bf16.mxu1 %v6534_v15  ;;  %v1385_v15 = vunpack.c.l.s4 %v7404_v14 }
 0x145   : > { %2165 = vmatpush1.bf16.msra.mxu1 %v6532_v17 }
 0x146   : > { %2166 = vmatprep.subr.bf16.mxu1 %v6540_v20 }
 0x149   : > { %2167 = vmatpush1.bf16.msra.mxu1 %v6538_v21  ;;  %v1328_v21 = vrot.slane %v1311_v38, %v7720_v11 }
 0x14a   : > { %2168 = vmatprep.subr.bf16.mxu1 %v6546_v23  ;;  %v1386_v23 = vunpack.c.0.s8 %v1385_v15 }
 0x14d   : > { %2169 = vmatpush1.bf16.msra.mxu1 %v6544_v25  ;;  %v1355_v25 = vrot.slane %v1342_v43, %v7717_v10 }
 0x14e   : > { %2540 = vmatprep.subr.bf16.mxu1 %v6552_v27 }
 0x1b1   : > { %v1212_v33 = vpop.f32.mrb[0].mxu0 }
 0x1b2   : > { %v1214_v34 = vpop.f32.mrb[1].mxu0 }
 0x1b3   : > { %v1216_v36 = vpop.f32.mrb[2].mxu0  ;;  %v690_v37 = vpop.f32.mrb[0].mxu1 }
 0x1b4   : > { %v1218_v40 = vpop.f32.mrb[3].mxu0  ;;  %v6242_v41 = vadd.f32 %v1212_v33, %v690_v37  ;;  %v692_v42 = vpop.f32.mrb[1].mxu1 }
 0x1b5   : > { %v6243_v44 = vadd.f32 %v1214_v34, %v692_v42  ;;  %v694_v45 = vpop.f32.mrb[2].mxu1 }
 0x1b6   : > { %v1294_v46 = vadd.f32 %v6242_v41, %v1277_v35  ;;  %v6244_v48 = vadd.f32 %v1216_v36, %v694_v45  ;;  %v696_v49 = vpop.f32.mrb[3].mxu1 }
 0x1b7   : > { %v1295_v50 = vadd.f32 %v6243_v44, %v1281_v39  ;;  %v6245_v52 = vadd.f32 %v1218_v40, %v696_v49 }
 0x1b8   : > { %v1302_v53 = vmax.f32 %v1294_v46, 0.0  ;;  %v1298_v55 = vadd.f32 %v6244_v48, %v1277_v35 }
 0x1b9   : > { %v1303_v56 = vmax.f32 %v1295_v50, 0.0  ;;  %v1299_v58 = vadd.f32 %v6245_v52, %v1281_v39  ;;  %v7729_v39 = vsub.s32 %v1386_v23, %v7702_v29 }
 0x1ba   : > { %v1333_v59 = vmul.f32 %v1316_v47, %v1302_v53  ;;  %v1306_v60 = vmax.f32 %v1298_v55, 0.0 }
 0x1bb   : > { %v1334_v61 = vmul.f32 %v1320_v51, %v1303_v56  ;;  %v1307_v62 = vmax.f32 %v1299_v58, 0.0 }
 0x1bc   : > { %v1364_v63 = vadd.f32 %v1347_v54, %v1333_v59  ;;  %v1337_v1 = vmul.f32 %v1316_v47, %v1306_v60 }
 0x1bd   : > { %v1365_v2 = vadd.f32 %v1351_v57, %v1334_v61  ;;  %v1338_v3 = vmul.f32 %v1320_v51, %v1307_v62 }
 0x1be   : > { %v1368_v4 = vadd.f32 %v1347_v54, %v1337_v1 }
 0x1bf   : > { %v1380_v5 = vcombine.low %v1364_v63, %v1365_v2  ;;  %v1381_v6 = vcombine.high %v1364_v63, %v1365_v2  ;;  %v1369_v7 = vadd.f32 %v1351_v57, %v1338_v3 }
 0x1c1   : > { %v1416_v8 = vcombine.low %v1368_v4, %v1369_v7  ;;  %v1417_v9 = vcombine.high %v1368_v4, %v1369_v7  ;;  %v1390_v48 = vrot.slane %v1380_v5, %v7729_v39  ;;  %v1397_v43 = vrot.slane %v1381_v6, %v7729_v39 }
 0x1c3   : > { %v1426_v56 = vrot.slane %v1416_v8, %v7729_v39  ;;  %v1433_v57 = vrot.slane %v1417_v9, %v7729_v39 }
 0x1e3   : > { %v1255_v16 = vpop.f32.mrb[4].mxu1 }
 0x1e4   : > { %v1296_v17 = vadd.f32 %v1285_v12, %v1255_v16  ;;  %v1257_v19 = vpop.f32.mrb[5].mxu1 }
 0x1e5   : > { %v1297_v20 = vadd.f32 %v1289_v13, %v1257_v19  ;;  %v1259_v22 = vpop.f32.mrb[6].mxu1 }
 0x1e6   : > { %v1304_v24 = vmax.f32 %v1296_v17, 0.0  ;;  %v1300_v26 = vadd.f32 %v1285_v12, %v1259_v22  ;;  %v1261_v27 = vpop.f32.mrb[7].mxu1 }
 0x1e7   : > { %v1305_v28 = vmax.f32 %v1297_v20, 0.0  ;;  %v1301_v33 = vadd.f32 %v1289_v13, %v1261_v27 }
 0x1e8   : > { %v1335_v34 = vmul.f32 %v1324_v18, %v1304_v24  ;;  %v1308_v35 = vmax.f32 %v1300_v26, 0.0 }
 0x1e9   : > { %v1336_v36 = vmul.f32 %v1328_v21, %v1305_v28  ;;  %v1309_v37 = vmax.f32 %v1301_v33, 0.0 }
 0x1ea   : > { %v1366_v40 = vadd.f32 %v1355_v25, %v1335_v34  ;;  %v1339_v38 = vmul.f32 %v1324_v18, %v1308_v35 }
 0x1eb   : > { %v1367_v41 = vadd.f32 %v1359_v31, %v1336_v36  ;;  %v1340_v42 = vmul.f32 %v1328_v21, %v1309_v37 }
 0x1ec   : > { %v1370_v44 = vadd.f32 %v1355_v25, %v1339_v38 }
 0x1ed   : > { %v1382_v45 = vcombine.low %v1366_v40, %v1367_v41  ;;  %v1383_v46 = vcombine.high %v1366_v40, %v1367_v41  ;;  %v1371_v47 = vadd.f32 %v1359_v31, %v1340_v42 }
 0x1ef   : > { %v1404_v49 = vrot.slane %v1382_v45, %v7729_v39  ;;  %v1411_v50 = vrot.slane %v1383_v46, %v7729_v39  ;;  %v1418_v51 = vcombine.low %v1370_v44, %v1371_v47  ;;  %v1419_v52 = vcombine.high %v1370_v44, %v1371_v47 }
 0x1f1   : > { %v1412_v29 = vcombine.low %v1390_v48, %v1404_v49  ;;  %v1413_v53 = vcombine.high %v1390_v48, %v1404_v49  ;;  %v1414_v54 = vcombine.low %v1397_v43, %v1411_v50  ;;  %v1415_v55 = vcombine.high %v1397_v43, %v1411_v50 }
 0x1f2   : > { %v1440_v58 = vrot.slane %v1418_v51, %v7729_v39  ;;  %v1447_v59 = vrot.slane %v1419_v52, %v7729_v39 }
 0x1f3   : > { %v5745_v60 = vrot.slane %v1412_v29, 9  ;;  %v5746_v61 = vrot.slane %v1413_v53, 9  ;;  %v5747_v62 = vrot.slane %v1414_v54, 9  ;;  %v5748_v63 = vrot.slane %v1415_v55, 9 }
 0x1f4   : > { %v1448_v1 = vcombine.low %v1426_v56, %v1440_v58  ;;  %v1449_v2 = vcombine.high %v1426_v56, %v1440_v58  ;;  %v1450_v3 = vcombine.low %v1433_v57, %v1447_v59  ;;  %v1451_v4 = vcombine.high %v1433_v57, %v1447_v59 }
 0x1f5   : > { %v1484_v5 = vmax.f32 %v1412_v29, %v5745_v60  ;;  %v1485_v6 = vmax.f32 %v1413_v53, %v5746_v61  ;;  %v1486_v7 = vmax.f32 %v1414_v54, %v5747_v62  ;;  %v1487_v8 = vmax.f32 %v1415_v55, %v5748_v63 }
 0x1f6   : > { %v5749_v9 = vrot.slane %v1448_v1, 9  ;;  %v5750_v12 = vrot.slane %v1449_v2, 9  ;;  %v5751_v13 = vrot.slane %v1450_v3, 9  ;;  %v5752_v14 = vrot.slane %v1451_v4, 9 }
 0x1f7   : > { %v1500_v15 = vrot.slane %v1484_v5, 4  ;;  %v1501_v16 = vrot.slane %v1485_v6, 4  ;;  %v1502_v17 = vrot.slane %v1486_v7, 4  ;;  %v1503_v18 = vrot.slane %v1487_v8, 4 }
 0x1f8   : > { %v1488_v19 = vmax.f32 %v1448_v1, %v5749_v9  ;;  %v1489_v20 = vmax.f32 %v1449_v2, %v5750_v12  ;;  %v1490_v21 = vmax.f32 %v1450_v3, %v5751_v13  ;;  %v1491_v22 = vmax.f32 %v1451_v4, %v5752_v14 }
 0x1f9   : > { %v1516_v23 = vmax.f32 %v1484_v5, %v1500_v15  ;;  %v1517_v24 = vmax.f32 %v1485_v6, %v1501_v16  ;;  %v1518_v25 = vmax.f32 %v1486_v7, %v1502_v17  ;;  %v1519_v26 = vmax.f32 %v1487_v8, %v1503_v18 }
 0x1fa   : > { %v1504_v27 = vrot.slane %v1488_v19, 4  ;;  %v1505_v28 = vrot.slane %v1489_v20, 4  ;;  %v1506_v31 = vrot.slane %v1490_v21, 4  ;;  %v1507_v33 = vrot.slane %v1491_v22, 4 }
 0x1fb   : > { %v1539_v34 = vrot.slane %v1516_v23, %v7705_v30  ;;  %v1543_v35 = vrot.slane %v1516_v23, %v7717_v10  ;;  %v1547_v36 = vrot.slane %v1517_v24, %v7705_v30  ;;  %v1551_v37 = vrot.slane %v1517_v24, %v7717_v10  ;;  %v6550_v23 = vld [vmem:[#allocation8 + $0x8] ss:$16 sps:$4 sm:$0xff]  }
 0x1fc   : > { %v1555_v40 = vrot.slane %v1518_v25, %v7705_v30  ;;  %v1559_v38 = vrot.slane %v1518_v25, %v7717_v10  ;;  %v1563_v41 = vrot.slane %v1519_v26, %v7705_v30  ;;  %v1567_v42 = vrot.slane %v1519_v26, %v7717_v10 }
 0x1fd   : > { %v1601_v44 = vsel %vm1600_vm5, %v1547_v36, %v1539_v34  ;;  %v1610_v45 = vsel %vm1600_vm5, %v1551_v37, %v1543_v35  ;;  %v1520_v46 = vmax.f32 %v1488_v19, %v1504_v27  ;;  %v1521_v47 = vmax.f32 %v1489_v20, %v1505_v28  ;;  %v6555_v27 = vld [vmem:[#allocation8 + $0x24] ss:$16 sps:$4 sm:$0xff]   ;;  %v6558_v28 = vld [vmem:[#allocation8 + $0x2c] ss:$16 sps:$4 sm:$0xff]   ;;  %v6559_v36 = vld [vmem:[#allocation8 + $0x40] ss:$16 sps:$4 sm:$0xff]  }
 0x1fe   : > { %v1603_v48 = vsel %vm1602_vm6, %v1555_v40, %v1601_v44  ;;  %v1611_v43 = vsel %vm1602_vm6, %v1559_v38, %v1610_v45  ;;  %v1522_v49 = vmax.f32 %v1490_v21, %v1506_v31  ;;  %v1523_v50 = vmax.f32 %v1491_v22, %v1507_v33  ;;  %v6547_v22 = vld [vmem:[#allocation8] ss:$16 sps:$4 sm:$0xff]   ;;  %v6556_v33 = vld [vmem:[#allocation8 + $0x28] ss:$16 sps:$4 sm:$0xff]   ;;  %v6561_v34 = vld [vmem:[#allocation8 + $0x44] ss:$16 sps:$4 sm:$0xff]  }
 0x1ff   : > { %v1605_v51 = vsel %vm1604_vm7, %v1563_v41, %v1603_v48  ;;  %v1612_v52 = vsel %vm1604_vm7, %v1567_v42, %v1611_v43  ;;  %v1571_v29 = vrot.slane %v1520_v46, %v7705_v30  ;;  %v1575_v53 = vrot.slane %v1520_v46, %v7717_v10  ;;  %v6553_v31 = vld [vmem:[#allocation8 + $0x20] ss:$16 sps:$4 sm:$0xff]   ;;  %v6564_v35 = vld [vmem:[#allocation8 + $0x4c] ss:$16 sps:$4 sm:$0xff]   ;;  %v6562_v37 = vld [vmem:[#allocation8 + $0x48] ss:$16 sps:$4 sm:$0xff]  }
 0x200   : > { %v1579_v54 = vrot.slane %v1521_v47, %v7705_v30  ;;  %v1583_v55 = vrot.slane %v1521_v47, %v7717_v10  ;;  %v1587_v56 = vrot.slane %v1522_v49, %v7705_v30  ;;  %v1591_v57 = vrot.slane %v1522_v49, %v7717_v10  ;;  %v6567_v40 = vld [vmem:[#allocation8 + $0x64] ss:$16 sps:$4 sm:$0xff]   ;;  %v6570_v38 = vld [vmem:[#allocation8 + $0x6c] ss:$16 sps:$4 sm:$0xff]   ;;  %v6565_v41 = vld [vmem:[#allocation8 + $0x60] ss:$16 sps:$4 sm:$0xff]  }
 0x201   : > { %v1595_v58 = vrot.slane %v1523_v50, %v7705_v30  ;;  %v1599_v59 = vrot.slane %v1523_v50, %v7717_v10  ;;  %v1607_v60 = vsel %vm1606_vm8, %v1571_v29, %v1605_v51  ;;  %v1613_v61 = vsel %vm1606_vm8, %v1575_v53, %v1612_v52  ;;  %v6568_v42 = vld [vmem:[#allocation8 + $0x68] ss:$16 sps:$4 sm:$0xff]   ;;  %v6573_v44 = vld [vmem:[#allocation8 + $0x84] ss:$16 sps:$4 sm:$0xff]   ;;  %v6576_v45 = vld [vmem:[#allocation8 + $0x8c] ss:$16 sps:$4 sm:$0xff]  }
 0x202   : > { %v1609_v62 = vsel %vm1608_vm9, %v1579_v54, %v1607_v60  ;;  %v1614_v63 = vsel %vm1608_vm9, %v1583_v55, %v1613_v61  ;;  %v6571_v46 = vld [vmem:[#allocation8 + $0x80] ss:$16 sps:$4 sm:$0xff]   ;;  %v6574_v47 = vld [vmem:[#allocation8 + $0x88] ss:$16 sps:$4 sm:$0xff]   ;;  %v6579_v48 = vld [vmem:[#allocation8 + $0xa4] ss:$16 sps:$4 sm:$0xff]  }
 0x203   : > { %v1616_v1 = vsel %vm1615_vm10, %v1595_v58, %v1587_v56  ;;  %v1617_v2 = vsel %vm1615_vm10, %v1599_v59, %v1591_v57  ;;  %1622 = vst [vmem:[#allocation2] sm:$0xfc] %v1609_v62  ;;  %1623 = vst [vmem:[#allocation2 + $0x8] sm:$0xfc] %v1614_v63  ;;  %v6582_v43 = vld [vmem:[#allocation8 + $0xac] ss:$16 sps:$4 sm:$0xff]  }
 0x204   : > { %1624 = vst [vmem:[#allocation2 + $0x10] sm:$0x3] %v1616_v1  ;;  %1625 = vst [vmem:[#allocation2 + $0x18] sm:$0x3] %v1617_v2  ;;  %v6577_v49 = vld [vmem:[#allocation8 + $0xa0] ss:$16 sps:$4 sm:$0xff]  }
 0x205   : > { %v6580_v50 = vld [vmem:[#allocation8 + $0xa8] ss:$16 sps:$4 sm:$0xff]   ;;  %v6585_v51 = vld [vmem:[#allocation8 + $0xc4] ss:$16 sps:$4 sm:$0xff]   ;;  %v6588_v52 = vld [vmem:[#allocation8 + $0xcc] ss:$16 sps:$4 sm:$0xff]  }
 0x206   : > { %v6583_v29 = vld [vmem:[#allocation8 + $0xc0] ss:$16 sps:$4 sm:$0xff]   ;;  %v6586_v53 = vld [vmem:[#allocation8 + $0xc8] ss:$16 sps:$4 sm:$0xff]   ;;  %v6591_v54 = vld [vmem:[#allocation8 + $0xe4] ss:$16 sps:$4 sm:$0xff]  }
 0x207   : > { %v6594_v55 = vld [vmem:[#allocation8 + $0xec] ss:$16 sps:$4 sm:$0xff]   ;;  %v6589_v56 = vld [vmem:[#allocation8 + $0xe0] ss:$16 sps:$4 sm:$0xff]   ;;  %v6592_v57 = vld [vmem:[#allocation8 + $0xe8] ss:$16 sps:$4 sm:$0xff]  }
 0x208   : > { %v6597_v58 = vld [vmem:[#allocation8 + $0x104] ss:$16 sps:$4 sm:$0xff]   ;;  %v6600_v59 = vld [vmem:[#allocation8 + $0x10c] ss:$16 sps:$4 sm:$0xff]   ;;  %v6595_v60 = vld [vmem:[#allocation8 + $0x100] ss:$16 sps:$4 sm:$0xff]  }
 0x209   : > { %v6598_v61 = vld [vmem:[#allocation8 + $0x108] ss:$16 sps:$4 sm:$0xff]   ;;  %v6603_v62 = vld [vmem:[#allocation8 + $0x124] ss:$16 sps:$4 sm:$0xff]   ;;  %v6606_v63 = vld [vmem:[#allocation8 + $0x12c] ss:$16 sps:$4 sm:$0xff]  }
 0x20a   : > { %v1627_v3 = vld [vmem:[#allocation2 + $0x8] sm:$0xff]  ;;  %v1626_v4 = vld [vmem:[#allocation2] sm:$0xff] }
 0x20b   : > { %v1629_v5 = vld [vmem:[#allocation2 + $0x18] sm:$0xf]  ;;  %v1628_v6 = vld [vmem:[#allocation2 + $0x10] sm:$0xf] }
 0x20c   : > { %v7767_v7 = vpack.c.bf16 %v1629_v5, %v1627_v3  ;;  %v7769_v8 = vpack.c.bf16 %v1628_v6, %v1626_v4  ;;  %v6601_v1 = vld [vmem:[#allocation8 + $0x120] ss:$16 sps:$4 sm:$0xff]   ;;  %v6604_v2 = vld [vmem:[#allocation8 + $0x128] ss:$16 sps:$4 sm:$0xff]   ;;  %v6609_v3 = vld [vmem:[#allocation8 + $0x144] ss:$16 sps:$4 sm:$0xff]  }
 0x20d   : > { %v6612_v4 = vld [vmem:[#allocation8 + $0x14c] ss:$16 sps:$4 sm:$0xff]   ;;  %v6607_v5 = vld [vmem:[#allocation8 + $0x140] ss:$16 sps:$4 sm:$0xff]   ;;  %v6610_v6 = vld [vmem:[#allocation8 + $0x148] ss:$16 sps:$4 sm:$0xff]  }
 0x20e   : > { %v1769_v9 = vshrl.u32 %v7767_v7, 16  ;;  %v1771_v12 = vshll.u32 %v7767_v7, 16  ;;  %v1762_v13 = vshrl.u32 %v7769_v8, 16  ;;  %v1764_v14 = vshll.u32 %v7769_v8, 16 }
 0x210   : > { %v1773_v15 = vrot.slane %v1771_v12, 1  ;;  %v1766_v16 = vrot.slane %v1764_v14, 1  ;;  %v3126_v17 = vrot.slane %v1769_v9, 1  ;;  %v3127_v18 = vrot.slane %v1771_v12, 2  ;;  %v6618_v12 = vld [vmem:[#allocation8 + $0x16c] ss:$16 sps:$4 sm:$0xff]  }
 0x211   : > { %v3123_v19 = vrot.slane %v1762_v13, 1  ;;  %v3124_v20 = vrot.slane %v1764_v14, 2  ;;  %v6616_v14 = vld [vmem:[#allocation8 + $0x168] ss:$16 sps:$4 sm:$0xff]  }
 0x212   : > { %v1774_v21 = vor.u32 %v1773_v15, %v1769_v9  ;;  %v1767_v24 = vor.u32 %v1766_v16, %v1762_v13  ;;  %v7775_v25 = vor.u32 %v3127_v18, %v3126_v17  ;;  %v6615_v9 = vld [vmem:[#allocation8 + $0x164] ss:$16 sps:$4 sm:$0xff]   ;;  %v6613_v13 = vld [vmem:[#allocation8 + $0x160] ss:$16 sps:$4 sm:$0xff]   ;;  %v6624_v16 = vld [vmem:[#allocation8 + $0x18c] ss:$16 sps:$4 sm:$0xff]  }
 0x213   : > { %v7777_v26 = vor.u32 %v3124_v20, %v3123_v19  ;;  %v6621_v15 = vld [vmem:[#allocation8 + $0x184] ss:$16 sps:$4 sm:$0xff]   ;;  %v6619_v17 = vld [vmem:[#allocation8 + $0x180] ss:$16 sps:$4 sm:$0xff]   ;;  %v6622_v18 = vld [vmem:[#allocation8 + $0x188] ss:$16 sps:$4 sm:$0xff]  }
 0x214   : > { %2129 = vmatprep.mubr.bf16.mxu0 %v1774_v21  ;;  %2170 = vmatprep.mubr.bf16.mxu1 %v1774_v21  ;;  %v6627_v19 = vld [vmem:[#allocation8 + $0x1a4] ss:$16 sps:$4 sm:$0xff]   ;;  %v6630_v20 = vld [vmem:[#allocation8 + $0x1ac] ss:$16 sps:$4 sm:$0xff]   ;;  %v6625_v21 = vld [vmem:[#allocation8 + $0x1a0] ss:$16 sps:$4 sm:$0xff]  }
 0x215   : > { %2130 = vmatmul.mubr.bf16.vlgmr.msra.gmra.mrb[4].mxu0 %v1767_v24  ;;  %2171 = vmatmul.mubr.bf16.vlgmr.msra.gmra.mrb[8].mxu1 %v1767_v24  ;;  %v6636_v24 = vld [vmem:[#allocation8 + $0x1cc] ss:$16 sps:$4 sm:$0xff]  }
 0x216   : > { %2500 = vmatpush1.bf16.msra.mxu0 %v6547_v22  ;;  %2541 = vmatpush1.bf16.msra.mxu1 %v6550_v23  ;;  %v6628_v22 = vld [vmem:[#allocation8 + $0x1a8] ss:$16 sps:$4 sm:$0xff]   ;;  %v6633_v23 = vld [vmem:[#allocation8 + $0x1c4] ss:$16 sps:$4 sm:$0xff]  }
 0x217   : > { %2531 = vmatprep.mubr.bf16.mxu0 %v7767_v7  ;;  %2572 = vmatprep.mubr.bf16.mxu1 %v7767_v7 }
 0x218   : > { %2501 = vmatprep.subr.bf16.mxu0 %v6555_v27  ;;  %2542 = vmatprep.subr.bf16.mxu1 %v6558_v28  ;;  %v6631_v27 = vld [vmem:[#allocation8 + $0x1c0] ss:$16 sps:$4 sm:$0xff]   ;;  %v6634_v28 = vld [vmem:[#allocation8 + $0x1c8] ss:$16 sps:$4 sm:$0xff]  }
 0x21a   : > { %2502 = vmatpush1.bf16.msra.mxu0 %v6553_v31  ;;  %2543 = vmatpush1.bf16.msra.mxu1 %v6556_v33  ;;  %v6639_v31 = vld [vmem:[#allocation8 + $0x1e4] ss:$16 sps:$4 sm:$0xff]   ;;  %v6642_v33 = vld [vmem:[#allocation8 + $0x1ec] ss:$16 sps:$4 sm:$0xff]  }
 0x21b   : > { %2503 = vmatprep.subr.bf16.mxu0 %v6561_v34  ;;  %2544 = vmatprep.subr.bf16.mxu1 %v6564_v35  ;;  %v6637_v34 = vld [vmem:[#allocation8 + $0x1e0] ss:$16 sps:$4 sm:$0xff]   ;;  %v6640_v35 = vld [vmem:[#allocation8 + $0x1e8] ss:$16 sps:$4 sm:$0xff]  }
 0x21e   : > { %2504 = vmatpush1.bf16.msra.mxu0 %v6559_v36  ;;  %2545 = vmatpush1.bf16.msra.mxu1 %v6562_v37  ;;  %v6645_v36 = vld [vmem:[#allocation8 + $0x404] ss:$16 sps:$4 sm:$0xff]   ;;  %v6648_v37 = vld [vmem:[#allocation8 + $0x40c] ss:$16 sps:$4 sm:$0xff]  }
 0x21f   : > { %2505 = vmatprep.subr.bf16.mxu0 %v6567_v40  ;;  %2546 = vmatprep.subr.bf16.mxu1 %v6570_v38  ;;  %v6643_v40 = vld [vmem:[#allocation8 + $0x400] ss:$16 sps:$4 sm:$0xff]   ;;  %v6646_v38 = vld [vmem:[#allocation8 + $0x408] ss:$16 sps:$4 sm:$0xff]  }
 0x222   : > { %2506 = vmatpush1.bf16.msra.mxu0 %v6565_v41  ;;  %2547 = vmatpush1.bf16.msra.mxu1 %v6568_v42  ;;  %v2649_v41 = vrot.slane %v7767_v7, 1  ;;  %v6651_v42 = vld [vmem:[#allocation8 + $0x424] ss:$16 sps:$4 sm:$0xff]  }
 0x223   : > { %2507 = vmatprep.subr.bf16.mxu0 %v6573_v44  ;;  %2548 = vmatprep.subr.bf16.mxu1 %v6576_v45  ;;  %v6654_v44 = vld [vmem:[#allocation8 + $0x42c] ss:$16 sps:$4 sm:$0xff]   ;;  %v6649_v45 = vld [vmem:[#allocation8 + $0x420] ss:$16 sps:$4 sm:$0xff]  }
 0x226   : > { %2508 = vmatpush1.bf16.msra.mxu0 %v6571_v46  ;;  %2549 = vmatpush1.bf16.msra.mxu1 %v6574_v47  ;;  %v6652_v46 = vld [vmem:[#allocation8 + $0x428] ss:$16 sps:$4 sm:$0xff]   ;;  %v6657_v47 = vld [vmem:[#allocation8 + $0x444] ss:$16 sps:$4 sm:$0xff]  }
 0x227   : > { %2509 = vmatprep.subr.bf16.mxu0 %v6579_v48  ;;  %2550 = vmatprep.subr.bf16.mxu1 %v6582_v43  ;;  %v6660_v48 = vld [vmem:[#allocation8 + $0x44c] ss:$16 sps:$4 sm:$0xff]   ;;  %v6655_v43 = vld [vmem:[#allocation8 + $0x440] ss:$16 sps:$4 sm:$0xff]  }
 0x22a   : > { %2510 = vmatpush1.bf16.msra.mxu0 %v6577_v49  ;;  %2551 = vmatpush1.bf16.msra.mxu1 %v6580_v50  ;;  %v6658_v49 = vld [vmem:[#allocation8 + $0x448] ss:$16 sps:$4 sm:$0xff]   ;;  %v6663_v50 = vld [vmem:[#allocation8 + $0x464] ss:$16 sps:$4 sm:$0xff]  }
 0x22b   : > { %2511 = vmatprep.subr.bf16.mxu0 %v6585_v51  ;;  %2552 = vmatprep.subr.bf16.mxu1 %v6588_v52  ;;  %v6666_v51 = vld [vmem:[#allocation8 + $0x46c] ss:$16 sps:$4 sm:$0xff]   ;;  %v6661_v52 = vld [vmem:[#allocation8 + $0x460] ss:$16 sps:$4 sm:$0xff]  }
 0x22e   : > { %2512 = vmatpush1.bf16.msra.mxu0 %v6583_v29  ;;  %2553 = vmatpush1.bf16.msra.mxu1 %v6586_v53  ;;  %v6664_v29 = vld [vmem:[#allocation8 + $0x468] ss:$16 sps:$4 sm:$0xff]   ;;  %v6669_v53 = vld [vmem:[#allocation8 + $0x484] ss:$16 sps:$4 sm:$0xff]  }
 0x22f   : > { %2513 = vmatprep.subr.bf16.mxu0 %v6591_v54  ;;  %2554 = vmatprep.subr.bf16.mxu1 %v6594_v55  ;;  %v6672_v54 = vld [vmem:[#allocation8 + $0x48c] ss:$16 sps:$4 sm:$0xff]   ;;  %v6667_v55 = vld [vmem:[#allocation8 + $0x480] ss:$16 sps:$4 sm:$0xff]  }
 0x232   : > { %2514 = vmatpush1.bf16.msra.mxu0 %v6589_v56  ;;  %2555 = vmatpush1.bf16.msra.mxu1 %v6592_v57  ;;  %v6670_v56 = vld [vmem:[#allocation8 + $0x488] ss:$16 sps:$4 sm:$0xff]   ;;  %v6675_v57 = vld [vmem:[#allocation8 + $0x4a4] ss:$16 sps:$4 sm:$0xff]  }
 0x233   : > { %2515 = vmatprep.subr.bf16.mxu0 %v6597_v58  ;;  %2556 = vmatprep.subr.bf16.mxu1 %v6600_v59  ;;  %v6678_v58 = vld [vmem:[#allocation8 + $0x4ac] ss:$16 sps:$4 sm:$0xff]   ;;  %v6673_v59 = vld [vmem:[#allocation8 + $0x4a0] ss:$16 sps:$4 sm:$0xff]  }
 0x236   : > { %2516 = vmatpush1.bf16.msra.mxu0 %v6595_v60  ;;  %2557 = vmatpush1.bf16.msra.mxu1 %v6598_v61  ;;  %v6676_v60 = vld [vmem:[#allocation8 + $0x4a8] ss:$16 sps:$4 sm:$0xff]   ;;  %v6681_v61 = vld [vmem:[#allocation8 + $0x4c4] ss:$16 sps:$4 sm:$0xff]  }
 0x237   : > { %2517 = vmatprep.subr.bf16.mxu0 %v6603_v62  ;;  %2558 = vmatprep.subr.bf16.mxu1 %v6606_v63  ;;  %v6684_v62 = vld [vmem:[#allocation8 + $0x4cc] ss:$16 sps:$4 sm:$0xff]   ;;  %v6679_v63 = vld [vmem:[#allocation8 + $0x4c0] ss:$16 sps:$4 sm:$0xff]  }
 0x23a   : > { %2518 = vmatpush1.bf16.msra.mxu0 %v6601_v1  ;;  %2559 = vmatpush1.bf16.msra.mxu1 %v6604_v2  ;;  %v6682_v1 = vld [vmem:[#allocation8 + $0x4c8] ss:$16 sps:$4 sm:$0xff]   ;;  %v6687_v2 = vld [vmem:[#allocation8 + $0x4e4] ss:$16 sps:$4 sm:$0xff]  }
 0x23b   : > { %2519 = vmatprep.subr.bf16.mxu0 %v6609_v3  ;;  %2560 = vmatprep.subr.bf16.mxu1 %v6612_v4  ;;  %v6690_v3 = vld [vmem:[#allocation8 + $0x4ec] ss:$16 sps:$4 sm:$0xff]   ;;  %v6685_v4 = vld [vmem:[#allocation8 + $0x4e0] ss:$16 sps:$4 sm:$0xff]  }
 0x23e   : > { %2520 = vmatpush1.bf16.msra.mxu0 %v6607_v5  ;;  %2561 = vmatpush1.bf16.msra.mxu1 %v6610_v6  ;;  %v6688_v5 = vld [vmem:[#allocation8 + $0x4e8] ss:$16 sps:$4 sm:$0xff]   ;;  %v6693_v6 = vld [vmem:[#allocation8 + $0x504] ss:$16 sps:$4 sm:$0xff]  }
 0x23f   : > { %2521 = vmatprep.subr.bf16.mxu0 %v6615_v9  ;;  %2562 = vmatprep.subr.bf16.mxu1 %v6618_v12  ;;  %v6696_v9 = vld [vmem:[#allocation8 + $0x50c] ss:$16 sps:$4 sm:$0xff]   ;;  %v6691_v12 = vld [vmem:[#allocation8 + $0x500] ss:$16 sps:$4 sm:$0xff]  }
 0x242   : > { %2522 = vmatpush1.bf16.msra.mxu0 %v6613_v13  ;;  %2563 = vmatpush1.bf16.msra.mxu1 %v6616_v14  ;;  %v6694_v13 = vld [vmem:[#allocation8 + $0x508] ss:$16 sps:$4 sm:$0xff]   ;;  %v6699_v14 = vld [vmem:[#allocation8 + $0x524] ss:$16 sps:$4 sm:$0xff]  }
 0x243   : > { %2523 = vmatprep.subr.bf16.mxu0 %v6621_v15  ;;  %2564 = vmatprep.subr.bf16.mxu1 %v6624_v16  ;;  %v6702_v15 = vld [vmem:[#allocation8 + $0x52c] ss:$16 sps:$4 sm:$0xff]   ;;  %v6697_v16 = vld [vmem:[#allocation8 + $0x520] ss:$16 sps:$4 sm:$0xff]  }
 0x246   : > { %2524 = vmatpush1.bf16.msra.mxu0 %v6619_v17  ;;  %2565 = vmatpush1.bf16.msra.mxu1 %v6622_v18  ;;  %v6700_v17 = vld [vmem:[#allocation8 + $0x528] ss:$16 sps:$4 sm:$0xff]   ;;  %v6705_v18 = vld [vmem:[#allocation8 + $0x544] ss:$16 sps:$4 sm:$0xff]  }
 0x247   : > { %2525 = vmatprep.subr.bf16.mxu0 %v6627_v19  ;;  %2566 = vmatprep.subr.bf16.mxu1 %v6630_v20  ;;  %v6708_v19 = vld [vmem:[#allocation8 + $0x54c] ss:$16 sps:$4 sm:$0xff]   ;;  %v6703_v20 = vld [vmem:[#allocation8 + $0x540] ss:$16 sps:$4 sm:$0xff]  }
 0x24a   : > { %2526 = vmatpush1.bf16.msra.mxu0 %v6625_v21  ;;  %2567 = vmatpush1.bf16.msra.mxu1 %v6628_v22  ;;  %v6706_v21 = vld [vmem:[#allocation8 + $0x548] ss:$16 sps:$4 sm:$0xff]   ;;  %v6711_v22 = vld [vmem:[#allocation8 + $0x564] ss:$16 sps:$4 sm:$0xff]  }
 0x24b   : > { %2527 = vmatprep.subr.bf16.mxu0 %v6633_v23  ;;  %2568 = vmatprep.subr.bf16.mxu1 %v6636_v24  ;;  %v6714_v23 = vld [vmem:[#allocation8 + $0x56c] ss:$16 sps:$4 sm:$0xff]   ;;  %v6709_v24 = vld [vmem:[#allocation8 + $0x560] ss:$16 sps:$4 sm:$0xff]  }
 0x24e   : > { %2528 = vmatpush1.bf16.msra.mxu0 %v6631_v27  ;;  %2569 = vmatpush1.bf16.msra.mxu1 %v6634_v28  ;;  %v6712_v27 = vld [vmem:[#allocation8 + $0x568] ss:$16 sps:$4 sm:$0xff]   ;;  %v6717_v28 = vld [vmem:[#allocation8 + $0x584] ss:$16 sps:$4 sm:$0xff]  }
 0x24f   : > { %2529 = vmatprep.subr.bf16.mxu0 %v6639_v31  ;;  %2570 = vmatprep.subr.bf16.mxu1 %v6642_v33  ;;  %v6720_v31 = vld [vmem:[#allocation8 + $0x58c] ss:$16 sps:$4 sm:$0xff]   ;;  %v6715_v33 = vld [vmem:[#allocation8 + $0x580] ss:$16 sps:$4 sm:$0xff]  }
 0x252   : > { %2530 = vmatpush1.bf16.msra.mxu0 %v6637_v34  ;;  %2571 = vmatpush1.bf16.msra.mxu1 %v6640_v35  ;;  %v6718_v34 = vld [vmem:[#allocation8 + $0x588] ss:$16 sps:$4 sm:$0xff]   ;;  %v6723_v35 = vld [vmem:[#allocation8 + $0x5a4] ss:$16 sps:$4 sm:$0xff]  }
 0x253   : > { %2972 = vmatprep.subr.bf16.mxu0 %v6645_v36  ;;  %3013 = vmatprep.subr.bf16.mxu1 %v6648_v37  ;;  %v6726_v36 = vld [vmem:[#allocation8 + $0x5ac] ss:$16 sps:$4 sm:$0xff]   ;;  %v6721_v37 = vld [vmem:[#allocation8 + $0x5a0] ss:$16 sps:$4 sm:$0xff]  }
 0x255   : > { %2532 = vmatmul.mubr.bf16.vlgmr.msra.gmra.mrb[8].mxu0 %v7769_v8  ;;  %2573 = vmatmul.mubr.bf16.vlgmr.msra.gmra.mrb[12].mxu1 %v7769_v8 }
 0x256   : > { %2973 = vmatpush1.bf16.msra.mxu0 %v6643_v40  ;;  %3004 = vmatprep.mubr.bf16.mxu0 %v2649_v41  ;;  %v6724_v40 = vld [vmem:[#allocation8 + $0x5a8] ss:$16 sps:$4 sm:$0xff]  }
 0x257   : > { %3014 = vmatpush1.bf16.msra.mxu1 %v6646_v38  ;;  %3045 = vmatprep.mubr.bf16.mxu1 %v2649_v41  ;;  %v6729_v38 = vld [vmem:[#allocation8 + $0x5c4] ss:$16 sps:$4 sm:$0xff]   ;;  %v6732_v41 = vld [vmem:[#allocation8 + $0x5cc] ss:$16 sps:$4 sm:$0xff]  }
 0x258   : > { %2974 = vmatprep.subr.bf16.mxu0 %v6651_v42  ;;  %3015 = vmatprep.subr.bf16.mxu1 %v6654_v44  ;;  %v6727_v42 = vld [vmem:[#allocation8 + $0x5c0] ss:$16 sps:$4 sm:$0xff]   ;;  %v6730_v44 = vld [vmem:[#allocation8 + $0x5c8] ss:$16 sps:$4 sm:$0xff]  }
 0x25a   : > { %2975 = vmatpush1.bf16.msra.mxu0 %v6649_v45  ;;  %v6735_v45 = vld [vmem:[#allocation8 + $0x5e4] ss:$16 sps:$4 sm:$0xff]  }
 0x25b   : > { %3016 = vmatpush1.bf16.msra.mxu1 %v6652_v46  ;;  %2976 = vmatprep.subr.bf16.mxu0 %v6657_v47  ;;  %v6738_v46 = vld [vmem:[#allocation8 + $0x5ec] ss:$16 sps:$4 sm:$0xff]   ;;  %v6733_v47 = vld [vmem:[#allocation8 + $0x5e0] ss:$16 sps:$4 sm:$0xff]  }
 0x25c   : > { %3017 = vmatprep.subr.bf16.mxu1 %v6660_v48  ;;  %v6736_v48 = vld [vmem:[#allocation8 + $0x5e8] ss:$16 sps:$4 sm:$0xff]  }
 0x25e   : > { %2977 = vmatpush1.bf16.msra.mxu0 %v6655_v43  ;;  %v6741_v43 = vld [vmem:[#allocation8 + $0x604] ss:$16 sps:$4 sm:$0xff]  }
 0x25f   : > { %3018 = vmatpush1.bf16.msra.mxu1 %v6658_v49  ;;  %2978 = vmatprep.subr.bf16.mxu0 %v6663_v50  ;;  %v6744_v49 = vld [vmem:[#allocation8 + $0x60c] ss:$16 sps:$4 sm:$0xff]   ;;  %v6739_v50 = vld [vmem:[#allocation8 + $0x600] ss:$16 sps:$4 sm:$0xff]  }
 0x260   : > { %3019 = vmatprep.subr.bf16.mxu1 %v6666_v51  ;;  %v2648_v51 = vrot.slane %v7769_v8, 1 }
 0x262   : > { %2979 = vmatpush1.bf16.msra.mxu0 %v6661_v52  ;;  %v6742_v52 = vld [vmem:[#allocation8 + $0x608] ss:$16 sps:$4 sm:$0xff]  }
 0x263   : > { %3020 = vmatpush1.bf16.msra.mxu1 %v6664_v29  ;;  %2980 = vmatprep.subr.bf16.mxu0 %v6669_v53  ;;  %v6747_v29 = vld [vmem:[#allocation8 + $0x624] ss:$16 sps:$4 sm:$0xff]   ;;  %v6750_v53 = vld [vmem:[#allocation8 + $0x62c] ss:$16 sps:$4 sm:$0xff]  }
 0x264   : > { %3021 = vmatprep.subr.bf16.mxu1 %v6672_v54  ;;  %v6745_v54 = vld [vmem:[#allocation8 + $0x620] ss:$16 sps:$4 sm:$0xff]  }
 0x266   : > { %2981 = vmatpush1.bf16.msra.mxu0 %v6667_v55  ;;  %v6748_v55 = vld [vmem:[#allocation8 + $0x628] ss:$16 sps:$4 sm:$0xff]  }
 0x267   : > { %3022 = vmatpush1.bf16.msra.mxu1 %v6670_v56  ;;  %2982 = vmatprep.subr.bf16.mxu0 %v6675_v57  ;;  %v6753_v56 = vld [vmem:[#allocation8 + $0x644] ss:$16 sps:$4 sm:$0xff]   ;;  %v6756_v57 = vld [vmem:[#allocation8 + $0x64c] ss:$16 sps:$4 sm:$0xff]  }
 0x268   : > { %3023 = vmatprep.subr.bf16.mxu1 %v6678_v58  ;;  %v6751_v58 = vld [vmem:[#allocation8 + $0x640] ss:$16 sps:$4 sm:$0xff]  }
 0x26a   : > { %2983 = vmatpush1.bf16.msra.mxu0 %v6673_v59  ;;  %v6754_v59 = vld [vmem:[#allocation8 + $0x648] ss:$16 sps:$4 sm:$0xff]  }
 0x26b   : > { %3024 = vmatpush1.bf16.msra.mxu1 %v6676_v60  ;;  %2984 = vmatprep.subr.bf16.mxu0 %v6681_v61  ;;  %v6759_v60 = vld [vmem:[#allocation8 + $0x664] ss:$16 sps:$4 sm:$0xff]   ;;  %v6762_v61 = vld [vmem:[#allocation8 + $0x66c] ss:$16 sps:$4 sm:$0xff]  }
 0x26c   : > { %3025 = vmatprep.subr.bf16.mxu1 %v6684_v62  ;;  %v6757_v62 = vld [vmem:[#allocation8 + $0x660] ss:$16 sps:$4 sm:$0xff]  }
 0x26e   : > { %2985 = vmatpush1.bf16.msra.mxu0 %v6679_v63  ;;  %v6760_v63 = vld [vmem:[#allocation8 + $0x668] ss:$16 sps:$4 sm:$0xff]  }
 0x26f   : > { %3026 = vmatpush1.bf16.msra.mxu1 %v6682_v1  ;;  %2986 = vmatprep.subr.bf16.mxu0 %v6687_v2  ;;  %v6765_v1 = vld [vmem:[#allocation8 + $0x684] ss:$16 sps:$4 sm:$0xff]   ;;  %v6768_v2 = vld [vmem:[#allocation8 + $0x68c] ss:$16 sps:$4 sm:$0xff]  }
 0x270   : > { %3027 = vmatprep.subr.bf16.mxu1 %v6690_v3  ;;  %v6766_v3 = vld [vmem:[#allocation8 + $0x688] ss:$16 sps:$4 sm:$0xff]  }
 0x272   : > { %2987 = vmatpush1.bf16.msra.mxu0 %v6685_v4  ;;  %v6771_v4 = vld [vmem:[#allocation8 + $0x6a4] ss:$16 sps:$4 sm:$0xff]  }
 0x273   : > { %3028 = vmatpush1.bf16.msra.mxu1 %v6688_v5  ;;  %2988 = vmatprep.subr.bf16.mxu0 %v6693_v6  ;;  %v6774_v5 = vld [vmem:[#allocation8 + $0x6ac] ss:$16 sps:$4 sm:$0xff]   ;;  %v6769_v6 = vld [vmem:[#allocation8 + $0x6a0] ss:$16 sps:$4 sm:$0xff]  }
 0x274   : > { %3029 = vmatprep.subr.bf16.mxu1 %v6696_v9  ;;  %v6772_v9 = vld [vmem:[#allocation8 + $0x6a8] ss:$16 sps:$4 sm:$0xff]  }
 0x276   : > { %2989 = vmatpush1.bf16.msra.mxu0 %v6691_v12  ;;  %v6777_v12 = vld [vmem:[#allocation8 + $0x6c4] ss:$16 sps:$4 sm:$0xff]  }
 0x277   : > { %3030 = vmatpush1.bf16.msra.mxu1 %v6694_v13  ;;  %2990 = vmatprep.subr.bf16.mxu0 %v6699_v14  ;;  %v6780_v13 = vld [vmem:[#allocation8 + $0x6cc] ss:$16 sps:$4 sm:$0xff]   ;;  %v6775_v14 = vld [vmem:[#allocation8 + $0x6c0] ss:$16 sps:$4 sm:$0xff]  }
 0x278   : > { %3031 = vmatprep.subr.bf16.mxu1 %v6702_v15  ;;  %v6778_v15 = vld [vmem:[#allocation8 + $0x6c8] ss:$16 sps:$4 sm:$0xff]  }
 0x27a   : > { %2991 = vmatpush1.bf16.msra.mxu0 %v6697_v16  ;;  %v6783_v16 = vld [vmem:[#allocation8 + $0x6e4] ss:$16 sps:$4 sm:$0xff]  }
 0x27b   : > { %3032 = vmatpush1.bf16.msra.mxu1 %v6700_v17  ;;  %2992 = vmatprep.subr.bf16.mxu0 %v6705_v18  ;;  %v6786_v17 = vld [vmem:[#allocation8 + $0x6ec] ss:$16 sps:$4 sm:$0xff]   ;;  %v6781_v18 = vld [vmem:[#allocation8 + $0x6e0] ss:$16 sps:$4 sm:$0xff]  }
 0x27c   : > { %3033 = vmatprep.subr.bf16.mxu1 %v6708_v19  ;;  %v6784_v19 = vld [vmem:[#allocation8 + $0x6e8] ss:$16 sps:$4 sm:$0xff]  }
 0x27e   : > { %2993 = vmatpush1.bf16.msra.mxu0 %v6703_v20  ;;  %v6789_v20 = vld [vmem:[#allocation8 + $0x704] ss:$16 sps:$4 sm:$0xff]  }
 0x27f   : > { %3034 = vmatpush1.bf16.msra.mxu1 %v6706_v21  ;;  %2994 = vmatprep.subr.bf16.mxu0 %v6711_v22  ;;  %v6792_v21 = vld [vmem:[#allocation8 + $0x70c] ss:$16 sps:$4 sm:$0xff]   ;;  %v6787_v22 = vld [vmem:[#allocation8 + $0x700] ss:$16 sps:$4 sm:$0xff]  }
 0x280   : > { %3035 = vmatprep.subr.bf16.mxu1 %v6714_v23  ;;  %v6790_v23 = vld [vmem:[#allocation8 + $0x708] ss:$16 sps:$4 sm:$0xff]  }
 0x282   : > { %2995 = vmatpush1.bf16.msra.mxu0 %v6709_v24  ;;  %v6795_v24 = vld [vmem:[#allocation8 + $0x724] ss:$16 sps:$4 sm:$0xff]  }
 0x283   : > { %3036 = vmatpush1.bf16.msra.mxu1 %v6712_v27  ;;  %2996 = vmatprep.subr.bf16.mxu0 %v6717_v28  ;;  %v6798_v27 = vld [vmem:[#allocation8 + $0x72c] ss:$16 sps:$4 sm:$0xff]   ;;  %v6793_v28 = vld [vmem:[#allocation8 + $0x720] ss:$16 sps:$4 sm:$0xff]  }
 0x284   : > { %3037 = vmatprep.subr.bf16.mxu1 %v6720_v31  ;;  %v6796_v31 = vld [vmem:[#allocation8 + $0x728] ss:$16 sps:$4 sm:$0xff]  }
 0x286   : > { %2997 = vmatpush1.bf16.msra.mxu0 %v6715_v33  ;;  %v6801_v33 = vld [vmem:[#allocation8 + $0x744] ss:$16 sps:$4 sm:$0xff]  }
 0x287   : > { %3038 = vmatpush1.bf16.msra.mxu1 %v6718_v34  ;;  %2998 = vmatprep.subr.bf16.mxu0 %v6723_v35  ;;  %v6804_v34 = vld [vmem:[#allocation8 + $0x74c] ss:$16 sps:$4 sm:$0xff]   ;;  %v6799_v35 = vld [vmem:[#allocation8 + $0x740] ss:$16 sps:$4 sm:$0xff]  }
 0x288   : > { %3039 = vmatprep.subr.bf16.mxu1 %v6726_v36  ;;  %v6802_v36 = vld [vmem:[#allocation8 + $0x748] ss:$16 sps:$4 sm:$0xff]  }
 0x28a   : > { %2999 = vmatpush1.bf16.msra.mxu0 %v6721_v37  ;;  %v6807_v37 = vld [vmem:[#allocation8 + $0x764] ss:$16 sps:$4 sm:$0xff]  }
 0x28b   : > { %3040 = vmatpush1.bf16.msra.mxu1 %v6724_v40  ;;  %3000 = vmatprep.subr.bf16.mxu0 %v6729_v38  ;;  %v6810_v40 = vld [vmem:[#allocation8 + $0x76c] ss:$16 sps:$4 sm:$0xff]   ;;  %v6805_v38 = vld [vmem:[#allocation8 + $0x760] ss:$16 sps:$4 sm:$0xff]  }
 0x28c   : > { %3041 = vmatprep.subr.bf16.mxu1 %v6732_v41  ;;  %v6808_v41 = vld [vmem:[#allocation8 + $0x768] ss:$16 sps:$4 sm:$0xff]  }
 0x28e   : > { %3001 = vmatpush1.bf16.msra.mxu0 %v6727_v42  ;;  %v6813_v42 = vld [vmem:[#allocation8 + $0x784] ss:$16 sps:$4 sm:$0xff]  }
 0x28f   : > { %3042 = vmatpush1.bf16.msra.mxu1 %v6730_v44  ;;  %3002 = vmatprep.subr.bf16.mxu0 %v6735_v45  ;;  %v6816_v44 = vld [vmem:[#allocation8 + $0x78c] ss:$16 sps:$4 sm:$0xff]   ;;  %v6811_v45 = vld [vmem:[#allocation8 + $0x780] ss:$16 sps:$4 sm:$0xff]  }
 0x290   : > { %3043 = vmatprep.subr.bf16.mxu1 %v6738_v46  ;;  %v6814_v46 = vld [vmem:[#allocation8 + $0x788] ss:$16 sps:$4 sm:$0xff]  }
 0x292   : > { %3003 = vmatpush1.bf16.msra.mxu0 %v6733_v47  ;;  %v6819_v47 = vld [vmem:[#allocation8 + $0x7a4] ss:$16 sps:$4 sm:$0xff]  }
 0x293   : > { %3044 = vmatpush1.bf16.msra.mxu1 %v6736_v48  ;;  %3451 = vmatprep.subr.bf16.mxu0 %v6741_v43  ;;  %v6822_v48 = vld [vmem:[#allocation8 + $0x7ac] ss:$16 sps:$4 sm:$0xff]   ;;  %v6817_v43 = vld [vmem:[#allocation8 + $0x7a0] ss:$16 sps:$4 sm:$0xff]  }
 0x294   : > { %3492 = vmatprep.subr.bf16.mxu1 %v6744_v49  ;;  %v6820_v49 = vld [vmem:[#allocation8 + $0x7a8] ss:$16 sps:$4 sm:$0xff]  }
 0x295   : > { %3005 = vmatmul.mubr.bf16.vlgmr.msra.gmra.mrb[12].mxu0 %v2648_v51 }
 0x296   : > { %3046 = vmatmul.mubr.bf16.vlgmr.msra.gmra.mrb[16].mxu1 %v2648_v51  ;;  %3452 = vmatpush1.bf16.msra.mxu0 %v6739_v50  ;;  %v6825_v50 = vld [vmem:[#allocation8 + $0x7c4] ss:$16 sps:$4 sm:$0xff]   ;;  %v6828_v51 = vld [vmem:[#allocation8 + $0x7cc] ss:$16 sps:$4 sm:$0xff]  }
 0x297   : > { %3483 = vmatprep.mubr.bf16.mxu0 %v7775_v25  ;;  %3493 = vmatpush1.bf16.msra.mxu1 %v6742_v52  ;;  %v6823_v52 = vld [vmem:[#allocation8 + $0x7c0] ss:$16 sps:$4 sm:$0xff]  }
 0x298   : > { %3524 = vmatprep.mubr.bf16.mxu1 %v7775_v25  ;;  %3453 = vmatprep.subr.bf16.mxu0 %v6747_v29  ;;  %v6763_v25 = vld [vmem:[#allocation8 + $0x680] ss:$16 sps:$4 sm:$0xff]   ;;  %v6826_v29 = vld [vmem:[#allocation8 + $0x7c8] ss:$16 sps:$4 sm:$0xff]  }
 0x299   : > { %3494 = vmatprep.subr.bf16.mxu1 %v6750_v53  ;;  %v6831_v53 = vld [vmem:[#allocation8 + $0x7e4] ss:$16 sps:$4 sm:$0xff]  }
 0x29a   : > { %3454 = vmatpush1.bf16.msra.mxu0 %v6745_v54  ;;  %v6834_v54 = vld [vmem:[#allocation8 + $0x7ec] ss:$16 sps:$4 sm:$0xff]  }
 0x29b   : > { %3495 = vmatpush1.bf16.msra.mxu1 %v6748_v55  ;;  %3455 = vmatprep.subr.bf16.mxu0 %v6753_v56  ;;  %v6829_v55 = vld [vmem:[#allocation8 + $0x7e0] ss:$16 sps:$4 sm:$0xff]   ;;  %v6832_v56 = vld [vmem:[#allocation8 + $0x7e8] ss:$16 sps:$4 sm:$0xff]  }
 0x29c   : > { %3496 = vmatprep.subr.bf16.mxu1 %v6756_v57  ;;  %v6837_v57 = vld [vmem:[#allocation8 + $0x804] ss:$16 sps:$4 sm:$0xff]  }
 0x29e   : > { %3456 = vmatpush1.bf16.msra.mxu0 %v6751_v58  ;;  %v6840_v58 = vld [vmem:[#allocation8 + $0x80c] ss:$16 sps:$4 sm:$0xff]  }
 0x29f   : > { %3497 = vmatpush1.bf16.msra.mxu1 %v6754_v59  ;;  %3457 = vmatprep.subr.bf16.mxu0 %v6759_v60  ;;  %v6835_v59 = vld [vmem:[#allocation8 + $0x800] ss:$16 sps:$4 sm:$0xff]   ;;  %v6838_v60 = vld [vmem:[#allocation8 + $0x808] ss:$16 sps:$4 sm:$0xff]  }
 0x2a0   : > { %3498 = vmatprep.subr.bf16.mxu1 %v6762_v61  ;;  %v6843_v61 = vld [vmem:[#allocation8 + $0x824] ss:$16 sps:$4 sm:$0xff]  }
 0x2a2   : > { %3458 = vmatpush1.bf16.msra.mxu0 %v6757_v62  ;;  %v3603_v62 = vrot.slane %v7767_v7, 2  ;;  %v6858_v7 = vld [vmem:[#allocation8 + $0x86c] ss:$16 sps:$4 sm:$0xff]  }
 0x2a3   : > { %3499 = vmatpush1.bf16.msra.mxu1 %v6760_v63  ;;  %3459 = vmatprep.subr.bf16.mxu0 %v6765_v1  ;;  %v6846_v63 = vld [vmem:[#allocation8 + $0x82c] ss:$16 sps:$4 sm:$0xff]   ;;  %v6841_v1 = vld [vmem:[#allocation8 + $0x820] ss:$16 sps:$4 sm:$0xff]  }
 0x2a4   : > { %3500 = vmatprep.subr.bf16.mxu1 %v6768_v2  ;;  %v6844_v2 = vld [vmem:[#allocation8 + $0x828] ss:$16 sps:$4 sm:$0xff]  }
 0x2a6   : > { %3460 = vmatpush1.bf16.msra.mxu0 %v6763_v25  ;;  %v6849_v25 = vld [vmem:[#allocation8 + $0x844] ss:$16 sps:$4 sm:$0xff]  }
 0x2a7   : > { %3501 = vmatpush1.bf16.msra.mxu1 %v6766_v3  ;;  %3461 = vmatprep.subr.bf16.mxu0 %v6771_v4  ;;  %v6852_v3 = vld [vmem:[#allocation8 + $0x84c] ss:$16 sps:$4 sm:$0xff]   ;;  %v6847_v4 = vld [vmem:[#allocation8 + $0x840] ss:$16 sps:$4 sm:$0xff]  }
 0x2a8   : > { %3502 = vmatprep.subr.bf16.mxu1 %v6774_v5  ;;  %v6850_v5 = vld [vmem:[#allocation8 + $0x848] ss:$16 sps:$4 sm:$0xff]  }
 0x2aa   : > { %3462 = vmatpush1.bf16.msra.mxu0 %v6769_v6  ;;  %v6855_v6 = vld [vmem:[#allocation8 + $0x864] ss:$16 sps:$4 sm:$0xff]  }
 0x2ab   : > { %3503 = vmatpush1.bf16.msra.mxu1 %v6772_v9  ;;  %3463 = vmatprep.subr.bf16.mxu0 %v6777_v12  ;;  %v6856_v9 = vld [vmem:[#allocation8 + $0x868] ss:$16 sps:$4 sm:$0xff]   ;;  %v6861_v12 = vld [vmem:[#allocation8 + $0x884] ss:$16 sps:$4 sm:$0xff]  }
 0x2ac   : > { %3504 = vmatprep.subr.bf16.mxu1 %v6780_v13  ;;  %v6864_v13 = vld [vmem:[#allocation8 + $0x88c] ss:$16 sps:$4 sm:$0xff]  }
 0x2ae   : > { %3464 = vmatpush1.bf16.msra.mxu0 %v6775_v14  ;;  %v6859_v14 = vld [vmem:[#allocation8 + $0x880] ss:$16 sps:$4 sm:$0xff]  }
 0x2af   : > { %3505 = vmatpush1.bf16.msra.mxu1 %v6778_v15  ;;  %3465 = vmatprep.subr.bf16.mxu0 %v6783_v16  ;;  %v6862_v15 = vld [vmem:[#allocation8 + $0x888] ss:$16 sps:$4 sm:$0xff]   ;;  %v6867_v16 = vld [vmem:[#allocation8 + $0x8a4] ss:$16 sps:$4 sm:$0xff]  }
 0x2b0   : > { %3506 = vmatprep.subr.bf16.mxu1 %v6786_v17  ;;  %v6870_v17 = vld [vmem:[#allocation8 + $0x8ac] ss:$16 sps:$4 sm:$0xff]  }
 0x2b2   : > { %3466 = vmatpush1.bf16.msra.mxu0 %v6781_v18  ;;  %v6865_v18 = vld [vmem:[#allocation8 + $0x8a0] ss:$16 sps:$4 sm:$0xff]  }
 0x2b3   : > { %3507 = vmatpush1.bf16.msra.mxu1 %v6784_v19  ;;  %3467 = vmatprep.subr.bf16.mxu0 %v6789_v20  ;;  %v6868_v19 = vld [vmem:[#allocation8 + $0x8a8] ss:$16 sps:$4 sm:$0xff]   ;;  %v6873_v20 = vld [vmem:[#allocation8 + $0x8c4] ss:$16 sps:$4 sm:$0xff]  }
 0x2b4   : > { %3508 = vmatprep.subr.bf16.mxu1 %v6792_v21 }
 0x2b6   : > { %3468 = vmatpush1.bf16.msra.mxu0 %v6787_v22 }
 0x2b7   : > { %3509 = vmatpush1.bf16.msra.mxu1 %v6790_v23  ;;  %3469 = vmatprep.subr.bf16.mxu0 %v6795_v24  ;;  %v6876_v23 = vld [vmem:[#allocation8 + $0x8cc] ss:$16 sps:$4 sm:$0xff]  }
 0x2b8   : > { %3510 = vmatprep.subr.bf16.mxu1 %v6798_v27 }
 0x2ba   : > { %3470 = vmatpush1.bf16.msra.mxu0 %v6793_v28 }
 0x2bb   : > { %3511 = vmatpush1.bf16.msra.mxu1 %v6796_v31  ;;  %3471 = vmatprep.subr.bf16.mxu0 %v6801_v33  ;;  %v6871_v33 = vld [vmem:[#allocation8 + $0x8c0] ss:$16 sps:$4 sm:$0xff]  }
 0x2bc   : > { %3512 = vmatprep.subr.bf16.mxu1 %v6804_v34 }
 0x2be   : > { %3472 = vmatpush1.bf16.msra.mxu0 %v6799_v35 }
 0x2bf   : > { %3513 = vmatpush1.bf16.msra.mxu1 %v6802_v36  ;;  %3473 = vmatprep.subr.bf16.mxu0 %v6807_v37  ;;  %v6874_v36 = vld [vmem:[#allocation8 + $0x8c8] ss:$16 sps:$4 sm:$0xff]   ;;  %v6879_v37 = vld [vmem:[#allocation8 + $0x8e4] ss:$16 sps:$4 sm:$0xff]  }
 0x2c0   : > { %3514 = vmatprep.subr.bf16.mxu1 %v6810_v40  ;;  %v6882_v40 = vld [vmem:[#allocation8 + $0x8ec] ss:$16 sps:$4 sm:$0xff]  }
 0x2c2   : > { %3474 = vmatpush1.bf16.msra.mxu0 %v6805_v38  ;;  %v6877_v38 = vld [vmem:[#allocation8 + $0x8e0] ss:$16 sps:$4 sm:$0xff]  }
 0x2c3   : > { %3515 = vmatpush1.bf16.msra.mxu1 %v6808_v41  ;;  %3475 = vmatprep.subr.bf16.mxu0 %v6813_v42  ;;  %v6880_v41 = vld [vmem:[#allocation8 + $0x8e8] ss:$16 sps:$4 sm:$0xff]   ;;  %v6885_v42 = vld [vmem:[#allocation8 + $0x904] ss:$16 sps:$4 sm:$0xff]  }
 0x2c4   : > { %3516 = vmatprep.subr.bf16.mxu1 %v6816_v44  ;;  %v6888_v44 = vld [vmem:[#allocation8 + $0x90c] ss:$16 sps:$4 sm:$0xff]  }
 0x2c6   : > { %3476 = vmatpush1.bf16.msra.mxu0 %v6811_v45  ;;  %v6883_v45 = vld [vmem:[#allocation8 + $0x900] ss:$16 sps:$4 sm:$0xff]  }
 0x2c7   : > { %3517 = vmatpush1.bf16.msra.mxu1 %v6814_v46  ;;  %3477 = vmatprep.subr.bf16.mxu0 %v6819_v47  ;;  %v6886_v46 = vld [vmem:[#allocation8 + $0x908] ss:$16 sps:$4 sm:$0xff]   ;;  %v6891_v47 = vld [vmem:[#allocation8 + $0x924] ss:$16 sps:$4 sm:$0xff]  }
 0x2c8   : > { %3518 = vmatprep.subr.bf16.mxu1 %v6822_v48  ;;  %v6894_v48 = vld [vmem:[#allocation8 + $0x92c] ss:$16 sps:$4 sm:$0xff]  }
 0x2ca   : > { %3478 = vmatpush1.bf16.msra.mxu0 %v6817_v43  ;;  %v6889_v43 = vld [vmem:[#allocation8 + $0x920] ss:$16 sps:$4 sm:$0xff]  }
 0x2cb   : > { %3519 = vmatpush1.bf16.msra.mxu1 %v6820_v49  ;;  %3479 = vmatprep.subr.bf16.mxu0 %v6825_v50  ;;  %v6892_v49 = vld [vmem:[#allocation8 + $0x928] ss:$16 sps:$4 sm:$0xff]   ;;  %v6897_v50 = vld [vmem:[#allocation8 + $0x944] ss:$16 sps:$4 sm:$0xff]  }
 0x2cc   : > { %3520 = vmatprep.subr.bf16.mxu1 %v6828_v51  ;;  %v6900_v51 = vld [vmem:[#allocation8 + $0x94c] ss:$16 sps:$4 sm:$0xff]  }
 0x2ce   : > { %3480 = vmatpush1.bf16.msra.mxu0 %v6823_v52  ;;  %v6895_v52 = vld [vmem:[#allocation8 + $0x940] ss:$16 sps:$4 sm:$0xff]  }
 0x2cf   : > { %3521 = vmatpush1.bf16.msra.mxu1 %v6826_v29  ;;  %3481 = vmatprep.subr.bf16.mxu0 %v6831_v53  ;;  %v6898_v29 = vld [vmem:[#allocation8 + $0x948] ss:$16 sps:$4 sm:$0xff]   ;;  %v6903_v53 = vld [vmem:[#allocation8 + $0x964] ss:$16 sps:$4 sm:$0xff]  }
 0x2d0   : > { %3522 = vmatprep.subr.bf16.mxu1 %v6834_v54  ;;  %v6906_v54 = vld [vmem:[#allocation8 + $0x96c] ss:$16 sps:$4 sm:$0xff]  }
 0x2d2   : > { %3482 = vmatpush1.bf16.msra.mxu0 %v6829_v55  ;;  %v6901_v55 = vld [vmem:[#allocation8 + $0x960] ss:$16 sps:$4 sm:$0xff]  }
 0x2d3   : > { %3523 = vmatpush1.bf16.msra.mxu1 %v6832_v56  ;;  %3926 = vmatprep.subr.bf16.mxu0 %v6837_v57  ;;  %v6904_v56 = vld [vmem:[#allocation8 + $0x968] ss:$16 sps:$4 sm:$0xff]   ;;  %v6909_v57 = vld [vmem:[#allocation8 + $0x984] ss:$16 sps:$4 sm:$0xff]  }
 0x2d4   : > { %3967 = vmatprep.subr.bf16.mxu1 %v6840_v58  ;;  %v6912_v58 = vld [vmem:[#allocation8 + $0x98c] ss:$16 sps:$4 sm:$0xff]  }
 0x2d5   : > { %3484 = vmatmul.mubr.bf16.vlgmr.msra.gmra.mrb[16].mxu0 %v7777_v26 }
 0x2d6   : > { %3525 = vmatmul.mubr.bf16.vlgmr.msra.gmra.mrb[20].mxu1 %v7777_v26  ;;  %3927 = vmatpush1.bf16.msra.mxu0 %v6835_v59  ;;  %v6853_v26 = vld [vmem:[#allocation8 + $0x860] ss:$16 sps:$4 sm:$0xff]  }
 0x2d7   : > { %3958 = vmatprep.mubr.bf16.mxu0 %v3603_v62  ;;  %3968 = vmatpush1.bf16.msra.mxu1 %v6838_v60  ;;  %v6907_v59 = vld [vmem:[#allocation8 + $0x980] ss:$16 sps:$4 sm:$0xff]   ;;  %v6910_v60 = vld [vmem:[#allocation8 + $0x988] ss:$16 sps:$4 sm:$0xff]  }
 0x2d8   : > { %3999 = vmatprep.mubr.bf16.mxu1 %v3603_v62  ;;  %3928 = vmatprep.subr.bf16.mxu0 %v6843_v61  ;;  %v6915_v61 = vld [vmem:[#allocation8 + $0x9a4] ss:$16 sps:$4 sm:$0xff]   ;;  %v6918_v62 = vld [vmem:[#allocation8 + $0x9ac] ss:$16 sps:$4 sm:$0xff]  }
 0x2d9   : > { %3969 = vmatprep.subr.bf16.mxu1 %v6846_v63  ;;  %v6913_v63 = vld [vmem:[#allocation8 + $0x9a0] ss:$16 sps:$4 sm:$0xff]  }
 0x2da   : > { %3929 = vmatpush1.bf16.msra.mxu0 %v6841_v1  ;;  %v6916_v1 = vld [vmem:[#allocation8 + $0x9a8] ss:$16 sps:$4 sm:$0xff]  }
 0x2db   : > { %3970 = vmatpush1.bf16.msra.mxu1 %v6844_v2  ;;  %3930 = vmatprep.subr.bf16.mxu0 %v6849_v25  ;;  %v6921_v2 = vld [vmem:[#allocation8 + $0x9c4] ss:$16 sps:$4 sm:$0xff]   ;;  %v6924_v25 = vld [vmem:[#allocation8 + $0x9cc] ss:$16 sps:$4 sm:$0xff]  }
 0x2dc   : > { %3971 = vmatprep.subr.bf16.mxu1 %v6852_v3  ;;  %v6919_v3 = vld [vmem:[#allocation8 + $0x9c0] ss:$16 sps:$4 sm:$0xff]  }
 0x2de   : > { %3931 = vmatpush1.bf16.msra.mxu0 %v6847_v4  ;;  %v6922_v4 = vld [vmem:[#allocation8 + $0x9c8] ss:$16 sps:$4 sm:$0xff]  }
 0x2df   : > { %3972 = vmatpush1.bf16.msra.mxu1 %v6850_v5  ;;  %3932 = vmatprep.subr.bf16.mxu0 %v6855_v6  ;;  %v6927_v5 = vld [vmem:[#allocation8 + $0x9e4] ss:$16 sps:$4 sm:$0xff]   ;;  %v6930_v6 = vld [vmem:[#allocation8 + $0x9ec] ss:$16 sps:$4 sm:$0xff]  }
 0x2e0   : > { %3973 = vmatprep.subr.bf16.mxu1 %v6858_v7  ;;  %v6925_v7 = vld [vmem:[#allocation8 + $0x9e0] ss:$16 sps:$4 sm:$0xff]  }
 0x2e2   : > { %3933 = vmatpush1.bf16.msra.mxu0 %v6853_v26  ;;  %v6928_v26 = vld [vmem:[#allocation8 + $0x9e8] ss:$16 sps:$4 sm:$0xff]  }
 0x2e3   : > { %3974 = vmatpush1.bf16.msra.mxu1 %v6856_v9  ;;  %3934 = vmatprep.subr.bf16.mxu0 %v6861_v12  ;;  %v3602_v9 = vrot.slane %v7769_v8, 2 }
 0x2e4   : > { %3975 = vmatprep.subr.bf16.mxu1 %v6864_v13 }
 0x2e6   : > { %3935 = vmatpush1.bf16.msra.mxu0 %v6859_v14 }
 0x2e7   : > { %3976 = vmatpush1.bf16.msra.mxu1 %v6862_v15  ;;  %3936 = vmatprep.subr.bf16.mxu0 %v6867_v16 }
 0x2e8   : > { %v7790_v21 = vpop.f32.mrb[4].mxu0  ;;  %v7792_v22 = vpop.f32.mrb[8].mxu1  ;;  %3977 = vmatprep.subr.bf16.mxu1 %v6870_v17 }
 0x2e9   : > { %v7794_v24 = vpop.f32.mrb[5].mxu0  ;;  %v7796_v27 = vpop.f32.mrb[9].mxu1 }
 0x2ea   : > { %3937 = vmatpush1.bf16.msra.mxu0 %v6865_v18  ;;  %v2135_v28 = vpop.f32.mrb[6].mxu0  ;;  %v2176_v31 = vpop.f32.mrb[10].mxu1 }
 0x2eb   : > { %3978 = vmatpush1.bf16.msra.mxu1 %v6868_v19  ;;  %v2136_v34 = vpop.f32.mrb[7].mxu0  ;;  %v2177_v35 = vpop.f32.mrb[11].mxu1  ;;  %3938 = vmatprep.subr.bf16.mxu0 %v6873_v20  ;;  %v6931_v31 = vld [vmem:[#allocation11] ss:$8 sps:$4 sm:$0xff]  }
 0x2ec   : > { %3979 = vmatprep.subr.bf16.mxu1 %v6876_v23  ;;  %v6934_v34 = vld [vmem:[#allocation11 + $0x100] ss:$8 sps:$4 sm:$0xff]   ;;  %v6939_v35 = vld [vmem:[#allocation11 + $0x14] ss:$8 sps:$4 sm:$0xff]  }
 0x2ee   : > { %3939 = vmatpush1.bf16.msra.mxu0 %v6871_v33  ;;  %v6933_v33 = vld [vmem:[#allocation11 + $0x4] ss:$8 sps:$4 sm:$0xff]  }
 0x2ef   : > { %3980 = vmatpush1.bf16.msra.mxu1 %v6874_v36  ;;  %3940 = vmatprep.subr.bf16.mxu0 %v6879_v37  ;;  %v6937_v36 = vld [vmem:[#allocation11 + $0x10] ss:$8 sps:$4 sm:$0xff]   ;;  %v6945_v37 = vld [vmem:[#allocation11 + $0x24] ss:$8 sps:$4 sm:$0xff]  }
 0x2f0   : > { %3981 = vmatprep.subr.bf16.mxu1 %v6882_v40  ;;  %v6943_v40 = vld [vmem:[#allocation11 + $0x20] ss:$8 sps:$4 sm:$0xff]  }
 0x2f2   : > { %3941 = vmatpush1.bf16.msra.mxu0 %v6877_v38  ;;  %v6946_v38 = vld [vmem:[#allocation11 + $0x120] ss:$8 sps:$4 sm:$0xff]  }
 0x2f3   : > { %3982 = vmatpush1.bf16.msra.mxu1 %v6880_v41  ;;  %3942 = vmatprep.subr.bf16.mxu0 %v6885_v42  ;;  %v6951_v41 = vld [vmem:[#allocation11 + $0x34] ss:$8 sps:$4 sm:$0xff]  }
 0x2f4   : > { %3983 = vmatprep.subr.bf16.mxu1 %v6888_v44  ;;  %v6954_v42 = vld [vmem:[#allocation11 + $0x134] ss:$8 sps:$4 sm:$0xff]   ;;  %v6949_v44 = vld [vmem:[#allocation11 + $0x30] ss:$8 sps:$4 sm:$0xff]  }
 0x2f6   : > { %3943 = vmatpush1.bf16.msra.mxu0 %v6883_v45  ;;  %v6952_v45 = vld [vmem:[#allocation11 + $0x130] ss:$8 sps:$4 sm:$0xff]  }
 0x2f7   : > { %3984 = vmatpush1.bf16.msra.mxu1 %v6886_v46  ;;  %3944 = vmatprep.subr.bf16.mxu0 %v6891_v47  ;;  %v6957_v46 = vld [vmem:[#allocation11 + $0x44] ss:$8 sps:$4 sm:$0xff]  }
 0x2f8   : > { %3985 = vmatprep.subr.bf16.mxu1 %v6894_v48  ;;  %v6960_v47 = vld [vmem:[#allocation11 + $0x144] ss:$8 sps:$4 sm:$0xff]   ;;  %v6955_v48 = vld [vmem:[#allocation11 + $0x40] ss:$8 sps:$4 sm:$0xff]  }
 0x2fa   : > { %3945 = vmatpush1.bf16.msra.mxu0 %v6889_v43  ;;  %v6958_v43 = vld [vmem:[#allocation11 + $0x140] ss:$8 sps:$4 sm:$0xff]  }
 0x2fb   : > { %3986 = vmatpush1.bf16.msra.mxu1 %v6892_v49  ;;  %3946 = vmatprep.subr.bf16.mxu0 %v6897_v50  ;;  %v6963_v49 = vld [vmem:[#allocation11 + $0x54] ss:$8 sps:$4 sm:$0xff]  }
 0x2fc   : > { %3987 = vmatprep.subr.bf16.mxu1 %v6900_v51  ;;  %v6966_v50 = vld [vmem:[#allocation11 + $0x154] ss:$8 sps:$4 sm:$0xff]   ;;  %v6961_v51 = vld [vmem:[#allocation11 + $0x50] ss:$8 sps:$4 sm:$0xff]  }
 0x2fe   : > { %3947 = vmatpush1.bf16.msra.mxu0 %v6895_v52  ;;  %v6964_v52 = vld [vmem:[#allocation11 + $0x150] ss:$8 sps:$4 sm:$0xff]  }
 0x2ff   : > { %3988 = vmatpush1.bf16.msra.mxu1 %v6898_v29  ;;  %3948 = vmatprep.subr.bf16.mxu0 %v6903_v53  ;;  %v6969_v29 = vld [vmem:[#allocation11 + $0x64] ss:$8 sps:$4 sm:$0xff]  }
 0x300   : > { %3989 = vmatprep.subr.bf16.mxu1 %v6906_v54  ;;  %v6972_v53 = vld [vmem:[#allocation11 + $0x164] ss:$8 sps:$4 sm:$0xff]   ;;  %v6967_v54 = vld [vmem:[#allocation11 + $0x60] ss:$8 sps:$4 sm:$0xff]  }
 0x302   : > { %3949 = vmatpush1.bf16.msra.mxu0 %v6901_v55  ;;  %v6970_v55 = vld [vmem:[#allocation11 + $0x160] ss:$8 sps:$4 sm:$0xff]  }
 0x303   : > { %3990 = vmatpush1.bf16.msra.mxu1 %v6904_v56  ;;  %3950 = vmatprep.subr.bf16.mxu0 %v6909_v57 }
 0x304   : > { %3991 = vmatprep.subr.bf16.mxu1 %v6912_v58 }
 0x306   : > { %3951 = vmatpush1.bf16.msra.mxu0 %v6907_v59 }
 0x307   : > { %3992 = vmatpush1.bf16.msra.mxu1 %v6910_v60  ;;  %3952 = vmatprep.subr.bf16.mxu0 %v6915_v61 }
 0x308   : > { %3993 = vmatprep.subr.bf16.mxu1 %v6918_v62 }
 0x30a   : > { %3953 = vmatpush1.bf16.msra.mxu0 %v6913_v63 }
 0x30b   : > { %3994 = vmatpush1.bf16.msra.mxu1 %v6916_v1  ;;  %3954 = vmatprep.subr.bf16.mxu0 %v6921_v2 }
 0x30c   : > { %3995 = vmatprep.subr.bf16.mxu1 %v6924_v25 }
 0x30e   : > { %3955 = vmatpush1.bf16.msra.mxu0 %v6919_v3 }
 0x30f   : > { %3996 = vmatpush1.bf16.msra.mxu1 %v6922_v4  ;;  %3956 = vmatprep.subr.bf16.mxu0 %v6927_v5  ;;  %v6975_v4 = vld [vmem:[#allocation11 + $0x74] ss:$8 sps:$4 sm:$0xff]  }
 0x310   : > { %3997 = vmatprep.subr.bf16.mxu1 %v6930_v6  ;;  %v6978_v5 = vld [vmem:[#allocation11 + $0x174] ss:$8 sps:$4 sm:$0xff]   ;;  %v6973_v6 = vld [vmem:[#allocation11 + $0x70] ss:$8 sps:$4 sm:$0xff]  }
 0x312   : > { %3957 = vmatpush1.bf16.msra.mxu0 %v6925_v7  ;;  %v6976_v7 = vld [vmem:[#allocation11 + $0x170] ss:$8 sps:$4 sm:$0xff]  }
 0x313   : > { %3998 = vmatpush1.bf16.msra.mxu1 %v6928_v26  ;;  %4459 = vmatprep.subr.bf16.mxu0 %v6933_v33  ;;  %v6981_v26 = vld [vmem:[#allocation11 + $0x84] ss:$8 sps:$4 sm:$0xff]   ;;  %v7000_v33 = vld [vmem:[#allocation11 + $0x1b0] ss:$8 sps:$4 sm:$0xff]  }
 0x315   : > { %3959 = vmatmul.mubr.bf16.vlgmr.msra.gmra.mrb[20].mxu0 %v3602_v9 }
 0x316   : > { %4000 = vmatmul.mubr.bf16.vlgmr.msra.gmra.mrb[24].mxu1 %v3602_v9  ;;  %4460 = vmatpush1.bf16.msra.mxu0 %v6931_v31  ;;  %v6984_v9 = vld [vmem:[#allocation11 + $0x184] ss:$8 sps:$4 sm:$0xff]   ;;  %v6997_v31 = vld [vmem:[#allocation11 + $0xb0] ss:$8 sps:$4 sm:$0xff]  }
 0x317   : > { %4461 = vmatprep.subr.bf16.mxu0 %v6939_v35  ;;  %v7003_v35 = vld [vmem:[#allocation11 + $0xc0] ss:$8 sps:$4 sm:$0xff]  }
 0x31a   : > { %4462 = vmatpush1.bf16.msra.mxu0 %v6937_v36  ;;  %v7011_v36 = vld [vmem:[#allocation11 + $0xd4] ss:$8 sps:$4 sm:$0xff]  }
 0x31b   : > { %4463 = vmatprep.subr.bf16.mxu0 %v6945_v37  ;;  %v7009_v37 = vld [vmem:[#allocation11 + $0xd0] ss:$8 sps:$4 sm:$0xff]  }
 0x31e   : > { %4464 = vmatpush1.bf16.msra.mxu0 %v6943_v40  ;;  %v7017_v40 = vld [vmem:[#allocation11 + $0xe4] ss:$8 sps:$4 sm:$0xff]  }
 0x31f   : > { %4465 = vmatprep.subr.bf16.mxu0 %v6951_v41  ;;  %v7015_v41 = vld [vmem:[#allocation11 + $0xe0] ss:$8 sps:$4 sm:$0xff]  }
 0x322   : > { %4466 = vmatpush1.bf16.msra.mxu0 %v6949_v44  ;;  %v7023_v44 = vld [vmem:[#allocation11 + $0xf4] ss:$8 sps:$4 sm:$0xff]  }
 0x323   : > { %4467 = vmatprep.subr.bf16.mxu0 %v6957_v46  ;;  %v7021_v46 = vld [vmem:[#allocation11 + $0xf0] ss:$8 sps:$4 sm:$0xff]  }
 0x326   : > { %4468 = vmatpush1.bf16.msra.mxu0 %v6955_v48  ;;  %v7029_v48 = vld [vmem:[#allocation11 + $0x204] ss:$8 sps:$4 sm:$0xff]  }
 0x327   : > { %4469 = vmatprep.subr.bf16.mxu0 %v6963_v49 }
 0x328   : > { %v2533_v12 = vpop.f32.mrb[8].mxu0  ;;  %v2574_v13 = vpop.f32.mrb[12].mxu1 }
 0x329   : > { %v7800_v14 = vadd.f32 %v2533_v12, %v7790_v21  ;;  %v7803_v15 = vadd.f32 %v2574_v13, %v7792_v22  ;;  %v2535_v16 = vpop.f32.mrb[9].mxu0  ;;  %v2576_v17 = vpop.f32.mrb[13].mxu1  ;;  %v6936_v21 = vld [vmem:[#allocation11 + $0x104] ss:$8 sps:$4 sm:$0xff]   ;;  %v6942_v22 = vld [vmem:[#allocation11 + $0x114] ss:$8 sps:$4 sm:$0xff]  }
 0x32a   : > { %v7806_v18 = vadd.f32 %v2535_v16, %v7794_v24  ;;  %v7809_v19 = vadd.f32 %v2576_v17, %v7796_v27  ;;  %v2537_v20 = vpop.f32.mrb[10].mxu0  ;;  %v2578_v8 = vpop.f32.mrb[14].mxu1  ;;  %4695 = vmatprep.subr.bf16.mxu1 %v6936_v21  ;;  %v6940_v24 = vld [vmem:[#allocation11 + $0x110] ss:$8 sps:$4 sm:$0xff]   ;;  %v6948_v27 = vld [vmem:[#allocation11 + $0x124] ss:$8 sps:$4 sm:$0xff]   ;;  %4470 = vmatpush1.bf16.msra.mxu0 %v6961_v51 }
 0x32b   : > { %v2538_v23 = vpop.f32.mrb[11].mxu0  ;;  %v2579_v28 = vpop.f32.mrb[15].mxu1  ;;  %4696 = vmatpush1.bf16.msra.mxu1 %v6934_v34  ;;  %4471 = vmatprep.subr.bf16.mxu0 %v6969_v29  ;;  %v6979_v12 = vld [vmem:[#allocation11 + $0x80] ss:$8 sps:$4 sm:$0xff]   ;;  %v6985_v16 = vld [vmem:[#allocation11 + $0x90] ss:$8 sps:$4 sm:$0xff]  }
 0x32c   : > { %4697 = vmatprep.subr.bf16.mxu1 %v6942_v22  ;;  %v6982_v13 = vld [vmem:[#allocation11 + $0x180] ss:$8 sps:$4 sm:$0xff]   ;;  %v6988_v17 = vld [vmem:[#allocation11 + $0x190] ss:$8 sps:$4 sm:$0xff]   ;;  %v6999_v23 = vld [vmem:[#allocation11 + $0xb4] ss:$8 sps:$4 sm:$0xff]  }
 0x32d   : > { %v6991_v20 = vld [vmem:[#allocation11 + $0xa0] ss:$8 sps:$4 sm:$0xff]   ;;  %v7002_v28 = vld [vmem:[#allocation11 + $0x1b4] ss:$8 sps:$4 sm:$0xff]   ;;  %v7005_v34 = vld [vmem:[#allocation11 + $0xc4] ss:$8 sps:$4 sm:$0xff]  }
 0x32e   : > { %4472 = vmatpush1.bf16.msra.mxu0 %v6967_v54  ;;  %v6994_v8 = vld [vmem:[#allocation11 + $0x1a0] ss:$8 sps:$4 sm:$0xff]   ;;  %v7008_v21 = vld [vmem:[#allocation11 + $0x1c4] ss:$8 sps:$4 sm:$0xff]  }
 0x32f   : > { %4698 = vmatpush1.bf16.msra.mxu1 %v6940_v24  ;;  %4473 = vmatprep.subr.bf16.mxu0 %v6975_v4  ;;  %v7006_v22 = vld [vmem:[#allocation11 + $0x1c0] ss:$8 sps:$4 sm:$0xff]   ;;  %v7014_v24 = vld [vmem:[#allocation11 + $0x1d4] ss:$8 sps:$4 sm:$0xff]  }
 0x330   : > { %4699 = vmatprep.subr.bf16.mxu1 %v6948_v27  ;;  %v7012_v27 = vld [vmem:[#allocation11 + $0x1d0] ss:$8 sps:$4 sm:$0xff]  }
 0x332   : > { %4474 = vmatpush1.bf16.msra.mxu0 %v6973_v6 }
 0x333   : > { %4700 = vmatpush1.bf16.msra.mxu1 %v6946_v38  ;;  %4475 = vmatprep.subr.bf16.mxu0 %v6981_v26  ;;  %v7020_v38 = vld [vmem:[#allocation11 + $0x1e4] ss:$8 sps:$4 sm:$0xff]  }
 0x334   : > { %4701 = vmatprep.subr.bf16.mxu1 %v6954_v42  ;;  %v7018_v42 = vld [vmem:[#allocation11 + $0x1e0] ss:$8 sps:$4 sm:$0xff]  }
 0x336   : > { %4476 = vmatpush1.bf16.msra.mxu0 %v6979_v12 }
 0x337   : > { %4702 = vmatpush1.bf16.msra.mxu1 %v6952_v45  ;;  %v7026_v45 = vld [vmem:[#allocation11 + $0x1f4] ss:$8 sps:$4 sm:$0xff]  }
 0x338   : > { %4703 = vmatprep.subr.bf16.mxu1 %v6960_v47  ;;  %v7024_v47 = vld [vmem:[#allocation11 + $0x1f0] ss:$8 sps:$4 sm:$0xff]  }
 0x33b   : > { %4704 = vmatpush1.bf16.msra.mxu1 %v6958_v43  ;;  %v7032_v43 = vld [vmem:[#allocation11 + $0x304] ss:$8 sps:$4 sm:$0xff]  }
 0x33c   : > { %4705 = vmatprep.subr.bf16.mxu1 %v6966_v50 }
 0x33f   : > { %4706 = vmatpush1.bf16.msra.mxu1 %v6964_v52 }
 0x340   : > { %4707 = vmatprep.subr.bf16.mxu1 %v6972_v53 }
 0x343   : > { %4708 = vmatpush1.bf16.msra.mxu1 %v6970_v55 }
 0x344   : > { %4709 = vmatprep.subr.bf16.mxu1 %v6978_v5 }
 0x347   : > { %4710 = vmatpush1.bf16.msra.mxu1 %v6976_v7  ;;  %v4070_v7 = vld [vmem:[#allocation9 + $0x2] ss:$4 sm:$0xf] }
 0x348   : > { %4711 = vmatprep.subr.bf16.mxu1 %v6984_v9 }
 0x34b   : > { %4712 = vmatpush1.bf16.msra.mxu1 %v6982_v13 }
 0x368   : > { %v3006_v56 = vpop.f32.mrb[12].mxu0 }
 0x369   : > { %v7812_v57 = vadd.f32 %v3006_v56, %v7800_v14  ;;  %v3047_v58 = vpop.f32.mrb[16].mxu1  ;;  %v3008_v59 = vpop.f32.mrb[13].mxu0  ;;  %v6987_v14 = vld [vmem:[#allocation11 + $0x94] ss:$8 sps:$4 sm:$0xff]  }
 0x36a   : > { %v7815_v60 = vadd.f32 %v3047_v58, %v7803_v15  ;;  %v7818_v61 = vadd.f32 %v3008_v59, %v7806_v18  ;;  %v3049_v62 = vpop.f32.mrb[17].mxu1  ;;  %v3010_v63 = vpop.f32.mrb[14].mxu0  ;;  %v6990_v15 = vld [vmem:[#allocation11 + $0x194] ss:$8 sps:$4 sm:$0xff]   ;;  %4477 = vmatprep.subr.bf16.mxu0 %v6987_v14  ;;  %v6993_v18 = vld [vmem:[#allocation11 + $0xa4] ss:$8 sps:$4 sm:$0xff]  }
 0x36b   : > { %v7821_v1 = vadd.f32 %v3049_v62, %v7809_v19  ;;  %v3051_v2 = vpop.f32.mrb[18].mxu1  ;;  %v3011_v25 = vpop.f32.mrb[15].mxu0  ;;  %4713 = vmatprep.subr.bf16.mxu1 %v6990_v15  ;;  %4478 = vmatpush1.bf16.msra.mxu0 %v6985_v16  ;;  %v6996_v19 = vld [vmem:[#allocation11 + $0x1a4] ss:$8 sps:$4 sm:$0xff]  }
 0x36c   : > { %v3052_v3 = vpop.f32.mrb[19].mxu1  ;;  %4714 = vmatpush1.bf16.msra.mxu1 %v6988_v17  ;;  %4479 = vmatprep.subr.bf16.mxu0 %v6993_v18  ;;  %v4012_v63 = vld [vmem:[#allocation9] ss:$4 sm:$0xf] }
 0x36d   : > { %4715 = vmatprep.subr.bf16.mxu1 %v6996_v19  ;;  %v4017_v2 = vrot.slane %v4012_v63, %v7705_v30  ;;  %v4043_v3 = vld [vmem:[#allocation9 + $0x1] ss:$4 sm:$0xf]  ;;  %v4021_v4 = vrot.slane %v4012_v63, %v7708_v32 }
 0x36e   : > { %v4048_v14 = vrot.slane %v4043_v3, %v7705_v30  ;;  %v4056_v19 = vrot.slane %v4043_v3, %v7717_v10 }
 0x36f   : > { %4480 = vmatpush1.bf16.msra.mxu0 %v6991_v20 }
 0x370   : > { %4716 = vmatpush1.bf16.msra.mxu1 %v6994_v8  ;;  %4481 = vmatprep.subr.bf16.mxu0 %v6999_v23  ;;  %v4052_v8 = vrot.slane %v4043_v3, %v7708_v32 }
 0x371   : > { %4717 = vmatprep.subr.bf16.mxu1 %v7002_v28 }
 0x373   : > { %4482 = vmatpush1.bf16.msra.mxu0 %v6997_v31  ;;  %v4075_v31 = vrot.slane %v4070_v7, %v7705_v30 }
 0x374   : > { %4718 = vmatpush1.bf16.msra.mxu1 %v7000_v33  ;;  %4483 = vmatprep.subr.bf16.mxu0 %v7005_v34  ;;  %v4060_v34 = vrot.slane %v4043_v3, %v7720_v11 }
 0x375   : > { %4719 = vmatprep.subr.bf16.mxu1 %v7008_v21 }
 0x377   : > { %4484 = vmatpush1.bf16.msra.mxu0 %v7003_v35  ;;  %v4083_v35 = vrot.slane %v4070_v7, %v7717_v10 }
 0x378   : > { %4720 = vmatpush1.bf16.msra.mxu1 %v7006_v22  ;;  %4485 = vmatprep.subr.bf16.mxu0 %v7011_v36  ;;  %v4079_v36 = vrot.slane %v4070_v7, %v7708_v32 }
 0x379   : > { %4721 = vmatprep.subr.bf16.mxu1 %v7014_v24 }
 0x37b   : > { %4486 = vmatpush1.bf16.msra.mxu0 %v7009_v37 }
 0x37c   : > { %4722 = vmatpush1.bf16.msra.mxu1 %v7012_v27  ;;  %4487 = vmatprep.subr.bf16.mxu0 %v7017_v40  ;;  %v4087_v27 = vrot.slane %v4070_v7, %v7720_v11 }
 0x37d   : > { %4723 = vmatprep.subr.bf16.mxu1 %v7020_v38 }
 0x37f   : > { %4488 = vmatpush1.bf16.msra.mxu0 %v7015_v41 }
 0x380   : > { %4724 = vmatpush1.bf16.msra.mxu1 %v7018_v42  ;;  %4489 = vmatprep.subr.bf16.mxu0 %v7023_v44 }
 0x381   : > { %4725 = vmatprep.subr.bf16.mxu1 %v7026_v45 }
 0x383   : > { %4490 = vmatpush1.bf16.msra.mxu0 %v7021_v46 }
 0x384   : > { %4726 = vmatpush1.bf16.msra.mxu1 %v7024_v47  ;;  %4931 = vmatprep.subr.bf16.mxu0 %v7029_v48 }
 0x385   : > { %5167 = vmatprep.subr.bf16.mxu1 %v7032_v43 }
 0x3a8   : > { %v3485_v49 = vpop.f32.mrb[16].mxu0 }
 0x3a9   : > { %v3533_v50 = vadd.f32 %v3485_v49, %v7812_v57  ;;  %v3526_v51 = vpop.f32.mrb[20].mxu1  ;;  %v3487_v52 = vpop.f32.mrb[17].mxu0  ;;  %v4025_v57 = vrot.slane %v4012_v63, %v7717_v10 }
 0x3aa   : > { %v3535_v29 = vadd.f32 %v3526_v51, %v7815_v60  ;;  %v3534_v53 = vadd.f32 %v3487_v52, %v7818_v61  ;;  %v3528_v54 = vpop.f32.mrb[21].mxu1  ;;  %v3489_v55 = vpop.f32.mrb[18].mxu0  ;;  %v4029_v61 = vrot.slane %v4012_v63, %v7720_v11 }
 0x3ab   : > { %v3536_v56 = vadd.f32 %v3528_v54, %v7821_v1  ;;  %v3530_v58 = vpop.f32.mrb[22].mxu1  ;;  %v3490_v59 = vpop.f32.mrb[19].mxu0 }
 0x3ac   : > { %v3531_v62 = vpop.f32.mrb[23].mxu1 }
 0x3e8   : > { %v3960_v25 = vpop.f32.mrb[20].mxu0 }
 0x3e9   : > { %v4008_v5 = vadd.f32 %v3960_v25, %v3533_v50  ;;  %v4001_v60 = vpop.f32.mrb[24].mxu1  ;;  %v3962_v6 = vpop.f32.mrb[21].mxu0 }
 0x3ea   : > { %v4010_v26 = vadd.f32 %v4001_v60, %v3535_v29  ;;  %v4009_v1 = vadd.f32 %v3962_v6, %v3534_v53  ;;  %v4003_v9 = vpop.f32.mrb[25].mxu1  ;;  %v3964_v12 = vpop.f32.mrb[22].mxu0 }
 0x3eb   : > { %v4034_v13 = vadd.f32 %v4017_v2, %v4008_v5  ;;  %v4011_v15 = vadd.f32 %v4003_v9, %v3536_v56  ;;  %v4005_v16 = vpop.f32.mrb[26].mxu1  ;;  %v3965_v17 = vpop.f32.mrb[23].mxu0 }
 0x3ec   : > { %v4036_v18 = vadd.f32 %v4025_v57, %v4010_v26  ;;  %v4035_v20 = vadd.f32 %v4021_v4, %v4009_v1  ;;  %v4006_v23 = vpop.f32.mrb[27].mxu1 }
 0x3ed   : > { %v4038_v28 = vmax.f32 %v4034_v13, 0.0  ;;  %v4037_v33 = vadd.f32 %v4029_v61, %v4011_v15 }
 0x3ee   : > { %v4040_v21 = vmax.f32 %v4036_v18, 0.0  ;;  %v4039_v22 = vmax.f32 %v4035_v20, 0.0 }
 0x3ef   : > { %v4065_v24 = vmul.f32 %v4048_v14, %v4038_v28  ;;  %v4041_v37 = vmax.f32 %v4037_v33, 0.0 }
 0x3f0   : > { %v4067_v40 = vmul.f32 %v4056_v19, %v4040_v21  ;;  %v4066_v38 = vmul.f32 %v4052_v8, %v4039_v22 }
 0x3f1   : > { %v4092_v41 = vadd.f32 %v4075_v31, %v4065_v24  ;;  %v4068_v42 = vmul.f32 %v4060_v34, %v4041_v37 }
 0x3f2   : > { %v4094_v44 = vadd.f32 %v4083_v35, %v4067_v40  ;;  %v4093_v45 = vadd.f32 %v4079_v36, %v4066_v38 }
 0x3f3   : > { %v4095_v46 = vadd.f32 %v4087_v27, %v4068_v42 }
 0x3f4   : > { %v4100_v47 = vcombine.low %v4092_v41, %v4093_v45  ;;  %v4101_v48 = vcombine.high %v4092_v41, %v4093_v45 }
 0x3f5   : > { %v4102_v43 = vcombine.low %v4094_v44, %v4095_v46  ;;  %v4103_v49 = vcombine.high %v4094_v44, %v4095_v46 }
 0x3f6   : > { %v4110_v50 = vrot.slane %v4100_v47, %v7729_v39  ;;  %v4117_v51 = vrot.slane %v4101_v48, %v7729_v39 }
 0x3f7   : > { %v4124_v52 = vrot.slane %v4102_v43, %v7729_v39  ;;  %v4131_v29 = vrot.slane %v4103_v49, %v7729_v39 }
 0x3f9   : > { %v4132_v11 = vcombine.low %v4110_v50, %v4124_v52  ;;  %v4133_v53 = vcombine.high %v4110_v50, %v4124_v52  ;;  %v4134_v54 = vcombine.low %v4117_v51, %v4131_v29  ;;  %v4135_v55 = vcombine.high %v4117_v51, %v4131_v29  ;;  %v7027_v50 = vld [vmem:[#allocation11 + $0x200] ss:$8 sps:$4 sm:$0xff]   ;;  %v7035_v29 = vld [vmem:[#allocation11 + $0x214] ss:$8 sps:$4 sm:$0xff]  }
 0x3fa   : > { %v7030_v51 = vld [vmem:[#allocation11 + $0x300] ss:$8 sps:$4 sm:$0xff]  }
 0x3fb   : > { %v6073_v56 = vrot.slane %v4132_v11, 9  ;;  %v6074_v58 = vrot.slane %v4133_v53, 9  ;;  %v6075_v59 = vrot.slane %v4134_v54, 9  ;;  %v6076_v62 = vrot.slane %v4135_v55, 9 }
 0x3fd   : > { %v4152_v63 = vmax.f32 %v4132_v11, %v6073_v56  ;;  %v4153_v2 = vmax.f32 %v4133_v53, %v6074_v58  ;;  %v4154_v25 = vmax.f32 %v4134_v54, %v6075_v59  ;;  %v4155_v3 = vmax.f32 %v4135_v55, %v6076_v62  ;;  %v7038_v11 = vld [vmem:[#allocation11 + $0x314] ss:$8 sps:$4 sm:$0xff]   ;;  %v7033_v53 = vld [vmem:[#allocation11 + $0x210] ss:$8 sps:$4 sm:$0xff]   ;;  %v7041_v55 = vld [vmem:[#allocation11 + $0x224] ss:$8 sps:$4 sm:$0xff]  }
 0x3fe   : > { %v7036_v54 = vld [vmem:[#allocation11 + $0x310] ss:$8 sps:$4 sm:$0xff]   ;;  %v7044_v56 = vld [vmem:[#allocation11 + $0x324] ss:$8 sps:$4 sm:$0xff]   ;;  %v7039_v58 = vld [vmem:[#allocation11 + $0x220] ss:$8 sps:$4 sm:$0xff]  }
 0x3ff   : > { %v4160_v57 = vrot.slane %v4152_v63, 4  ;;  %v4161_v4 = vrot.slane %v4153_v2, 4  ;;  %v4162_v5 = vrot.slane %v4154_v25, 4  ;;  %v4163_v60 = vrot.slane %v4155_v3, 4  ;;  %v7042_v59 = vld [vmem:[#allocation11 + $0x320] ss:$8 sps:$4 sm:$0xff]  }
 0x400   : > { %v7047_v62 = vld [vmem:[#allocation11 + $0x234] ss:$8 sps:$4 sm:$0xff]  }
 0x401   : > { %v4168_v6 = vmax.f32 %v4152_v63, %v4160_v57  ;;  %v4169_v61 = vmax.f32 %v4153_v2, %v4161_v4  ;;  %v4170_v7 = vmax.f32 %v4154_v25, %v4162_v5  ;;  %v4171_v39 = vmax.f32 %v4155_v3, %v4163_v60  ;;  %v7050_v63 = vld [vmem:[#allocation11 + $0x334] ss:$8 sps:$4 sm:$0xff]   ;;  %v7045_v2 = vld [vmem:[#allocation11 + $0x230] ss:$8 sps:$4 sm:$0xff]   ;;  %v7053_v3 = vld [vmem:[#allocation11 + $0x244] ss:$8 sps:$4 sm:$0xff]  }
 0x402   : > { %v7048_v25 = vld [vmem:[#allocation11 + $0x330] ss:$8 sps:$4 sm:$0xff]   ;;  %v7056_v57 = vld [vmem:[#allocation11 + $0x344] ss:$8 sps:$4 sm:$0xff]   ;;  %v7051_v4 = vld [vmem:[#allocation11 + $0x240] ss:$8 sps:$4 sm:$0xff]  }
 0x403   : > { %v4179_v26 = vrot.slane %v4168_v6, %v7705_v30  ;;  %v4183_v1 = vrot.slane %v4168_v6, %v7717_v10  ;;  %v4187_v9 = vrot.slane %v4169_v61, %v7705_v30  ;;  %v4191_v12 = vrot.slane %v4169_v61, %v7717_v10  ;;  %v7054_v5 = vld [vmem:[#allocation11 + $0x340] ss:$8 sps:$4 sm:$0xff]   ;;  %v7059_v60 = vld [vmem:[#allocation11 + $0x254] ss:$8 sps:$4 sm:$0xff]   ;;  %v7057_v61 = vld [vmem:[#allocation11 + $0x250] ss:$8 sps:$4 sm:$0xff]  }
 0x404   : > { %v4195_v13 = vrot.slane %v4170_v7, %v7705_v30  ;;  %v4199_v14 = vrot.slane %v4170_v7, %v7717_v10  ;;  %v4207_v15 = vrot.slane %v4171_v39, %v7717_v10  ;;  %v4203_v16 = vrot.slane %v4171_v39, %v7705_v30  ;;  %v7062_v6 = vld [vmem:[#allocation11 + $0x354] ss:$8 sps:$4 sm:$0xff]   ;;  %v7060_v7 = vld [vmem:[#allocation11 + $0x350] ss:$8 sps:$4 sm:$0xff]   ;;  %v7065_v39 = vld [vmem:[#allocation11 + $0x264] ss:$8 sps:$4 sm:$0xff]  }
 0x405   : > { %v4216_v17 = vpack.c.bf16 %v4179_v26, %v4179_v26  ;;  %v4217_v18 = vpack.c.bf16 %v4183_v1, %v4183_v1  ;;  %v4218_v19 = vpack.c.bf16 %v4187_v9, %v4187_v9  ;;  %v4219_v20 = vpack.c.bf16 %v4191_v12, %v4191_v12  ;;  %v7068_v26 = vld [vmem:[#allocation11 + $0x364] ss:$8 sps:$4 sm:$0xff]   ;;  %v7063_v1 = vld [vmem:[#allocation11 + $0x260] ss:$8 sps:$4 sm:$0xff]   ;;  %v7071_v12 = vld [vmem:[#allocation11 + $0x274] ss:$8 sps:$4 sm:$0xff]  }
 0x406   : > { %v4220_v8 = vpack.c.bf16 %v4195_v13, %v4195_v13  ;;  %v4221_v23 = vpack.c.bf16 %v4199_v14, %v4199_v14  ;;  %v4223_v28 = vpack.c.bf16 %v4207_v15, %v4207_v15  ;;  %v4222_v31 = vpack.c.bf16 %v4203_v16, %v4203_v16  ;;  %v7066_v9 = vld [vmem:[#allocation11 + $0x360] ss:$8 sps:$4 sm:$0xff]   ;;  %v7074_v13 = vld [vmem:[#allocation11 + $0x374] ss:$8 sps:$4 sm:$0xff]   ;;  %v7069_v14 = vld [vmem:[#allocation11 + $0x270] ss:$8 sps:$4 sm:$0xff]  }
 0x407   : > { %v4276_v33 = vunpack.c.l.b16 %v4218_v19  ;;  %v4277_v34 = vunpack.c.l.b16 %v4219_v20  ;;  %v4274_v24 = vunpack.c.l.b16 %v4216_v17  ;;  %v4275_v37 = vunpack.c.l.b16 %v4217_v18  ;;  %v7072_v15 = vld [vmem:[#allocation11 + $0x370] ss:$8 sps:$4 sm:$0xff]   ;;  %v7077_v16 = vld [vmem:[#allocation11 + $0x284] ss:$8 sps:$4 sm:$0xff]   ;;  %v7075_v18 = vld [vmem:[#allocation11 + $0x280] ss:$8 sps:$4 sm:$0xff]  }
 0x408   : > { %v4279_v21 = vunpack.c.l.b16 %v4221_v23  ;;  %v4281_v35 = vunpack.c.l.b16 %v4223_v28  ;;  %v4278_v22 = vunpack.c.l.b16 %v4220_v8  ;;  %v4280_v36 = vunpack.c.l.b16 %v4222_v31  ;;  %v7080_v17 = vld [vmem:[#allocation11 + $0x384] ss:$8 sps:$4 sm:$0xff]   ;;  %v7078_v19 = vld [vmem:[#allocation11 + $0x380] ss:$8 sps:$4 sm:$0xff]   ;;  %v7083_v20 = vld [vmem:[#allocation11 + $0x294] ss:$8 sps:$4 sm:$0xff]  }
 0x409   : > { %v4282_v10 = vrot.slane %v4276_v33, 7  ;;  %v4289_v27 = vrot.slane %v4277_v34, 7  ;;  %v7086_v8 = vld [vmem:[#allocation11 + $0x394] ss:$8 sps:$4 sm:$0xff]   ;;  %v7081_v23 = vld [vmem:[#allocation11 + $0x290] ss:$8 sps:$4 sm:$0xff]  }
 0x40a   : > { %v4291_v40 = vrot.slane %v4279_v21, 6  ;;  %v4284_v38 = vrot.slane %v4278_v22, 6  ;;  %v4293_v42 = vrot.slane %v4281_v35, 5  ;;  %v4287_v45 = vrot.slane %v4280_v36, 5  ;;  %v7084_v28 = vld [vmem:[#allocation11 + $0x390] ss:$8 sps:$4 sm:$0xff]  }
 0x40b   : > { %v4290_v41 = vsel %vm1615_vm10, %v4289_v27, %v4275_v37  ;;  %v4283_v44 = vsel %vm1615_vm10, %v4282_v10, %v4274_v24  ;;  %v7089_v31 = vld [vmem:[#allocation11 + $0x2a4] ss:$8 sps:$4 sm:$0xff]   ;;  %v7087_v34 = vld [vmem:[#allocation11 + $0x2a0] ss:$8 sps:$4 sm:$0xff]   ;;  %v7095_v35 = vld [vmem:[#allocation11 + $0x2b4] ss:$8 sps:$4 sm:$0xff]  }
 0x40c   : > { %v4292_v46 = vsel %vm4285_vm11, %v4291_v40, %v4290_v41  ;;  %v4286_v47 = vsel %vm4285_vm11, %v4284_v38, %v4283_v44  ;;  %v7092_v33 = vld [vmem:[#allocation11 + $0x3a4] ss:$8 sps:$4 sm:$0xff]   ;;  %v7090_v21 = vld [vmem:[#allocation11 + $0x3a0] ss:$8 sps:$4 sm:$0xff]   ;;  %v7098_v22 = vld [vmem:[#allocation11 + $0x3b4] ss:$8 sps:$4 sm:$0xff]  }
 0x40d   : > { %v4294_v48 = vsel %vm1600_vm5, %v4293_v42, %v4292_v46  ;;  %v4288_v43 = vsel %vm1600_vm5, %v4287_v45, %v4286_v47  ;;  %v7093_v36 = vld [vmem:[#allocation11 + $0x2b0] ss:$8 sps:$4 sm:$0xff]   ;;  %v7101_v37 = vld [vmem:[#allocation11 + $0x2c4] ss:$8 sps:$4 sm:$0xff]   ;;  %v7099_v27 = vld [vmem:[#allocation11 + $0x2c0] ss:$8 sps:$4 sm:$0xff]  }
 0x40e   : > { %v7857_v49 = vpack.c.b16 %v4294_v48, %v4294_v48  ;;  %v7859_v52 = vpack.c.b16 %v4288_v43, %v4288_v43  ;;  %v7096_v24 = vld [vmem:[#allocation11 + $0x3b0] ss:$8 sps:$4 sm:$0xff]   ;;  %v7104_v10 = vld [vmem:[#allocation11 + $0x3c4] ss:$8 sps:$4 sm:$0xff]   ;;  %v7102_v40 = vld [vmem:[#allocation11 + $0x3c0] ss:$8 sps:$4 sm:$0xff]  }
 0x40f   : > { %v7107_v38 = vld [vmem:[#allocation11 + $0x2d4] ss:$8 sps:$4 sm:$0xff]   ;;  %v7105_v42 = vld [vmem:[#allocation11 + $0x2d0] ss:$8 sps:$4 sm:$0xff]   ;;  %v7113_v45 = vld [vmem:[#allocation11 + $0x2e4] ss:$8 sps:$4 sm:$0xff]  }
 0x410   : > { %4491 = vmatprep.mubr.bf16.mxu0 %v7857_v49  ;;  %4727 = vmatprep.mubr.bf16.mxu1 %v7857_v49  ;;  %v7110_v41 = vld [vmem:[#allocation11 + $0x3d4] ss:$8 sps:$4 sm:$0xff]   ;;  %v7108_v44 = vld [vmem:[#allocation11 + $0x3d0] ss:$8 sps:$4 sm:$0xff]   ;;  %v7116_v46 = vld [vmem:[#allocation11 + $0x3e4] ss:$8 sps:$4 sm:$0xff]  }
 0x411   : > { %4492 = vmatmul.mubr.bf16.vlgmr.msra.gmra.mrb[24].mxu0 %v7859_v52  ;;  %4728 = vmatmul.mubr.bf16.vlgmr.msra.gmra.mrb[28].mxu1 %v7859_v52  ;;  %v7111_v47 = vld [vmem:[#allocation11 + $0x2e0] ss:$8 sps:$4 sm:$0xff]   ;;  %v7119_v43 = vld [vmem:[#allocation11 + $0x2f4] ss:$8 sps:$4 sm:$0xff]  }
 0x412   : > { %4932 = vmatpush1.bf16.msra.mxu0 %v7027_v50  ;;  %5168 = vmatpush1.bf16.msra.mxu1 %v7030_v51  ;;  %v7114_v48 = vld [vmem:[#allocation11 + $0x3e0] ss:$8 sps:$4 sm:$0xff]   ;;  %v7122_v50 = vld [vmem:[#allocation11 + $0x3f4] ss:$8 sps:$4 sm:$0xff]   ;;  %v7117_v51 = vld [vmem:[#allocation11 + $0x2f0] ss:$8 sps:$4 sm:$0xff]  }
 0x413   : > { %4963 = vmatprep.mubr.bf16.mxu0 %v7857_v49  ;;  %5199 = vmatprep.mubr.bf16.mxu1 %v7857_v49 }
 0x414   : > { %4933 = vmatprep.subr.bf16.mxu0 %v7035_v29  ;;  %5169 = vmatprep.subr.bf16.mxu1 %v7038_v11  ;;  %v7120_v29 = vld [vmem:[#allocation11 + $0x3f0] ss:$8 sps:$4 sm:$0xff]   ;;  %v7125_v11 = vld [vmem:[#allocation11 + $0x404] ss:$8 sps:$4 sm:$0xff]  }
 0x416   : > { %4934 = vmatpush1.bf16.msra.mxu0 %v7033_v53  ;;  %5170 = vmatpush1.bf16.msra.mxu1 %v7036_v54  ;;  %v7123_v53 = vld [vmem:[#allocation11 + $0x400] ss:$8 sps:$4 sm:$0xff]   ;;  %v7128_v54 = vld [vmem:[#allocation11 + $0x414] ss:$8 sps:$4 sm:$0xff]  }
 0x417   : > { %4935 = vmatprep.subr.bf16.mxu0 %v7041_v55  ;;  %5171 = vmatprep.subr.bf16.mxu1 %v7044_v56  ;;  %v7126_v55 = vld [vmem:[#allocation11 + $0x410] ss:$8 sps:$4 sm:$0xff]   ;;  %v7131_v56 = vld [vmem:[#allocation11 + $0x424] ss:$8 sps:$4 sm:$0xff]  }
 0x41a   : > { %4936 = vmatpush1.bf16.msra.mxu0 %v7039_v58  ;;  %5172 = vmatpush1.bf16.msra.mxu1 %v7042_v59  ;;  %v7129_v58 = vld [vmem:[#allocation11 + $0x420] ss:$8 sps:$4 sm:$0xff]   ;;  %v7134_v59 = vld [vmem:[#allocation11 + $0x434] ss:$8 sps:$4 sm:$0xff]  }
 0x41b   : > { %4937 = vmatprep.subr.bf16.mxu0 %v7047_v62  ;;  %5173 = vmatprep.subr.bf16.mxu1 %v7050_v63  ;;  %v7132_v62 = vld [vmem:[#allocation11 + $0x430] ss:$8 sps:$4 sm:$0xff]   ;;  %v7137_v63 = vld [vmem:[#allocation11 + $0x444] ss:$8 sps:$4 sm:$0xff]  }
 0x41e   : > { %4938 = vmatpush1.bf16.msra.mxu0 %v7045_v2  ;;  %5174 = vmatpush1.bf16.msra.mxu1 %v7048_v25  ;;  %v7135_v2 = vld [vmem:[#allocation11 + $0x440] ss:$8 sps:$4 sm:$0xff]   ;;  %v7140_v25 = vld [vmem:[#allocation11 + $0x454] ss:$8 sps:$4 sm:$0xff]  }
 0x41f   : > { %4939 = vmatprep.subr.bf16.mxu0 %v7053_v3  ;;  %5175 = vmatprep.subr.bf16.mxu1 %v7056_v57  ;;  %v7138_v3 = vld [vmem:[#allocation11 + $0x450] ss:$8 sps:$4 sm:$0xff]   ;;  %v7141_v57 = vld [vmem:[#allocation11 + $0x460] ss:$8 sps:$4 sm:$0xff]  }
 0x422   : > { %4940 = vmatpush1.bf16.msra.mxu0 %v7051_v4  ;;  %5176 = vmatpush1.bf16.msra.mxu1 %v7054_v5  ;;  %v7144_v4 = vld [vmem:[#allocation11 + $0x470] ss:$8 sps:$4 sm:$0xff]   ;;  %v7149_v5 = vld [vmem:[#allocation11 + $0x484] ss:$8 sps:$4 sm:$0xff]  }
 0x423   : > { %4941 = vmatprep.subr.bf16.mxu0 %v7059_v60  ;;  %5177 = vmatprep.subr.bf16.mxu1 %v7062_v6  ;;  %v7147_v60 = vld [vmem:[#allocation11 + $0x480] ss:$8 sps:$4 sm:$0xff]   ;;  %v7152_v6 = vld [vmem:[#allocation11 + $0x494] ss:$8 sps:$4 sm:$0xff]  }
 0x426   : > { %4942 = vmatpush1.bf16.msra.mxu0 %v7057_v61  ;;  %5178 = vmatpush1.bf16.msra.mxu1 %v7060_v7  ;;  %v7150_v61 = vld [vmem:[#allocation11 + $0x490] ss:$8 sps:$4 sm:$0xff]   ;;  %v7155_v7 = vld [vmem:[#allocation11 + $0x4a4] ss:$8 sps:$4 sm:$0xff]  }
 0x427   : > { %4943 = vmatprep.subr.bf16.mxu0 %v7065_v39  ;;  %5179 = vmatprep.subr.bf16.mxu1 %v7068_v26  ;;  %v7153_v39 = vld [vmem:[#allocation11 + $0x4a0] ss:$8 sps:$4 sm:$0xff]   ;;  %v7158_v26 = vld [vmem:[#allocation11 + $0x4b4] ss:$8 sps:$4 sm:$0xff]  }
 0x42a   : > { %4944 = vmatpush1.bf16.msra.mxu0 %v7063_v1  ;;  %5180 = vmatpush1.bf16.msra.mxu1 %v7066_v9  ;;  %v7156_v1 = vld [vmem:[#allocation11 + $0x4b0] ss:$8 sps:$4 sm:$0xff]   ;;  %v7161_v9 = vld [vmem:[#allocation11 + $0x4c4] ss:$8 sps:$4 sm:$0xff]  }
 0x42b   : > { %4945 = vmatprep.subr.bf16.mxu0 %v7071_v12  ;;  %5181 = vmatprep.subr.bf16.mxu1 %v7074_v13  ;;  %v7159_v12 = vld [vmem:[#allocation11 + $0x4c0] ss:$8 sps:$4 sm:$0xff]   ;;  %v7164_v13 = vld [vmem:[#allocation11 + $0x4d4] ss:$8 sps:$4 sm:$0xff]  }
 0x42e   : > { %4946 = vmatpush1.bf16.msra.mxu0 %v7069_v14  ;;  %5182 = vmatpush1.bf16.msra.mxu1 %v7072_v15  ;;  %v7162_v14 = vld [vmem:[#allocation11 + $0x4d0] ss:$8 sps:$4 sm:$0xff]   ;;  %v7167_v15 = vld [vmem:[#allocation11 + $0x4e4] ss:$8 sps:$4 sm:$0xff]  }
 0x42f   : > { %4947 = vmatprep.subr.bf16.mxu0 %v7077_v16  ;;  %5183 = vmatprep.subr.bf16.mxu1 %v7080_v17  ;;  %v7165_v16 = vld [vmem:[#allocation11 + $0x4e0] ss:$8 sps:$4 sm:$0xff]   ;;  %v7170_v17 = vld [vmem:[#allocation11 + $0x4f4] ss:$8 sps:$4 sm:$0xff]  }
 0x432   : > { %4948 = vmatpush1.bf16.msra.mxu0 %v7075_v18  ;;  %5184 = vmatpush1.bf16.msra.mxu1 %v7078_v19  ;;  %v7168_v18 = vld [vmem:[#allocation11 + $0x4f0] ss:$8 sps:$4 sm:$0xff]  }
 0x433   : > { %4949 = vmatprep.subr.bf16.mxu0 %v7083_v20  ;;  %5185 = vmatprep.subr.bf16.mxu1 %v7086_v8 }
 0x436   : > { %4950 = vmatpush1.bf16.msra.mxu0 %v7081_v23  ;;  %5186 = vmatpush1.bf16.msra.mxu1 %v7084_v28 }
 0x437   : > { %4951 = vmatprep.subr.bf16.mxu0 %v7089_v31  ;;  %5187 = vmatprep.subr.bf16.mxu1 %v7092_v33 }
 0x43a   : > { %4952 = vmatpush1.bf16.msra.mxu0 %v7087_v34  ;;  %5188 = vmatpush1.bf16.msra.mxu1 %v7090_v21 }
 0x43b   : > { %4953 = vmatprep.subr.bf16.mxu0 %v7095_v35  ;;  %5189 = vmatprep.subr.bf16.mxu1 %v7098_v22 }
 0x43e   : > { %4954 = vmatpush1.bf16.msra.mxu0 %v7093_v36  ;;  %5190 = vmatpush1.bf16.msra.mxu1 %v7096_v24 }
 0x43f   : > { %4955 = vmatprep.subr.bf16.mxu0 %v7101_v37  ;;  %5191 = vmatprep.subr.bf16.mxu1 %v7104_v10 }
 0x442   : > { %4956 = vmatpush1.bf16.msra.mxu0 %v7099_v27  ;;  %5192 = vmatpush1.bf16.msra.mxu1 %v7102_v40 }
 0x443   : > { %4957 = vmatprep.subr.bf16.mxu0 %v7107_v38  ;;  %5193 = vmatprep.subr.bf16.mxu1 %v7110_v41 }
 0x446   : > { %4958 = vmatpush1.bf16.msra.mxu0 %v7105_v42  ;;  %5194 = vmatpush1.bf16.msra.mxu1 %v7108_v44 }
 0x447   : > { %4959 = vmatprep.subr.bf16.mxu0 %v7113_v45  ;;  %5195 = vmatprep.subr.bf16.mxu1 %v7116_v46 }
 0x44a   : > { %4960 = vmatpush1.bf16.msra.mxu0 %v7111_v47  ;;  %5196 = vmatpush1.bf16.msra.mxu1 %v7114_v48 }
 0x44b   : > { %4961 = vmatprep.subr.bf16.mxu0 %v7119_v43  ;;  %5197 = vmatprep.subr.bf16.mxu1 %v7122_v50 }
 0x44e   : > { %4962 = vmatpush1.bf16.msra.mxu0 %v7117_v51  ;;  %5198 = vmatpush1.bf16.msra.mxu1 %v7120_v29 }
 0x44f   : > { %5403 = vmatprep.subr.bf16.mxu0 %v7125_v11 }
 0x451   : > { %4964 = vmatmul.mubr.bf16.vlgmr.msra.gmra.mrb[28].mxu0 %v7859_v52  ;;  %5200 = vmatmul.mubr.bf16.vlgmr.msra.gmra.mrb[32].mxu1 %v7859_v52 }
 0x452   : > { %5404 = vmatpush1.bf16.msra.mxu0 %v7123_v53  ;;  %5435 = vmatprep.mubr.bf16.mxu0 %v7857_v49  ;;  %v7143_v49 = vld [vmem:[#allocation11 + $0x464] ss:$8 sps:$4 sm:$0xff]  }
 0x453   : > { %5405 = vmatprep.subr.bf16.mxu0 %v7128_v54  ;;  %5518 = vmatprep.mubr.bf16.mxu1 %v7402_v0  ;;  %v7146_v0 = vld [vmem:[#allocation11 + $0x474] ss:$8 sps:$4 sm:$0xff]  }
 0x456   : > { %5406 = vmatpush1.bf16.msra.mxu0 %v7126_v55 }
 0x457   : > { %5407 = vmatprep.subr.bf16.mxu0 %v7131_v56 }
 0x45a   : > { %5408 = vmatpush1.bf16.msra.mxu0 %v7129_v58 }
 0x45b   : > { %5409 = vmatprep.subr.bf16.mxu0 %v7134_v59 }
 0x45e   : > { %5410 = vmatpush1.bf16.msra.mxu0 %v7132_v62  ;;  %v5446_v62 = vld [vmem:[#allocation12] sm:$0xf] }
 0x45f   : > { %5411 = vmatprep.subr.bf16.mxu0 %v7137_v63  ;;  %v5463_v63 = vld [vmem:[#allocation14] sm:$0x3] }
 0x462   : > { %5412 = vmatpush1.bf16.msra.mxu0 %v7135_v2  ;;  %v5468_v2 = vrot.slane %v5463_v63, %v7705_v30 }
 0x463   : > { %5413 = vmatprep.subr.bf16.mxu0 %v7140_v25  ;;  %v5472_v25 = vrot.slane %v5463_v63, %v7708_v32 }
 0x466   : > { %5414 = vmatpush1.bf16.msra.mxu0 %v7138_v3 }
 0x467   : > { %5415 = vmatprep.subr.bf16.mxu0 %v7143_v49 }
 0x46a   : > { %5416 = vmatpush1.bf16.msra.mxu0 %v7141_v57 }
 0x46b   : > { %5417 = vmatprep.subr.bf16.mxu0 %v7146_v0 }
 0x46e   : > { %5418 = vmatpush1.bf16.msra.mxu0 %v7144_v4 }
 0x46f   : > { %5419 = vmatprep.subr.bf16.mxu0 %v7149_v5 }
 0x472   : > { %5420 = vmatpush1.bf16.msra.mxu0 %v7147_v60 }
 0x473   : > { %5421 = vmatprep.subr.bf16.mxu0 %v7152_v6 }
 0x476   : > { %5422 = vmatpush1.bf16.msra.mxu0 %v7150_v61 }
 0x477   : > { %5423 = vmatprep.subr.bf16.mxu0 %v7155_v7 }
 0x47a   : > { %5424 = vmatpush1.bf16.msra.mxu0 %v7153_v39 }
 0x47b   : > { %5425 = vmatprep.subr.bf16.mxu0 %v7158_v26 }
 0x47e   : > { %5426 = vmatpush1.bf16.msra.mxu0 %v7156_v1 }
 0x47f   : > { %5427 = vmatprep.subr.bf16.mxu0 %v7161_v9 }
 0x482   : > { %5428 = vmatpush1.bf16.msra.mxu0 %v7159_v12 }
 0x483   : > { %5429 = vmatprep.subr.bf16.mxu0 %v7164_v13 }
 0x486   : > { %5430 = vmatpush1.bf16.msra.mxu0 %v7162_v14 }
 0x487   : > { %5431 = vmatprep.subr.bf16.mxu0 %v7167_v15 }
 0x48a   : > { %5432 = vmatpush1.bf16.msra.mxu0 %v7165_v16 }
 0x48b   : > { %5433 = vmatprep.subr.bf16.mxu0 %v7170_v17 }
 0x48e   : > { %5434 = vmatpush1.bf16.msra.mxu0 %v7168_v18 }
 0x491   : > { %5436 = vmatmul.mubr.bf16.vlgmr.msra.gmra.mrb[32].mxu0 %v7859_v52 }
 0x4e4   : > { %v4493_v19 = vpop.f32.mrb[24].mxu0  ;;  %v4729_v20 = vpop.f32.mrb[28].mxu1 }
 0x4e5   : > { %4500 = vst [vmem:[#allocation3] sm:$0xf] %v4493_v19  ;;  %4736 = vst [vmem:[#allocation3 + $0x10] sm:$0xf] %v4729_v20  ;;  %v4495_v8 = vpop.f32.mrb[25].mxu0  ;;  %v4731_v23 = vpop.f32.mrb[29].mxu1 }
 0x4e6   : > { %4501 = vst [vmem:[#allocation3 + $0x8] sm:$0xf] %v4495_v8  ;;  %4737 = vst [vmem:[#allocation3 + $0x18] sm:$0xf] %v4731_v23  ;;  %v4497_v28 = vpop.f32.mrb[26].mxu0  ;;  %v4733_v31 = vpop.f32.mrb[30].mxu1 }
 0x4e7   : > { %v4498_v33 = vpop.f32.mrb[27].mxu0  ;;  %v4734_v34 = vpop.f32.mrb[31].mxu1 }
 0x4ec   : > { %v5447_v21 = vld [vmem:[#allocation3] sm:$0xff]  ;;  %v5449_v35 = vld [vmem:[#allocation3 + $0x10] sm:$0xff] }
 0x4ed   : > { %v5448_v22 = vld [vmem:[#allocation3 + $0x8] sm:$0xff]  ;;  %v5450_v36 = vld [vmem:[#allocation3 + $0x18] sm:$0xff]  ;;  %v5457_v37 = vpack.c.bf16 %v5449_v35, %v5447_v21 }
 0x4ee   : > { %v5458_v24 = vpack.c.bf16 %v5450_v36, %v5448_v22 }
 0x4f0   : > { %5486 = vmatprep.subr.bf16.mxu1 %v5458_v24 }
 0x4f1   : > { %5487 = vmatpush1.bf16.msra.mxu1 %v5457_v37 }
 0x524   : > { %v4965_v52 = vpop.f32.mrb[28].mxu0  ;;  %v5201_v10 = vpop.f32.mrb[32].mxu1 }
 0x525   : > { %4972 = vst [vmem:[#allocation3 + $0x20] sm:$0xf] %v4965_v52  ;;  %5208 = vst [vmem:[#allocation3 + $0x30] sm:$0xf] %v5201_v10  ;;  %v4967_v27 = vpop.f32.mrb[29].mxu0  ;;  %v5203_v40 = vpop.f32.mrb[33].mxu1 }
 0x526   : > { %4973 = vst [vmem:[#allocation3 + $0x28] sm:$0xf] %v4967_v27  ;;  %5209 = vst [vmem:[#allocation3 + $0x38] sm:$0xf] %v5203_v40  ;;  %v4969_v38 = vpop.f32.mrb[30].mxu0  ;;  %v5205_v41 = vpop.f32.mrb[34].mxu1 }
 0x527   : > { %v4970_v42 = vpop.f32.mrb[31].mxu0  ;;  %v5206_v44 = vpop.f32.mrb[35].mxu1 }
 0x52c   : > { %v5451_v45 = vld [vmem:[#allocation3 + $0x20] sm:$0xff]  ;;  %v5453_v46 = vld [vmem:[#allocation3 + $0x30] sm:$0xff] }
 0x52d   : > { %v5452_v47 = vld [vmem:[#allocation3 + $0x28] sm:$0xff]  ;;  %v5454_v48 = vld [vmem:[#allocation3 + $0x38] sm:$0xff]  ;;  %v5459_v50 = vpack.c.bf16 %v5453_v46, %v5451_v45 }
 0x52e   : > { %v5460_v43 = vpack.c.bf16 %v5454_v48, %v5452_v47 }
 0x530   : > { %5488 = vmatprep.subr.bf16.mxu1 %v5460_v43 }
 0x531   : > { %5489 = vmatpush1.bf16.msra.mxu1 %v5459_v50 }
 0x564   : > { %v5437_v51 = vpop.f32.mrb[32].mxu0 }
 0x565   : > { %5444 = vst [vmem:[#allocation3 + $0x40] sm:$0xf] %v5437_v51  ;;  %v5439_v29 = vpop.f32.mrb[33].mxu0 }
 0x566   : > { %5445 = vst [vmem:[#allocation3 + $0x48] sm:$0xf] %v5439_v29  ;;  %v5441_v11 = vpop.f32.mrb[34].mxu0 }
 0x567   : > { %v5442_v53 = vpop.f32.mrb[35].mxu0 }
 0x56c   : > { %v5455_v54 = vld [vmem:[#allocation3 + $0x40] sm:$0xff] }
 0x56d   : > { %v5456_v55 = vld [vmem:[#allocation3 + $0x48] sm:$0xff]  ;;  %v5461_v56 = vpack.c.bf16 %v5455_v54, %v5455_v54 }
 0x56e   : > { %v5462_v58 = vpack.c.bf16 %v5456_v55, %v5456_v55 }
 0x56f   : > { %v5481_v59 = vsel %vm5479_vm12, %v5461_v56, 0 }
 0x570   : > { %6237 = vmatprep.subr.msk.bf16.mxu1 %vm5479_vm12, %v5462_v58 }
 0x571   : > { %5491 = vmatpush1.bf16.msra.mxu1 %v5481_v59 }
 0x574   : > { %6238 = vmatmul.mubr.msk.bf16.vlgmr.msra.gmra.mrb[36].mxu1 %vm5475_vm13, %v5446_v62 }
 0x647   : > { %v5520_v3 = vpop.f32.mrb[36].mxu1 }
 0x648   : > { %v5521_v49 = vadd.f32 %v5520_v3, %v5468_v2  ;;  %v5522_v57 = vpop.f32.mrb[37].mxu1 }
 0x649   : > { %v5523_v0 = vadd.f32 %v5522_v57, %v5472_v25  ;;  %v5524_v4 = vpop.f32.mrb[38].mxu1 }
 0x64a   : > { %5527 = vst [vmem:[%s399_s24] sm:$0xff] %v5521_v49  ;;  %v5525_v5 = vpop.f32.mrb[39].mxu1 }
 0x64b   : > { %5528 = vst [vmem:[%s399_s24 + $0x8] sm:$0xff] %v5523_v0 }
 0x64c PF: > { %s22_s27 = sadd.s32 1, %s7389_s27  }
 0x64d   : > { %p19_p11 = scmp.ge.s32.totalorder %s22_s27, 4  }
 0x64f   :  { %21 = sbr.rel (!%p19_p11) target bundleno = 4 (0x4), region = 127 }
 0x656   :  { %5550 = vsyncpa [#allocation5], 1 }
 0x657   :  { %5552 = vsyncpa [#allocation5 + $0x1], 1 }
 0x658   :  { %5553 = vsyncpa [#allocation7], 1 }
 0x659   :  { %5554 = vsyncpa [#allocation10], 1 }
 0x65a   :  { %5555 = vsyncpa [#allocation13], 1 }

// kernel: demo_net_forward.3
= control target key start
LH: loop header
LB: loop body
LE: loop exit
PB: predicated region body
PF: predicated region fallthrough
CT: control target
= control target key end

     0   :  { %9 = vsyncpa [#allocation4], 0  ;;  %s7644_s15 = smov 0   ;;  %s10586_s0 = inlined_call_operand.vmem [shape: f32[2,8,256], index: 0, kind: input, shape index: {}]   ;;  %s10587_s1 = inlined_call_operand.vmem [shape: bf16[5,256,768], index: 1, kind: input, shape index: {}]   ;;  %s10588_s2 = inlined_call_operand.vmem [shape: bf16[530,40], index: 2, kind: input, shape index: {}]   ;;  %s10589_s3 = inlined_call_operand.hbm [shape: f32[1,768], index: 3, kind: input, shape index: {}]   ;;  %s10590_s4 = inlined_call_operand.vmem [shape: f32[2,530,768], index: 4, kind: output, shape index: {}]  }
   0x1 LB: > { %s7650_s16 = sadd.s32 4294967295, %s7615_s15   ;;  %p5766_p0 = scmp.ge.s32.totalorder %s7615_s15, 1  ;;  %s7615_s15 = sphi %s7644_s15, %s15_s15  }
   0x2   : > { %p135_p1 = scmp.lt.s32.totalorder %s7615_s15, 3  ;;  %p10591_p3 = scmp.eq.s32.totalorder %s7650_s16, 0 }
   0x3   : > { %s7617_s18 = smov [#allocation3]   ;;  %s7577_s23 = scalar_lea.hbm %s10589_s3, 96 }
   0x4   : > { %p7654_p2 = pnand %p5766_p0, %p135_p1  ;;  %s154_s19 = sshll.u32 %s7617_s18, 4  ;;  %s155_s19 = int_to_ptr.vmem [resolvable:$true] %s154_s19 }
   0x5   : > { %p7578_p6 = scmp.ne.s32.totalorder %s10589_s3, %s7577_s23  ;;  %p7584_p10 = scmp.lt.u32.totalorder %s7577_s23, %s10589_s3 }
   0x6   : > { %s10593_s17 = scalar_select %p7654_p2, 1, 0 }
   0x7   : > { %p6791_p4 = pneg %p7654_p2 }
   0x9   : > { %p7663_p5 = pnand %p10591_p3, %p6791_p4 }
   0xb   : > { %p7579_p7 = pneg %p7663_p5 }
   0xd   : > { %p7580_p8 = pnand %p7579_p7, %p7578_p6 }
   0xf   : > { %p7581_p9 = pneg %p7580_p8 }
  0x11   : > { %p7586_p11 = pnand %p7584_p10, %p7581_p9 }
  0x13   : > { %7589 = shalt.err (!%p7586_p11)
}
  0x14   : > { %s7590_s28 = scalar_lea.vmem %s155_s19, 96  ;;  %p7598_p1 = scmp.lt.s32.totalorder %s155_s19, %s155_s19 }
  0x15   : > { %p7591_p12 = scmp.ne.s32.totalorder %s155_s19, %s7590_s28  ;;  %p7599_p4 = scmp.lt.s32.totalorder %s7590_s28, %s7590_s28 }
  0x17   : > { %p7593_p13 = pnand %p7591_p12, %p7579_p7  ;;  %p7600_p3 = por %p7599_p4, %p7598_p1 }
  0x19   : > { %p7594_p0 = pneg %p7593_p13 }
  0x1b   : > { %p7601_p2 = pnand %p7600_p3, %p7594_p0 }
  0x1d   : > { %7604 = shalt.err (!%p7601_p2)
}
  0x1e   : > { %6794 = dma.hbm_to_vmem [thread:$0]  (!%p7663_p5), %s10589_s3, 96, %s155_s19, [#allocation4]  }
  0x1f   : > { %p10595_p6 = scmp.ne.s32.totalorder %s10593_s17, 0 }
  0x20   : > { %p10596_p8 = scmp.eq.s32.totalorder (!%p10595_p6), %s7650_s16, 0 }
  0x21   : > { %175 = sbr.rel (%p10595_p6) target bundleno = 1357 (0x54d), region = 36 }
  0x28   : > { %7610 = dma.done.wait (%p10596_p8), [#allocation4], 96   ;;  %p10597_p7 = pmov %p10596_p8 }
  0x29   : > { %v6807_v0 = vld [vmem:[%s10587_s1 + $0x4] ss:$24 sps:$4 sm:$0xff]   ;;  %v6811_v2 = vld [vmem:[%s10587_s1] ss:$24 sps:$4 sm:$0xff]   ;;  %v6813_v4 = vld [vmem:[%s10587_s1 + $0x34] ss:$24 sps:$4 sm:$0xff]  }
  0x2a   : > { %7612 = vsyncadd (%p10597_p7), [#allocation4], 4294967200  ;;  %v6809_v1 = vld [vmem:[%s10587_s1 + $0xc] ss:$24 sps:$4 sm:$0xff]   ;;  %792 = vmatprep.subr.bf16.mxu0 %v6807_v0  ;;  %v6812_v3 = vld [vmem:[%s10587_s1 + $0x8] ss:$24 sps:$4 sm:$0xff]  }
  0x2b   : > { %833 = vmatprep.subr.bf16.mxu1 %v6809_v1  ;;  %793 = vmatpush1.bf16.msra.mxu0 %v6811_v2  ;;  %v6815_v5 = vld [vmem:[%s10587_s1 + $0x3c] ss:$24 sps:$4 sm:$0xff]   ;;  %v6817_v6 = vld [vmem:[%s10587_s1 + $0x30] ss:$24 sps:$4 sm:$0xff]   ;;  %v6821_v9 = vld [vmem:[%s10587_s1 + $0x6c] ss:$24 sps:$4 sm:$0xff]  }
  0x2c   : > { %834 = vmatpush1.bf16.msra.mxu1 %v6812_v3  ;;  %794 = vmatprep.subr.bf16.mxu0 %v6813_v4  ;;  %v6818_v7 = vld [vmem:[%s10587_s1 + $0x38] ss:$24 sps:$4 sm:$0xff]   ;;  %v6819_v8 = vld [vmem:[%s10587_s1 + $0x64] ss:$24 sps:$4 sm:$0xff]   ;;  %v6824_v11 = vld [vmem:[%s10587_s1 + $0x68] ss:$24 sps:$4 sm:$0xff]  }
  0x2d   : > { %835 = vmatprep.subr.bf16.mxu1 %v6815_v5  ;;  %v6823_v10 = vld [vmem:[%s10587_s1 + $0x60] ss:$24 sps:$4 sm:$0xff]   ;;  %v6825_v12 = vld [vmem:[%s10587_s1 + $0x94] ss:$24 sps:$4 sm:$0xff]   ;;  %v6829_v14 = vld [vmem:[%s10587_s1 + $0x90] ss:$24 sps:$4 sm:$0xff]  }
  0x2e   : > { %v6827_v13 = vld [vmem:[%s10587_s1 + $0x9c] ss:$24 sps:$4 sm:$0xff]   ;;  %v6830_v15 = vld [vmem:[%s10587_s1 + $0x98] ss:$24 sps:$4 sm:$0xff]   ;;  %v6833_v17 = vld [vmem:[%s10587_s1 + $0xcc] ss:$24 sps:$4 sm:$0xff]  }
  0x2f   : > { %795 = vmatpush1.bf16.msra.mxu0 %v6817_v6  ;;  %v6831_v16 = vld [vmem:[%s10587_s1 + $0xc4] ss:$24 sps:$4 sm:$0xff]   ;;  %v6835_v18 = vld [vmem:[%s10587_s1 + $0xc0] ss:$24 sps:$4 sm:$0xff]   ;;  %v6837_v20 = vld [vmem:[%s10587_s1 + $0xf4] ss:$24 sps:$4 sm:$0xff]  }
  0x30   : > { %836 = vmatpush1.bf16.msra.mxu1 %v6818_v7  ;;  %796 = vmatprep.subr.bf16.mxu0 %v6819_v8  ;;  %v6836_v19 = vld [vmem:[%s10587_s1 + $0xc8] ss:$24 sps:$4 sm:$0xff]   ;;  %v6839_v21 = vld [vmem:[%s10587_s1 + $0xfc] ss:$24 sps:$4 sm:$0xff]   ;;  %v6842_v23 = vld [vmem:[%s10587_s1 + $0xf8] ss:$24 sps:$4 sm:$0xff]  }
  0x31   : > { %837 = vmatprep.subr.bf16.mxu1 %v6821_v9  ;;  %v6841_v22 = vld [vmem:[%s10587_s1 + $0xf0] ss:$24 sps:$4 sm:$0xff]   ;;  %v6843_v24 = vld [vmem:[%s10587_s1 + $0x124] ss:$24 sps:$4 sm:$0xff]   ;;  %v6847_v26 = vld [vmem:[%s10587_s1 + $0x120] ss:$24 sps:$4 sm:$0xff]  }
  0x32   : > { %v6845_v25 = vld [vmem:[%s10587_s1 + $0x12c] ss:$24 sps:$4 sm:$0xff]   ;;  %v6848_v27 = vld [vmem:[%s10587_s1 + $0x128] ss:$24 sps:$4 sm:$0xff]   ;;  %v6851_v29 = vld [vmem:[%s10587_s1 + $0x15c] ss:$24 sps:$4 sm:$0xff]  }
  0x33   : > { %797 = vmatpush1.bf16.msra.mxu0 %v6823_v10  ;;  %v6849_v28 = vld [vmem:[%s10587_s1 + $0x154] ss:$24 sps:$4 sm:$0xff]   ;;  %v6853_v30 = vld [vmem:[%s10587_s1 + $0x150] ss:$24 sps:$4 sm:$0xff]   ;;  %v6855_v32 = vld [vmem:[%s10587_s1 + $0x184] ss:$24 sps:$4 sm:$0xff]  }
  0x34   : > { %838 = vmatpush1.bf16.msra.mxu1 %v6824_v11  ;;  %798 = vmatprep.subr.bf16.mxu0 %v6825_v12  ;;  %v6854_v31 = vld [vmem:[%s10587_s1 + $0x158] ss:$24 sps:$4 sm:$0xff]   ;;  %p201_p2 = scmp.lt.s32.totalorder %s7650_s16, 1  ;;  %v6857_v33 = vld [vmem:[%s10587_s1 + $0x18c] ss:$24 sps:$4 sm:$0xff]   ;;  %vm4163_vm0 = vcmask 1043456  }
  0x35   : > { %839 = vmatprep.subr.bf16.mxu1 %v6827_v13  ;;  %v6859_v34 = vld [vmem:[%s10587_s1 + $0x180] ss:$24 sps:$4 sm:$0xff]   ;;  %v6861_v36 = vld [vmem:[%s10587_s1 + $0x1b4] ss:$24 sps:$4 sm:$0xff]   ;;  %v6865_v38 = vld [vmem:[%s10587_s1 + $0x1b0] ss:$24 sps:$4 sm:$0xff]  }
  0x36   : > { %v6860_v35 = vld [vmem:[%s10587_s1 + $0x188] ss:$24 sps:$4 sm:$0xff]   ;;  %s10599_s16 = smov (!%p201_p2, %s7650_s16), 1  ;;  %v6863_v37 = vld [vmem:[%s10587_s1 + $0x1bc] ss:$24 sps:$4 sm:$0xff]   ;;  %vm4060_vm1 = vcmask 326656  }
  0x37   : > { %799 = vmatpush1.bf16.msra.mxu0 %v6829_v14  ;;  %v6866_v39 = vld [vmem:[%s10587_s1 + $0x1b8] ss:$24 sps:$4 sm:$0xff]   ;;  %v6867_v40 = vld [vmem:[%s10587_s1 + $0x1e4] ss:$24 sps:$4 sm:$0xff]   ;;  %s6779_s17 = sshll.u32 %s10599_s16, 4  ;;  %s6786_s6 = smul.u32 3216, %s10599_s16 }
  0x38   : > { %840 = vmatpush1.bf16.msra.mxu1 %v6830_v15  ;;  %800 = vmatprep.subr.bf16.mxu0 %v6831_v16  ;;  %v6869_v41 = vld [vmem:[%s10587_s1 + $0x1ec] ss:$24 sps:$4 sm:$0xff]   ;;  %v6871_v42 = vld [vmem:[%s10587_s1 + $0x1e0] ss:$24 sps:$4 sm:$0xff]   ;;  %s7829_s26 = scalar_lea.vmem %s10586_s0, %s6779_s17  ;;  %v6875_v45 = vld [vmem:[%s10587_s1 + $0x21c] ss:$24 sps:$4 sm:$0xff]  }
  0x39   : > { %841 = vmatprep.subr.bf16.mxu1 %v6833_v17  ;;  %v6872_v43 = vld [vmem:[%s10587_s1 + $0x1e8] ss:$24 sps:$4 sm:$0xff]   ;;  %v6873_v44 = vld [vmem:[%s10587_s1 + $0x214] ss:$24 sps:$4 sm:$0xff]   ;;  %v6878_v49 = vld [vmem:[%s10587_s1 + $0x218] ss:$24 sps:$4 sm:$0xff]   ;;  %s9579_s16 = scalar_lea.vmem %s10590_s4, %s6786_s6 }
  0x3a   : > { %v213_v46 = vld [vmem:[%s7829_s26 + $0x8] sm:$0xff]  ;;  %v6879_v50 = vld [vmem:[%s10587_s1 + $0x244] ss:$24 sps:$4 sm:$0xff]   ;;  %v6883_v52 = vld [vmem:[%s10587_s1 + $0x240] ss:$24 sps:$4 sm:$0xff]  }
  0x3b   : > { %801 = vmatpush1.bf16.msra.mxu0 %v6835_v18  ;;  %v7838_v47 = vpack.c.bf16 %v213_v46, %v213_v46  ;;  %v6877_v48 = vld [vmem:[%s10587_s1 + $0x210] ss:$24 sps:$4 sm:$0xff]   ;;  %v6881_v51 = vld [vmem:[%s10587_s1 + $0x24c] ss:$24 sps:$4 sm:$0xff]   ;;  %v6887_v55 = vld [vmem:[%s10587_s1 + $0x27c] ss:$24 sps:$4 sm:$0xff]  }
  0x3c   : > { %842 = vmatpush1.bf16.msra.mxu1 %v6836_v19  ;;  %802 = vmatprep.subr.bf16.mxu0 %v6837_v20  ;;  %v6884_v53 = vld [vmem:[%s10587_s1 + $0x248] ss:$24 sps:$4 sm:$0xff]   ;;  %v6885_v54 = vld [vmem:[%s10587_s1 + $0x274] ss:$24 sps:$4 sm:$0xff]   ;;  %v6890_v57 = vld [vmem:[%s10587_s1 + $0x278] ss:$24 sps:$4 sm:$0xff]  }
  0x3d   : > { %843 = vmatprep.subr.bf16.mxu1 %v6839_v21  ;;  %824 = vmatprep.mubr.bf16.mxu0 %v7838_v47  ;;  %v6889_v56 = vld [vmem:[%s10587_s1 + $0x270] ss:$24 sps:$4 sm:$0xff]   ;;  %v6891_v58 = vld [vmem:[%s10587_s1 + $0x2a4] ss:$24 sps:$4 sm:$0xff]   ;;  %v6895_v60 = vld [vmem:[%s10587_s1 + $0x2a0] ss:$24 sps:$4 sm:$0xff]  }
  0x3e   : > { %865 = vmatprep.mubr.bf16.mxu1 %v7838_v47  ;;  %v6893_v59 = vld [vmem:[%s10587_s1 + $0x2ac] ss:$24 sps:$4 sm:$0xff]   ;;  %v6896_v61 = vld [vmem:[%s10587_s1 + $0x2a8] ss:$24 sps:$4 sm:$0xff]   ;;  %v6899_v63 = vld [vmem:[%s10587_s1 + $0x2dc] ss:$24 sps:$4 sm:$0xff]  }
  0x3f   : > { %803 = vmatpush1.bf16.msra.mxu0 %v6841_v22  ;;  %v6897_v62 = vld [vmem:[%s10587_s1 + $0x2d4] ss:$24 sps:$4 sm:$0xff]   ;;  %v6901_v0 = vld [vmem:[%s10587_s1 + $0x2d0] ss:$24 sps:$4 sm:$0xff]   ;;  %v212_v2 = vld [vmem:[%s7829_s26] sm:$0xff] }
  0x40   : > { %844 = vmatpush1.bf16.msra.mxu1 %v6842_v23  ;;  %804 = vmatprep.subr.bf16.mxu0 %v6843_v24  ;;  %v6902_v1 = vld [vmem:[%s10587_s1 + $0x2d8] ss:$24 sps:$4 sm:$0xff]   ;;  %v6905_v3 = vld [vmem:[%s10587_s1 + $0x14] ss:$24 sps:$4 sm:$0xff]   ;;  %v6908_v4 = vld [vmem:[%s10587_s1 + $0x304] ss:$24 sps:$4 sm:$0xff]   ;;  %v7903_v5 = vpack.c.bf16 %v212_v2, %v212_v2 }
  0x41   : > { %845 = vmatprep.subr.bf16.mxu1 %v6845_v25  ;;  %v6903_v6 = vld [vmem:[%s10587_s1 + $0x10] ss:$24 sps:$4 sm:$0xff]   ;;  %v6906_v7 = vld [vmem:[%s10587_s1 + $0x300] ss:$24 sps:$4 sm:$0xff]   ;;  %v6911_v8 = vld [vmem:[%s10587_s1 + $0x44] ss:$24 sps:$4 sm:$0xff]  }
  0x42   : > { %v6914_v9 = vld [vmem:[%s10587_s1 + $0x334] ss:$24 sps:$4 sm:$0xff]   ;;  %v6909_v10 = vld [vmem:[%s10587_s1 + $0x40] ss:$24 sps:$4 sm:$0xff]   ;;  %v6912_v11 = vld [vmem:[%s10587_s1 + $0x330] ss:$24 sps:$4 sm:$0xff]  }
  0x43   : > { %805 = vmatpush1.bf16.msra.mxu0 %v6847_v26  ;;  %v6917_v12 = vld [vmem:[%s10587_s1 + $0x74] ss:$24 sps:$4 sm:$0xff]   ;;  %v6920_v13 = vld [vmem:[%s10587_s1 + $0x364] ss:$24 sps:$4 sm:$0xff]   ;;  %v6915_v14 = vld [vmem:[%s10587_s1 + $0x70] ss:$24 sps:$4 sm:$0xff]  }
  0x44   : > { %846 = vmatpush1.bf16.msra.mxu1 %v6848_v27  ;;  %806 = vmatprep.subr.bf16.mxu0 %v6849_v28  ;;  %v6918_v15 = vld [vmem:[%s10587_s1 + $0x360] ss:$24 sps:$4 sm:$0xff]   ;;  %v6923_v16 = vld [vmem:[%s10587_s1 + $0xa4] ss:$24 sps:$4 sm:$0xff]   ;;  %v6926_v17 = vld [vmem:[%s10587_s1 + $0x394] ss:$24 sps:$4 sm:$0xff]  }
  0x45   : > { %847 = vmatprep.subr.bf16.mxu1 %v6851_v29  ;;  %v6921_v18 = vld [vmem:[%s10587_s1 + $0xa0] ss:$24 sps:$4 sm:$0xff]   ;;  %v6924_v19 = vld [vmem:[%s10587_s1 + $0x390] ss:$24 sps:$4 sm:$0xff]   ;;  %v6929_v20 = vld [vmem:[%s10587_s1 + $0xd4] ss:$24 sps:$4 sm:$0xff]  }
  0x46   : > { %v6932_v21 = vld [vmem:[%s10587_s1 + $0x3c4] ss:$24 sps:$4 sm:$0xff]   ;;  %v6927_v22 = vld [vmem:[%s10587_s1 + $0xd0] ss:$24 sps:$4 sm:$0xff]   ;;  %v6930_v23 = vld [vmem:[%s10587_s1 + $0x3c0] ss:$24 sps:$4 sm:$0xff]  }
  0x47   : > { %807 = vmatpush1.bf16.msra.mxu0 %v6853_v30  ;;  %v6935_v24 = vld [vmem:[%s10587_s1 + $0x104] ss:$24 sps:$4 sm:$0xff]   ;;  %v6938_v25 = vld [vmem:[%s10587_s1 + $0x3f4] ss:$24 sps:$4 sm:$0xff]   ;;  %v6933_v26 = vld [vmem:[%s10587_s1 + $0x100] ss:$24 sps:$4 sm:$0xff]  }
  0x48   : > { %848 = vmatpush1.bf16.msra.mxu1 %v6854_v31  ;;  %808 = vmatprep.subr.bf16.mxu0 %v6855_v32  ;;  %v6936_v27 = vld [vmem:[%s10587_s1 + $0x3f0] ss:$24 sps:$4 sm:$0xff]   ;;  %v6941_v28 = vld [vmem:[%s10587_s1 + $0x134] ss:$24 sps:$4 sm:$0xff]   ;;  %v6944_v29 = vld [vmem:[%s10587_s1 + $0x424] ss:$24 sps:$4 sm:$0xff]  }
  0x49   : > { %849 = vmatprep.subr.bf16.mxu1 %v6857_v33  ;;  %v6939_v30 = vld [vmem:[%s10587_s1 + $0x130] ss:$24 sps:$4 sm:$0xff]   ;;  %v6942_v31 = vld [vmem:[%s10587_s1 + $0x420] ss:$24 sps:$4 sm:$0xff]   ;;  %v6947_v32 = vld [vmem:[%s10587_s1 + $0x164] ss:$24 sps:$4 sm:$0xff]  }
  0x4a   : > { %v6950_v33 = vld [vmem:[%s10587_s1 + $0x454] ss:$24 sps:$4 sm:$0xff]   ;;  %v6963_v46 = vld [vmem:[%s10587_s1 + $0x1f0] ss:$24 sps:$4 sm:$0xff]  }
  0x4b   : > { %809 = vmatpush1.bf16.msra.mxu0 %v6859_v34  ;;  %v6945_v34 = vld [vmem:[%s10587_s1 + $0x160] ss:$24 sps:$4 sm:$0xff]   ;;  %v6998_v2 = vld [vmem:[%s10587_s1 + $0x5d4] ss:$24 sps:$4 sm:$0xff]  }
  0x4c   : > { %850 = vmatpush1.bf16.msra.mxu1 %v6860_v35  ;;  %810 = vmatprep.subr.bf16.mxu0 %v6861_v36  ;;  %v6948_v35 = vld [vmem:[%s10587_s1 + $0x450] ss:$24 sps:$4 sm:$0xff]   ;;  %v6953_v36 = vld [vmem:[%s10587_s1 + $0x194] ss:$24 sps:$4 sm:$0xff]  }
  0x4d   : > { %851 = vmatprep.subr.bf16.mxu1 %v6863_v37  ;;  %v6956_v37 = vld [vmem:[%s10587_s1 + $0x484] ss:$24 sps:$4 sm:$0xff]  }
  0x4f   : > { %811 = vmatpush1.bf16.msra.mxu0 %v6865_v38  ;;  %v6951_v38 = vld [vmem:[%s10587_s1 + $0x190] ss:$24 sps:$4 sm:$0xff]  }
  0x50   : > { %852 = vmatpush1.bf16.msra.mxu1 %v6866_v39  ;;  %812 = vmatprep.subr.bf16.mxu0 %v6867_v40  ;;  %v6954_v39 = vld [vmem:[%s10587_s1 + $0x480] ss:$24 sps:$4 sm:$0xff]   ;;  %v6959_v40 = vld [vmem:[%s10587_s1 + $0x1c4] ss:$24 sps:$4 sm:$0xff]  }
  0x51   : > { %853 = vmatprep.subr.bf16.mxu1 %v6869_v41  ;;  %v6962_v41 = vld [vmem:[%s10587_s1 + $0x4b4] ss:$24 sps:$4 sm:$0xff]  }
  0x53   : > { %813 = vmatpush1.bf16.msra.mxu0 %v6871_v42  ;;  %v6957_v42 = vld [vmem:[%s10587_s1 + $0x1c0] ss:$24 sps:$4 sm:$0xff]  }
  0x54   : > { %854 = vmatpush1.bf16.msra.mxu1 %v6872_v43  ;;  %814 = vmatprep.subr.bf16.mxu0 %v6873_v44  ;;  %v6960_v43 = vld [vmem:[%s10587_s1 + $0x4b0] ss:$24 sps:$4 sm:$0xff]   ;;  %v6965_v44 = vld [vmem:[%s10587_s1 + $0x1f4] ss:$24 sps:$4 sm:$0xff]  }
  0x55   : > { %855 = vmatprep.subr.bf16.mxu1 %v6875_v45  ;;  %v6968_v45 = vld [vmem:[%s10587_s1 + $0x4e4] ss:$24 sps:$4 sm:$0xff]  }
  0x57   : > { %815 = vmatpush1.bf16.msra.mxu0 %v6877_v48  ;;  %v6966_v48 = vld [vmem:[%s10587_s1 + $0x4e0] ss:$24 sps:$4 sm:$0xff]  }
  0x58   : > { %856 = vmatpush1.bf16.msra.mxu1 %v6878_v49  ;;  %816 = vmatprep.subr.bf16.mxu0 %v6879_v50  ;;  %v6971_v49 = vld [vmem:[%s10587_s1 + $0x224] ss:$24 sps:$4 sm:$0xff]   ;;  %v6974_v50 = vld [vmem:[%s10587_s1 + $0x514] ss:$24 sps:$4 sm:$0xff]  }
  0x59   : > { %857 = vmatprep.subr.bf16.mxu1 %v6881_v51  ;;  %v6969_v51 = vld [vmem:[%s10587_s1 + $0x220] ss:$24 sps:$4 sm:$0xff]  }
  0x5b   : > { %817 = vmatpush1.bf16.msra.mxu0 %v6883_v52  ;;  %v6972_v52 = vld [vmem:[%s10587_s1 + $0x510] ss:$24 sps:$4 sm:$0xff]  }
  0x5c   : > { %858 = vmatpush1.bf16.msra.mxu1 %v6884_v53  ;;  %818 = vmatprep.subr.bf16.mxu0 %v6885_v54  ;;  %v6977_v53 = vld [vmem:[%s10587_s1 + $0x254] ss:$24 sps:$4 sm:$0xff]   ;;  %v6980_v54 = vld [vmem:[%s10587_s1 + $0x544] ss:$24 sps:$4 sm:$0xff]  }
  0x5d   : > { %859 = vmatprep.subr.bf16.mxu1 %v6887_v55  ;;  %v6975_v55 = vld [vmem:[%s10587_s1 + $0x250] ss:$24 sps:$4 sm:$0xff]  }
  0x5f   : > { %819 = vmatpush1.bf16.msra.mxu0 %v6889_v56  ;;  %v6978_v56 = vld [vmem:[%s10587_s1 + $0x540] ss:$24 sps:$4 sm:$0xff]  }
  0x60   : > { %860 = vmatpush1.bf16.msra.mxu1 %v6890_v57  ;;  %820 = vmatprep.subr.bf16.mxu0 %v6891_v58  ;;  %v6983_v57 = vld [vmem:[%s10587_s1 + $0x284] ss:$24 sps:$4 sm:$0xff]   ;;  %v6986_v58 = vld [vmem:[%s10587_s1 + $0x574] ss:$24 sps:$4 sm:$0xff]  }
  0x61   : > { %861 = vmatprep.subr.bf16.mxu1 %v6893_v59  ;;  %v6981_v59 = vld [vmem:[%s10587_s1 + $0x280] ss:$24 sps:$4 sm:$0xff]  }
  0x63   : > { %821 = vmatpush1.bf16.msra.mxu0 %v6895_v60  ;;  %v6984_v60 = vld [vmem:[%s10587_s1 + $0x570] ss:$24 sps:$4 sm:$0xff]  }
  0x64   : > { %862 = vmatpush1.bf16.msra.mxu1 %v6896_v61  ;;  %822 = vmatprep.subr.bf16.mxu0 %v6897_v62  ;;  %v6989_v61 = vld [vmem:[%s10587_s1 + $0x2b4] ss:$24 sps:$4 sm:$0xff]   ;;  %v6992_v62 = vld [vmem:[%s10587_s1 + $0x5a4] ss:$24 sps:$4 sm:$0xff]  }
  0x65   : > { %863 = vmatprep.subr.bf16.mxu1 %v6899_v63  ;;  %v6987_v63 = vld [vmem:[%s10587_s1 + $0x2b0] ss:$24 sps:$4 sm:$0xff]  }
  0x67   : > { %823 = vmatpush1.bf16.msra.mxu0 %v6901_v0  ;;  %v6990_v0 = vld [vmem:[%s10587_s1 + $0x5a0] ss:$24 sps:$4 sm:$0xff]  }
  0x68   : > { %864 = vmatpush1.bf16.msra.mxu1 %v6902_v1  ;;  %874 = vmatprep.subr.bf16.mxu0 %v6905_v3  ;;  %v6995_v1 = vld [vmem:[%s10587_s1 + $0x2e4] ss:$24 sps:$4 sm:$0xff]   ;;  %v6993_v3 = vld [vmem:[%s10587_s1 + $0x2e0] ss:$24 sps:$4 sm:$0xff]  }
  0x69   : > { %1498 = vmatprep.subr.bf16.mxu1 %v6908_v4  ;;  %v6996_v4 = vld [vmem:[%s10587_s1 + $0x5d0] ss:$24 sps:$4 sm:$0xff]  }
  0x6a   : > { %825 = vmatmul.mubr.bf16.vlgmr.msra.gmra.mrb[0].mxu0 %v7903_v5 }
  0x6b   : > { %866 = vmatmul.mubr.bf16.vlgmr.msra.gmra.mrb[0].mxu1 %v7903_v5  ;;  %875 = vmatpush1.bf16.msra.mxu0 %v6903_v6  ;;  %v7001_v6 = vld [vmem:[%s10587_s1 + $0x30c] ss:$24 sps:$4 sm:$0xff]  }
  0x6c   : > { %1499 = vmatpush1.bf16.msra.mxu1 %v6906_v7  ;;  %876 = vmatprep.subr.bf16.mxu0 %v6911_v8  ;;  %v7004_v7 = vld [vmem:[%s10587_s1 + $0x314] ss:$24 sps:$4 sm:$0xff]   ;;  %v6999_v8 = vld [vmem:[%s10587_s1 + $0x308] ss:$24 sps:$4 sm:$0xff]  }
  0x6d   : > { %1500 = vmatprep.subr.bf16.mxu1 %v6914_v9  ;;  %906 = vmatprep.mubr.bf16.mxu0 %v7838_v47  ;;  %v7002_v9 = vld [vmem:[%s10587_s1 + $0x310] ss:$24 sps:$4 sm:$0xff]  }
  0x6e   : > { %1530 = vmatprep.mubr.bf16.mxu1 %v7838_v47 }
  0x6f   : > { %877 = vmatpush1.bf16.msra.mxu0 %v6909_v10  ;;  %v7007_v10 = vld [vmem:[%s10587_s1 + $0x33c] ss:$24 sps:$4 sm:$0xff]  }
  0x70   : > { %1501 = vmatpush1.bf16.msra.mxu1 %v6912_v11  ;;  %878 = vmatprep.subr.bf16.mxu0 %v6917_v12  ;;  %v7010_v11 = vld [vmem:[%s10587_s1 + $0x344] ss:$24 sps:$4 sm:$0xff]   ;;  %v7005_v12 = vld [vmem:[%s10587_s1 + $0x338] ss:$24 sps:$4 sm:$0xff]  }
  0x71   : > { %1502 = vmatprep.subr.bf16.mxu1 %v6920_v13  ;;  %v7008_v13 = vld [vmem:[%s10587_s1 + $0x340] ss:$24 sps:$4 sm:$0xff]  }
  0x73   : > { %879 = vmatpush1.bf16.msra.mxu0 %v6915_v14  ;;  %v7013_v14 = vld [vmem:[%s10587_s1 + $0x36c] ss:$24 sps:$4 sm:$0xff]  }
  0x74   : > { %1503 = vmatpush1.bf16.msra.mxu1 %v6918_v15  ;;  %880 = vmatprep.subr.bf16.mxu0 %v6923_v16  ;;  %v7016_v15 = vld [vmem:[%s10587_s1 + $0x374] ss:$24 sps:$4 sm:$0xff]   ;;  %v7011_v16 = vld [vmem:[%s10587_s1 + $0x368] ss:$24 sps:$4 sm:$0xff]  }
  0x75   : > { %1504 = vmatprep.subr.bf16.mxu1 %v6926_v17  ;;  %v7014_v17 = vld [vmem:[%s10587_s1 + $0x370] ss:$24 sps:$4 sm:$0xff]  }
  0x77   : > { %881 = vmatpush1.bf16.msra.mxu0 %v6921_v18  ;;  %v7019_v18 = vld [vmem:[%s10587_s1 + $0x39c] ss:$24 sps:$4 sm:$0xff]  }
  0x78   : > { %1505 = vmatpush1.bf16.msra.mxu1 %v6924_v19  ;;  %882 = vmatprep.subr.bf16.mxu0 %v6929_v20  ;;  %v7022_v19 = vld [vmem:[%s10587_s1 + $0x3a4] ss:$24 sps:$4 sm:$0xff]   ;;  %v7017_v20 = vld [vmem:[%s10587_s1 + $0x398] ss:$24 sps:$4 sm:$0xff]  }
  0x79   : > { %1506 = vmatprep.subr.bf16.mxu1 %v6932_v21  ;;  %v7020_v21 = vld [vmem:[%s10587_s1 + $0x3a0] ss:$24 sps:$4 sm:$0xff]  }
  0x7b   : > { %883 = vmatpush1.bf16.msra.mxu0 %v6927_v22  ;;  %v7025_v22 = vld [vmem:[%s10587_s1 + $0x3cc] ss:$24 sps:$4 sm:$0xff]  }
  0x7c   : > { %1507 = vmatpush1.bf16.msra.mxu1 %v6930_v23  ;;  %884 = vmatprep.subr.bf16.mxu0 %v6935_v24  ;;  %v7028_v23 = vld [vmem:[%s10587_s1 + $0x3d4] ss:$24 sps:$4 sm:$0xff]   ;;  %v7023_v24 = vld [vmem:[%s10587_s1 + $0x3c8] ss:$24 sps:$4 sm:$0xff]  }
  0x7d   : > { %1508 = vmatprep.subr.bf16.mxu1 %v6938_v25  ;;  %v7026_v25 = vld [vmem:[%s10587_s1 + $0x3d0] ss:$24 sps:$4 sm:$0xff]  }
  0x7f   : > { %885 = vmatpush1.bf16.msra.mxu0 %v6933_v26  ;;  %v7031_v26 = vld [vmem:[%s10587_s1 + $0x3fc] ss:$24 sps:$4 sm:$0xff]  }
  0x80   : > { %1509 = vmatpush1.bf16.msra.mxu1 %v6936_v27  ;;  %886 = vmatprep.subr.bf16.mxu0 %v6941_v28  ;;  %v7034_v27 = vld [vmem:[%s10587_s1 + $0x404] ss:$24 sps:$4 sm:$0xff]   ;;  %v7029_v28 = vld [vmem:[%s10587_s1 + $0x3f8] ss:$24 sps:$4 sm:$0xff]  }
  0x81   : > { %1510 = vmatprep.subr.bf16.mxu1 %v6944_v29  ;;  %v7032_v29 = vld [vmem:[%s10587_s1 + $0x400] ss:$24 sps:$4 sm:$0xff]  }
  0x83   : > { %887 = vmatpush1.bf16.msra.mxu0 %v6939_v30  ;;  %v7037_v30 = vld [vmem:[%s10587_s1 + $0x42c] ss:$24 sps:$4 sm:$0xff]  }
  0x84   : > { %1511 = vmatpush1.bf16.msra.mxu1 %v6942_v31  ;;  %888 = vmatprep.subr.bf16.mxu0 %v6947_v32  ;;  %v7040_v31 = vld [vmem:[%s10587_s1 + $0x434] ss:$24 sps:$4 sm:$0xff]   ;;  %v7035_v32 = vld [vmem:[%s10587_s1 + $0x428] ss:$24 sps:$4 sm:$0xff]  }
  0x85   : > { %1512 = vmatprep.subr.bf16.mxu1 %v6950_v33  ;;  %v7038_v33 = vld [vmem:[%s10587_s1 + $0x430] ss:$24 sps:$4 sm:$0xff]  }
  0x87   : > { %889 = vmatpush1.bf16.msra.mxu0 %v6945_v34  ;;  %v7043_v34 = vld [vmem:[%s10587_s1 + $0x45c] ss:$24 sps:$4 sm:$0xff]  }
  0x88   : > { %1513 = vmatpush1.bf16.msra.mxu1 %v6948_v35  ;;  %890 = vmatprep.subr.bf16.mxu0 %v6953_v36  ;;  %v7046_v35 = vld [vmem:[%s10587_s1 + $0x464] ss:$24 sps:$4 sm:$0xff]   ;;  %v7041_v36 = vld [vmem:[%s10587_s1 + $0x458] ss:$24 sps:$4 sm:$0xff]  }
  0x89   : > { %1514 = vmatprep.subr.bf16.mxu1 %v6956_v37  ;;  %v7044_v37 = vld [vmem:[%s10587_s1 + $0x460] ss:$24 sps:$4 sm:$0xff]  }
  0x8b   : > { %891 = vmatpush1.bf16.msra.mxu0 %v6951_v38  ;;  %v7049_v38 = vld [vmem:[%s10587_s1 + $0x48c] ss:$24 sps:$4 sm:$0xff]  }
  0x8c   : > { %1515 = vmatpush1.bf16.msra.mxu1 %v6954_v39  ;;  %892 = vmatprep.subr.bf16.mxu0 %v6959_v40  ;;  %v7052_v39 = vld [vmem:[%s10587_s1 + $0x494] ss:$24 sps:$4 sm:$0xff]   ;;  %v7047_v40 = vld [vmem:[%s10587_s1 + $0x488] ss:$24 sps:$4 sm:$0xff]  }
  0x8d   : > { %1516 = vmatprep.subr.bf16.mxu1 %v6962_v41  ;;  %v7050_v41 = vld [vmem:[%s10587_s1 + $0x490] ss:$24 sps:$4 sm:$0xff]  }
  0x8f   : > { %893 = vmatpush1.bf16.msra.mxu0 %v6957_v42  ;;  %v7055_v42 = vld [vmem:[%s10587_s1 + $0x4bc] ss:$24 sps:$4 sm:$0xff]  }
  0x90   : > { %1517 = vmatpush1.bf16.msra.mxu1 %v6960_v43  ;;  %894 = vmatprep.subr.bf16.mxu0 %v6965_v44  ;;  %v7058_v43 = vld [vmem:[%s10587_s1 + $0x4c4] ss:$24 sps:$4 sm:$0xff]   ;;  %v7053_v44 = vld [vmem:[%s10587_s1 + $0x4b8] ss:$24 sps:$4 sm:$0xff]  }
  0x91   : > { %1518 = vmatprep.subr.bf16.mxu1 %v6968_v45  ;;  %v7056_v45 = vld [vmem:[%s10587_s1 + $0x4c0] ss:$24 sps:$4 sm:$0xff]  }
  0x93   : > { %895 = vmatpush1.bf16.msra.mxu0 %v6963_v46  ;;  %v7061_v46 = vld [vmem:[%s10587_s1 + $0x4ec] ss:$24 sps:$4 sm:$0xff]  }
  0x94   : > { %1519 = vmatpush1.bf16.msra.mxu1 %v6966_v48  ;;  %896 = vmatprep.subr.bf16.mxu0 %v6971_v49  ;;  %v7064_v48 = vld [vmem:[%s10587_s1 + $0x4f4] ss:$24 sps:$4 sm:$0xff]   ;;  %v7059_v49 = vld [vmem:[%s10587_s1 + $0x4e8] ss:$24 sps:$4 sm:$0xff]  }
  0x95   : > { %1520 = vmatprep.subr.bf16.mxu1 %v6974_v50  ;;  %v7062_v50 = vld [vmem:[%s10587_s1 + $0x4f0] ss:$24 sps:$4 sm:$0xff]  }
  0x97   : > { %897 = vmatpush1.bf16.msra.mxu0 %v6969_v51  ;;  %v7067_v51 = vld [vmem:[%s10587_s1 + $0x51c] ss:$24 sps:$4 sm:$0xff]  }
  0x98   : > { %1521 = vmatpush1.bf16.msra.mxu1 %v6972_v52  ;;  %898 = vmatprep.subr.bf16.mxu0 %v6977_v53  ;;  %v7070_v52 = vld [vmem:[%s10587_s1 + $0x524] ss:$24 sps:$4 sm:$0xff]   ;;  %v7065_v53 = vld [vmem:[%s10587_s1 + $0x518] ss:$24 sps:$4 sm:$0xff]  }
  0x99   : > { %1522 = vmatprep.subr.bf16.mxu1 %v6980_v54  ;;  %v7068_v54 = vld [vmem:[%s10587_s1 + $0x520] ss:$24 sps:$4 sm:$0xff]  }
  0x9b   : > { %899 = vmatpush1.bf16.msra.mxu0 %v6975_v55  ;;  %v7073_v55 = vld [vmem:[%s10587_s1 + $0x54c] ss:$24 sps:$4 sm:$0xff]  }
  0x9c   : > { %1523 = vmatpush1.bf16.msra.mxu1 %v6978_v56  ;;  %900 = vmatprep.subr.bf16.mxu0 %v6983_v57  ;;  %v7076_v56 = vld [vmem:[%s10587_s1 + $0x554] ss:$24 sps:$4 sm:$0xff]   ;;  %v7071_v57 = vld [vmem:[%s10587_s1 + $0x548] ss:$24 sps:$4 sm:$0xff]  }
  0x9d   : > { %1524 = vmatprep.subr.bf16.mxu1 %v6986_v58  ;;  %v7074_v58 = vld [vmem:[%s10587_s1 + $0x550] ss:$24 sps:$4 sm:$0xff]  }
  0x9f   : > { %901 = vmatpush1.bf16.msra.mxu0 %v6981_v59  ;;  %v7079_v59 = vld [vmem:[%s10587_s1 + $0x57c] ss:$24 sps:$4 sm:$0xff]  }
  0xa0   : > { %1525 = vmatpush1.bf16.msra.mxu1 %v6984_v60  ;;  %902 = vmatprep.subr.bf16.mxu0 %v6989_v61  ;;  %v7082_v60 = vld [vmem:[%s10587_s1 + $0x584] ss:$24 sps:$4 sm:$0xff]   ;;  %v7077_v61 = vld [vmem:[%s10587_s1 + $0x578] ss:$24 sps:$4 sm:$0xff]  }
  0xa1   : > { %1526 = vmatprep.subr.bf16.mxu1 %v6992_v62  ;;  %v7080_v62 = vld [vmem:[%s10587_s1 + $0x580] ss:$24 sps:$4 sm:$0xff]  }
  0xa3   : > { %903 = vmatpush1.bf16.msra.mxu0 %v6987_v63  ;;  %v7085_v63 = vld [vmem:[%s10587_s1 + $0x5ac] ss:$24 sps:$4 sm:$0xff]  }
  0xa4   : > { %1527 = vmatpush1.bf16.msra.mxu1 %v6990_v0  ;;  %904 = vmatprep.subr.bf16.mxu0 %v6995_v1  ;;  %v7088_v0 = vld [vmem:[%s10587_s1 + $0x5b4] ss:$24 sps:$4 sm:$0xff]   ;;  %v7083_v1 = vld [vmem:[%s10587_s1 + $0x5a8] ss:$24 sps:$4 sm:$0xff]  }
  0xa5   : > { %1528 = vmatprep.subr.bf16.mxu1 %v6998_v2  ;;  %v7086_v2 = vld [vmem:[%s10587_s1 + $0x5b0] ss:$24 sps:$4 sm:$0xff]  }
  0xa7   : > { %905 = vmatpush1.bf16.msra.mxu0 %v6993_v3  ;;  %v7091_v3 = vld [vmem:[%s10587_s1 + $0x5dc] ss:$24 sps:$4 sm:$0xff]  }
  0xa8   : > { %1529 = vmatpush1.bf16.msra.mxu1 %v6996_v4  ;;  %1539 = vmatprep.subr.bf16.mxu0 %v7001_v6  ;;  %v7094_v4 = vld [vmem:[%s10587_s1 + $0x5e4] ss:$24 sps:$4 sm:$0xff]   ;;  %v7089_v6 = vld [vmem:[%s10587_s1 + $0x5d8] ss:$24 sps:$4 sm:$0xff]  }
  0xa9   : > { %1580 = vmatprep.subr.bf16.mxu1 %v7004_v7  ;;  %v7092_v7 = vld [vmem:[%s10587_s1 + $0x5e0] ss:$24 sps:$4 sm:$0xff]  }
  0xaa   : > { %907 = vmatmul.mubr.bf16.vlgmr.msra.gmra.mrb[4].mxu0 %v7903_v5 }
  0xab   : > { %1531 = vmatmul.mubr.bf16.vlgmr.msra.gmra.mrb[4].mxu1 %v7903_v5  ;;  %1540 = vmatpush1.bf16.msra.mxu0 %v6999_v8  ;;  %v7097_v8 = vld [vmem:[%s10587_s1 + $0x604] ss:$24 sps:$4 sm:$0xff]  }
  0xac   : > { %1581 = vmatpush1.bf16.msra.mxu1 %v7002_v9  ;;  %1541 = vmatprep.subr.bf16.mxu0 %v7007_v10  ;;  %v7100_v9 = vld [vmem:[%s10587_s1 + $0x60c] ss:$24 sps:$4 sm:$0xff]   ;;  %v7095_v10 = vld [vmem:[%s10587_s1 + $0x600] ss:$24 sps:$4 sm:$0xff]  }
  0xad   : > { %1582 = vmatprep.subr.bf16.mxu1 %v7010_v11  ;;  %1571 = vmatprep.mubr.bf16.mxu0 %v7838_v47  ;;  %v7098_v11 = vld [vmem:[%s10587_s1 + $0x608] ss:$24 sps:$4 sm:$0xff]  }
  0xae   : > { %1612 = vmatprep.mubr.bf16.mxu1 %v7838_v47 }
  0xaf   : > { %1542 = vmatpush1.bf16.msra.mxu0 %v7005_v12  ;;  %v7103_v12 = vld [vmem:[%s10587_s1 + $0x634] ss:$24 sps:$4 sm:$0xff]  }
  0xb0   : > { %1583 = vmatpush1.bf16.msra.mxu1 %v7008_v13  ;;  %1543 = vmatprep.subr.bf16.mxu0 %v7013_v14  ;;  %v7106_v13 = vld [vmem:[%s10587_s1 + $0x63c] ss:$24 sps:$4 sm:$0xff]   ;;  %v7101_v14 = vld [vmem:[%s10587_s1 + $0x630] ss:$24 sps:$4 sm:$0xff]  }
  0xb1   : > { %1584 = vmatprep.subr.bf16.mxu1 %v7016_v15  ;;  %v7104_v15 = vld [vmem:[%s10587_s1 + $0x638] ss:$24 sps:$4 sm:$0xff]  }
  0xb3   : > { %1544 = vmatpush1.bf16.msra.mxu0 %v7011_v16  ;;  %v7109_v16 = vld [vmem:[%s10587_s1 + $0x664] ss:$24 sps:$4 sm:$0xff]  }
  0xb4   : > { %1585 = vmatpush1.bf16.msra.mxu1 %v7014_v17  ;;  %1545 = vmatprep.subr.bf16.mxu0 %v7019_v18  ;;  %v7112_v17 = vld [vmem:[%s10587_s1 + $0x66c] ss:$24 sps:$4 sm:$0xff]   ;;  %v7107_v18 = vld [vmem:[%s10587_s1 + $0x660] ss:$24 sps:$4 sm:$0xff]  }
  0xb5   : > { %1586 = vmatprep.subr.bf16.mxu1 %v7022_v19  ;;  %v7110_v19 = vld [vmem:[%s10587_s1 + $0x668] ss:$24 sps:$4 sm:$0xff]  }
  0xb7   : > { %1546 = vmatpush1.bf16.msra.mxu0 %v7017_v20  ;;  %v7115_v20 = vld [vmem:[%s10587_s1 + $0x694] ss:$24 sps:$4 sm:$0xff]  }
  0xb8   : > { %1587 = vmatpush1.bf16.msra.mxu1 %v7020_v21  ;;  %1547 = vmatprep.subr.bf16.mxu0 %v7025_v22  ;;  %v7118_v21 = vld [vmem:[%s10587_s1 + $0x69c] ss:$24 sps:$4 sm:$0xff]   ;;  %v7113_v22 = vld [vmem:[%s10587_s1 + $0x690] ss:$24 sps:$4 sm:$0xff]  }
  0xb9   : > { %1588 = vmatprep.subr.bf16.mxu1 %v7028_v23  ;;  %v7116_v23 = vld [vmem:[%s10587_s1 + $0x698] ss:$24 sps:$4 sm:$0xff]  }
  0xbb   : > { %1548 = vmatpush1.bf16.msra.mxu0 %v7023_v24  ;;  %v7121_v24 = vld [vmem:[%s10587_s1 + $0x6c4] ss:$24 sps:$4 sm:$0xff]  }
  0xbc   : > { %1589 = vmatpush1.bf16.msra.mxu1 %v7026_v25  ;;  %1549 = vmatprep.subr.bf16.mxu0 %v7031_v26  ;;  %v7124_v25 = vld [vmem:[%s10587_s1 + $0x6cc] ss:$24 sps:$4 sm:$0xff]   ;;  %v7119_v26 = vld [vmem:[%s10587_s1 + $0x6c0] ss:$24 sps:$4 sm:$0xff]  }
  0xbd   : > { %1590 = vmatprep.subr.bf16.mxu1 %v7034_v27  ;;  %v7122_v27 = vld [vmem:[%s10587_s1 + $0x6c8] ss:$24 sps:$4 sm:$0xff]  }
  0xbf   : > { %1550 = vmatpush1.bf16.msra.mxu0 %v7029_v28  ;;  %v7127_v28 = vld [vmem:[%s10587_s1 + $0x6f4] ss:$24 sps:$4 sm:$0xff]  }
  0xc0   : > { %1591 = vmatpush1.bf16.msra.mxu1 %v7032_v29  ;;  %1551 = vmatprep.subr.bf16.mxu0 %v7037_v30  ;;  %v7130_v29 = vld [vmem:[%s10587_s1 + $0x6fc] ss:$24 sps:$4 sm:$0xff]   ;;  %v7125_v30 = vld [vmem:[%s10587_s1 + $0x6f0] ss:$24 sps:$4 sm:$0xff]  }
  0xc1   : > { %1592 = vmatprep.subr.bf16.mxu1 %v7040_v31  ;;  %v7128_v31 = vld [vmem:[%s10587_s1 + $0x6f8] ss:$24 sps:$4 sm:$0xff]  }
  0xc3   : > { %1552 = vmatpush1.bf16.msra.mxu0 %v7035_v32  ;;  %v7133_v32 = vld [vmem:[%s10587_s1 + $0x724] ss:$24 sps:$4 sm:$0xff]  }
  0xc4   : > { %1593 = vmatpush1.bf16.msra.mxu1 %v7038_v33  ;;  %1553 = vmatprep.subr.bf16.mxu0 %v7043_v34  ;;  %v7136_v33 = vld [vmem:[%s10587_s1 + $0x72c] ss:$24 sps:$4 sm:$0xff]   ;;  %v7131_v34 = vld [vmem:[%s10587_s1 + $0x720] ss:$24 sps:$4 sm:$0xff]  }
  0xc5   : > { %1594 = vmatprep.subr.bf16.mxu1 %v7046_v35  ;;  %v7134_v35 = vld [vmem:[%s10587_s1 + $0x728] ss:$24 sps:$4 sm:$0xff]  }
  0xc7   : > { %1554 = vmatpush1.bf16.msra.mxu0 %v7041_v36  ;;  %v7139_v36 = vld [vmem:[%s10587_s1 + $0x754] ss:$24 sps:$4 sm:$0xff]  }
  0xc8   : > { %1595 = vmatpush1.bf16.msra.mxu1 %v7044_v37  ;;  %1555 = vmatprep.subr.bf16.mxu0 %v7049_v38  ;;  %v7142_v37 = vld [vmem:[%s10587_s1 + $0x75c] ss:$24 sps:$4 sm:$0xff]   ;;  %v7137_v38 = vld [vmem:[%s10587_s1 + $0x750] ss:$24 sps:$4 sm:$0xff]  }
  0xc9   : > { %1596 = vmatprep.subr.bf16.mxu1 %v7052_v39  ;;  %v7140_v39 = vld [vmem:[%s10587_s1 + $0x758] ss:$24 sps:$4 sm:$0xff]  }
  0xcb   : > { %1556 = vmatpush1.bf16.msra.mxu0 %v7047_v40  ;;  %v7145_v40 = vld [vmem:[%s10587_s1 + $0x784] ss:$24 sps:$4 sm:$0xff]  }
  0xcc   : > { %1597 = vmatpush1.bf16.msra.mxu1 %v7050_v41  ;;  %1557 = vmatprep.subr.bf16.mxu0 %v7055_v42  ;;  %v7148_v41 = vld [vmem:[%s10587_s1 + $0x78c] ss:$24 sps:$4 sm:$0xff]   ;;  %v7143_v42 = vld [vmem:[%s10587_s1 + $0x780] ss:$24 sps:$4 sm:$0xff]  }
  0xcd   : > { %1598 = vmatprep.subr.bf16.mxu1 %v7058_v43  ;;  %v7146_v43 = vld [vmem:[%s10587_s1 + $0x788] ss:$24 sps:$4 sm:$0xff]  }
  0xcf   : > { %1558 = vmatpush1.bf16.msra.mxu0 %v7053_v44  ;;  %v7151_v44 = vld [vmem:[%s10587_s1 + $0x7b4] ss:$24 sps:$4 sm:$0xff]  }
  0xd0   : > { %1599 = vmatpush1.bf16.msra.mxu1 %v7056_v45  ;;  %1559 = vmatprep.subr.bf16.mxu0 %v7061_v46  ;;  %v7154_v45 = vld [vmem:[%s10587_s1 + $0x7bc] ss:$24 sps:$4 sm:$0xff]   ;;  %v7149_v46 = vld [vmem:[%s10587_s1 + $0x7b0] ss:$24 sps:$4 sm:$0xff]  }
  0xd1   : > { %1600 = vmatprep.subr.bf16.mxu1 %v7064_v48  ;;  %v7152_v48 = vld [vmem:[%s10587_s1 + $0x7b8] ss:$24 sps:$4 sm:$0xff]  }
  0xd3   : > { %1560 = vmatpush1.bf16.msra.mxu0 %v7059_v49  ;;  %v7157_v49 = vld [vmem:[%s10587_s1 + $0x7e4] ss:$24 sps:$4 sm:$0xff]  }
  0xd4   : > { %1601 = vmatpush1.bf16.msra.mxu1 %v7062_v50  ;;  %1561 = vmatprep.subr.bf16.mxu0 %v7067_v51  ;;  %v7160_v50 = vld [vmem:[%s10587_s1 + $0x7ec] ss:$24 sps:$4 sm:$0xff]   ;;  %v7155_v51 = vld [vmem:[%s10587_s1 + $0x7e0] ss:$24 sps:$4 sm:$0xff]  }
  0xd5   : > { %1602 = vmatprep.subr.bf16.mxu1 %v7070_v52  ;;  %v7158_v52 = vld [vmem:[%s10587_s1 + $0x7e8] ss:$24 sps:$4 sm:$0xff]  }
  0xd7   : > { %1562 = vmatpush1.bf16.msra.mxu0 %v7065_v53  ;;  %v7163_v53 = vld [vmem:[%s10587_s1 + $0x814] ss:$24 sps:$4 sm:$0xff]  }
  0xd8   : > { %1603 = vmatpush1.bf16.msra.mxu1 %v7068_v54  ;;  %1563 = vmatprep.subr.bf16.mxu0 %v7073_v55  ;;  %v7166_v54 = vld [vmem:[%s10587_s1 + $0x81c] ss:$24 sps:$4 sm:$0xff]   ;;  %v7161_v55 = vld [vmem:[%s10587_s1 + $0x810] ss:$24 sps:$4 sm:$0xff]  }
  0xd9   : > { %1604 = vmatprep.subr.bf16.mxu1 %v7076_v56  ;;  %v7164_v56 = vld [vmem:[%s10587_s1 + $0x818] ss:$24 sps:$4 sm:$0xff]  }
  0xdb   : > { %1564 = vmatpush1.bf16.msra.mxu0 %v7071_v57  ;;  %v7169_v57 = vld [vmem:[%s10587_s1 + $0x844] ss:$24 sps:$4 sm:$0xff]  }
  0xdc   : > { %1605 = vmatpush1.bf16.msra.mxu1 %v7074_v58  ;;  %1565 = vmatprep.subr.bf16.mxu0 %v7079_v59  ;;  %v7172_v58 = vld [vmem:[%s10587_s1 + $0x84c] ss:$24 sps:$4 sm:$0xff]   ;;  %v7167_v59 = vld [vmem:[%s10587_s1 + $0x840] ss:$24 sps:$4 sm:$0xff]  }
  0xdd   : > { %1606 = vmatprep.subr.bf16.mxu1 %v7082_v60  ;;  %v7170_v60 = vld [vmem:[%s10587_s1 + $0x848] ss:$24 sps:$4 sm:$0xff]  }
  0xdf   : > { %1566 = vmatpush1.bf16.msra.mxu0 %v7077_v61  ;;  %v7175_v61 = vld [vmem:[%s10587_s1 + $0x874] ss:$24 sps:$4 sm:$0xff]  }
  0xe0   : > { %1607 = vmatpush1.bf16.msra.mxu1 %v7080_v62  ;;  %1567 = vmatprep.subr.bf16.mxu0 %v7085_v63  ;;  %v7178_v62 = vld [vmem:[%s10587_s1 + $0x87c] ss:$24 sps:$4 sm:$0xff]   ;;  %v7173_v63 = vld [vmem:[%s10587_s1 + $0x870] ss:$24 sps:$4 sm:$0xff]  }
  0xe1   : > { %1608 = vmatprep.subr.bf16.mxu1 %v7088_v0  ;;  %v7176_v0 = vld [vmem:[%s10587_s1 + $0x878] ss:$24 sps:$4 sm:$0xff]  }
  0xe3   : > { %1568 = vmatpush1.bf16.msra.mxu0 %v7083_v1  ;;  %v7181_v1 = vld [vmem:[%s10587_s1 + $0x8a4] ss:$24 sps:$4 sm:$0xff]  }
  0xe4   : > { %1609 = vmatpush1.bf16.msra.mxu1 %v7086_v2  ;;  %1569 = vmatprep.subr.bf16.mxu0 %v7091_v3  ;;  %v7184_v2 = vld [vmem:[%s10587_s1 + $0x8ac] ss:$24 sps:$4 sm:$0xff]   ;;  %v7179_v3 = vld [vmem:[%s10587_s1 + $0x8a0] ss:$24 sps:$4 sm:$0xff]  }
  0xe5   : > { %1610 = vmatprep.subr.bf16.mxu1 %v7094_v4  ;;  %v7182_v4 = vld [vmem:[%s10587_s1 + $0x8a8] ss:$24 sps:$4 sm:$0xff]  }
  0xe7   : > { %1570 = vmatpush1.bf16.msra.mxu0 %v7089_v6  ;;  %v7187_v6 = vld [vmem:[%s10587_s1 + $0x8d4] ss:$24 sps:$4 sm:$0xff]  }
  0xe8   : > { %1611 = vmatpush1.bf16.msra.mxu1 %v7092_v7  ;;  %2204 = vmatprep.subr.bf16.mxu0 %v7097_v8  ;;  %v7190_v7 = vld [vmem:[%s10587_s1 + $0x8dc] ss:$24 sps:$4 sm:$0xff]   ;;  %v7185_v8 = vld [vmem:[%s10587_s1 + $0x8d0] ss:$24 sps:$4 sm:$0xff]  }
  0xe9   : > { %2245 = vmatprep.subr.bf16.mxu1 %v7100_v9  ;;  %v7188_v9 = vld [vmem:[%s10587_s1 + $0x8d8] ss:$24 sps:$4 sm:$0xff]  }
  0xea   : > { %1572 = vmatmul.mubr.bf16.vlgmr.msra.gmra.mrb[8].mxu0 %v7903_v5 }
  0xeb   : > { %1613 = vmatmul.mubr.bf16.vlgmr.msra.gmra.mrb[8].mxu1 %v7903_v5  ;;  %2205 = vmatpush1.bf16.msra.mxu0 %v7095_v10  ;;  %v7193_v10 = vld [vmem:[%s10587_s1 + $0x614] ss:$24 sps:$4 sm:$0xff]  }
  0xec   : > { %2246 = vmatpush1.bf16.msra.mxu1 %v7098_v11  ;;  %2206 = vmatprep.subr.bf16.mxu0 %v7103_v12  ;;  %v7196_v11 = vld [vmem:[%s10587_s1 + $0x904] ss:$24 sps:$4 sm:$0xff]   ;;  %v7191_v12 = vld [vmem:[%s10587_s1 + $0x610] ss:$24 sps:$4 sm:$0xff]  }
  0xed   : > { %2247 = vmatprep.subr.bf16.mxu1 %v7106_v13  ;;  %2236 = vmatprep.mubr.bf16.mxu0 %v7838_v47  ;;  %v7194_v13 = vld [vmem:[%s10587_s1 + $0x900] ss:$24 sps:$4 sm:$0xff]  }
  0xee   : > { %2277 = vmatprep.mubr.bf16.mxu1 %v7838_v47 }
  0xef   : > { %2207 = vmatpush1.bf16.msra.mxu0 %v7101_v14  ;;  %v7199_v14 = vld [vmem:[%s10587_s1 + $0x644] ss:$24 sps:$4 sm:$0xff]  }
  0xf0   : > { %2248 = vmatpush1.bf16.msra.mxu1 %v7104_v15  ;;  %2208 = vmatprep.subr.bf16.mxu0 %v7109_v16  ;;  %v7202_v15 = vld [vmem:[%s10587_s1 + $0x934] ss:$24 sps:$4 sm:$0xff]   ;;  %v7197_v16 = vld [vmem:[%s10587_s1 + $0x640] ss:$24 sps:$4 sm:$0xff]  }
  0xf1   : > { %2249 = vmatprep.subr.bf16.mxu1 %v7112_v17  ;;  %v7200_v17 = vld [vmem:[%s10587_s1 + $0x930] ss:$24 sps:$4 sm:$0xff]  }
  0xf3   : > { %2209 = vmatpush1.bf16.msra.mxu0 %v7107_v18  ;;  %v7205_v18 = vld [vmem:[%s10587_s1 + $0x674] ss:$24 sps:$4 sm:$0xff]  }
  0xf4   : > { %2250 = vmatpush1.bf16.msra.mxu1 %v7110_v19  ;;  %2210 = vmatprep.subr.bf16.mxu0 %v7115_v20  ;;  %v7208_v19 = vld [vmem:[%s10587_s1 + $0x964] ss:$24 sps:$4 sm:$0xff]   ;;  %v7203_v20 = vld [vmem:[%s10587_s1 + $0x670] ss:$24 sps:$4 sm:$0xff]  }
  0xf5   : > { %2251 = vmatprep.subr.bf16.mxu1 %v7118_v21  ;;  %v7206_v21 = vld [vmem:[%s10587_s1 + $0x960] ss:$24 sps:$4 sm:$0xff]  }
  0xf7   : > { %2211 = vmatpush1.bf16.msra.mxu0 %v7113_v22  ;;  %v7211_v22 = vld [vmem:[%s10587_s1 + $0x6a4] ss:$24 sps:$4 sm:$0xff]  }
  0xf8   : > { %2252 = vmatpush1.bf16.msra.mxu1 %v7116_v23  ;;  %2212 = vmatprep.subr.bf16.mxu0 %v7121_v24  ;;  %v7214_v23 = vld [vmem:[%s10587_s1 + $0x994] ss:$24 sps:$4 sm:$0xff]   ;;  %v7209_v24 = vld [vmem:[%s10587_s1 + $0x6a0] ss:$24 sps:$4 sm:$0xff]  }
  0xf9   : > { %2253 = vmatprep.subr.bf16.mxu1 %v7124_v25  ;;  %v7212_v25 = vld [vmem:[%s10587_s1 + $0x990] ss:$24 sps:$4 sm:$0xff]  }
  0xfb   : > { %2213 = vmatpush1.bf16.msra.mxu0 %v7119_v26  ;;  %v7217_v26 = vld [vmem:[%s10587_s1 + $0x6d4] ss:$24 sps:$4 sm:$0xff]  }
  0xfc   : > { %2254 = vmatpush1.bf16.msra.mxu1 %v7122_v27  ;;  %2214 = vmatprep.subr.bf16.mxu0 %v7127_v28  ;;  %v7220_v27 = vld [vmem:[%s10587_s1 + $0x9c4] ss:$24 sps:$4 sm:$0xff]   ;;  %v7215_v28 = vld [vmem:[%s10587_s1 + $0x6d0] ss:$24 sps:$4 sm:$0xff]  }
  0xfd   : > { %2255 = vmatprep.subr.bf16.mxu1 %v7130_v29  ;;  %v7218_v29 = vld [vmem:[%s10587_s1 + $0x9c0] ss:$24 sps:$4 sm:$0xff]  }
  0xff   : > { %2215 = vmatpush1.bf16.msra.mxu0 %v7125_v30  ;;  %v7223_v30 = vld [vmem:[%s10587_s1 + $0x704] ss:$24 sps:$4 sm:$0xff]  }
 0x100   : > { %2256 = vmatpush1.bf16.msra.mxu1 %v7128_v31  ;;  %2216 = vmatprep.subr.bf16.mxu0 %v7133_v32  ;;  %v7226_v31 = vld [vmem:[%s10587_s1 + $0x9f4] ss:$24 sps:$4 sm:$0xff]   ;;  %v7221_v32 = vld [vmem:[%s10587_s1 + $0x700] ss:$24 sps:$4 sm:$0xff]  }
 0x101   : > { %2257 = vmatprep.subr.bf16.mxu1 %v7136_v33  ;;  %v7224_v33 = vld [vmem:[%s10587_s1 + $0x9f0] ss:$24 sps:$4 sm:$0xff]  }
 0x103   : > { %2217 = vmatpush1.bf16.msra.mxu0 %v7131_v34  ;;  %v7229_v34 = vld [vmem:[%s10587_s1 + $0x734] ss:$24 sps:$4 sm:$0xff]  }
 0x104   : > { %2258 = vmatpush1.bf16.msra.mxu1 %v7134_v35  ;;  %2218 = vmatprep.subr.bf16.mxu0 %v7139_v36  ;;  %v7232_v35 = vld [vmem:[%s10587_s1 + $0xa24] ss:$24 sps:$4 sm:$0xff]  }
 0x105   : > { %2259 = vmatprep.subr.bf16.mxu1 %v7142_v37  ;;  %v7227_v37 = vld [vmem:[%s10587_s1 + $0x730] ss:$24 sps:$4 sm:$0xff]  }
 0x107   : > { %2219 = vmatpush1.bf16.msra.mxu0 %v7137_v38  ;;  %v7230_v38 = vld [vmem:[%s10587_s1 + $0xa20] ss:$24 sps:$4 sm:$0xff]  }
 0x108   : > { %2260 = vmatpush1.bf16.msra.mxu1 %v7140_v39  ;;  %2220 = vmatprep.subr.bf16.mxu0 %v7145_v40 }
 0x109   : > { %2261 = vmatprep.subr.bf16.mxu1 %v7148_v41 }
 0x10b   : > { %2221 = vmatpush1.bf16.msra.mxu0 %v7143_v42 }
 0x10c   : > { %2262 = vmatpush1.bf16.msra.mxu1 %v7146_v43  ;;  %2222 = vmatprep.subr.bf16.mxu0 %v7151_v44 }
 0x10d   : > { %2263 = vmatprep.subr.bf16.mxu1 %v7154_v45  ;;  %v7235_v45 = vld [vmem:[%s10587_s1 + $0x764] ss:$24 sps:$4 sm:$0xff]  }
 0x10f   : > { %2223 = vmatpush1.bf16.msra.mxu0 %v7149_v46  ;;  %v7238_v46 = vld [vmem:[%s10587_s1 + $0xa54] ss:$24 sps:$4 sm:$0xff]  }
 0x110   : > { %2264 = vmatpush1.bf16.msra.mxu1 %v7152_v48  ;;  %2224 = vmatprep.subr.bf16.mxu0 %v7157_v49  ;;  %v7233_v49 = vld [vmem:[%s10587_s1 + $0x760] ss:$24 sps:$4 sm:$0xff]  }
 0x111   : > { %2265 = vmatprep.subr.bf16.mxu1 %v7160_v50  ;;  %v7236_v50 = vld [vmem:[%s10587_s1 + $0xa50] ss:$24 sps:$4 sm:$0xff]  }
 0x113   : > { %2225 = vmatpush1.bf16.msra.mxu0 %v7155_v51  ;;  %v7241_v51 = vld [vmem:[%s10587_s1 + $0x794] ss:$24 sps:$4 sm:$0xff]  }
 0x114   : > { %2266 = vmatpush1.bf16.msra.mxu1 %v7158_v52  ;;  %2226 = vmatprep.subr.bf16.mxu0 %v7163_v53  ;;  %v7244_v52 = vld [vmem:[%s10587_s1 + $0xa84] ss:$24 sps:$4 sm:$0xff]   ;;  %v7239_v53 = vld [vmem:[%s10587_s1 + $0x790] ss:$24 sps:$4 sm:$0xff]  }
 0x115   : > { %2267 = vmatprep.subr.bf16.mxu1 %v7166_v54  ;;  %v7242_v54 = vld [vmem:[%s10587_s1 + $0xa80] ss:$24 sps:$4 sm:$0xff]  }
 0x117   : > { %2227 = vmatpush1.bf16.msra.mxu0 %v7161_v55  ;;  %v7247_v55 = vld [vmem:[%s10587_s1 + $0x7c4] ss:$24 sps:$4 sm:$0xff]  }
 0x118   : > { %2268 = vmatpush1.bf16.msra.mxu1 %v7164_v56  ;;  %2228 = vmatprep.subr.bf16.mxu0 %v7169_v57  ;;  %v7250_v56 = vld [vmem:[%s10587_s1 + $0xab4] ss:$24 sps:$4 sm:$0xff]   ;;  %v7245_v57 = vld [vmem:[%s10587_s1 + $0x7c0] ss:$24 sps:$4 sm:$0xff]  }
 0x119   : > { %2269 = vmatprep.subr.bf16.mxu1 %v7172_v58  ;;  %v7248_v58 = vld [vmem:[%s10587_s1 + $0xab0] ss:$24 sps:$4 sm:$0xff]  }
 0x11b   : > { %2229 = vmatpush1.bf16.msra.mxu0 %v7167_v59  ;;  %v7253_v59 = vld [vmem:[%s10587_s1 + $0x7f4] ss:$24 sps:$4 sm:$0xff]  }
 0x11c   : > { %2270 = vmatpush1.bf16.msra.mxu1 %v7170_v60  ;;  %2230 = vmatprep.subr.bf16.mxu0 %v7175_v61  ;;  %v7256_v60 = vld [vmem:[%s10587_s1 + $0xae4] ss:$24 sps:$4 sm:$0xff]   ;;  %v7251_v61 = vld [vmem:[%s10587_s1 + $0x7f0] ss:$24 sps:$4 sm:$0xff]  }
 0x11d   : > { %2271 = vmatprep.subr.bf16.mxu1 %v7178_v62  ;;  %v7254_v62 = vld [vmem:[%s10587_s1 + $0xae0] ss:$24 sps:$4 sm:$0xff]  }
 0x11f   : > { %2231 = vmatpush1.bf16.msra.mxu0 %v7173_v63  ;;  %v7259_v63 = vld [vmem:[%s10587_s1 + $0x824] ss:$24 sps:$4 sm:$0xff]  }
 0x120   : > { %2272 = vmatpush1.bf16.msra.mxu1 %v7176_v0  ;;  %2232 = vmatprep.subr.bf16.mxu0 %v7181_v1  ;;  %v7262_v0 = vld [vmem:[%s10587_s1 + $0xb14] ss:$24 sps:$4 sm:$0xff]   ;;  %v7257_v1 = vld [vmem:[%s10587_s1 + $0x820] ss:$24 sps:$4 sm:$0xff]  }
 0x121   : > { %2273 = vmatprep.subr.bf16.mxu1 %v7184_v2  ;;  %v7260_v2 = vld [vmem:[%s10587_s1 + $0xb10] ss:$24 sps:$4 sm:$0xff]  }
 0x123   : > { %2233 = vmatpush1.bf16.msra.mxu0 %v7179_v3  ;;  %v7265_v3 = vld [vmem:[%s10587_s1 + $0x854] ss:$24 sps:$4 sm:$0xff]  }
 0x124   : > { %2274 = vmatpush1.bf16.msra.mxu1 %v7182_v4  ;;  %2234 = vmatprep.subr.bf16.mxu0 %v7187_v6  ;;  %v7268_v4 = vld [vmem:[%s10587_s1 + $0xb44] ss:$24 sps:$4 sm:$0xff]   ;;  %v7263_v6 = vld [vmem:[%s10587_s1 + $0x850] ss:$24 sps:$4 sm:$0xff]  }
 0x125   : > { %2275 = vmatprep.subr.bf16.mxu1 %v7190_v7  ;;  %v7266_v7 = vld [vmem:[%s10587_s1 + $0xb40] ss:$24 sps:$4 sm:$0xff]  }
 0x127   : > { %2235 = vmatpush1.bf16.msra.mxu0 %v7185_v8  ;;  %v7271_v8 = vld [vmem:[%s10587_s1 + $0x884] ss:$24 sps:$4 sm:$0xff]  }
 0x128   : > { %2276 = vmatpush1.bf16.msra.mxu1 %v7188_v9  ;;  %2286 = vmatprep.subr.bf16.mxu0 %v7193_v10  ;;  %v7274_v9 = vld [vmem:[%s10587_s1 + $0xb74] ss:$24 sps:$4 sm:$0xff]   ;;  %v7269_v10 = vld [vmem:[%s10587_s1 + $0x880] ss:$24 sps:$4 sm:$0xff]  }
 0x129   : > { %2910 = vmatprep.subr.bf16.mxu1 %v7196_v11  ;;  %v7272_v11 = vld [vmem:[%s10587_s1 + $0xb70] ss:$24 sps:$4 sm:$0xff]  }
 0x12a   : > { %2237 = vmatmul.mubr.bf16.vlgmr.msra.gmra.mrb[12].mxu0 %v7903_v5 }
 0x12b   : > { %2278 = vmatmul.mubr.bf16.vlgmr.msra.gmra.mrb[12].mxu1 %v7903_v5  ;;  %2287 = vmatpush1.bf16.msra.mxu0 %v7191_v12  ;;  %v7277_v12 = vld [vmem:[%s10587_s1 + $0x8b4] ss:$24 sps:$4 sm:$0xff]  }
 0x12c   : > { %2911 = vmatpush1.bf16.msra.mxu1 %v7194_v13  ;;  %2288 = vmatprep.subr.bf16.mxu0 %v7199_v14  ;;  %v7280_v13 = vld [vmem:[%s10587_s1 + $0xba4] ss:$24 sps:$4 sm:$0xff]   ;;  %v7275_v14 = vld [vmem:[%s10587_s1 + $0x8b0] ss:$24 sps:$4 sm:$0xff]  }
 0x12d   : > { %2912 = vmatprep.subr.bf16.mxu1 %v7202_v15  ;;  %2318 = vmatprep.mubr.bf16.mxu0 %v7838_v47  ;;  %v7278_v15 = vld [vmem:[%s10587_s1 + $0xba0] ss:$24 sps:$4 sm:$0xff]  }
 0x12e   : > { %2942 = vmatprep.mubr.bf16.mxu1 %v7838_v47 }
 0x12f   : > { %2289 = vmatpush1.bf16.msra.mxu0 %v7197_v16  ;;  %v7283_v16 = vld [vmem:[%s10587_s1 + $0x8e4] ss:$24 sps:$4 sm:$0xff]  }
 0x130   : > { %2913 = vmatpush1.bf16.msra.mxu1 %v7200_v17  ;;  %2290 = vmatprep.subr.bf16.mxu0 %v7205_v18  ;;  %v7286_v17 = vld [vmem:[%s10587_s1 + $0xbd4] ss:$24 sps:$4 sm:$0xff]   ;;  %v7281_v18 = vld [vmem:[%s10587_s1 + $0x8e0] ss:$24 sps:$4 sm:$0xff]  }
 0x131   : > { %2914 = vmatprep.subr.bf16.mxu1 %v7208_v19  ;;  %v7284_v19 = vld [vmem:[%s10587_s1 + $0xbd0] ss:$24 sps:$4 sm:$0xff]  }
 0x133   : > { %2291 = vmatpush1.bf16.msra.mxu0 %v7203_v20  ;;  %v7289_v20 = vld [vmem:[%s10587_s1 + $0x90c] ss:$24 sps:$4 sm:$0xff]  }
 0x134   : > { %2915 = vmatpush1.bf16.msra.mxu1 %v7206_v21  ;;  %2292 = vmatprep.subr.bf16.mxu0 %v7211_v22  ;;  %v7292_v21 = vld [vmem:[%s10587_s1 + $0x914] ss:$24 sps:$4 sm:$0xff]   ;;  %v7287_v22 = vld [vmem:[%s10587_s1 + $0x908] ss:$24 sps:$4 sm:$0xff]  }
 0x135   : > { %2916 = vmatprep.subr.bf16.mxu1 %v7214_v23  ;;  %v7290_v23 = vld [vmem:[%s10587_s1 + $0x910] ss:$24 sps:$4 sm:$0xff]  }
 0x137   : > { %2293 = vmatpush1.bf16.msra.mxu0 %v7209_v24  ;;  %v7295_v24 = vld [vmem:[%s10587_s1 + $0x93c] ss:$24 sps:$4 sm:$0xff]  }
 0x138   : > { %2917 = vmatpush1.bf16.msra.mxu1 %v7212_v25  ;;  %2294 = vmatprep.subr.bf16.mxu0 %v7217_v26  ;;  %v7298_v25 = vld [vmem:[%s10587_s1 + $0x944] ss:$24 sps:$4 sm:$0xff]   ;;  %v7293_v26 = vld [vmem:[%s10587_s1 + $0x938] ss:$24 sps:$4 sm:$0xff]  }
 0x139   : > { %2918 = vmatprep.subr.bf16.mxu1 %v7220_v27  ;;  %v7296_v27 = vld [vmem:[%s10587_s1 + $0x940] ss:$24 sps:$4 sm:$0xff]  }
 0x13b   : > { %2295 = vmatpush1.bf16.msra.mxu0 %v7215_v28  ;;  %v7301_v28 = vld [vmem:[%s10587_s1 + $0x96c] ss:$24 sps:$4 sm:$0xff]  }
 0x13c   : > { %2919 = vmatpush1.bf16.msra.mxu1 %v7218_v29  ;;  %2296 = vmatprep.subr.bf16.mxu0 %v7223_v30  ;;  %v7304_v29 = vld [vmem:[%s10587_s1 + $0x974] ss:$24 sps:$4 sm:$0xff]   ;;  %v7299_v30 = vld [vmem:[%s10587_s1 + $0x968] ss:$24 sps:$4 sm:$0xff]  }
 0x13d   : > { %2920 = vmatprep.subr.bf16.mxu1 %v7226_v31  ;;  %v8569_v36 = vpop.f32.mrb[0].mxu0  ;;  %v7302_v31 = vld [vmem:[%s10587_s1 + $0x970] ss:$24 sps:$4 sm:$0xff]  }
 0x13e   : > { %v8577_v39 = vpop.f32.mrb[0].mxu1  ;;  %v8579_v40 = vpop.f32.mrb[1].mxu0 }
 0x13f   : > { %v8581_v41 = vpop.f32.mrb[1].mxu1  ;;  %v830_v42 = vpop.f32.mrb[2].mxu0  ;;  %2297 = vmatpush1.bf16.msra.mxu0 %v7221_v32  ;;  %v7307_v32 = vld [vmem:[%s10587_s1 + $0x99c] ss:$24 sps:$4 sm:$0xff]  }
 0x140   : > { %2921 = vmatpush1.bf16.msra.mxu1 %v7224_v33  ;;  %v871_v43 = vpop.f32.mrb[2].mxu1  ;;  %v831_v44 = vpop.f32.mrb[3].mxu0  ;;  %2298 = vmatprep.subr.bf16.mxu0 %v7229_v34  ;;  %v7310_v33 = vld [vmem:[%s10587_s1 + $0x9a4] ss:$24 sps:$4 sm:$0xff]   ;;  %v7305_v34 = vld [vmem:[%s10587_s1 + $0x998] ss:$24 sps:$4 sm:$0xff]  }
 0x141   : > { %2922 = vmatprep.subr.bf16.mxu1 %v7232_v35  ;;  %v872_v48 = vpop.f32.mrb[3].mxu1  ;;  %v7308_v35 = vld [vmem:[%s10587_s1 + $0x9a0] ss:$24 sps:$4 sm:$0xff]   ;;  %v7314_v43 = vld [vmem:[%s10587_s1 + $0x9d0] ss:$24 sps:$4 sm:$0xff]  }
 0x142   : > { %v7311_v42 = vld [vmem:[%s10587_s1 + $0x9c8] ss:$24 sps:$4 sm:$0xff]   ;;  %v7319_v44 = vld [vmem:[%s10587_s1 + $0x9fc] ss:$24 sps:$4 sm:$0xff]  }
 0x143   : > { %2299 = vmatpush1.bf16.msra.mxu0 %v7227_v37  ;;  %v7313_v37 = vld [vmem:[%s10587_s1 + $0x9cc] ss:$24 sps:$4 sm:$0xff]   ;;  %v7320_v48 = vld [vmem:[%s10587_s1 + $0xa00] ss:$24 sps:$4 sm:$0xff]  }
 0x144   : > { %2923 = vmatpush1.bf16.msra.mxu1 %v7230_v38  ;;  %2300 = vmatprep.subr.bf16.mxu0 %v7235_v45  ;;  %v7316_v38 = vld [vmem:[%s10587_s1 + $0x9d4] ss:$24 sps:$4 sm:$0xff]   ;;  %v7322_v45 = vld [vmem:[%s10587_s1 + $0xa04] ss:$24 sps:$4 sm:$0xff]  }
 0x145   : > { %2924 = vmatprep.subr.bf16.mxu1 %v7238_v46  ;;  %v7317_v46 = vld [vmem:[%s10587_s1 + $0x9f8] ss:$24 sps:$4 sm:$0xff]  }
 0x147   : > { %2301 = vmatpush1.bf16.msra.mxu0 %v7233_v49  ;;  %v7325_v49 = vld [vmem:[%s10587_s1 + $0xa2c] ss:$24 sps:$4 sm:$0xff]  }
 0x148   : > { %2925 = vmatpush1.bf16.msra.mxu1 %v7236_v50  ;;  %2302 = vmatprep.subr.bf16.mxu0 %v7241_v51  ;;  %v7328_v50 = vld [vmem:[%s10587_s1 + $0xa34] ss:$24 sps:$4 sm:$0xff]  }
 0x149   : > { %2926 = vmatprep.subr.bf16.mxu1 %v7244_v52 }
 0x14b   : > { %2303 = vmatpush1.bf16.msra.mxu0 %v7239_v53 }
 0x14c   : > { %2927 = vmatpush1.bf16.msra.mxu1 %v7242_v54  ;;  %2304 = vmatprep.subr.bf16.mxu0 %v7247_v55 }
 0x14d   : > { %2928 = vmatprep.subr.bf16.mxu1 %v7250_v56 }
 0x14f   : > { %2305 = vmatpush1.bf16.msra.mxu0 %v7245_v57 }
 0x150   : > { %2929 = vmatpush1.bf16.msra.mxu1 %v7248_v58  ;;  %2306 = vmatprep.subr.bf16.mxu0 %v7253_v59  ;;  %v7323_v58 = vld [vmem:[%s10587_s1 + $0xa28] ss:$24 sps:$4 sm:$0xff]  }
 0x151   : > { %2930 = vmatprep.subr.bf16.mxu1 %v7256_v60  ;;  %v7326_v59 = vld [vmem:[%s10587_s1 + $0xa30] ss:$24 sps:$4 sm:$0xff]  }
 0x153   : > { %2307 = vmatpush1.bf16.msra.mxu0 %v7251_v61  ;;  %v7334_v61 = vld [vmem:[%s10587_s1 + $0xa64] ss:$24 sps:$4 sm:$0xff]  }
 0x154   : > { %2931 = vmatpush1.bf16.msra.mxu1 %v7254_v62  ;;  %2308 = vmatprep.subr.bf16.mxu0 %v7259_v63  ;;  %v7329_v63 = vld [vmem:[%s10587_s1 + $0xa58] ss:$24 sps:$4 sm:$0xff]  }
 0x155   : > { %2932 = vmatprep.subr.bf16.mxu1 %v7262_v0  ;;  %v7332_v0 = vld [vmem:[%s10587_s1 + $0xa60] ss:$24 sps:$4 sm:$0xff]  }
 0x157   : > { %2309 = vmatpush1.bf16.msra.mxu0 %v7257_v1  ;;  %v7337_v1 = vld [vmem:[%s10587_s1 + $0xa8c] ss:$24 sps:$4 sm:$0xff]  }
 0x158   : > { %2933 = vmatpush1.bf16.msra.mxu1 %v7260_v2  ;;  %2310 = vmatprep.subr.bf16.mxu0 %v7265_v3  ;;  %v7340_v2 = vld [vmem:[%s10587_s1 + $0xa94] ss:$24 sps:$4 sm:$0xff]   ;;  %v7335_v3 = vld [vmem:[%s10587_s1 + $0xa88] ss:$24 sps:$4 sm:$0xff]  }
 0x159   : > { %2934 = vmatprep.subr.bf16.mxu1 %v7268_v4  ;;  %v7338_v4 = vld [vmem:[%s10587_s1 + $0xa90] ss:$24 sps:$4 sm:$0xff]  }
 0x15b   : > { %2311 = vmatpush1.bf16.msra.mxu0 %v7263_v6  ;;  %v7343_v6 = vld [vmem:[%s10587_s1 + $0xabc] ss:$24 sps:$4 sm:$0xff]  }
 0x15c   : > { %2935 = vmatpush1.bf16.msra.mxu1 %v7266_v7  ;;  %2312 = vmatprep.subr.bf16.mxu0 %v7271_v8  ;;  %v7346_v7 = vld [vmem:[%s10587_s1 + $0xac4] ss:$24 sps:$4 sm:$0xff]   ;;  %v7341_v8 = vld [vmem:[%s10587_s1 + $0xab8] ss:$24 sps:$4 sm:$0xff]  }
 0x15d   : > { %2936 = vmatprep.subr.bf16.mxu1 %v7274_v9  ;;  %v7344_v9 = vld [vmem:[%s10587_s1 + $0xac0] ss:$24 sps:$4 sm:$0xff]  }
 0x15f   : > { %2313 = vmatpush1.bf16.msra.mxu0 %v7269_v10  ;;  %v7349_v10 = vld [vmem:[%s10587_s1 + $0xaec] ss:$24 sps:$4 sm:$0xff]  }
 0x160   : > { %2937 = vmatpush1.bf16.msra.mxu1 %v7272_v11  ;;  %2314 = vmatprep.subr.bf16.mxu0 %v7277_v12  ;;  %v7352_v11 = vld [vmem:[%s10587_s1 + $0xaf4] ss:$24 sps:$4 sm:$0xff]   ;;  %v7347_v12 = vld [vmem:[%s10587_s1 + $0xae8] ss:$24 sps:$4 sm:$0xff]  }
 0x161   : > { %2938 = vmatprep.subr.bf16.mxu1 %v7280_v13  ;;  %v7350_v13 = vld [vmem:[%s10587_s1 + $0xaf0] ss:$24 sps:$4 sm:$0xff]  }
 0x163   : > { %2315 = vmatpush1.bf16.msra.mxu0 %v7275_v14  ;;  %v7355_v14 = vld [vmem:[%s10587_s1 + $0xb1c] ss:$24 sps:$4 sm:$0xff]  }
 0x164   : > { %2939 = vmatpush1.bf16.msra.mxu1 %v7278_v15  ;;  %2316 = vmatprep.subr.bf16.mxu0 %v7283_v16  ;;  %v7358_v15 = vld [vmem:[%s10587_s1 + $0xb24] ss:$24 sps:$4 sm:$0xff]   ;;  %v7353_v16 = vld [vmem:[%s10587_s1 + $0xb18] ss:$24 sps:$4 sm:$0xff]  }
 0x165   : > { %2940 = vmatprep.subr.bf16.mxu1 %v7286_v17  ;;  %v7356_v17 = vld [vmem:[%s10587_s1 + $0xb20] ss:$24 sps:$4 sm:$0xff]  }
 0x167   : > { %2317 = vmatpush1.bf16.msra.mxu0 %v7281_v18  ;;  %v7361_v18 = vld [vmem:[%s10587_s1 + $0xb4c] ss:$24 sps:$4 sm:$0xff]  }
 0x168   : > { %2941 = vmatpush1.bf16.msra.mxu1 %v7284_v19  ;;  %2951 = vmatprep.subr.bf16.mxu0 %v7289_v20  ;;  %v7364_v19 = vld [vmem:[%s10587_s1 + $0xb54] ss:$24 sps:$4 sm:$0xff]   ;;  %v7359_v20 = vld [vmem:[%s10587_s1 + $0xb48] ss:$24 sps:$4 sm:$0xff]  }
 0x169   : > { %2992 = vmatprep.subr.bf16.mxu1 %v7292_v21  ;;  %v7362_v21 = vld [vmem:[%s10587_s1 + $0xb50] ss:$24 sps:$4 sm:$0xff]  }
 0x16a   : > { %2319 = vmatmul.mubr.bf16.vlgmr.msra.gmra.mrb[16].mxu0 %v7903_v5 }
 0x16b   : > { %2943 = vmatmul.mubr.bf16.vlgmr.msra.gmra.mrb[16].mxu1 %v7903_v5  ;;  %2952 = vmatpush1.bf16.msra.mxu0 %v7287_v22  ;;  %v7367_v22 = vld [vmem:[%s10587_s1 + $0xb7c] ss:$24 sps:$4 sm:$0xff]  }
 0x16c   : > { %2993 = vmatpush1.bf16.msra.mxu1 %v7290_v23  ;;  %2953 = vmatprep.subr.bf16.mxu0 %v7295_v24  ;;  %v7370_v23 = vld [vmem:[%s10587_s1 + $0xb84] ss:$24 sps:$4 sm:$0xff]   ;;  %v7365_v24 = vld [vmem:[%s10587_s1 + $0xb78] ss:$24 sps:$4 sm:$0xff]  }
 0x16d   : > { %2994 = vmatprep.subr.bf16.mxu1 %v7298_v25  ;;  %2983 = vmatprep.mubr.bf16.mxu0 %v7838_v47  ;;  %v7368_v25 = vld [vmem:[%s10587_s1 + $0xb80] ss:$24 sps:$4 sm:$0xff]  }
 0x16e   : > { %3024 = vmatprep.mubr.bf16.mxu1 %v7838_v47 }
 0x16f   : > { %2954 = vmatpush1.bf16.msra.mxu0 %v7293_v26  ;;  %v7373_v26 = vld [vmem:[%s10587_s1 + $0xbac] ss:$24 sps:$4 sm:$0xff]  }
 0x170   : > { %2995 = vmatpush1.bf16.msra.mxu1 %v7296_v27  ;;  %2955 = vmatprep.subr.bf16.mxu0 %v7301_v28  ;;  %v7376_v27 = vld [vmem:[%s10587_s1 + $0xbb4] ss:$24 sps:$4 sm:$0xff]   ;;  %v7371_v28 = vld [vmem:[%s10587_s1 + $0xba8] ss:$24 sps:$4 sm:$0xff]  }
 0x171   : > { %2996 = vmatprep.subr.bf16.mxu1 %v7304_v29  ;;  %v7374_v29 = vld [vmem:[%s10587_s1 + $0xbb0] ss:$24 sps:$4 sm:$0xff]  }
 0x173   : > { %2956 = vmatpush1.bf16.msra.mxu0 %v7299_v30  ;;  %v7379_v30 = vld [vmem:[%s10587_s1 + $0xbdc] ss:$24 sps:$4 sm:$0xff]  }
 0x174   : > { %2997 = vmatpush1.bf16.msra.mxu1 %v7302_v31  ;;  %2957 = vmatprep.subr.bf16.mxu0 %v7307_v32  ;;  %v7382_v31 = vld [vmem:[%s10587_s1 + $0xbe4] ss:$24 sps:$4 sm:$0xff]   ;;  %v7377_v32 = vld [vmem:[%s10587_s1 + $0xbd8] ss:$24 sps:$4 sm:$0xff]  }
 0x175   : > { %2998 = vmatprep.subr.bf16.mxu1 %v7310_v33  ;;  %v7380_v33 = vld [vmem:[%s10587_s1 + $0xbe0] ss:$24 sps:$4 sm:$0xff]  }
 0x177   : > { %2958 = vmatpush1.bf16.msra.mxu0 %v7305_v34  ;;  %v7385_v34 = vld [vmem:[%s10587_s1 + $0xc04] ss:$24 sps:$4 sm:$0xff]  }
 0x178   : > { %2999 = vmatpush1.bf16.msra.mxu1 %v7308_v35  ;;  %2959 = vmatprep.subr.bf16.mxu0 %v7313_v37  ;;  %v7388_v35 = vld [vmem:[%s10587_s1 + $0xc0c] ss:$24 sps:$4 sm:$0xff]   ;;  %v7383_v37 = vld [vmem:[%s10587_s1 + $0xc00] ss:$24 sps:$4 sm:$0xff]  }
 0x179   : > { %3000 = vmatprep.subr.bf16.mxu1 %v7316_v38  ;;  %v7386_v38 = vld [vmem:[%s10587_s1 + $0xc08] ss:$24 sps:$4 sm:$0xff]  }
 0x17b   : > { %2960 = vmatpush1.bf16.msra.mxu0 %v7311_v42  ;;  %v7391_v42 = vld [vmem:[%s10587_s1 + $0xc34] ss:$24 sps:$4 sm:$0xff]  }
 0x17c   : > { %3001 = vmatpush1.bf16.msra.mxu1 %v7314_v43  ;;  %2961 = vmatprep.subr.bf16.mxu0 %v7319_v44  ;;  %v7394_v43 = vld [vmem:[%s10587_s1 + $0xc3c] ss:$24 sps:$4 sm:$0xff]   ;;  %v7389_v44 = vld [vmem:[%s10587_s1 + $0xc30] ss:$24 sps:$4 sm:$0xff]  }
 0x17d   : > { %3002 = vmatprep.subr.bf16.mxu1 %v7322_v45  ;;  %v8773_v51 = vpop.f32.mrb[4].mxu0  ;;  %v7392_v45 = vld [vmem:[%s10587_s1 + $0xc38] ss:$24 sps:$4 sm:$0xff]  }
 0x17e   : > { %v1532_v52 = vpop.f32.mrb[4].mxu1  ;;  %v8778_v54 = vpop.f32.mrb[5].mxu0 }
 0x17f   : > { %v8776_v53 = vpack.c.bf16 %v1532_v52, %v8569_v36  ;;  %v1534_v55 = vpop.f32.mrb[5].mxu1  ;;  %v912_v57 = vpop.f32.mrb[6].mxu0  ;;  %2962 = vmatpush1.bf16.msra.mxu0 %v7317_v46  ;;  %v7397_v46 = vld [vmem:[%s10587_s1 + $0xc64] ss:$24 sps:$4 sm:$0xff]   ;;  %v7403_v52 = vld [vmem:[%s10587_s1 + $0xc94] ss:$24 sps:$4 sm:$0xff]  }
 0x180   : > { %v8781_v56 = vpack.c.bf16 %v1534_v55, %v8579_v40  ;;  %3003 = vmatpush1.bf16.msra.mxu1 %v7320_v48  ;;  %v1536_v60 = vpop.f32.mrb[6].mxu1  ;;  %v913_v36 = vpop.f32.mrb[7].mxu0  ;;  %2963 = vmatprep.subr.bf16.mxu0 %v7325_v49  ;;  %v7331_v40 = vld [vmem:[%s10587_s1 + $0xa5c] ss:$24 sps:$4 sm:$0xff]   ;;  %v7400_v48 = vld [vmem:[%s10587_s1 + $0xc6c] ss:$24 sps:$4 sm:$0xff]  }
 0x181   : > { %3004 = vmatprep.subr.bf16.mxu1 %v7328_v50  ;;  %v1537_v62 = vpop.f32.mrb[7].mxu1  ;;  %v7395_v49 = vld [vmem:[%s10587_s1 + $0xc60] ss:$24 sps:$4 sm:$0xff]   ;;  %v7406_v55 = vld [vmem:[%s10587_s1 + $0xc9c] ss:$24 sps:$4 sm:$0xff]  }
 0x182   : > { %v7398_v50 = vld [vmem:[%s10587_s1 + $0xc68] ss:$24 sps:$4 sm:$0xff]   ;;  %v7412_v60 = vld [vmem:[%s10587_s1 + $0xccc] ss:$24 sps:$4 sm:$0xff]   ;;  %v7418_v62 = vld [vmem:[%s10587_s1 + $0xcfc] ss:$24 sps:$4 sm:$0xff]  }
 0x183   : > { %2964 = vmatpush1.bf16.msra.mxu0 %v7323_v58  ;;  %v7401_v57 = vld [vmem:[%s10587_s1 + $0xc90] ss:$24 sps:$4 sm:$0xff]   ;;  %v7407_v36 = vld [vmem:[%s10587_s1 + $0xcc0] ss:$24 sps:$4 sm:$0xff]  }
 0x184   : > { %3005 = vmatpush1.bf16.msra.mxu1 %v7326_v59  ;;  %2965 = vmatprep.subr.bf16.mxu0 %v7331_v40  ;;  %v7404_v58 = vld [vmem:[%s10587_s1 + $0xc98] ss:$24 sps:$4 sm:$0xff]   ;;  %v7409_v59 = vld [vmem:[%s10587_s1 + $0xcc4] ss:$24 sps:$4 sm:$0xff]   ;;  %v7410_v40 = vld [vmem:[%s10587_s1 + $0xcc8] ss:$24 sps:$4 sm:$0xff]  }
 0x185   : > { %3006 = vmatprep.subr.bf16.mxu1 %v7334_v61  ;;  %v7415_v61 = vld [vmem:[%s10587_s1 + $0xcf4] ss:$24 sps:$4 sm:$0xff]  }
 0x187   : > { %2966 = vmatpush1.bf16.msra.mxu0 %v7329_v63  ;;  %v7413_v63 = vld [vmem:[%s10587_s1 + $0xcf0] ss:$24 sps:$4 sm:$0xff]  }
 0x188   : > { %3007 = vmatpush1.bf16.msra.mxu1 %v7332_v0  ;;  %2967 = vmatprep.subr.bf16.mxu0 %v7337_v1  ;;  %v7416_v0 = vld [vmem:[%s10587_s1 + $0xcf8] ss:$24 sps:$4 sm:$0xff]   ;;  %v7421_v1 = vld [vmem:[%s10587_s1 + $0xd24] ss:$24 sps:$4 sm:$0xff]  }
 0x189   : > { %3008 = vmatprep.subr.bf16.mxu1 %v7340_v2  ;;  %v7424_v2 = vld [vmem:[%s10587_s1 + $0xd2c] ss:$24 sps:$4 sm:$0xff]  }
 0x18b   : > { %2968 = vmatpush1.bf16.msra.mxu0 %v7335_v3 }
 0x18c   : > { %3009 = vmatpush1.bf16.msra.mxu1 %v7338_v4  ;;  %2969 = vmatprep.subr.bf16.mxu0 %v7343_v6 }
 0x18d   : > { %3010 = vmatprep.subr.bf16.mxu1 %v7346_v7 }
 0x18f   : > { %2970 = vmatpush1.bf16.msra.mxu0 %v7341_v8 }
 0x190   : > { %3011 = vmatpush1.bf16.msra.mxu1 %v7344_v9  ;;  %2971 = vmatprep.subr.bf16.mxu0 %v7349_v10 }
 0x191   : > { %3012 = vmatprep.subr.bf16.mxu1 %v7352_v11 }
 0x193   : > { %2972 = vmatpush1.bf16.msra.mxu0 %v7347_v12 }
 0x194   : > { %3013 = vmatpush1.bf16.msra.mxu1 %v7350_v13  ;;  %2973 = vmatprep.subr.bf16.mxu0 %v7355_v14  ;;  %v7419_v13 = vld [vmem:[%s10587_s1 + $0xd20] ss:$24 sps:$4 sm:$0xff]  }
 0x195   : > { %3014 = vmatprep.subr.bf16.mxu1 %v7358_v15  ;;  %v7422_v14 = vld [vmem:[%s10587_s1 + $0xd28] ss:$24 sps:$4 sm:$0xff]  }
 0x197   : > { %2974 = vmatpush1.bf16.msra.mxu0 %v7353_v16 }
 0x198   : > { %3015 = vmatpush1.bf16.msra.mxu1 %v7356_v17  ;;  %2975 = vmatprep.subr.bf16.mxu0 %v7361_v18  ;;  %v7427_v17 = vld [vmem:[%s10587_s1 + $0xd54] ss:$24 sps:$4 sm:$0xff]  }
 0x199   : > { %3016 = vmatprep.subr.bf16.mxu1 %v7364_v19  ;;  %v7430_v18 = vld [vmem:[%s10587_s1 + $0xd5c] ss:$24 sps:$4 sm:$0xff]  }
 0x19b   : > { %2976 = vmatpush1.bf16.msra.mxu0 %v7359_v20  ;;  %v7425_v20 = vld [vmem:[%s10587_s1 + $0xd50] ss:$24 sps:$4 sm:$0xff]  }
 0x19c   : > { %3017 = vmatpush1.bf16.msra.mxu1 %v7362_v21  ;;  %2977 = vmatprep.subr.bf16.mxu0 %v7367_v22  ;;  %v7428_v21 = vld [vmem:[%s10587_s1 + $0xd58] ss:$24 sps:$4 sm:$0xff]   ;;  %v7433_v22 = vld [vmem:[%s10587_s1 + $0xd84] ss:$24 sps:$4 sm:$0xff]  }
 0x19d   : > { %3018 = vmatprep.subr.bf16.mxu1 %v7370_v23  ;;  %v7436_v23 = vld [vmem:[%s10587_s1 + $0xd8c] ss:$24 sps:$4 sm:$0xff]  }
 0x19f   : > { %2978 = vmatpush1.bf16.msra.mxu0 %v7365_v24  ;;  %v7431_v24 = vld [vmem:[%s10587_s1 + $0xd80] ss:$24 sps:$4 sm:$0xff]  }
 0x1a0   : > { %3019 = vmatpush1.bf16.msra.mxu1 %v7368_v25  ;;  %2979 = vmatprep.subr.bf16.mxu0 %v7373_v26  ;;  %v7434_v25 = vld [vmem:[%s10587_s1 + $0xd88] ss:$24 sps:$4 sm:$0xff]   ;;  %v7439_v26 = vld [vmem:[%s10587_s1 + $0xdb4] ss:$24 sps:$4 sm:$0xff]  }
 0x1a1   : > { %3020 = vmatprep.subr.bf16.mxu1 %v7376_v27  ;;  %v7442_v27 = vld [vmem:[%s10587_s1 + $0xdbc] ss:$24 sps:$4 sm:$0xff]  }
 0x1a3   : > { %2980 = vmatpush1.bf16.msra.mxu0 %v7371_v28  ;;  %v7437_v28 = vld [vmem:[%s10587_s1 + $0xdb0] ss:$24 sps:$4 sm:$0xff]  }
 0x1a4   : > { %3021 = vmatpush1.bf16.msra.mxu1 %v7374_v29  ;;  %2981 = vmatprep.subr.bf16.mxu0 %v7379_v30  ;;  %v7440_v29 = vld [vmem:[%s10587_s1 + $0xdb8] ss:$24 sps:$4 sm:$0xff]   ;;  %v7445_v30 = vld [vmem:[%s10587_s1 + $0xde4] ss:$24 sps:$4 sm:$0xff]  }
 0x1a5   : > { %3022 = vmatprep.subr.bf16.mxu1 %v7382_v31  ;;  %v7448_v31 = vld [vmem:[%s10587_s1 + $0xdec] ss:$24 sps:$4 sm:$0xff]  }
 0x1a7   : > { %2982 = vmatpush1.bf16.msra.mxu0 %v7377_v32  ;;  %v7443_v32 = vld [vmem:[%s10587_s1 + $0xde0] ss:$24 sps:$4 sm:$0xff]  }
 0x1a8   : > { %3023 = vmatpush1.bf16.msra.mxu1 %v7380_v33  ;;  %3616 = vmatprep.subr.bf16.mxu0 %v7385_v34  ;;  %v7446_v33 = vld [vmem:[%s10587_s1 + $0xde8] ss:$24 sps:$4 sm:$0xff]   ;;  %v7451_v34 = vld [vmem:[%s10587_s1 + $0xe14] ss:$24 sps:$4 sm:$0xff]  }
 0x1a9   : > { %3657 = vmatprep.subr.bf16.mxu1 %v7388_v35  ;;  %v7454_v35 = vld [vmem:[%s10587_s1 + $0xe1c] ss:$24 sps:$4 sm:$0xff]  }
 0x1aa   : > { %2984 = vmatmul.mubr.bf16.vlgmr.msra.gmra.mrb[20].mxu0 %v7903_v5 }
 0x1ab   : > { %3025 = vmatmul.mubr.bf16.vlgmr.msra.gmra.mrb[20].mxu1 %v7903_v5  ;;  %3617 = vmatpush1.bf16.msra.mxu0 %v7383_v37  ;;  %v7449_v37 = vld [vmem:[%s10587_s1 + $0xe10] ss:$24 sps:$4 sm:$0xff]  }
 0x1ac   : > { %3658 = vmatpush1.bf16.msra.mxu1 %v7386_v38  ;;  %3618 = vmatprep.subr.bf16.mxu0 %v7391_v42  ;;  %v7452_v38 = vld [vmem:[%s10587_s1 + $0xe18] ss:$24 sps:$4 sm:$0xff]   ;;  %v7457_v42 = vld [vmem:[%s10587_s1 + $0xe44] ss:$24 sps:$4 sm:$0xff]  }
 0x1ad   : > { %3659 = vmatprep.subr.bf16.mxu1 %v7394_v43  ;;  %3648 = vmatprep.mubr.bf16.mxu0 %v7838_v47  ;;  %v7460_v43 = vld [vmem:[%s10587_s1 + $0xe4c] ss:$24 sps:$4 sm:$0xff]  }
 0x1ae   : > { %3689 = vmatprep.mubr.bf16.mxu1 %v7838_v47 }
 0x1af   : > { %3619 = vmatpush1.bf16.msra.mxu0 %v7389_v44  ;;  %v7455_v44 = vld [vmem:[%s10587_s1 + $0xe40] ss:$24 sps:$4 sm:$0xff]  }
 0x1b0   : > { %3660 = vmatpush1.bf16.msra.mxu1 %v7392_v45  ;;  %3620 = vmatprep.subr.bf16.mxu0 %v7397_v46  ;;  %v7458_v45 = vld [vmem:[%s10587_s1 + $0xe48] ss:$24 sps:$4 sm:$0xff]   ;;  %v7463_v46 = vld [vmem:[%s10587_s1 + $0xe74] ss:$24 sps:$4 sm:$0xff]  }
 0x1b1   : > { %3661 = vmatprep.subr.bf16.mxu1 %v7400_v48  ;;  %v7466_v48 = vld [vmem:[%s10587_s1 + $0xe7c] ss:$24 sps:$4 sm:$0xff]  }
 0x1b3   : > { %3621 = vmatpush1.bf16.msra.mxu0 %v7395_v49  ;;  %v7461_v49 = vld [vmem:[%s10587_s1 + $0xe70] ss:$24 sps:$4 sm:$0xff]  }
 0x1b4   : > { %3662 = vmatpush1.bf16.msra.mxu1 %v7398_v50  ;;  %3622 = vmatprep.subr.bf16.mxu0 %v7403_v52  ;;  %v7464_v50 = vld [vmem:[%s10587_s1 + $0xe78] ss:$24 sps:$4 sm:$0xff]   ;;  %v7469_v52 = vld [vmem:[%s10587_s1 + $0xea4] ss:$24 sps:$4 sm:$0xff]  }
 0x1b5   : > { %3663 = vmatprep.subr.bf16.mxu1 %v7406_v55  ;;  %v7472_v55 = vld [vmem:[%s10587_s1 + $0xeac] ss:$24 sps:$4 sm:$0xff]  }
 0x1b7   : > { %3623 = vmatpush1.bf16.msra.mxu0 %v7401_v57  ;;  %v7467_v57 = vld [vmem:[%s10587_s1 + $0xea0] ss:$24 sps:$4 sm:$0xff]  }
 0x1b8   : > { %3664 = vmatpush1.bf16.msra.mxu1 %v7404_v58  ;;  %3624 = vmatprep.subr.bf16.mxu0 %v7409_v59  ;;  %v7470_v58 = vld [vmem:[%s10587_s1 + $0xea8] ss:$24 sps:$4 sm:$0xff]   ;;  %v7475_v59 = vld [vmem:[%s10587_s1 + $0xed4] ss:$24 sps:$4 sm:$0xff]  }
 0x1b9   : > { %3665 = vmatprep.subr.bf16.mxu1 %v7412_v60  ;;  %v7478_v60 = vld [vmem:[%s10587_s1 + $0xedc] ss:$24 sps:$4 sm:$0xff]  }
 0x1bb   : > { %3625 = vmatpush1.bf16.msra.mxu0 %v7407_v36  ;;  %v7473_v36 = vld [vmem:[%s10587_s1 + $0xed0] ss:$24 sps:$4 sm:$0xff]  }
 0x1bc   : > { %3666 = vmatpush1.bf16.msra.mxu1 %v7410_v40  ;;  %3626 = vmatprep.subr.bf16.mxu0 %v7415_v61  ;;  %v7476_v40 = vld [vmem:[%s10587_s1 + $0xed8] ss:$24 sps:$4 sm:$0xff]   ;;  %v7481_v61 = vld [vmem:[%s10587_s1 + $0xc14] ss:$24 sps:$4 sm:$0xff]  }
 0x1bd   : > { %3667 = vmatprep.subr.bf16.mxu1 %v7418_v62  ;;  %v8979_v3 = vpop.f32.mrb[8].mxu0  ;;  %v7479_v62 = vld [vmem:[%s10587_s1 + $0xc10] ss:$24 sps:$4 sm:$0xff]  }
 0x1be   : > { %v8981_v4 = vpop.f32.mrb[8].mxu1  ;;  %v3844_v6 = vpack.c.bf16 %v8979_v3, %v8577_v39  ;;  %v8987_v8 = vpop.f32.mrb[9].mxu0  ;;  %v9263_v39 = vld [vmem:[%s10588_s2 + $0x8] sm:$0xff]   ;;  %v9276_v3 = vld [vmem:[%s10588_s2 + $0x78] sm:$0xff]  }
 0x1bf   : > { %v3846_v7 = vpack.c.bf16 %v8981_v4, %v8773_v51  ;;  %v8989_v9 = vpop.f32.mrb[9].mxu1  ;;  %v3845_v10 = vpack.c.bf16 %v8987_v8, %v8581_v41  ;;  %v1577_v12 = vpop.f32.mrb[10].mxu0  ;;  %3627 = vmatpush1.bf16.msra.mxu0 %v7413_v63  ;;  %v7484_v63 = vld [vmem:[%s10587_s1 + $0xc44] ss:$24 sps:$4 sm:$0xff]   ;;  %v9258_v8 = vld [vmem:[%s10588_s2 + $0x70] sm:$0xff]  }
 0x1c0   : > { %v3847_v11 = vpack.c.bf16 %v8989_v9, %v8778_v54  ;;  %3668 = vmatpush1.bf16.msra.mxu1 %v7416_v0  ;;  %v1618_v15 = vpop.f32.mrb[10].mxu1  ;;  %v1578_v16 = vpop.f32.mrb[11].mxu0  ;;  %3628 = vmatprep.subr.bf16.mxu0 %v7421_v1  ;;  %v7482_v0 = vld [vmem:[%s10587_s1 + $0xc40] ss:$24 sps:$4 sm:$0xff]   ;;  %v7487_v1 = vld [vmem:[%s10587_s1 + $0xc74] ss:$24 sps:$4 sm:$0xff]  }
 0x1c1   : > { %3669 = vmatprep.subr.bf16.mxu1 %v7424_v2  ;;  %v1619_v19 = vpop.f32.mrb[11].mxu1  ;;  %v7485_v2 = vld [vmem:[%s10587_s1 + $0xc70] ss:$24 sps:$4 sm:$0xff]   ;;  %v7490_v12 = vld [vmem:[%s10587_s1 + $0xca4] ss:$24 sps:$4 sm:$0xff]  }
 0x1c2   : > { %v7496_v15 = vld [vmem:[%s10587_s1 + $0xd04] ss:$24 sps:$4 sm:$0xff]   ;;  %v7494_v16 = vld [vmem:[%s10587_s1 + $0xd00] ss:$24 sps:$4 sm:$0xff]   ;;  %v9281_v4 = vld [vmem:[%s10588_s2 + $0x10] sm:$0xff]  }
 0x1c3   : > { %3629 = vmatpush1.bf16.msra.mxu0 %v7419_v13  ;;  %v7488_v13 = vld [vmem:[%s10587_s1 + $0xca0] ss:$24 sps:$4 sm:$0xff]   ;;  %v9308_v9 = vld [vmem:[%s10588_s2 + $0x88] sm:$0xff]  }
 0x1c4   : > { %3670 = vmatpush1.bf16.msra.mxu1 %v7422_v14  ;;  %3630 = vmatprep.subr.bf16.mxu0 %v7427_v17  ;;  %v7491_v14 = vld [vmem:[%s10587_s1 + $0xcd0] ss:$24 sps:$4 sm:$0xff]   ;;  %v7499_v17 = vld [vmem:[%s10587_s1 + $0xd34] ss:$24 sps:$4 sm:$0xff]  }
 0x1c5   : > { %3671 = vmatprep.subr.bf16.mxu1 %v7430_v18 }
 0x1c7   : > { %3631 = vmatpush1.bf16.msra.mxu0 %v7425_v20 }
 0x1c8   : > { %3672 = vmatpush1.bf16.msra.mxu1 %v7428_v21  ;;  %3632 = vmatprep.subr.bf16.mxu0 %v7433_v22 }
 0x1c9   : > { %3673 = vmatprep.subr.bf16.mxu1 %v7436_v23  ;;  %v7497_v23 = vld [vmem:[%s10587_s1 + $0xd30] ss:$24 sps:$4 sm:$0xff]  }
 0x1cb   : > { %3633 = vmatpush1.bf16.msra.mxu0 %v7431_v24 }
 0x1cc   : > { %3674 = vmatpush1.bf16.msra.mxu1 %v7434_v25  ;;  %3634 = vmatprep.subr.bf16.mxu0 %v7439_v26  ;;  %v7502_v26 = vld [vmem:[%s10587_s1 + $0xd64] ss:$24 sps:$4 sm:$0xff]  }
 0x1cd   : > { %3675 = vmatprep.subr.bf16.mxu1 %v7442_v27 }
 0x1cf   : > { %3635 = vmatpush1.bf16.msra.mxu0 %v7437_v28  ;;  %v7500_v28 = vld [vmem:[%s10587_s1 + $0xd60] ss:$24 sps:$4 sm:$0xff]  }
 0x1d0   : > { %3676 = vmatpush1.bf16.msra.mxu1 %v7440_v29  ;;  %3636 = vmatprep.subr.bf16.mxu0 %v7445_v30  ;;  %v7505_v29 = vld [vmem:[%s10587_s1 + $0xd94] ss:$24 sps:$4 sm:$0xff]   ;;  %v7503_v30 = vld [vmem:[%s10587_s1 + $0xd90] ss:$24 sps:$4 sm:$0xff]  }
 0x1d1   : > { %3677 = vmatprep.subr.bf16.mxu1 %v7448_v31  ;;  %v7508_v31 = vld [vmem:[%s10587_s1 + $0xdc4] ss:$24 sps:$4 sm:$0xff]  }
 0x1d3   : > { %3637 = vmatpush1.bf16.msra.mxu0 %v7443_v32  ;;  %v7506_v32 = vld [vmem:[%s10587_s1 + $0xdc0] ss:$24 sps:$4 sm:$0xff]  }
 0x1d4   : > { %3678 = vmatpush1.bf16.msra.mxu1 %v7446_v33  ;;  %3638 = vmatprep.subr.bf16.mxu0 %v7451_v34  ;;  %v7511_v33 = vld [vmem:[%s10587_s1 + $0xdf4] ss:$24 sps:$4 sm:$0xff]   ;;  %v7509_v34 = vld [vmem:[%s10587_s1 + $0xdf0] ss:$24 sps:$4 sm:$0xff]  }
 0x1d5   : > { %3679 = vmatprep.subr.bf16.mxu1 %v7454_v35  ;;  %v7514_v35 = vld [vmem:[%s10587_s1 + $0xe24] ss:$24 sps:$4 sm:$0xff]  }
 0x1d7   : > { %3639 = vmatpush1.bf16.msra.mxu0 %v7449_v37  ;;  %v7512_v37 = vld [vmem:[%s10587_s1 + $0xe20] ss:$24 sps:$4 sm:$0xff]  }
 0x1d8   : > { %3680 = vmatpush1.bf16.msra.mxu1 %v7452_v38  ;;  %3640 = vmatprep.subr.bf16.mxu0 %v7457_v42  ;;  %v7517_v38 = vld [vmem:[%s10587_s1 + $0xe54] ss:$24 sps:$4 sm:$0xff]   ;;  %v7515_v42 = vld [vmem:[%s10587_s1 + $0xe50] ss:$24 sps:$4 sm:$0xff]  }
 0x1d9   : > { %3681 = vmatprep.subr.bf16.mxu1 %v7460_v43  ;;  %v7520_v43 = vld [vmem:[%s10587_s1 + $0xe84] ss:$24 sps:$4 sm:$0xff]  }
 0x1db   : > { %3641 = vmatpush1.bf16.msra.mxu0 %v7455_v44  ;;  %v7518_v44 = vld [vmem:[%s10587_s1 + $0xe80] ss:$24 sps:$4 sm:$0xff]  }
 0x1dc   : > { %3682 = vmatpush1.bf16.msra.mxu1 %v7458_v45  ;;  %3642 = vmatprep.subr.bf16.mxu0 %v7463_v46  ;;  %v7523_v45 = vld [vmem:[%s10587_s1 + $0xeb4] ss:$24 sps:$4 sm:$0xff]   ;;  %v7521_v46 = vld [vmem:[%s10587_s1 + $0xeb0] ss:$24 sps:$4 sm:$0xff]  }
 0x1dd   : > { %3683 = vmatprep.subr.bf16.mxu1 %v7466_v48  ;;  %v7526_v48 = vld [vmem:[%s10587_s1 + $0xee4] ss:$24 sps:$4 sm:$0xff]  }
 0x1df   : > { %3643 = vmatpush1.bf16.msra.mxu0 %v7461_v49  ;;  %v7524_v49 = vld [vmem:[%s10587_s1 + $0xee0] ss:$24 sps:$4 sm:$0xff]  }
 0x1e0   : > { %3684 = vmatpush1.bf16.msra.mxu1 %v7464_v50  ;;  %3644 = vmatprep.subr.bf16.mxu0 %v7469_v52 }
 0x1e1   : > { %3685 = vmatprep.subr.bf16.mxu1 %v7472_v55 }
 0x1e3   : > { %3645 = vmatpush1.bf16.msra.mxu0 %v7467_v57 }
 0x1e4   : > { %3686 = vmatpush1.bf16.msra.mxu1 %v7470_v58  ;;  %3646 = vmatprep.subr.bf16.mxu0 %v7475_v59 }
 0x1e5   : > { %3687 = vmatprep.subr.bf16.mxu1 %v7478_v60 }
 0x1e7   : > { %3647 = vmatpush1.bf16.msra.mxu0 %v7473_v36 }
 0x1e8   : > { %3688 = vmatpush1.bf16.msra.mxu1 %v7476_v40  ;;  %3698 = vmatprep.subr.bf16.mxu0 %v7481_v61 }
 0x1e9   : > { %6780 = vmatprep.subr.bf16.mxu1 %v8781_v56 }
 0x1ea   : > { %3649 = vmatmul.mubr.bf16.vlgmr.msra.gmra.mrb[24].mxu0 %v7903_v5 }
 0x1eb   : > { %3690 = vmatmul.mubr.bf16.vlgmr.msra.gmra.mrb[24].mxu1 %v7903_v5  ;;  %3699 = vmatpush1.bf16.msra.mxu0 %v7479_v62 }
 0x1ec   : > { %6783 = vmatpush1.bf16.msra.mxu1 %v8776_v53  ;;  %3700 = vmatprep.subr.bf16.mxu0 %v7484_v63 }
 0x1ed   : > { %3730 = vmatprep.mubr.bf16.mxu0 %v7838_v47  ;;  %v7493_v47 = vld [vmem:[%s10587_s1 + $0xcd4] ss:$24 sps:$4 sm:$0xff]  }
 0x1ef   : > { %3701 = vmatpush1.bf16.msra.mxu0 %v7482_v0 }
 0x1f0   : > { %3702 = vmatprep.subr.bf16.mxu0 %v7487_v1 }
 0x1f3   : > { %3703 = vmatpush1.bf16.msra.mxu0 %v7485_v2 }
 0x1f4   : > { %3704 = vmatprep.subr.bf16.mxu0 %v7490_v12 }
 0x1f7   : > { %3705 = vmatpush1.bf16.msra.mxu0 %v7488_v13 }
 0x1f8   : > { %3706 = vmatprep.subr.bf16.mxu0 %v7493_v47 }
 0x1fb   : > { %3707 = vmatpush1.bf16.msra.mxu0 %v7491_v14 }
 0x1fc   : > { %3708 = vmatprep.subr.bf16.mxu0 %v7496_v15 }
 0x1fd   : > { %v2238_v18 = vpop.f32.mrb[12].mxu0 }
 0x1fe   : > { %v9153_v19 = vpop.f32.mrb[12].mxu1  ;;  %v2240_v20 = vpop.f32.mrb[13].mxu0 }
 0x1ff   : > { %v9155_v21 = vpop.f32.mrb[13].mxu1  ;;  %v2242_v22 = vpop.f32.mrb[14].mxu0  ;;  %3709 = vmatpush1.bf16.msra.mxu0 %v7494_v16 }
 0x200   : > { %v2283_v24 = vpop.f32.mrb[14].mxu1  ;;  %v2243_v25 = vpop.f32.mrb[15].mxu0  ;;  %3710 = vmatprep.subr.bf16.mxu0 %v7499_v17 }
 0x201   : > { %v2284_v27 = vpop.f32.mrb[15].mxu1 }
 0x203   : > { %3711 = vmatpush1.bf16.msra.mxu0 %v7497_v23 }
 0x204   : > { %3712 = vmatprep.subr.bf16.mxu0 %v7502_v26 }
 0x207   : > { %3713 = vmatpush1.bf16.msra.mxu0 %v7500_v28  ;;  %v9235_v28 = vld [vmem:[%s10588_s2] sm:$0xff]  }
 0x208   : > { %3714 = vmatprep.subr.bf16.mxu0 %v7505_v29  ;;  %v9329_v29 = vld [vmem:[%s10588_s2 + $0x28] sm:$0xff]  }
 0x20b   : > { %3715 = vmatpush1.bf16.msra.mxu0 %v7503_v30  ;;  %v9340_v30 = vld [vmem:[%s10588_s2 + $0x98] sm:$0xff]  }
 0x20c   : > { %3716 = vmatprep.subr.bf16.mxu0 %v7508_v31  ;;  %v9345_v31 = vld [vmem:[%s10588_s2 + $0x30] sm:$0xff]  }
 0x20f   : > { %3717 = vmatpush1.bf16.msra.mxu0 %v7506_v32  ;;  %v9356_v32 = vld [vmem:[%s10588_s2 + $0xa0] sm:$0xff]  }
 0x210   : > { %3718 = vmatprep.subr.bf16.mxu0 %v7511_v33  ;;  %v9361_v33 = vld [vmem:[%s10588_s2 + $0x38] sm:$0xff]  }
 0x213   : > { %3719 = vmatpush1.bf16.msra.mxu0 %v7509_v34 }
 0x214   : > { %3720 = vmatprep.subr.bf16.mxu0 %v7514_v35 }
 0x217   : > { %3721 = vmatpush1.bf16.msra.mxu0 %v7512_v37 }
 0x218   : > { %3722 = vmatprep.subr.bf16.mxu0 %v7517_v38 }
 0x21b   : > { %3723 = vmatpush1.bf16.msra.mxu0 %v7515_v42 }
 0x21c   : > { %3724 = vmatprep.subr.bf16.mxu0 %v7520_v43 }
 0x21f   : > { %3725 = vmatpush1.bf16.msra.mxu0 %v7518_v44 }
 0x220   : > { %3726 = vmatprep.subr.bf16.mxu0 %v7523_v45  ;;  %v9373_v45 = vld [vmem:[%s10588_s2 + $0xa8] sm:$0xff]  }
 0x223   : > { %3727 = vmatpush1.bf16.msra.mxu0 %v7521_v46  ;;  %v9379_v46 = vld [vmem:[%s10588_s2 + $0x40] sm:$0xff]  }
 0x224   : > { %3728 = vmatprep.subr.bf16.mxu0 %v7526_v48  ;;  %v9390_v48 = vld [vmem:[%s10588_s2 + $0xb0] sm:$0xff]  }
 0x227   : > { %3729 = vmatpush1.bf16.msra.mxu0 %v7524_v49  ;;  %v9395_v49 = vld [vmem:[%s10588_s2 + $0x48] sm:$0xff]  }
 0x228   : > { %4182 = vmatprep.subr.bf16.mxu0 %v8781_v56  ;;  %v7618_v56 = vmov 0  }
 0x229   : > { %4344 = vmatprep.mubr.bf16.mxu1 %v7618_v56 }
 0x22a   : > { %3731 = vmatmul.mubr.bf16.vlgmr.msra.gmra.mrb[28].mxu0 %v7903_v5 }
 0x22b   : > { %4183 = vmatpush1.bf16.msra.mxu0 %v8776_v53  ;;  %4214 = vmatprep.mubr.bf16.mxu0 %v7618_v56 }
 0x23d   : > { %v9217_v50 = vpop.f32.mrb[16].mxu0 }
 0x23e   : > { %v2944_v52 = vpop.f32.mrb[16].mxu1  ;;  %v2322_v57 = vpop.f32.mrb[17].mxu0 }
 0x23f   : > { %v3848_v55 = vpack.c.bf16 %v2944_v52, %v2238_v18  ;;  %v2946_v58 = vpop.f32.mrb[17].mxu1  ;;  %v2324_v60 = vpop.f32.mrb[18].mxu0  ;;  %v9411_v52 = vld [vmem:[%s10588_s2 + $0x50] sm:$0xff]  }
 0x240   : > { %v3849_v59 = vpack.c.bf16 %v2946_v58, %v2240_v20  ;;  %v2948_v36 = vpop.f32.mrb[18].mxu1  ;;  %v2325_v40 = vpop.f32.mrb[19].mxu0  ;;  %v9438_v58 = vld [vmem:[%s10588_s2 + $0xc8] sm:$0xff]   ;;  %v9454_v60 = vld [vmem:[%s10588_s2 + $0xd0] sm:$0xff]  }
 0x241   : > { %v2949_v61 = vpop.f32.mrb[19].mxu1  ;;  %v9465_v36 = vld [vmem:[%s10588_s2 + $0xd8] sm:$0xff]   ;;  %v9476_v40 = vld [vmem:[%s10588_s2 + $0xe0] sm:$0xff]  }
 0x242   : > { %4184 = vmatprep.subr.bf16.mxu0 %v3849_v59  ;;  %6781 = vmatprep.subr.bf16.mxu1 %v3849_v59  ;;  %v9443_v59 = vld [vmem:[%s10588_s2 + $0x60] sm:$0xff]   ;;  %v9487_v61 = vld [vmem:[%s10588_s2 + $0xe8] sm:$0xff]  }
 0x243   : > { %4185 = vmatpush1.bf16.msra.mxu0 %v3848_v55  ;;  %6784 = vmatpush1.bf16.msra.mxu1 %v3848_v55  ;;  %v9422_v55 = vld [vmem:[%s10588_s2 + $0xc0] sm:$0xff]  }
 0x27d   : > { %v2985_v5 = vpop.f32.mrb[20].mxu0 }
 0x27e   : > { %v3026_v53 = vpop.f32.mrb[20].mxu1  ;;  %v3850_v62 = vpack.c.bf16 %v2985_v5, %v9153_v19  ;;  %v2987_v0 = vpop.f32.mrb[21].mxu0  ;;  %v7554_v5 = vld [vmem:[%s10588_s2 + $0xf0] sm:$0xff]  }
 0x27f   : > { %v3852_v63 = vpack.c.bf16 %v3026_v53, %v9217_v50  ;;  %v3028_v1 = vpop.f32.mrb[21].mxu1  ;;  %v3851_v2 = vpack.c.bf16 %v2987_v0, %v9155_v21  ;;  %v2989_v13 = vpop.f32.mrb[22].mxu0  ;;  %v9230_v21 = vld [vmem:[%s10588_s2 + $0x68] sm:$0xff]   ;;  %v9406_v50 = vld [vmem:[%s10588_s2 + $0xb8] sm:$0xff]   ;;  %v3862_v0 = vlaneseq }
 0x280   : > { %v3853_v12 = vpack.c.bf16 %v3028_v1, %v2322_v57  ;;  %v3030_v47 = vpop.f32.mrb[22].mxu1  ;;  %v2990_v14 = vpop.f32.mrb[23].mxu0  ;;  %v9427_v57 = vld [vmem:[%s10588_s2 + $0x58] sm:$0xff]  }
 0x281   : > { %v3031_v15 = vpop.f32.mrb[23].mxu1  ;;  %v7556_v53 = vld [vmem:[%s10588_s2 + $0xf8] sm:$0xff]   ;;  %v9553_v1 = vshrl.u32 %v3862_v0, 7 }
 0x283   : > { %v3868_v13 = vsub.s32 1, %v9553_v1 }
 0x2bd   : > { %v3650_v16 = vpop.f32.mrb[24].mxu0 }
 0x2be   : > { %v3691_v17 = vpop.f32.mrb[24].mxu1  ;;  %v3854_v18 = vpack.c.bf16 %v3650_v16, %v3650_v16  ;;  %v3652_v20 = vpop.f32.mrb[25].mxu0 }
 0x2bf   : > { %v3693_v22 = vpop.f32.mrb[25].mxu1  ;;  %v3855_v23 = vpack.c.bf16 %v3652_v20, %v3652_v20  ;;  %v3654_v24 = vpop.f32.mrb[26].mxu0  ;;  %v3856_v54 = vpack.c.bf16 %v3691_v17, %v3691_v17 }
 0x2c0   : > { %v3695_v19 = vpop.f32.mrb[26].mxu1  ;;  %v4165_v25 = vsel %vm4163_vm0, %v3854_v18, 0  ;;  %v3655_v26 = vpop.f32.mrb[27].mxu0  ;;  %v3857_v41 = vpack.c.bf16 %v3693_v22, %v3693_v22 }
 0x2c1   : > { %v3696_v27 = vpop.f32.mrb[27].mxu1  ;;  %6672 = vmatprep.subr.msk.bf16.mxu0 %vm4163_vm0, %v3855_v23  ;;  %6782 = vmatprep.subr.msk.bf16.mxu1 %vm4163_vm0, %v3855_v23  ;;  %v4171_v51 = vsel %vm4163_vm0, %v3856_v54, 0 }
 0x2c2   : > { %4187 = vmatpush1.bf16.msra.mxu0 %v4165_v25  ;;  %6785 = vmatpush1.bf16.msra.mxu1 %v4165_v25 }
 0x2c3   : > { %4553 = vmatprep.subr.bf16.mxu0 %v3845_v10  ;;  %4924 = vmatprep.subr.bf16.mxu1 %v3847_v11  ;;  %v9313_v10 = vld [vmem:[%s10588_s2 + $0x20] sm:$0xff]   ;;  %v9324_v11 = vld [vmem:[%s10588_s2 + $0x90] sm:$0xff]  }
 0x2c5   : > { %6686 = vmatmul.mubr.msk.bf16.vlgmr.msra.gmra.mrb[28].mxu1 %vm4060_vm1, %v9230_v21  ;;  %6673 = vmatmul.mubr.msk.bf16.vlgmr.msra.gmra.mrb[32].mxu0 %vm4060_vm1, %v9235_v28 }
 0x2c6   : > { %4554 = vmatpush1.bf16.msra.mxu0 %v3844_v6  ;;  %4925 = vmatpush1.bf16.msra.mxu1 %v3846_v7  ;;  %v9292_v6 = vld [vmem:[%s10588_s2 + $0x80] sm:$0xff]   ;;  %v9297_v7 = vld [vmem:[%s10588_s2 + $0x18] sm:$0xff]  }
 0x2c7   : > { %4555 = vmatprep.subr.bf16.mxu0 %v3851_v2  ;;  %4926 = vmatprep.subr.bf16.mxu1 %v3853_v12  ;;  %v3864_v2 = vsub.s32 0, %v9553_v1  ;;  %v9560_v12 = vld [vmem:[#allocation3] sm:$0x3f] }
 0x2c8   : > { %4354 = vmatprep.mubr.bf16.mxu1 %v7618_v56  ;;  %4224 = vmatprep.mubr.bf16.mxu0 %v7618_v56  ;;  %v9572_v14 = vrot.slane %v9560_v12, %v3868_v13 }
 0x2c9   : > { %v9567_v47 = vrot.slane %v9560_v12, %v3864_v2 }
 0x2ca   : > { %4556 = vmatpush1.bf16.msra.mxu0 %v3850_v62  ;;  %4927 = vmatpush1.bf16.msra.mxu1 %v3852_v63  ;;  %v7558_v62 = vld [vmem:[%s10588_s2 + $0x100] sm:$0xff]   ;;  %v7560_v63 = vld [vmem:[%s10588_s2 + $0x108] ss:$0 sps:$4 sm:$0x11]  }
 0x2cb   : > { %6707 = vmatprep.subr.msk.bf16.mxu0 %vm4163_vm0, %v3857_v41 }
 0x2cd   : > { %6687 = vmatmul.mubr.msk.bf16.gmra.mrb[32].mxu1 %vm4060_vm1, %v9258_v8  ;;  %6674 = vmatmul.mubr.msk.bf16.gmra.mrb[36].mxu0 %vm4060_vm1, %v9263_v39 }
 0x2ce   : > { %4364 = vmatprep.mubr.bf16.mxu1 %v7618_v56  ;;  %4234 = vmatprep.mubr.bf16.mxu0 %v7618_v56 }
 0x2cf   : > { %4558 = vmatpush1.bf16.msra.mxu0 %v4171_v51 }
 0x2d5   : > { %6688 = vmatmul.mubr.msk.bf16.gmra.mrb[36].mxu1 %vm4060_vm1, %v9276_v3  ;;  %6675 = vmatmul.mubr.msk.bf16.gmra.mrb[40].mxu0 %vm4060_vm1, %v9281_v4 }
 0x2d6   : > { %4374 = vmatprep.mubr.bf16.mxu1 %v7618_v56  ;;  %4244 = vmatprep.mubr.bf16.mxu0 %v7618_v56 }
 0x2dd   : > { %6689 = vmatmul.mubr.msk.bf16.gmra.mrb[40].mxu1 %vm4060_vm1, %v9292_v6  ;;  %6676 = vmatmul.mubr.msk.bf16.gmra.mrb[44].mxu0 %vm4060_vm1, %v9297_v7 }
 0x2de   : > { %4384 = vmatprep.mubr.bf16.mxu1 %v7618_v56  ;;  %4254 = vmatprep.mubr.bf16.mxu0 %v7618_v56 }
 0x2e5   : > { %6690 = vmatmul.mubr.msk.bf16.gmra.mrb[44].mxu1 %vm4060_vm1, %v9308_v9  ;;  %6677 = vmatmul.mubr.msk.bf16.gmra.mrb[48].mxu0 %vm4060_vm1, %v9313_v10 }
 0x2e6   : > { %4394 = vmatprep.mubr.bf16.mxu1 %v7618_v56  ;;  %4264 = vmatprep.mubr.bf16.mxu0 %v7618_v56 }
 0x2ed   : > { %6691 = vmatmul.mubr.msk.bf16.gmra.mrb[48].mxu1 %vm4060_vm1, %v9324_v11  ;;  %6678 = vmatmul.mubr.msk.bf16.gmra.mrb[52].mxu0 %vm4060_vm1, %v9329_v29 }
 0x2ee   : > { %4404 = vmatprep.mubr.bf16.mxu1 %v7618_v56  ;;  %4274 = vmatprep.mubr.bf16.mxu0 %v7618_v56 }
 0x2f5   : > { %6692 = vmatmul.mubr.msk.bf16.gmra.mrb[52].mxu1 %vm4060_vm1, %v9340_v30  ;;  %6679 = vmatmul.mubr.msk.bf16.gmra.mrb[56].mxu0 %vm4060_vm1, %v9345_v31 }
 0x2f6   : > { %4414 = vmatprep.mubr.bf16.mxu1 %v7618_v56  ;;  %4284 = vmatprep.mubr.bf16.mxu0 %v7618_v56 }
 0x2fd   : > { %6693 = vmatmul.mubr.msk.bf16.gmra.mrb[56].mxu1 %vm4060_vm1, %v9356_v32  ;;  %v3732_v34 = vpop.f32.mrb[28].mxu0  ;;  %6680 = vmatmul.mubr.msk.bf16.gmra.mrb[60].mxu0 %vm4060_vm1, %v9361_v33 }
 0x2fe   : > { %4424 = vmatprep.mubr.bf16.mxu1 %v7618_v56  ;;  %v3858_v35 = vpack.c.bf16 %v3732_v34, %v3732_v34  ;;  %v3734_v37 = vpop.f32.mrb[29].mxu0  ;;  %4294 = vmatprep.mubr.bf16.mxu0 %v7618_v56 }
 0x2ff   : > { %v3859_v38 = vpack.c.bf16 %v3734_v37, %v3734_v37  ;;  %v3736_v42 = vpop.f32.mrb[30].mxu0 }
 0x300   : > { %v4177_v43 = vsel %vm4163_vm0, %v3858_v35, 0  ;;  %v3737_v44 = vpop.f32.mrb[31].mxu0 }
 0x301   : > { %6742 = vmatprep.subr.msk.bf16.mxu1 %vm4163_vm0, %v3859_v38 }
 0x302   : > { %4929 = vmatpush1.bf16.msra.mxu1 %v4177_v43 }
 0x305   : > { %6694 = vmatmul.mubr.msk.bf16.gmra.mrb[60].mxu1 %vm4060_vm1, %v9373_v45  ;;  %6681 = vmatmul.mubr.msk.bf16.gmra.mrb[64].mxu0 %vm4060_vm1, %v9379_v46 }
 0x306   : > { %4434 = vmatprep.mubr.bf16.mxu1 %v7618_v56  ;;  %4304 = vmatprep.mubr.bf16.mxu0 %v7618_v56 }
 0x30d   : > { %6695 = vmatmul.mubr.msk.bf16.gmra.mrb[64].mxu1 %vm4060_vm1, %v9390_v48  ;;  %6682 = vmatmul.mubr.msk.bf16.gmra.mrb[68].mxu0 %vm4060_vm1, %v9395_v49 }
 0x30e   : > { %4444 = vmatprep.mubr.bf16.mxu1 %v7618_v56  ;;  %4314 = vmatprep.mubr.bf16.mxu0 %v7618_v56 }
 0x315   : > { %6696 = vmatmul.mubr.msk.bf16.gmra.mrb[68].mxu1 %vm4060_vm1, %v9406_v50  ;;  %6683 = vmatmul.mubr.msk.bf16.gmra.mrb[72].mxu0 %vm4060_vm1, %v9411_v52 }
 0x316   : > { %4454 = vmatprep.mubr.bf16.mxu1 %v7618_v56  ;;  %4324 = vmatprep.mubr.bf16.mxu0 %v7618_v56 }
 0x31d   : > { %6697 = vmatmul.mubr.msk.bf16.gmra.mrb[72].mxu1 %vm4060_vm1, %v9422_v55  ;;  %6684 = vmatmul.mubr.msk.bf16.gmra.mrb[76].mxu0 %vm4060_vm1, %v9427_v57 }
 0x31e   : > { %4464 = vmatprep.mubr.bf16.mxu1 %v7618_v56  ;;  %4334 = vmatprep.mubr.bf16.mxu0 %v7618_v56 }
 0x325   : > { %6698 = vmatmul.mubr.msk.bf16.gmra.mrb[76].mxu1 %vm4060_vm1, %v9438_v58  ;;  %6685 = vmatmul.mubr.msk.bf16.gmra.mrb[80].mxu0 %vm4060_vm1, %v9443_v59 }
 0x326   : > { %4474 = vmatprep.mubr.bf16.mxu1 %v7618_v56  ;;  %4585 = vmatprep.mubr.bf16.mxu0 %v7618_v56 }
 0x32d   : > { %6699 = vmatmul.mubr.msk.bf16.gmra.mrb[80].mxu1 %vm4060_vm1, %v9454_v60  ;;  %6708 = vmatmul.mubr.msk.bf16.vlgmr.msra.gmra.mrb[84].mxu0 %vm4060_vm1, %v9235_v28 }
 0x32e   : > { %4484 = vmatprep.mubr.bf16.mxu1 %v7618_v56  ;;  %4595 = vmatprep.mubr.bf16.mxu0 %v7618_v56 }
 0x335   : > { %6700 = vmatmul.mubr.msk.bf16.gmra.mrb[84].mxu1 %vm4060_vm1, %v9465_v36  ;;  %6709 = vmatmul.mubr.msk.bf16.gmra.mrb[88].mxu0 %vm4060_vm1, %v9263_v39 }
 0x336   : > { %4494 = vmatprep.mubr.bf16.mxu1 %v7618_v56  ;;  %4605 = vmatprep.mubr.bf16.mxu0 %v7618_v56 }
 0x33d   : > { %6701 = vmatmul.mubr.msk.bf16.gmra.mrb[88].mxu1 %vm4060_vm1, %v9476_v40  ;;  %6710 = vmatmul.mubr.msk.bf16.gmra.mrb[92].mxu0 %vm4060_vm1, %v9281_v4 }
 0x33e   : > { %4504 = vmatprep.mubr.bf16.mxu1 %v7618_v56  ;;  %4615 = vmatprep.mubr.bf16.mxu0 %v7618_v56 }
 0x345   : > { %6702 = vmatmul.mubr.msk.bf16.gmra.mrb[92].mxu1 %vm4060_vm1, %v9487_v61  ;;  %6711 = vmatmul.mubr.msk.bf16.gmra.mrb[96].mxu0 %vm4060_vm1, %v9297_v7 }
 0x346   : > { %4514 = vmatprep.mubr.bf16.mxu1 %v7618_v56  ;;  %4625 = vmatprep.mubr.bf16.mxu0 %v7618_v56 }
 0x34d   : > { %6703 = vmatmul.mubr.msk.bf16.gmra.mrb[96].mxu1 %vm4060_vm1, %v7554_v5  ;;  %6712 = vmatmul.mubr.msk.bf16.gmra.mrb[100].mxu0 %vm4060_vm1, %v9313_v10 }
 0x34e   : > { %4524 = vmatprep.mubr.bf16.mxu1 %v7618_v56  ;;  %4635 = vmatprep.mubr.bf16.mxu0 %v7618_v56 }
 0x355   : > { %6704 = vmatmul.mubr.msk.bf16.gmra.mrb[100].mxu1 %vm4060_vm1, %v7556_v53  ;;  %6713 = vmatmul.mubr.msk.bf16.gmra.mrb[104].mxu0 %vm4060_vm1, %v9329_v29 }
 0x356   : > { %4534 = vmatprep.mubr.bf16.mxu1 %v7618_v56  ;;  %4645 = vmatprep.mubr.bf16.mxu0 %v7618_v56 }
 0x35d   : > { %6705 = vmatmul.mubr.msk.bf16.gmra.mrb[104].mxu1 %vm4060_vm1, %v7558_v62  ;;  %6714 = vmatmul.mubr.msk.bf16.gmra.mrb[108].mxu0 %vm4060_vm1, %v9345_v31 }
 0x35e   : > { %4544 = vmatprep.mubr.bf16.mxu1 %v7618_v56  ;;  %4655 = vmatprep.mubr.bf16.mxu0 %v7618_v56 }
 0x365   : > { %6706 = vmatmul.mubr.msk.bf16.gmra.mrb[108].mxu1 %vm4060_vm1, %v7560_v63  ;;  %6715 = vmatmul.mubr.msk.bf16.gmra.mrb[112].mxu0 %vm4060_vm1, %v9361_v33 }
 0x366   : > { %4956 = vmatprep.mubr.bf16.mxu1 %v7618_v56  ;;  %4665 = vmatprep.mubr.bf16.mxu0 %v7618_v56 }
 0x36d   : > { %6743 = vmatmul.mubr.msk.bf16.vlgmr.msra.gmra.mrb[112].mxu1 %vm4060_vm1, %v9235_v28  ;;  %6716 = vmatmul.mubr.msk.bf16.gmra.mrb[116].mxu0 %vm4060_vm1, %v9379_v46 }
 0x36e   : > { %4966 = vmatprep.mubr.bf16.mxu1 %v7618_v56  ;;  %4675 = vmatprep.mubr.bf16.mxu0 %v7618_v56 }
 0x375   : > { %6744 = vmatmul.mubr.msk.bf16.gmra.mrb[116].mxu1 %vm4060_vm1, %v9263_v39  ;;  %6717 = vmatmul.mubr.msk.bf16.gmra.mrb[120].mxu0 %vm4060_vm1, %v9395_v49 }
 0x376   : > { %4976 = vmatprep.mubr.bf16.mxu1 %v7618_v56  ;;  %4685 = vmatprep.mubr.bf16.mxu0 %v7618_v56 }
 0x37d   : > { %6745 = vmatmul.mubr.msk.bf16.gmra.mrb[120].mxu1 %vm4060_vm1, %v9281_v4  ;;  %6718 = vmatmul.mubr.msk.bf16.gmra.mrb[124].mxu0 %vm4060_vm1, %v9411_v52 }
 0x37e   : > { %4986 = vmatprep.mubr.bf16.mxu1 %v7618_v56  ;;  %4695 = vmatprep.mubr.bf16.mxu0 %v7618_v56 }
 0x385   : > { %6746 = vmatmul.mubr.msk.bf16.gmra.mrb[124].mxu1 %vm4060_vm1, %v9297_v7  ;;  %6719 = vmatmul.mubr.msk.bf16.gmra.mrb[128].mxu0 %vm4060_vm1, %v9427_v57 }
 0x386   : > { %4996 = vmatprep.mubr.bf16.mxu1 %v7618_v56  ;;  %4705 = vmatprep.mubr.bf16.mxu0 %v7618_v56 }
 0x38d   : > { %6747 = vmatmul.mubr.msk.bf16.gmra.mrb[128].mxu1 %vm4060_vm1, %v9313_v10  ;;  %6720 = vmatmul.mubr.msk.bf16.gmra.mrb[132].mxu0 %vm4060_vm1, %v9443_v59 }
 0x38e   : > { %5006 = vmatprep.mubr.bf16.mxu1 %v7618_v56  ;;  %4715 = vmatprep.mubr.bf16.mxu0 %v7618_v56 }
 0x395   : > { %6748 = vmatmul.mubr.msk.bf16.gmra.mrb[132].mxu1 %vm4060_vm1, %v9329_v29  ;;  %6721 = vmatmul.mubr.msk.bf16.gmra.mrb[136].mxu0 %vm4060_vm1, %v9230_v21 }
 0x396   : > { %5016 = vmatprep.mubr.bf16.mxu1 %v7618_v56  ;;  %4725 = vmatprep.mubr.bf16.mxu0 %v7618_v56 }
 0x398   : > { %v4346_v15 = vpop.f32.mrb[28].mxu1  ;;  %v4216_v16 = vpop.f32.mrb[32].mxu0 }
 0x399   : > { %v4347_v17 = vadd.f32 %v4346_v15, %v9567_v47  ;;  %v4348_v18 = vpop.f32.mrb[29].mxu1  ;;  %v4217_v20 = vadd.f32 %v4216_v16, %v9567_v47  ;;  %v4218_v22 = vpop.f32.mrb[33].mxu0 }
 0x39a   : > { %v4349_v23 = vadd.f32 %v4348_v18, %v9572_v14  ;;  %v4350_v24 = vpop.f32.mrb[30].mxu1  ;;  %v4219_v19 = vadd.f32 %v4218_v22, %v9572_v14  ;;  %v4220_v25 = vpop.f32.mrb[34].mxu0 }
 0x39b   : > { %5451 = vst [vmem:[%s9579_s16 + $0x4e0] sm:$0xff] %v4347_v17  ;;  %v4351_v26 = vadd.f32 %v4350_v24, %v9567_v47  ;;  %v4352_v27 = vpop.f32.mrb[31].mxu1  ;;  %5295 = vst [vmem:[%s9579_s16] sm:$0xff] %v4217_v20  ;;  %v4221_v28 = vadd.f32 %v4220_v25, %v9567_v47  ;;  %v4222_v41 = vpop.f32.mrb[35].mxu0 }
 0x39c   : > { %5452 = vst [vmem:[%s9579_s16 + $0x4e8] sm:$0xff] %v4349_v23  ;;  %v4353_v54 = vadd.f32 %v4352_v27, %v9572_v14  ;;  %5296 = vst [vmem:[%s9579_s16 + $0x8] sm:$0xff] %v4219_v19  ;;  %v4223_v39 = vadd.f32 %v4222_v41, %v9572_v14 }
 0x39d   : > { %5457 = vst [vmem:[%s9579_s16 + $0x510] sm:$0xff] %v4351_v26  ;;  %6749 = vmatmul.mubr.msk.bf16.gmra.mrb[136].mxu1 %vm4060_vm1, %v9345_v31  ;;  %5301 = vst [vmem:[%s9579_s16 + $0x30] sm:$0xff] %v4221_v28  ;;  %6722 = vmatmul.mubr.msk.bf16.gmra.mrb[140].mxu0 %vm4060_vm1, %v9258_v8 }
 0x39e   : > { %5458 = vst [vmem:[%s9579_s16 + $0x518] sm:$0xff] %v4353_v54  ;;  %5026 = vmatprep.mubr.bf16.mxu1 %v7618_v56  ;;  %5302 = vst [vmem:[%s9579_s16 + $0x38] sm:$0xff] %v4223_v39  ;;  %4735 = vmatprep.mubr.bf16.mxu0 %v7618_v56 }
 0x3a0   : > { %v4356_v51 = vpop.f32.mrb[32].mxu1  ;;  %v4226_v4 = vpop.f32.mrb[36].mxu0 }
 0x3a1   : > { %v4357_v7 = vadd.f32 %v4356_v51, %v9567_v47  ;;  %v4358_v10 = vpop.f32.mrb[33].mxu1  ;;  %v4227_v29 = vadd.f32 %v4226_v4, %v9567_v47  ;;  %v4228_v31 = vpop.f32.mrb[37].mxu0 }
 0x3a2   : > { %v4359_v34 = vadd.f32 %v4358_v10, %v9572_v14  ;;  %v4360_v35 = vpop.f32.mrb[34].mxu1  ;;  %v4229_v37 = vadd.f32 %v4228_v31, %v9572_v14  ;;  %v4230_v38 = vpop.f32.mrb[38].mxu0 }
 0x3a3   : > { %5463 = vst [vmem:[%s9579_s16 + $0x540] sm:$0xff] %v4357_v7  ;;  %v4361_v42 = vadd.f32 %v4360_v35, %v9567_v47  ;;  %v4362_v43 = vpop.f32.mrb[35].mxu1  ;;  %5307 = vst [vmem:[%s9579_s16 + $0x60] sm:$0xff] %v4227_v29  ;;  %v4231_v44 = vadd.f32 %v4230_v38, %v9567_v47  ;;  %v4232_v5 = vpop.f32.mrb[39].mxu0 }
 0x3a4   : > { %5464 = vst [vmem:[%s9579_s16 + $0x548] sm:$0xff] %v4359_v34  ;;  %v4363_v53 = vadd.f32 %v4362_v43, %v9572_v14  ;;  %5308 = vst [vmem:[%s9579_s16 + $0x68] sm:$0xff] %v4229_v37  ;;  %v4233_v62 = vadd.f32 %v4232_v5, %v9572_v14 }
 0x3a5   : > { %5469 = vst [vmem:[%s9579_s16 + $0x570] sm:$0xff] %v4361_v42  ;;  %6750 = vmatmul.mubr.msk.bf16.gmra.mrb[140].mxu1 %vm4060_vm1, %v9361_v33  ;;  %5313 = vst [vmem:[%s9579_s16 + $0x90] sm:$0xff] %v4231_v44  ;;  %6723 = vmatmul.mubr.msk.bf16.gmra.mrb[144].mxu0 %vm4060_vm1, %v9276_v3 }
 0x3a6   : > { %5470 = vst [vmem:[%s9579_s16 + $0x578] sm:$0xff] %v4363_v53  ;;  %5036 = vmatprep.mubr.bf16.mxu1 %v7618_v56  ;;  %5314 = vst [vmem:[%s9579_s16 + $0x98] sm:$0xff] %v4233_v62  ;;  %4745 = vmatprep.mubr.bf16.mxu0 %v7618_v56 }
 0x3a8   : > { %v4366_v63 = vpop.f32.mrb[36].mxu1  ;;  %v4236_v0 = vpop.f32.mrb[40].mxu0 }
 0x3a9   : > { %v4367_v2 = vadd.f32 %v4366_v63, %v9567_v47  ;;  %v4368_v13 = vpop.f32.mrb[37].mxu1  ;;  %v4237_v33 = vadd.f32 %v4236_v0, %v9567_v47  ;;  %v4238_v15 = vpop.f32.mrb[41].mxu0 }
 0x3aa   : > { %v4369_v16 = vadd.f32 %v4368_v13, %v9572_v14  ;;  %v4370_v17 = vpop.f32.mrb[38].mxu1  ;;  %v4239_v18 = vadd.f32 %v4238_v15, %v9572_v14  ;;  %v4240_v20 = vpop.f32.mrb[42].mxu0 }
 0x3ab   : > { %5475 = vst [vmem:[%s9579_s16 + $0x5a0] sm:$0xff] %v4367_v2  ;;  %v4371_v22 = vadd.f32 %v4370_v17, %v9567_v47  ;;  %v4372_v23 = vpop.f32.mrb[39].mxu1  ;;  %5319 = vst [vmem:[%s9579_s16 + $0xc0] sm:$0xff] %v4237_v33  ;;  %v4241_v24 = vadd.f32 %v4240_v20, %v9567_v47  ;;  %v4242_v19 = vpop.f32.mrb[43].mxu0 }
 0x3ac   : > { %5476 = vst [vmem:[%s9579_s16 + $0x5a8] sm:$0xff] %v4369_v16  ;;  %v4373_v25 = vadd.f32 %v4372_v23, %v9572_v14  ;;  %5320 = vst [vmem:[%s9579_s16 + $0xc8] sm:$0xff] %v4239_v18  ;;  %v4243_v26 = vadd.f32 %v4242_v19, %v9572_v14 }
 0x3ad   : > { %5481 = vst [vmem:[%s9579_s16 + $0x5d0] sm:$0xff] %v4371_v22  ;;  %6751 = vmatmul.mubr.msk.bf16.gmra.mrb[144].mxu1 %vm4060_vm1, %v9379_v46  ;;  %5325 = vst [vmem:[%s9579_s16 + $0xf0] sm:$0xff] %v4241_v24  ;;  %6724 = vmatmul.mubr.msk.bf16.gmra.mrb[148].mxu0 %vm4060_vm1, %v9292_v6 }
 0x3ae   : > { %5482 = vst [vmem:[%s9579_s16 + $0x5d8] sm:$0xff] %v4373_v25  ;;  %5046 = vmatprep.mubr.bf16.mxu1 %v7618_v56  ;;  %5326 = vst [vmem:[%s9579_s16 + $0xf8] sm:$0xff] %v4243_v26  ;;  %4755 = vmatprep.mubr.bf16.mxu0 %v7618_v56 }
 0x3b0   : > { %v4376_v27 = vpop.f32.mrb[40].mxu1  ;;  %v4246_v28 = vpop.f32.mrb[44].mxu0 }
 0x3b1   : > { %v4377_v41 = vadd.f32 %v4376_v27, %v9567_v47  ;;  %v4378_v54 = vpop.f32.mrb[41].mxu1  ;;  %v4247_v46 = vadd.f32 %v4246_v28, %v9567_v47  ;;  %v4248_v39 = vpop.f32.mrb[45].mxu0 }
 0x3b2   : > { %v4379_v51 = vadd.f32 %v4378_v54, %v9572_v14  ;;  %v4380_v4 = vpop.f32.mrb[42].mxu1  ;;  %v4249_v7 = vadd.f32 %v4248_v39, %v9572_v14  ;;  %v4250_v10 = vpop.f32.mrb[46].mxu0 }
 0x3b3   : > { %5487 = vst [vmem:[%s9579_s16 + $0x600] sm:$0xff] %v4377_v41  ;;  %v4381_v29 = vadd.f32 %v4380_v4, %v9567_v47  ;;  %v4382_v31 = vpop.f32.mrb[43].mxu1  ;;  %5331 = vst [vmem:[%s9579_s16 + $0x120] sm:$0xff] %v4247_v46  ;;  %v4251_v34 = vadd.f32 %v4250_v10, %v9567_v47  ;;  %v4252_v35 = vpop.f32.mrb[47].mxu0 }
 0x3b4   : > { %5488 = vst [vmem:[%s9579_s16 + $0x608] sm:$0xff] %v4379_v51  ;;  %v4383_v37 = vadd.f32 %v4382_v31, %v9572_v14  ;;  %5332 = vst [vmem:[%s9579_s16 + $0x128] sm:$0xff] %v4249_v7  ;;  %v4253_v38 = vadd.f32 %v4252_v35, %v9572_v14 }
 0x3b5   : > { %5493 = vst [vmem:[%s9579_s16 + $0x630] sm:$0xff] %v4381_v29  ;;  %6752 = vmatmul.mubr.msk.bf16.gmra.mrb[148].mxu1 %vm4060_vm1, %v9395_v49  ;;  %5337 = vst [vmem:[%s9579_s16 + $0x150] sm:$0xff] %v4251_v34  ;;  %6725 = vmatmul.mubr.msk.bf16.gmra.mrb[152].mxu0 %vm4060_vm1, %v9308_v9 }
 0x3b6   : > { %5494 = vst [vmem:[%s9579_s16 + $0x638] sm:$0xff] %v4383_v37  ;;  %5056 = vmatprep.mubr.bf16.mxu1 %v7618_v56  ;;  %5338 = vst [vmem:[%s9579_s16 + $0x158] sm:$0xff] %v4253_v38  ;;  %4765 = vmatprep.mubr.bf16.mxu0 %v7618_v56 }
 0x3b8   : > { %v4386_v42 = vpop.f32.mrb[44].mxu1  ;;  %v4256_v43 = vpop.f32.mrb[48].mxu0 }
 0x3b9   : > { %v4387_v44 = vadd.f32 %v4386_v42, %v9567_v47  ;;  %v4388_v5 = vpop.f32.mrb[45].mxu1  ;;  %v4257_v49 = vadd.f32 %v4256_v43, %v9567_v47  ;;  %v4258_v53 = vpop.f32.mrb[49].mxu0 }
 0x3ba   : > { %v4389_v62 = vadd.f32 %v4388_v5, %v9572_v14  ;;  %v4390_v63 = vpop.f32.mrb[46].mxu1  ;;  %v4259_v0 = vadd.f32 %v4258_v53, %v9572_v14  ;;  %v4260_v2 = vpop.f32.mrb[50].mxu0 }
 0x3bb   : > { %5499 = vst [vmem:[%s9579_s16 + $0x660] sm:$0xff] %v4387_v44  ;;  %v4391_v13 = vadd.f32 %v4390_v63, %v9567_v47  ;;  %v4392_v33 = vpop.f32.mrb[47].mxu1  ;;  %5343 = vst [vmem:[%s9579_s16 + $0x180] sm:$0xff] %v4257_v49  ;;  %v4261_v15 = vadd.f32 %v4260_v2, %v9567_v47  ;;  %v4262_v16 = vpop.f32.mrb[51].mxu0 }
 0x3bc   : > { %5500 = vst [vmem:[%s9579_s16 + $0x668] sm:$0xff] %v4389_v62  ;;  %v4393_v17 = vadd.f32 %v4392_v33, %v9572_v14  ;;  %5344 = vst [vmem:[%s9579_s16 + $0x188] sm:$0xff] %v4259_v0  ;;  %v4263_v18 = vadd.f32 %v4262_v16, %v9572_v14 }
 0x3bd   : > { %5505 = vst [vmem:[%s9579_s16 + $0x690] sm:$0xff] %v4391_v13  ;;  %6753 = vmatmul.mubr.msk.bf16.gmra.mrb[152].mxu1 %vm4060_vm1, %v9411_v52  ;;  %5349 = vst [vmem:[%s9579_s16 + $0x1b0] sm:$0xff] %v4261_v15  ;;  %6726 = vmatmul.mubr.msk.bf16.gmra.mrb[156].mxu0 %vm4060_vm1, %v9324_v11 }
 0x3be   : > { %5506 = vst [vmem:[%s9579_s16 + $0x698] sm:$0xff] %v4393_v17  ;;  %5066 = vmatprep.mubr.bf16.mxu1 %v7618_v56  ;;  %5350 = vst [vmem:[%s9579_s16 + $0x1b8] sm:$0xff] %v4263_v18  ;;  %4775 = vmatprep.mubr.bf16.mxu0 %v7618_v56 }
 0x3c0   : > { %v4396_v20 = vpop.f32.mrb[48].mxu1  ;;  %v4266_v22 = vpop.f32.mrb[52].mxu0 }
 0x3c1   : > { %v4397_v23 = vadd.f32 %v4396_v20, %v9567_v47  ;;  %v4398_v24 = vpop.f32.mrb[49].mxu1  ;;  %v4267_v52 = vadd.f32 %v4266_v22, %v9567_v47  ;;  %v4268_v19 = vpop.f32.mrb[53].mxu0 }
 0x3c2   : > { %v4399_v25 = vadd.f32 %v4398_v24, %v9572_v14  ;;  %v4400_v26 = vpop.f32.mrb[50].mxu1  ;;  %v4269_v27 = vadd.f32 %v4268_v19, %v9572_v14  ;;  %v4270_v28 = vpop.f32.mrb[54].mxu0 }
 0x3c3   : > { %5511 = vst [vmem:[%s9579_s16 + $0x6c0] sm:$0xff] %v4397_v23  ;;  %v4401_v41 = vadd.f32 %v4400_v26, %v9567_v47  ;;  %v4402_v54 = vpop.f32.mrb[51].mxu1  ;;  %5355 = vst [vmem:[%s9579_s16 + $0x1e0] sm:$0xff] %v4267_v52  ;;  %v4271_v46 = vadd.f32 %v4270_v28, %v9567_v47  ;;  %v4272_v39 = vpop.f32.mrb[55].mxu0 }
 0x3c4   : > { %5512 = vst [vmem:[%s9579_s16 + $0x6c8] sm:$0xff] %v4399_v25  ;;  %v4403_v51 = vadd.f32 %v4402_v54, %v9572_v14  ;;  %5356 = vst [vmem:[%s9579_s16 + $0x1e8] sm:$0xff] %v4269_v27  ;;  %v4273_v4 = vadd.f32 %v4272_v39, %v9572_v14 }
 0x3c5   : > { %5517 = vst [vmem:[%s9579_s16 + $0x6f0] sm:$0xff] %v4401_v41  ;;  %6754 = vmatmul.mubr.msk.bf16.gmra.mrb[156].mxu1 %vm4060_vm1, %v9427_v57  ;;  %5361 = vst [vmem:[%s9579_s16 + $0x210] sm:$0xff] %v4271_v46  ;;  %6727 = vmatmul.mubr.msk.bf16.gmra.mrb[160].mxu0 %vm4060_vm1, %v9340_v30 }
 0x3c6   : > { %5518 = vst [vmem:[%s9579_s16 + $0x6f8] sm:$0xff] %v4403_v51  ;;  %5076 = vmatprep.mubr.bf16.mxu1 %v7618_v56  ;;  %5362 = vst [vmem:[%s9579_s16 + $0x218] sm:$0xff] %v4273_v4  ;;  %4785 = vmatprep.mubr.bf16.mxu0 %v7618_v56 }
 0x3c8   : > { %v4406_v7 = vpop.f32.mrb[52].mxu1  ;;  %v4276_v10 = vpop.f32.mrb[56].mxu0 }
 0x3c9   : > { %v4407_v29 = vadd.f32 %v4406_v7, %v9567_v47  ;;  %v4408_v31 = vpop.f32.mrb[53].mxu1  ;;  %v4277_v57 = vadd.f32 %v4276_v10, %v9567_v47  ;;  %v4278_v34 = vpop.f32.mrb[57].mxu0 }
 0x3ca   : > { %v4409_v30 = vadd.f32 %v4408_v31, %v9572_v14  ;;  %v4410_v35 = vpop.f32.mrb[54].mxu1  ;;  %v4279_v37 = vadd.f32 %v4278_v34, %v9572_v14  ;;  %v4280_v38 = vpop.f32.mrb[58].mxu0 }
 0x3cb   : > { %5523 = vst [vmem:[%s9579_s16 + $0x720] sm:$0xff] %v4407_v29  ;;  %v4411_v42 = vadd.f32 %v4410_v35, %v9567_v47  ;;  %v4412_v43 = vpop.f32.mrb[55].mxu1  ;;  %5367 = vst [vmem:[%s9579_s16 + $0x240] sm:$0xff] %v4277_v57  ;;  %v4281_v44 = vadd.f32 %v4280_v38, %v9567_v47  ;;  %v4282_v5 = vpop.f32.mrb[59].mxu0 }
 0x3cc   : > { %5524 = vst [vmem:[%s9579_s16 + $0x728] sm:$0xff] %v4409_v30  ;;  %v4413_v49 = vadd.f32 %v4412_v43, %v9572_v14  ;;  %5368 = vst [vmem:[%s9579_s16 + $0x248] sm:$0xff] %v4279_v37  ;;  %v4283_v53 = vadd.f32 %v4282_v5, %v9572_v14 }
 0x3cd   : > { %5529 = vst [vmem:[%s9579_s16 + $0x750] sm:$0xff] %v4411_v42  ;;  %6755 = vmatmul.mubr.msk.bf16.gmra.mrb[160].mxu1 %vm4060_vm1, %v9443_v59  ;;  %5373 = vst [vmem:[%s9579_s16 + $0x270] sm:$0xff] %v4281_v44  ;;  %6728 = vmatmul.mubr.msk.bf16.gmra.mrb[164].mxu0 %vm4060_vm1, %v9356_v32 }
 0x3ce   : > { %5530 = vst [vmem:[%s9579_s16 + $0x758] sm:$0xff] %v4413_v49  ;;  %5086 = vmatprep.mubr.bf16.mxu1 %v7618_v56  ;;  %5374 = vst [vmem:[%s9579_s16 + $0x278] sm:$0xff] %v4283_v53  ;;  %4795 = vmatprep.mubr.bf16.mxu0 %v7618_v56 }
 0x3d0   : > { %v4416_v62 = vpop.f32.mrb[56].mxu1  ;;  %v4286_v63 = vpop.f32.mrb[60].mxu0 }
 0x3d1   : > { %v4417_v0 = vadd.f32 %v4416_v62, %v9567_v47  ;;  %v4418_v2 = vpop.f32.mrb[57].mxu1  ;;  %v4287_v59 = vadd.f32 %v4286_v63, %v9567_v47  ;;  %v4288_v13 = vpop.f32.mrb[61].mxu0 }
 0x3d2   : > { %v4419_v32 = vadd.f32 %v4418_v2, %v9572_v14  ;;  %v4420_v33 = vpop.f32.mrb[58].mxu1  ;;  %v4289_v15 = vadd.f32 %v4288_v13, %v9572_v14  ;;  %v4290_v16 = vpop.f32.mrb[62].mxu0 }
 0x3d3   : > { %5535 = vst [vmem:[%s9579_s16 + $0x780] sm:$0xff] %v4417_v0  ;;  %v4421_v17 = vadd.f32 %v4420_v33, %v9567_v47  ;;  %v4422_v18 = vpop.f32.mrb[59].mxu1  ;;  %5379 = vst [vmem:[%s9579_s16 + $0x2a0] sm:$0xff] %v4287_v59  ;;  %v4291_v20 = vadd.f32 %v4290_v16, %v9567_v47  ;;  %v4292_v22 = vpop.f32.mrb[63].mxu0 }
 0x3d4   : > { %5536 = vst [vmem:[%s9579_s16 + $0x788] sm:$0xff] %v4419_v32  ;;  %v4423_v23 = vadd.f32 %v4422_v18, %v9572_v14  ;;  %5380 = vst [vmem:[%s9579_s16 + $0x2a8] sm:$0xff] %v4289_v15  ;;  %v4293_v24 = vadd.f32 %v4292_v22, %v9572_v14 }
 0x3d5   : > { %5541 = vst [vmem:[%s9579_s16 + $0x7b0] sm:$0xff] %v4421_v17  ;;  %6756 = vmatmul.mubr.msk.bf16.gmra.mrb[164].mxu1 %vm4060_vm1, %v9230_v21  ;;  %5385 = vst [vmem:[%s9579_s16 + $0x2d0] sm:$0xff] %v4291_v20  ;;  %6729 = vmatmul.mubr.msk.bf16.gmra.mrb[168].mxu0 %vm4060_vm1, %v9373_v45 }
 0x3d6   : > { %5542 = vst [vmem:[%s9579_s16 + $0x7b8] sm:$0xff] %v4423_v23  ;;  %5096 = vmatprep.mubr.bf16.mxu1 %v7618_v56  ;;  %5386 = vst [vmem:[%s9579_s16 + $0x2d8] sm:$0xff] %v4293_v24  ;;  %4805 = vmatprep.mubr.bf16.mxu0 %v7618_v56 }
 0x3d8   : > { %v4426_v52 = vpop.f32.mrb[60].mxu1  ;;  %v4296_v19 = vpop.f32.mrb[64].mxu0 }
 0x3d9   : > { %v4427_v25 = vadd.f32 %v4426_v52, %v9567_v47  ;;  %v4428_v26 = vpop.f32.mrb[61].mxu1  ;;  %v4297_v21 = vadd.f32 %v4296_v19, %v9567_v47  ;;  %v4298_v27 = vpop.f32.mrb[65].mxu0 }
 0x3da   : > { %v4429_v45 = vadd.f32 %v4428_v26, %v9572_v14  ;;  %v4430_v28 = vpop.f32.mrb[62].mxu1  ;;  %v4299_v41 = vadd.f32 %v4298_v27, %v9572_v14  ;;  %v4300_v54 = vpop.f32.mrb[66].mxu0 }
 0x3db   : > { %5547 = vst [vmem:[%s9579_s16 + $0x7e0] sm:$0xff] %v4427_v25  ;;  %v4431_v46 = vadd.f32 %v4430_v28, %v9567_v47  ;;  %v4432_v39 = vpop.f32.mrb[63].mxu1  ;;  %5391 = vst [vmem:[%s9579_s16 + $0x300] sm:$0xff] %v4297_v21  ;;  %v4301_v51 = vadd.f32 %v4300_v54, %v9567_v47  ;;  %v4302_v4 = vpop.f32.mrb[67].mxu0 }
 0x3dc   : > { %5548 = vst [vmem:[%s9579_s16 + $0x7e8] sm:$0xff] %v4429_v45  ;;  %v4433_v7 = vadd.f32 %v4432_v39, %v9572_v14  ;;  %5392 = vst [vmem:[%s9579_s16 + $0x308] sm:$0xff] %v4299_v41  ;;  %v4303_v10 = vadd.f32 %v4302_v4, %v9572_v14 }
 0x3dd   : > { %5553 = vst [vmem:[%s9579_s16 + $0x810] sm:$0xff] %v4431_v46  ;;  %6757 = vmatmul.mubr.msk.bf16.gmra.mrb[168].mxu1 %vm4060_vm1, %v9258_v8  ;;  %5397 = vst [vmem:[%s9579_s16 + $0x330] sm:$0xff] %v4301_v51  ;;  %6730 = vmatmul.mubr.msk.bf16.gmra.mrb[172].mxu0 %vm4060_vm1, %v9390_v48 }
 0x3de   : > { %5554 = vst [vmem:[%s9579_s16 + $0x818] sm:$0xff] %v4433_v7  ;;  %5106 = vmatprep.mubr.bf16.mxu1 %v7618_v56  ;;  %5398 = vst [vmem:[%s9579_s16 + $0x338] sm:$0xff] %v4303_v10  ;;  %4815 = vmatprep.mubr.bf16.mxu0 %v7618_v56 }
 0x3e0   : > { %v4436_v29 = vpop.f32.mrb[64].mxu1  ;;  %v4306_v31 = vpop.f32.mrb[68].mxu0 }
 0x3e1   : > { %v4437_v57 = vadd.f32 %v4436_v29, %v9567_v47  ;;  %v4438_v34 = vpop.f32.mrb[65].mxu1  ;;  %v4307_v8 = vadd.f32 %v4306_v31, %v9567_v47  ;;  %v4308_v30 = vpop.f32.mrb[69].mxu0 }
 0x3e2   : > { %v4439_v48 = vadd.f32 %v4438_v34, %v9572_v14  ;;  %v4440_v35 = vpop.f32.mrb[66].mxu1  ;;  %v4309_v37 = vadd.f32 %v4308_v30, %v9572_v14  ;;  %v4310_v38 = vpop.f32.mrb[70].mxu0  ;;  %v3876_v30 = vsub.s32 3, %v9553_v1 }
 0x3e3   : > { %5559 = vst [vmem:[%s9579_s16 + $0x840] sm:$0xff] %v4437_v57  ;;  %v4441_v42 = vadd.f32 %v4440_v35, %v9567_v47  ;;  %v4442_v43 = vpop.f32.mrb[67].mxu1  ;;  %5403 = vst [vmem:[%s9579_s16 + $0x360] sm:$0xff] %v4307_v8  ;;  %v4311_v44 = vadd.f32 %v4310_v38, %v9567_v47  ;;  %v4312_v5 = vpop.f32.mrb[71].mxu0 }
 0x3e4   : > { %5560 = vst [vmem:[%s9579_s16 + $0x848] sm:$0xff] %v4439_v48  ;;  %v4443_v49 = vadd.f32 %v4442_v43, %v9572_v14  ;;  %5404 = vst [vmem:[%s9579_s16 + $0x368] sm:$0xff] %v4309_v37  ;;  %v4313_v53 = vadd.f32 %v4312_v5, %v9572_v14  ;;  %v9872_v5 = vrot.slane %v9560_v12, %v3876_v30  ;;  %v7563_v30 = vld [vmem:[%s10588_s2 + $0xa8] sm:$0xff]  }
 0x3e5   : > { %5565 = vst [vmem:[%s9579_s16 + $0x870] sm:$0xff] %v4441_v42  ;;  %6758 = vmatmul.mubr.msk.bf16.gmra.mrb[172].mxu1 %vm4060_vm1, %v9276_v3  ;;  %5409 = vst [vmem:[%s9579_s16 + $0x390] sm:$0xff] %v4311_v44  ;;  %6731 = vmatmul.mubr.msk.bf16.gmra.mrb[176].mxu0 %vm4060_vm1, %v9406_v50 }
 0x3e6   : > { %5566 = vst [vmem:[%s9579_s16 + $0x878] sm:$0xff] %v4443_v49  ;;  %5116 = vmatprep.mubr.bf16.mxu1 %v7618_v56  ;;  %5410 = vst [vmem:[%s9579_s16 + $0x398] sm:$0xff] %v4313_v53  ;;  %4825 = vmatprep.mubr.bf16.mxu0 %v7618_v56 }
 0x3e8   : > { %v4446_v62 = vpop.f32.mrb[68].mxu1  ;;  %v4316_v63 = vpop.f32.mrb[72].mxu0 }
 0x3e9   : > { %v4447_v0 = vadd.f32 %v4446_v62, %v9567_v47  ;;  %v4448_v2 = vpop.f32.mrb[69].mxu1  ;;  %v4317_v3 = vadd.f32 %v4316_v63, %v9567_v47  ;;  %v4318_v59 = vpop.f32.mrb[73].mxu0 }
 0x3ea   : > { %v4449_v50 = vadd.f32 %v4448_v2, %v9572_v14  ;;  %v4450_v13 = vpop.f32.mrb[70].mxu1  ;;  %v4319_v32 = vadd.f32 %v4318_v59, %v9572_v14  ;;  %v4320_v33 = vpop.f32.mrb[74].mxu0 }
 0x3eb   : > { %5571 = vst [vmem:[%s9579_s16 + $0x8a0] sm:$0xff] %v4447_v0  ;;  %v4451_v15 = vadd.f32 %v4450_v13, %v9567_v47  ;;  %v4452_v16 = vpop.f32.mrb[71].mxu1  ;;  %5415 = vst [vmem:[%s9579_s16 + $0x3c0] sm:$0xff] %v4317_v3  ;;  %v4321_v17 = vadd.f32 %v4320_v33, %v9567_v47  ;;  %v4322_v18 = vpop.f32.mrb[75].mxu0 }
 0x3ec   : > { %5572 = vst [vmem:[%s9579_s16 + $0x8a8] sm:$0xff] %v4449_v50  ;;  %v4453_v20 = vadd.f32 %v4452_v16, %v9572_v14  ;;  %5416 = vst [vmem:[%s9579_s16 + $0x3c8] sm:$0xff] %v4319_v32  ;;  %v4323_v22 = vadd.f32 %v4322_v18, %v9572_v14  ;;  %v7561_v16 = vld [vmem:[%s10588_s2 + $0x98] sm:$0xff]  }
 0x3ed   : > { %5577 = vst [vmem:[%s9579_s16 + $0x8d0] sm:$0xff] %v4451_v15  ;;  %6759 = vmatmul.mubr.msk.bf16.gmra.mrb[176].mxu1 %vm4060_vm1, %v9292_v6  ;;  %5421 = vst [vmem:[%s9579_s16 + $0x3f0] sm:$0xff] %v4321_v17  ;;  %6732 = vmatmul.mubr.msk.bf16.gmra.mrb[180].mxu0 %vm4060_vm1, %v9422_v55 }
 0x3ee   : > { %5578 = vst [vmem:[%s9579_s16 + $0x8d8] sm:$0xff] %v4453_v20  ;;  %5126 = vmatprep.mubr.bf16.mxu1 %v7618_v56  ;;  %5422 = vst [vmem:[%s9579_s16 + $0x3f8] sm:$0xff] %v4323_v22  ;;  %4835 = vmatprep.mubr.bf16.mxu0 %v7618_v56 }
 0x3f0   : > { %v4456_v23 = vpop.f32.mrb[72].mxu1  ;;  %v4326_v24 = vpop.f32.mrb[76].mxu0 }
 0x3f1   : > { %v4457_v52 = vadd.f32 %v4456_v23, %v9567_v47  ;;  %v4458_v19 = vpop.f32.mrb[73].mxu1  ;;  %v4327_v6 = vadd.f32 %v4326_v24, %v9567_v47  ;;  %v4328_v25 = vpop.f32.mrb[77].mxu0 }
 0x3f2   : > { %v4459_v55 = vadd.f32 %v4458_v19, %v9572_v14  ;;  %v4460_v26 = vpop.f32.mrb[74].mxu1  ;;  %v4329_v21 = vadd.f32 %v4328_v25, %v9572_v14  ;;  %v4330_v27 = vpop.f32.mrb[78].mxu0 }
 0x3f3   : > { %5583 = vst [vmem:[%s9579_s16 + $0x900] sm:$0xff] %v4457_v52  ;;  %v4461_v45 = vadd.f32 %v4460_v26, %v9567_v47  ;;  %v4462_v28 = vpop.f32.mrb[75].mxu1  ;;  %5427 = vst [vmem:[%s9579_s16 + $0x420] sm:$0xff] %v4327_v6  ;;  %v4331_v41 = vadd.f32 %v4330_v27, %v9567_v47  ;;  %v4332_v54 = vpop.f32.mrb[79].mxu0 }
 0x3f4   : > { %5584 = vst [vmem:[%s9579_s16 + $0x908] sm:$0xff] %v4459_v55  ;;  %v4463_v46 = vadd.f32 %v4462_v28, %v9572_v14  ;;  %5428 = vst [vmem:[%s9579_s16 + $0x428] sm:$0xff] %v4329_v21  ;;  %v4333_v39 = vadd.f32 %v4332_v54, %v9572_v14  ;;  %v7562_v28 = vld [vmem:[%s10588_s2 + $0xa0] sm:$0xff]  }
 0x3f5   : > { %5589 = vst [vmem:[%s9579_s16 + $0x930] sm:$0xff] %v4461_v45  ;;  %6760 = vmatmul.mubr.msk.bf16.gmra.mrb[180].mxu1 %vm4060_vm1, %v9308_v9  ;;  %5433 = vst [vmem:[%s9579_s16 + $0x450] sm:$0xff] %v4331_v41  ;;  %6733 = vmatmul.mubr.msk.bf16.gmra.mrb[184].mxu0 %vm4060_vm1, %v9438_v58  ;;  %v3872_v58 = vsub.s32 2, %v9553_v1 }
 0x3f6   : > { %5590 = vst [vmem:[%s9579_s16 + $0x938] sm:$0xff] %v4463_v46  ;;  %5136 = vmatprep.mubr.bf16.mxu1 %v7618_v56  ;;  %5434 = vst [vmem:[%s9579_s16 + $0x458] sm:$0xff] %v4333_v39  ;;  %4845 = vmatprep.mubr.bf16.mxu0 %v7618_v56 }
 0x3f7   : > { %v9866_v44 = vrot.slane %v9560_v12, %v3872_v58 }
 0x3f8   : > { %v4466_v51 = vpop.f32.mrb[76].mxu1  ;;  %v4336_v4 = vpop.f32.mrb[80].mxu0 }
 0x3f9   : > { %v4467_v7 = vadd.f32 %v4466_v51, %v9567_v47  ;;  %v4468_v10 = vpop.f32.mrb[77].mxu1  ;;  %v4337_v9 = vadd.f32 %v4336_v4, %v9567_v47  ;;  %v4338_v29 = vpop.f32.mrb[81].mxu0 }
 0x3fa   : > { %v4469_v31 = vadd.f32 %v4468_v10, %v9572_v14  ;;  %v4470_v57 = vpop.f32.mrb[78].mxu1  ;;  %v4339_v34 = vadd.f32 %v4338_v29, %v9572_v14  ;;  %v4340_v8 = vpop.f32.mrb[82].mxu0 }
 0x3fb   : > { %5595 = vst [vmem:[%s9579_s16 + $0x960] sm:$0xff] %v4467_v7  ;;  %v4471_v48 = vadd.f32 %v4470_v57, %v9567_v47  ;;  %v4472_v35 = vpop.f32.mrb[79].mxu1  ;;  %5439 = vst [vmem:[%s9579_s16 + $0x480] sm:$0xff] %v4337_v9  ;;  %v4341_v37 = vadd.f32 %v4340_v8, %v9567_v47  ;;  %v4342_v38 = vpop.f32.mrb[83].mxu0 }
 0x3fc   : > { %5596 = vst [vmem:[%s9579_s16 + $0x968] sm:$0xff] %v4469_v31  ;;  %v4473_v42 = vadd.f32 %v4472_v35, %v9572_v14  ;;  %5440 = vst [vmem:[%s9579_s16 + $0x488] sm:$0xff] %v4339_v34  ;;  %v4343_v43 = vadd.f32 %v4342_v38, %v9572_v14 }
 0x3fd   : > { %5601 = vst [vmem:[%s9579_s16 + $0x990] sm:$0xff] %v4471_v48  ;;  %6761 = vmatmul.mubr.msk.bf16.gmra.mrb[184].mxu1 %vm4060_vm1, %v9324_v11  ;;  %5445 = vst [vmem:[%s9579_s16 + $0x4b0] sm:$0xff] %v4341_v37  ;;  %6734 = vmatmul.mubr.msk.bf16.gmra.mrb[188].mxu0 %vm4060_vm1, %v9454_v60 }
 0x3fe   : > { %5602 = vst [vmem:[%s9579_s16 + $0x998] sm:$0xff] %v4473_v42  ;;  %5146 = vmatprep.mubr.bf16.mxu1 %v7618_v56  ;;  %5446 = vst [vmem:[%s9579_s16 + $0x4b8] sm:$0xff] %v4343_v43  ;;  %4855 = vmatprep.mubr.bf16.mxu0 %v7618_v56 }
 0x400   : > { %v4476_v49 = vpop.f32.mrb[80].mxu1  ;;  %v4587_v11 = vpop.f32.mrb[84].mxu0 }
 0x401   : > { %v4477_v53 = vadd.f32 %v4476_v49, %v9567_v47  ;;  %v4478_v60 = vpop.f32.mrb[81].mxu1  ;;  %v4588_v62 = vadd.f32 %v4587_v11, %v9866_v44  ;;  %v4589_v63 = vpop.f32.mrb[85].mxu0 }
 0x402   : > { %v4479_v0 = vadd.f32 %v4478_v60, %v9572_v14  ;;  %v4480_v2 = vpop.f32.mrb[82].mxu1  ;;  %v4590_v12 = vadd.f32 %v4589_v63, %v9872_v5  ;;  %v4591_v3 = vpop.f32.mrb[86].mxu0 }
 0x403   : > { %5607 = vst [vmem:[%s9579_s16 + $0x9c0] sm:$0xff] %v4477_v53  ;;  %v4481_v59 = vadd.f32 %v4480_v2, %v9567_v47  ;;  %v4482_v50 = vpop.f32.mrb[83].mxu1  ;;  %5297 = vst [vmem:[%s9579_s16 + $0x10] sm:$0xff] %v4588_v62  ;;  %v4592_v13 = vadd.f32 %v4591_v3, %v9866_v44  ;;  %v4593_v32 = vpop.f32.mrb[87].mxu0  ;;  %v7564_v3 = vld [vmem:[%s10588_s2 + $0xb0] sm:$0xff]  }
 0x404   : > { %5608 = vst [vmem:[%s9579_s16 + $0x9c8] sm:$0xff] %v4479_v0  ;;  %v4483_v33 = vadd.f32 %v4482_v50, %v9572_v14  ;;  %5298 = vst [vmem:[%s9579_s16 + $0x18] sm:$0xff] %v4590_v12  ;;  %v4594_v15 = vadd.f32 %v4593_v32, %v9872_v5 }
 0x405   : > { %5613 = vst [vmem:[%s9579_s16 + $0x9f0] sm:$0xff] %v4481_v59  ;;  %6762 = vmatmul.mubr.msk.bf16.gmra.mrb[188].mxu1 %vm4060_vm1, %v7561_v16  ;;  %5303 = vst [vmem:[%s9579_s16 + $0x40] sm:$0xff] %v4592_v13  ;;  %6735 = vmatmul.mubr.msk.bf16.gmra.mrb[192].mxu0 %vm4060_vm1, %v9465_v36  ;;  %v9968_v59 = vld [vmem:[%s10588_s2 + $0xf0] sm:$0xff]  }
 0x406   : > { %5614 = vst [vmem:[%s9579_s16 + $0x9f8] sm:$0xff] %v4483_v33  ;;  %5156 = vmatprep.mubr.bf16.mxu1 %v7618_v56  ;;  %5304 = vst [vmem:[%s9579_s16 + $0x48] sm:$0xff] %v4594_v15  ;;  %4865 = vmatprep.mubr.bf16.mxu0 %v7618_v56 }
 0x408   : > { %v4486_v17 = vpop.f32.mrb[84].mxu1  ;;  %v4597_v18 = vpop.f32.mrb[88].mxu0 }
 0x409   : > { %v4487_v20 = vadd.f32 %v4486_v17, %v9567_v47  ;;  %v4488_v22 = vpop.f32.mrb[85].mxu1  ;;  %v4598_v23 = vadd.f32 %v4597_v18, %v9866_v44  ;;  %v4599_v24 = vpop.f32.mrb[89].mxu0 }
 0x40a   : > { %v4489_v36 = vadd.f32 %v4488_v22, %v9572_v14  ;;  %v4490_v52 = vpop.f32.mrb[86].mxu1  ;;  %v4600_v19 = vadd.f32 %v4599_v24, %v9872_v5  ;;  %v4601_v6 = vpop.f32.mrb[90].mxu0 }
 0x40b   : > { %5619 = vst [vmem:[%s9579_s16 + $0xa20] sm:$0xff] %v4487_v20  ;;  %v4491_v25 = vadd.f32 %v4490_v52, %v9567_v47  ;;  %v4492_v55 = vpop.f32.mrb[87].mxu1  ;;  %5309 = vst [vmem:[%s9579_s16 + $0x70] sm:$0xff] %v4598_v23  ;;  %v4602_v26 = vadd.f32 %v4601_v6, %v9866_v44  ;;  %v4603_v21 = vpop.f32.mrb[91].mxu0 }
 0x40c   : > { %5620 = vst [vmem:[%s9579_s16 + $0xa28] sm:$0xff] %v4489_v36  ;;  %v4493_v27 = vadd.f32 %v4492_v55, %v9572_v14  ;;  %5310 = vst [vmem:[%s9579_s16 + $0x78] sm:$0xff] %v4600_v19  ;;  %v4604_v45 = vadd.f32 %v4603_v21, %v9872_v5  ;;  %v9997_v55 = vld [vmem:[%s10588_s2 + $0xf8] sm:$0xff]  }
 0x40d   : > { %5625 = vst [vmem:[%s9579_s16 + $0xa50] sm:$0xff] %v4491_v25  ;;  %6763 = vmatmul.mubr.msk.bf16.gmra.mrb[192].mxu1 %vm4060_vm1, %v7562_v28  ;;  %5315 = vst [vmem:[%s9579_s16 + $0xa0] sm:$0xff] %v4602_v26  ;;  %6736 = vmatmul.mubr.msk.bf16.gmra.mrb[196].mxu0 %vm4060_vm1, %v9476_v40  ;;  %v7566_v25 = vld [vmem:[%s10588_s2 + $0xb8] sm:$0xff]  }
 0x40e   : > { %5626 = vst [vmem:[%s9579_s16 + $0xa58] sm:$0xff] %v4493_v27  ;;  %5166 = vmatprep.mubr.bf16.mxu1 %v7618_v56  ;;  %5316 = vst [vmem:[%s9579_s16 + $0xa8] sm:$0xff] %v4604_v45  ;;  %4875 = vmatprep.mubr.bf16.mxu0 %v7618_v56 }
 0x410   : > { %v4496_v41 = vpop.f32.mrb[88].mxu1  ;;  %v4607_v54 = vpop.f32.mrb[92].mxu0 }
 0x411   : > { %v4497_v46 = vadd.f32 %v4496_v41, %v9567_v47  ;;  %v4498_v39 = vpop.f32.mrb[89].mxu1  ;;  %v4608_v51 = vadd.f32 %v4607_v54, %v9866_v44  ;;  %v4609_v4 = vpop.f32.mrb[93].mxu0 }
 0x412   : > { %v4499_v40 = vadd.f32 %v4498_v39, %v9572_v14  ;;  %v4500_v7 = vpop.f32.mrb[90].mxu1  ;;  %v4610_v10 = vadd.f32 %v4609_v4, %v9872_v5  ;;  %v4611_v9 = vpop.f32.mrb[94].mxu0 }
 0x413   : > { %5631 = vst [vmem:[%s9579_s16 + $0xa80] sm:$0xff] %v4497_v46  ;;  %v4501_v29 = vadd.f32 %v4500_v7, %v9567_v47  ;;  %v4502_v58 = vpop.f32.mrb[91].mxu1  ;;  %5321 = vst [vmem:[%s9579_s16 + $0xd0] sm:$0xff] %v4608_v51  ;;  %v4612_v31 = vadd.f32 %v4611_v9, %v9866_v44  ;;  %v4613_v57 = vpop.f32.mrb[95].mxu0 }
 0x414   : > { %5632 = vst [vmem:[%s9579_s16 + $0xa88] sm:$0xff] %v4499_v40  ;;  %v4503_v34 = vadd.f32 %v4502_v58, %v9572_v14  ;;  %5322 = vst [vmem:[%s9579_s16 + $0xd8] sm:$0xff] %v4610_v10  ;;  %v4614_v8 = vadd.f32 %v4613_v57, %v9872_v5  ;;  %v7568_v58 = vld [vmem:[%s10588_s2 + $0xc0] sm:$0xff]  }
 0x415   : > { %5637 = vst [vmem:[%s9579_s16 + $0xab0] sm:$0xff] %v4501_v29  ;;  %6764 = vmatmul.mubr.msk.bf16.gmra.mrb[196].mxu1 %vm4060_vm1, %v7563_v30  ;;  %5327 = vst [vmem:[%s9579_s16 + $0x100] sm:$0xff] %v4612_v31  ;;  %6737 = vmatmul.mubr.msk.bf16.gmra.mrb[200].mxu0 %vm4060_vm1, %v9487_v61  ;;  %v10026_v31 = vld [vmem:[%s10588_s2 + $0x100] sm:$0xff]  }
 0x416   : > { %5638 = vst [vmem:[%s9579_s16 + $0xab8] sm:$0xff] %v4503_v34  ;;  %5176 = vmatprep.mubr.bf16.mxu1 %v7618_v56  ;;  %5328 = vst [vmem:[%s9579_s16 + $0x108] sm:$0xff] %v4614_v8  ;;  %4885 = vmatprep.mubr.bf16.mxu0 %v7618_v56 }
 0x418   : > { %v4506_v48 = vpop.f32.mrb[92].mxu1  ;;  %v4617_v35 = vpop.f32.mrb[96].mxu0 }
 0x419   : > { %v4507_v37 = vadd.f32 %v4506_v48, %v9567_v47  ;;  %v4508_v38 = vpop.f32.mrb[93].mxu1  ;;  %v4618_v42 = vadd.f32 %v4617_v35, %v9866_v44  ;;  %v4619_v43 = vpop.f32.mrb[97].mxu0 }
 0x41a   : > { %v4509_v61 = vadd.f32 %v4508_v38, %v9572_v14  ;;  %v4510_v49 = vpop.f32.mrb[94].mxu1  ;;  %v4620_v11 = vadd.f32 %v4619_v43, %v9872_v5  ;;  %v4621_v53 = vpop.f32.mrb[98].mxu0 }
 0x41b   : > { %5643 = vst [vmem:[%s9579_s16 + $0xae0] sm:$0xff] %v4507_v37  ;;  %v4511_v60 = vadd.f32 %v4510_v49, %v9567_v47  ;;  %v4512_v62 = vpop.f32.mrb[95].mxu1  ;;  %5333 = vst [vmem:[%s9579_s16 + $0x130] sm:$0xff] %v4618_v42  ;;  %v4622_v63 = vadd.f32 %v4621_v53, %v9866_v44  ;;  %v4623_v0 = vpop.f32.mrb[99].mxu0 }
 0x41c   : > { %5644 = vst [vmem:[%s9579_s16 + $0xae8] sm:$0xff] %v4509_v61  ;;  %v4513_v2 = vadd.f32 %v4512_v62, %v9572_v14  ;;  %5334 = vst [vmem:[%s9579_s16 + $0x138] sm:$0xff] %v4620_v11  ;;  %v4624_v12 = vadd.f32 %v4623_v0, %v9872_v5  ;;  %v10055_v0 = vld [vmem:[%s10588_s2 + $0x108] ss:$0 sps:$4 sm:$0x11]  }
 0x41d   : > { %5649 = vst [vmem:[%s9579_s16 + $0xb10] sm:$0xff] %v4511_v60  ;;  %6765 = vmatmul.mubr.msk.bf16.gmra.mrb[200].mxu1 %vm4060_vm1, %v7564_v3  ;;  %5339 = vst [vmem:[%s9579_s16 + $0x160] sm:$0xff] %v4622_v63  ;;  %6738 = vmatmul.mubr.msk.bf16.gmra.mrb[204].mxu0 %vm4060_vm1, %v9968_v59  ;;  %v7570_v63 = vld [vmem:[%s10588_s2 + $0xc8] sm:$0xff]  }
 0x41e   : > { %5650 = vst [vmem:[%s9579_s16 + $0xb18] sm:$0xff] %v4513_v2  ;;  %5186 = vmatprep.mubr.bf16.mxu1 %v7618_v56  ;;  %5340 = vst [vmem:[%s9579_s16 + $0x168] sm:$0xff] %v4624_v12  ;;  %4895 = vmatprep.mubr.bf16.mxu0 %v7618_v56 }
 0x420   : > { %v4516_v50 = vpop.f32.mrb[96].mxu1  ;;  %v4627_v13 = vpop.f32.mrb[100].mxu0 }
 0x421   : > { %v4517_v32 = vadd.f32 %v4516_v50, %v9567_v47  ;;  %v4518_v33 = vpop.f32.mrb[97].mxu1  ;;  %v4628_v15 = vadd.f32 %v4627_v13, %v9866_v44  ;;  %v4629_v16 = vpop.f32.mrb[101].mxu0  ;;  %v3880_v13 = vsub.s32 4, %v9553_v1 }
 0x422   : > { %v4519_v17 = vadd.f32 %v4518_v33, %v9572_v14  ;;  %v4520_v18 = vpop.f32.mrb[98].mxu1  ;;  %v4630_v20 = vadd.f32 %v4629_v16, %v9872_v5  ;;  %v4631_v22 = vpop.f32.mrb[102].mxu0 }
 0x423   : > { %5655 = vst [vmem:[%s9579_s16 + $0xb40] sm:$0xff] %v4517_v32  ;;  %v4521_v23 = vadd.f32 %v4520_v18, %v9567_v47  ;;  %v4522_v24 = vpop.f32.mrb[99].mxu1  ;;  %5345 = vst [vmem:[%s9579_s16 + $0x190] sm:$0xff] %v4628_v15  ;;  %v4632_v36 = vadd.f32 %v4631_v22, %v9866_v44  ;;  %v4633_v52 = vpop.f32.mrb[103].mxu0 }
 0x424   : > { %5656 = vst [vmem:[%s9579_s16 + $0xb48] sm:$0xff] %v4519_v17  ;;  %v4523_v19 = vadd.f32 %v4522_v24, %v9572_v14  ;;  %5346 = vst [vmem:[%s9579_s16 + $0x198] sm:$0xff] %v4630_v20  ;;  %v4634_v6 = vadd.f32 %v4633_v52, %v9872_v5  ;;  %v3884_v17 = vsub.s32 5, %v9553_v1  ;;  %v7573_v1 = vld [vmem:[#allocation3] sm:$0x3f] }
 0x425   : > { %5661 = vst [vmem:[%s9579_s16 + $0xb70] sm:$0xff] %v4521_v23  ;;  %6766 = vmatmul.mubr.msk.bf16.gmra.mrb[204].mxu1 %vm4060_vm1, %v7566_v25  ;;  %5351 = vst [vmem:[%s9579_s16 + $0x1c0] sm:$0xff] %v4632_v36  ;;  %6739 = vmatmul.mubr.msk.bf16.gmra.mrb[208].mxu0 %vm4060_vm1, %v9997_v55  ;;  %v10078_v36 = vrot.slane %v7573_v1, %v3880_v13 }
 0x426   : > { %5662 = vst [vmem:[%s9579_s16 + $0xb78] sm:$0xff] %v4523_v19  ;;  %5196 = vmatprep.mubr.bf16.mxu1 %v7618_v56  ;;  %5352 = vst [vmem:[%s9579_s16 + $0x1c8] sm:$0xff] %v4634_v6  ;;  %4905 = vmatprep.mubr.bf16.mxu0 %v7618_v56  ;;  %v10081_v52 = vrot.slane %v7573_v1, %v3884_v17 }
 0x428   : > { %v4526_v26 = vpop.f32.mrb[100].mxu1  ;;  %v4637_v21 = vpop.f32.mrb[104].mxu0 }
 0x429   : > { %v4527_v27 = vadd.f32 %v4526_v26, %v9567_v47  ;;  %v4528_v45 = vpop.f32.mrb[101].mxu1  ;;  %v4638_v28 = vadd.f32 %v4637_v21, %v9866_v44  ;;  %v4639_v41 = vpop.f32.mrb[105].mxu0 }
 0x42a   : > { %v4529_v54 = vadd.f32 %v4528_v45, %v9572_v14  ;;  %v4530_v46 = vpop.f32.mrb[102].mxu1  ;;  %v4640_v39 = vadd.f32 %v4639_v41, %v9872_v5  ;;  %v4641_v51 = vpop.f32.mrb[106].mxu0 }
 0x42b   : > { %5667 = vst [vmem:[%s9579_s16 + $0xba0] sm:$0xff] %v4527_v27  ;;  %v4531_v4 = vadd.f32 %v4530_v46, %v9567_v47  ;;  %v4532_v40 = vpop.f32.mrb[103].mxu1  ;;  %5357 = vst [vmem:[%s9579_s16 + $0x1f0] sm:$0xff] %v4638_v28  ;;  %v4642_v7 = vadd.f32 %v4641_v51, %v9866_v44  ;;  %v4643_v10 = vpop.f32.mrb[107].mxu0 }
 0x42c   : > { %5668 = vst [vmem:[%s9579_s16 + $0xba8] sm:$0xff] %v4529_v54  ;;  %v4533_v9 = vadd.f32 %v4532_v40, %v9572_v14  ;;  %5358 = vst [vmem:[%s9579_s16 + $0x1f8] sm:$0xff] %v4640_v39  ;;  %v4644_v29 = vadd.f32 %v4643_v10, %v9872_v5  ;;  %v7574_v10 = vld [vmem:[%s10588_s2 + $0xd8] sm:$0xff]  }
 0x42d   : > { %5673 = vst [vmem:[%s9579_s16 + $0xbd0] sm:$0xff] %v4531_v4  ;;  %6767 = vmatmul.mubr.msk.bf16.gmra.mrb[208].mxu1 %vm4060_vm1, %v7568_v58  ;;  %5363 = vst [vmem:[%s9579_s16 + $0x220] sm:$0xff] %v4642_v7  ;;  %6740 = vmatmul.mubr.msk.bf16.gmra.mrb[212].mxu0 %vm4060_vm1, %v10026_v31 }
 0x42e   : > { %5674 = vst [vmem:[%s9579_s16 + $0xbd8] sm:$0xff] %v4533_v9  ;;  %5206 = vmatprep.mubr.bf16.mxu1 %v7618_v56  ;;  %5364 = vst [vmem:[%s9579_s16 + $0x228] sm:$0xff] %v4644_v29  ;;  %4915 = vmatprep.mubr.bf16.mxu0 %v7618_v56 }
 0x430   : > { %v4536_v57 = vpop.f32.mrb[104].mxu1  ;;  %v4647_v34 = vpop.f32.mrb[108].mxu0 }
 0x431   : > { %v4537_v8 = vadd.f32 %v4536_v57, %v9567_v47  ;;  %v4538_v30 = vpop.f32.mrb[105].mxu1  ;;  %v4648_v48 = vadd.f32 %v4647_v34, %v9866_v44  ;;  %v4649_v35 = vpop.f32.mrb[109].mxu0 }
 0x432   : > { %v4539_v37 = vadd.f32 %v4538_v30, %v9572_v14  ;;  %v4540_v38 = vpop.f32.mrb[106].mxu1  ;;  %v4650_v42 = vadd.f32 %v4649_v35, %v9872_v5  ;;  %v4651_v43 = vpop.f32.mrb[110].mxu0 }
 0x433   : > { %5679 = vst [vmem:[%s9579_s16 + $0xc00] sm:$0xff] %v4537_v8  ;;  %v4541_v61 = vadd.f32 %v4540_v38, %v9567_v47  ;;  %v4542_v49 = vpop.f32.mrb[107].mxu1  ;;  %5369 = vst [vmem:[%s9579_s16 + $0x250] sm:$0xff] %v4648_v48  ;;  %v4652_v11 = vadd.f32 %v4651_v43, %v9866_v44  ;;  %v4653_v53 = vpop.f32.mrb[111].mxu0 }
 0x434   : > { %5680 = vst [vmem:[%s9579_s16 + $0xc08] sm:$0xff] %v4539_v37  ;;  %v4543_v60 = vadd.f32 %v4542_v49, %v9572_v14  ;;  %5370 = vst [vmem:[%s9579_s16 + $0x258] sm:$0xff] %v4650_v42  ;;  %v4654_v62 = vadd.f32 %v4653_v53, %v9872_v5  ;;  %v7575_v53 = vld [vmem:[%s10588_s2 + $0xe0] sm:$0xff]  }
 0x435   : > { %5685 = vst [vmem:[%s9579_s16 + $0xc30] sm:$0xff] %v4541_v61  ;;  %6768 = vmatmul.mubr.msk.bf16.gmra.mrb[212].mxu1 %vm4060_vm1, %v7570_v63  ;;  %5375 = vst [vmem:[%s9579_s16 + $0x280] sm:$0xff] %v4652_v11  ;;  %6741 = vmatmul.mubr.msk.bf16.gmra.mrb[216].mxu0 %vm4060_vm1, %v10055_v0 }
 0x436   : > { %5686 = vst [vmem:[%s9579_s16 + $0xc38] sm:$0xff] %v4543_v60  ;;  %5216 = vmatprep.mubr.bf16.mxu1 %v7618_v56  ;;  %5376 = vst [vmem:[%s9579_s16 + $0x288] sm:$0xff] %v4654_v62 }
 0x438   : > { %v4546_v2 = vpop.f32.mrb[108].mxu1  ;;  %v4657_v12 = vpop.f32.mrb[112].mxu0 }
 0x439   : > { %v4547_v3 = vadd.f32 %v4546_v2, %v9567_v47  ;;  %v4548_v50 = vpop.f32.mrb[109].mxu1  ;;  %v4658_v32 = vadd.f32 %v4657_v12, %v9866_v44  ;;  %v4659_v33 = vpop.f32.mrb[113].mxu0 }
 0x43a   : > { %v4549_v15 = vadd.f32 %v4548_v50, %v9572_v14  ;;  %v4550_v16 = vpop.f32.mrb[110].mxu1  ;;  %v4660_v18 = vadd.f32 %v4659_v33, %v9872_v5  ;;  %v4661_v20 = vpop.f32.mrb[114].mxu0  ;;  %v7572_v14 = vld [vmem:[%s10588_s2 + $0xd0] sm:$0xff]  }
 0x43b   : > { %5691 = vst [vmem:[%s9579_s16 + $0xc60] sm:$0x3] %v4547_v3  ;;  %v4551_v22 = vpop.f32.mrb[111].mxu1  ;;  %5381 = vst [vmem:[%s9579_s16 + $0x2b0] sm:$0xff] %v4658_v32  ;;  %v4662_v47 = vadd.f32 %v4661_v20, %v9866_v44  ;;  %v4663_v23 = vpop.f32.mrb[115].mxu0 }
 0x43c   : > { %5692 = vst [vmem:[%s9579_s16 + $0xc68] sm:$0x3] %v4549_v15  ;;  %5382 = vst [vmem:[%s9579_s16 + $0x2b8] sm:$0xff] %v4660_v18  ;;  %v4664_v24 = vadd.f32 %v4663_v23, %v9872_v5 }
 0x43d   : > { %6769 = vmatmul.mubr.msk.bf16.gmra.mrb[216].mxu1 %vm4060_vm1, %v7572_v14  ;;  %5387 = vst [vmem:[%s9579_s16 + $0x2e0] sm:$0xff] %v4662_v47  ;;  %v7576_v47 = vld [vmem:[%s10588_s2 + $0xe8] sm:$0xff]  }
 0x43e   : > { %5226 = vmatprep.mubr.bf16.mxu1 %v7618_v56  ;;  %5388 = vst [vmem:[%s9579_s16 + $0x2e8] sm:$0xff] %v4664_v24 }
 0x440   : > { %v4958_v19 = vpop.f32.mrb[112].mxu1  ;;  %v4667_v6 = vpop.f32.mrb[116].mxu0 }
 0x441   : > { %v4959_v25 = vadd.f32 %v4958_v19, %v10078_v36  ;;  %v4960_v26 = vpop.f32.mrb[113].mxu1  ;;  %v4668_v21 = vadd.f32 %v4667_v6, %v9866_v44  ;;  %v4669_v27 = vpop.f32.mrb[117].mxu0 }
 0x442   : > { %v4961_v45 = vadd.f32 %v4960_v26, %v10081_v52  ;;  %v4962_v28 = vpop.f32.mrb[114].mxu1  ;;  %v4670_v41 = vadd.f32 %v4669_v27, %v9872_v5  ;;  %v4671_v54 = vpop.f32.mrb[118].mxu0 }
 0x443   : > { %5299 = vst [vmem:[%s9579_s16 + $0x20] sm:$0xff] %v4959_v25  ;;  %v4963_v46 = vadd.f32 %v4962_v28, %v10078_v36  ;;  %v4964_v39 = vpop.f32.mrb[115].mxu1  ;;  %5393 = vst [vmem:[%s9579_s16 + $0x310] sm:$0xff] %v4668_v21  ;;  %v4672_v51 = vadd.f32 %v4671_v54, %v9866_v44  ;;  %v4673_v4 = vpop.f32.mrb[119].mxu0 }
 0x444   : > { %5300 = vst [vmem:[%s9579_s16 + $0x28] sm:$0xff] %v4961_v45  ;;  %v4965_v40 = vadd.f32 %v4964_v39, %v10081_v52  ;;  %5394 = vst [vmem:[%s9579_s16 + $0x318] sm:$0xff] %v4670_v41  ;;  %v4674_v7 = vadd.f32 %v4673_v4, %v9872_v5 }
 0x445   : > { %5305 = vst [vmem:[%s9579_s16 + $0x50] sm:$0xff] %v4963_v46  ;;  %6770 = vmatmul.mubr.msk.bf16.gmra.mrb[220].mxu1 %vm4060_vm1, %v7574_v10  ;;  %5399 = vst [vmem:[%s9579_s16 + $0x340] sm:$0xff] %v4672_v51 }
 0x446   : > { %5306 = vst [vmem:[%s9579_s16 + $0x58] sm:$0xff] %v4965_v40  ;;  %5236 = vmatprep.mubr.bf16.mxu1 %v7618_v56  ;;  %5400 = vst [vmem:[%s9579_s16 + $0x348] sm:$0xff] %v4674_v7 }
 0x448   : > { %v4968_v9 = vpop.f32.mrb[116].mxu1  ;;  %v4677_v29 = vpop.f32.mrb[120].mxu0 }
 0x449   : > { %v4969_v58 = vadd.f32 %v4968_v9, %v10078_v36  ;;  %v4970_v57 = vpop.f32.mrb[117].mxu1  ;;  %v4678_v34 = vadd.f32 %v4677_v29, %v9866_v44  ;;  %v4679_v8 = vpop.f32.mrb[121].mxu0 }
 0x44a   : > { %v4971_v30 = vadd.f32 %v4970_v57, %v10081_v52  ;;  %v4972_v48 = vpop.f32.mrb[118].mxu1  ;;  %v4680_v35 = vadd.f32 %v4679_v8, %v9872_v5  ;;  %v4681_v37 = vpop.f32.mrb[122].mxu0 }
 0x44b   : > { %5311 = vst [vmem:[%s9579_s16 + $0x80] sm:$0xff] %v4969_v58  ;;  %v4973_v38 = vadd.f32 %v4972_v48, %v10078_v36  ;;  %v4974_v42 = vpop.f32.mrb[119].mxu1  ;;  %5405 = vst [vmem:[%s9579_s16 + $0x370] sm:$0xff] %v4678_v34  ;;  %v4682_v43 = vadd.f32 %v4681_v37, %v9866_v44  ;;  %v4683_v61 = vpop.f32.mrb[123].mxu0 }
 0x44c   : > { %5312 = vst [vmem:[%s9579_s16 + $0x88] sm:$0xff] %v4971_v30  ;;  %v4975_v49 = vadd.f32 %v4974_v42, %v10081_v52  ;;  %5406 = vst [vmem:[%s9579_s16 + $0x378] sm:$0xff] %v4680_v35  ;;  %v4684_v11 = vadd.f32 %v4683_v61, %v9872_v5 }
 0x44d   : > { %5317 = vst [vmem:[%s9579_s16 + $0xb0] sm:$0xff] %v4973_v38  ;;  %6771 = vmatmul.mubr.msk.bf16.gmra.mrb[224].mxu1 %vm4060_vm1, %v7575_v53  ;;  %5411 = vst [vmem:[%s9579_s16 + $0x3a0] sm:$0xff] %v4682_v43 }
 0x44e   : > { %5318 = vst [vmem:[%s9579_s16 + $0xb8] sm:$0xff] %v4975_v49  ;;  %5246 = vmatprep.mubr.bf16.mxu1 %v7618_v56  ;;  %5412 = vst [vmem:[%s9579_s16 + $0x3a8] sm:$0xff] %v4684_v11 }
 0x450   : > { %v4978_v60 = vpop.f32.mrb[120].mxu1  ;;  %v4687_v62 = vpop.f32.mrb[124].mxu0 }
 0x451   : > { %v4979_v63 = vadd.f32 %v4978_v60, %v10078_v36  ;;  %v4980_v2 = vpop.f32.mrb[121].mxu1  ;;  %v4688_v12 = vadd.f32 %v4687_v62, %v9866_v44  ;;  %v4689_v3 = vpop.f32.mrb[125].mxu0 }
 0x452   : > { %v4981_v50 = vadd.f32 %v4980_v2, %v10081_v52  ;;  %v4982_v13 = vpop.f32.mrb[122].mxu1  ;;  %v4690_v32 = vadd.f32 %v4689_v3, %v9872_v5  ;;  %v4691_v33 = vpop.f32.mrb[126].mxu0 }
 0x453   : > { %5323 = vst [vmem:[%s9579_s16 + $0xe0] sm:$0xff] %v4979_v63  ;;  %v4983_v15 = vadd.f32 %v4982_v13, %v10078_v36  ;;  %v4984_v16 = vpop.f32.mrb[123].mxu1  ;;  %5417 = vst [vmem:[%s9579_s16 + $0x3d0] sm:$0xff] %v4688_v12  ;;  %v4692_v17 = vadd.f32 %v4691_v33, %v9866_v44  ;;  %v4693_v18 = vpop.f32.mrb[127].mxu0 }
 0x454   : > { %5324 = vst [vmem:[%s9579_s16 + $0xe8] sm:$0xff] %v4981_v50  ;;  %v4985_v20 = vadd.f32 %v4984_v16, %v10081_v52  ;;  %5418 = vst [vmem:[%s9579_s16 + $0x3d8] sm:$0xff] %v4690_v32  ;;  %v4694_v22 = vadd.f32 %v4693_v18, %v9872_v5 }
 0x455   : > { %5329 = vst [vmem:[%s9579_s16 + $0x110] sm:$0xff] %v4983_v15  ;;  %6772 = vmatmul.mubr.msk.bf16.gmra.mrb[228].mxu1 %vm4060_vm1, %v7576_v47  ;;  %5423 = vst [vmem:[%s9579_s16 + $0x400] sm:$0xff] %v4692_v17 }
 0x456   : > { %5330 = vst [vmem:[%s9579_s16 + $0x118] sm:$0xff] %v4985_v20  ;;  %5256 = vmatprep.mubr.bf16.mxu1 %v7618_v56  ;;  %5424 = vst [vmem:[%s9579_s16 + $0x408] sm:$0xff] %v4694_v22 }
 0x458   : > { %v4988_v23 = vpop.f32.mrb[124].mxu1  ;;  %v4697_v24 = vpop.f32.mrb[128].mxu0 }
 0x459   : > { %v4989_v14 = vadd.f32 %v4988_v23, %v10078_v36  ;;  %v4990_v1 = vpop.f32.mrb[125].mxu1  ;;  %v4698_v19 = vadd.f32 %v4697_v24, %v9866_v44  ;;  %v4699_v6 = vpop.f32.mrb[129].mxu0 }
 0x45a   : > { %v4991_v25 = vadd.f32 %v4990_v1, %v10081_v52  ;;  %v4992_v26 = vpop.f32.mrb[126].mxu1  ;;  %v4700_v21 = vadd.f32 %v4699_v6, %v9872_v5  ;;  %v4701_v27 = vpop.f32.mrb[130].mxu0 }
 0x45b   : > { %5335 = vst [vmem:[%s9579_s16 + $0x140] sm:$0xff] %v4989_v14  ;;  %v4993_v45 = vadd.f32 %v4992_v26, %v10078_v36  ;;  %v4994_v28 = vpop.f32.mrb[127].mxu1  ;;  %5429 = vst [vmem:[%s9579_s16 + $0x430] sm:$0xff] %v4698_v19  ;;  %v4702_v41 = vadd.f32 %v4701_v27, %v9866_v44  ;;  %v4703_v54 = vpop.f32.mrb[131].mxu0 }
 0x45c   : > { %5336 = vst [vmem:[%s9579_s16 + $0x148] sm:$0xff] %v4991_v25  ;;  %v4995_v46 = vadd.f32 %v4994_v28, %v10081_v52  ;;  %5430 = vst [vmem:[%s9579_s16 + $0x438] sm:$0xff] %v4700_v21  ;;  %v4704_v39 = vadd.f32 %v4703_v54, %v9872_v5 }
 0x45d   : > { %5341 = vst [vmem:[%s9579_s16 + $0x170] sm:$0xff] %v4993_v45  ;;  %6773 = vmatmul.mubr.msk.bf16.gmra.mrb[232].mxu1 %vm4060_vm1, %v9968_v59  ;;  %5435 = vst [vmem:[%s9579_s16 + $0x460] sm:$0xff] %v4702_v41 }
 0x45e   : > { %5342 = vst [vmem:[%s9579_s16 + $0x178] sm:$0xff] %v4995_v46  ;;  %5266 = vmatprep.mubr.bf16.mxu1 %v7618_v56  ;;  %5436 = vst [vmem:[%s9579_s16 + $0x468] sm:$0xff] %v4704_v39 }
 0x460   : > { %v4998_v51 = vpop.f32.mrb[128].mxu1  ;;  %v4707_v4 = vpop.f32.mrb[132].mxu0 }
 0x461   : > { %v4999_v40 = vadd.f32 %v4998_v51, %v10078_v36  ;;  %v5000_v7 = vpop.f32.mrb[129].mxu1  ;;  %v4708_v10 = vadd.f32 %v4707_v4, %v9866_v44  ;;  %v4709_v9 = vpop.f32.mrb[133].mxu0 }
 0x462   : > { %v5001_v29 = vadd.f32 %v5000_v7, %v10081_v52  ;;  %v5002_v59 = vpop.f32.mrb[130].mxu1  ;;  %v4710_v58 = vadd.f32 %v4709_v9, %v9872_v5  ;;  %v4711_v57 = vpop.f32.mrb[134].mxu0 }
 0x463   : > { %5347 = vst [vmem:[%s9579_s16 + $0x1a0] sm:$0xff] %v4999_v40  ;;  %v5003_v34 = vadd.f32 %v5002_v59, %v10078_v36  ;;  %v5004_v8 = vpop.f32.mrb[131].mxu1  ;;  %5441 = vst [vmem:[%s9579_s16 + $0x490] sm:$0xff] %v4708_v10  ;;  %v4712_v30 = vadd.f32 %v4711_v57, %v9866_v44  ;;  %v4713_v48 = vpop.f32.mrb[135].mxu0 }
 0x464   : > { %5348 = vst [vmem:[%s9579_s16 + $0x1a8] sm:$0xff] %v5001_v29  ;;  %v5005_v35 = vadd.f32 %v5004_v8, %v10081_v52  ;;  %5442 = vst [vmem:[%s9579_s16 + $0x498] sm:$0xff] %v4710_v58  ;;  %v4714_v37 = vadd.f32 %v4713_v48, %v9872_v5 }
 0x465   : > { %5353 = vst [vmem:[%s9579_s16 + $0x1d0] sm:$0xff] %v5003_v34  ;;  %6774 = vmatmul.mubr.msk.bf16.gmra.mrb[236].mxu1 %vm4060_vm1, %v9997_v55  ;;  %5447 = vst [vmem:[%s9579_s16 + $0x4c0] sm:$0xff] %v4712_v30 }
 0x466   : > { %5354 = vst [vmem:[%s9579_s16 + $0x1d8] sm:$0xff] %v5005_v35  ;;  %5276 = vmatprep.mubr.bf16.mxu1 %v7618_v56  ;;  %5448 = vst [vmem:[%s9579_s16 + $0x4c8] sm:$0xff] %v4714_v37 }
 0x468   : > { %v5008_v38 = vpop.f32.mrb[132].mxu1  ;;  %v4717_v42 = vpop.f32.mrb[136].mxu0 }
 0x469   : > { %v5009_v43 = vadd.f32 %v5008_v38, %v10078_v36  ;;  %v5010_v61 = vpop.f32.mrb[133].mxu1  ;;  %v4718_v49 = vadd.f32 %v4717_v42, %v9866_v44  ;;  %v4719_v11 = vpop.f32.mrb[137].mxu0 }
 0x46a   : > { %v5011_v53 = vadd.f32 %v5010_v61, %v10081_v52  ;;  %v5012_v55 = vpop.f32.mrb[134].mxu1  ;;  %v4720_v60 = vadd.f32 %v4719_v11, %v9872_v5  ;;  %v4721_v62 = vpop.f32.mrb[138].mxu0 }
 0x46b   : > { %5359 = vst [vmem:[%s9579_s16 + $0x200] sm:$0xff] %v5009_v43  ;;  %v5013_v63 = vadd.f32 %v5012_v55, %v10078_v36  ;;  %v5014_v2 = vpop.f32.mrb[135].mxu1  ;;  %5453 = vst [vmem:[%s9579_s16 + $0x4f0] sm:$0xff] %v4718_v49  ;;  %v4722_v12 = vadd.f32 %v4721_v62, %v9866_v44  ;;  %v4723_v3 = vpop.f32.mrb[139].mxu0 }
 0x46c   : > { %5360 = vst [vmem:[%s9579_s16 + $0x208] sm:$0xff] %v5011_v53  ;;  %v5015_v50 = vadd.f32 %v5014_v2, %v10081_v52  ;;  %5454 = vst [vmem:[%s9579_s16 + $0x4f8] sm:$0xff] %v4720_v60  ;;  %v4724_v13 = vadd.f32 %v4723_v3, %v9872_v5 }
 0x46d   : > { %5365 = vst [vmem:[%s9579_s16 + $0x230] sm:$0xff] %v5013_v63  ;;  %6775 = vmatmul.mubr.msk.bf16.gmra.mrb[240].mxu1 %vm4060_vm1, %v10026_v31  ;;  %5459 = vst [vmem:[%s9579_s16 + $0x520] sm:$0xff] %v4722_v12 }
 0x46e   : > { %5366 = vst [vmem:[%s9579_s16 + $0x238] sm:$0xff] %v5015_v50  ;;  %5286 = vmatprep.mubr.bf16.mxu1 %v7618_v56  ;;  %5460 = vst [vmem:[%s9579_s16 + $0x528] sm:$0xff] %v4724_v13 }
 0x470   : > { %v5018_v32 = vpop.f32.mrb[136].mxu1  ;;  %v4727_v33 = vpop.f32.mrb[140].mxu0 }
 0x471   : > { %v5019_v15 = vadd.f32 %v5018_v32, %v10078_v36  ;;  %v5020_v16 = vpop.f32.mrb[137].mxu1  ;;  %v4728_v17 = vadd.f32 %v4727_v33, %v9866_v44  ;;  %v4729_v18 = vpop.f32.mrb[141].mxu0 }
 0x472   : > { %v5021_v20 = vadd.f32 %v5020_v16, %v10081_v52  ;;  %v5022_v31 = vpop.f32.mrb[138].mxu1  ;;  %v4730_v22 = vadd.f32 %v4729_v18, %v9872_v5  ;;  %v4731_v56 = vpop.f32.mrb[142].mxu0 }
 0x473   : > { %5371 = vst [vmem:[%s9579_s16 + $0x260] sm:$0xff] %v5019_v15  ;;  %v5023_v47 = vadd.f32 %v5022_v31, %v10078_v36  ;;  %v5024_v23 = vpop.f32.mrb[139].mxu1  ;;  %5465 = vst [vmem:[%s9579_s16 + $0x550] sm:$0xff] %v4728_v17  ;;  %v4732_v24 = vadd.f32 %v4731_v56, %v9866_v44  ;;  %v4733_v14 = vpop.f32.mrb[143].mxu0 }
 0x474   : > { %5372 = vst [vmem:[%s9579_s16 + $0x268] sm:$0xff] %v5021_v20  ;;  %v5025_v1 = vadd.f32 %v5024_v23, %v10081_v52  ;;  %5466 = vst [vmem:[%s9579_s16 + $0x558] sm:$0xff] %v4730_v22  ;;  %v4734_v19 = vadd.f32 %v4733_v14, %v9872_v5 }
 0x475   : > { %5377 = vst [vmem:[%s9579_s16 + $0x290] sm:$0xff] %v5023_v47  ;;  %6776 = vmatmul.mubr.msk.bf16.gmra.mrb[244].mxu1 %vm4060_vm1, %v10055_v0  ;;  %5471 = vst [vmem:[%s9579_s16 + $0x580] sm:$0xff] %v4732_v24 }
 0x476   : > { %5378 = vst [vmem:[%s9579_s16 + $0x298] sm:$0xff] %v5025_v1  ;;  %5472 = vst [vmem:[%s9579_s16 + $0x588] sm:$0xff] %v4734_v19 }
 0x478   : > { %v5028_v6 = vpop.f32.mrb[140].mxu1  ;;  %v4737_v25 = vpop.f32.mrb[144].mxu0 }
 0x479   : > { %v5029_v26 = vadd.f32 %v5028_v6, %v10078_v36  ;;  %v5030_v21 = vpop.f32.mrb[141].mxu1  ;;  %v4738_v27 = vadd.f32 %v4737_v25, %v9866_v44  ;;  %v4739_v45 = vpop.f32.mrb[145].mxu0 }
 0x47a   : > { %v5031_v28 = vadd.f32 %v5030_v21, %v10081_v52  ;;  %v5032_v0 = vpop.f32.mrb[142].mxu1  ;;  %v4740_v41 = vadd.f32 %v4739_v45, %v9872_v5  ;;  %v4741_v54 = vpop.f32.mrb[146].mxu0 }
 0x47b   : > { %5383 = vst [vmem:[%s9579_s16 + $0x2c0] sm:$0xff] %v5029_v26  ;;  %v5033_v46 = vadd.f32 %v5032_v0, %v10078_v36  ;;  %v5034_v39 = vpop.f32.mrb[143].mxu1  ;;  %5477 = vst [vmem:[%s9579_s16 + $0x5b0] sm:$0xff] %v4738_v27  ;;  %v4742_v51 = vadd.f32 %v4741_v54, %v9866_v44  ;;  %v4743_v4 = vpop.f32.mrb[147].mxu0 }
 0x47c   : > { %5384 = vst [vmem:[%s9579_s16 + $0x2c8] sm:$0xff] %v5031_v28  ;;  %v5035_v40 = vadd.f32 %v5034_v39, %v10081_v52  ;;  %5478 = vst [vmem:[%s9579_s16 + $0x5b8] sm:$0xff] %v4740_v41  ;;  %v4744_v7 = vadd.f32 %v4743_v4, %v9872_v5 }
 0x47d   : > { %5389 = vst [vmem:[%s9579_s16 + $0x2f0] sm:$0xff] %v5033_v46  ;;  %5483 = vst [vmem:[%s9579_s16 + $0x5e0] sm:$0xff] %v4742_v51 }
 0x47e   : > { %5390 = vst [vmem:[%s9579_s16 + $0x2f8] sm:$0xff] %v5035_v40  ;;  %5484 = vst [vmem:[%s9579_s16 + $0x5e8] sm:$0xff] %v4744_v7 }
 0x480   : > { %v5038_v10 = vpop.f32.mrb[144].mxu1  ;;  %v4747_v9 = vpop.f32.mrb[148].mxu0 }
 0x481   : > { %v5039_v29 = vadd.f32 %v5038_v10, %v10078_v36  ;;  %v5040_v59 = vpop.f32.mrb[145].mxu1  ;;  %v4748_v58 = vadd.f32 %v4747_v9, %v9866_v44  ;;  %v4749_v57 = vpop.f32.mrb[149].mxu0 }
 0x482   : > { %v5041_v34 = vadd.f32 %v5040_v59, %v10081_v52  ;;  %v5042_v8 = vpop.f32.mrb[146].mxu1  ;;  %v4750_v30 = vadd.f32 %v4749_v57, %v9872_v5  ;;  %v4751_v48 = vpop.f32.mrb[150].mxu0 }
 0x483   : > { %5395 = vst [vmem:[%s9579_s16 + $0x320] sm:$0xff] %v5039_v29  ;;  %v5043_v35 = vadd.f32 %v5042_v8, %v10078_v36  ;;  %v5044_v37 = vpop.f32.mrb[147].mxu1  ;;  %5489 = vst [vmem:[%s9579_s16 + $0x610] sm:$0xff] %v4748_v58  ;;  %v4752_v38 = vadd.f32 %v4751_v48, %v9866_v44  ;;  %v4753_v42 = vpop.f32.mrb[151].mxu0 }
 0x484   : > { %5396 = vst [vmem:[%s9579_s16 + $0x328] sm:$0xff] %v5041_v34  ;;  %v5045_v43 = vadd.f32 %v5044_v37, %v10081_v52  ;;  %5490 = vst [vmem:[%s9579_s16 + $0x618] sm:$0xff] %v4750_v30  ;;  %v4754_v61 = vadd.f32 %v4753_v42, %v9872_v5 }
 0x485   : > { %5401 = vst [vmem:[%s9579_s16 + $0x350] sm:$0xff] %v5043_v35  ;;  %5495 = vst [vmem:[%s9579_s16 + $0x640] sm:$0xff] %v4752_v38 }
 0x486   : > { %5402 = vst [vmem:[%s9579_s16 + $0x358] sm:$0xff] %v5045_v43  ;;  %5496 = vst [vmem:[%s9579_s16 + $0x648] sm:$0xff] %v4754_v61 }
 0x488   : > { %v5048_v49 = vpop.f32.mrb[148].mxu1  ;;  %v4757_v11 = vpop.f32.mrb[152].mxu0 }
 0x489   : > { %v5049_v53 = vadd.f32 %v5048_v49, %v10078_v36  ;;  %v5050_v55 = vpop.f32.mrb[149].mxu1  ;;  %v4758_v60 = vadd.f32 %v4757_v11, %v9866_v44  ;;  %v4759_v62 = vpop.f32.mrb[153].mxu0 }
 0x48a   : > { %v5051_v63 = vadd.f32 %v5050_v55, %v10081_v52  ;;  %v5052_v2 = vpop.f32.mrb[150].mxu1  ;;  %v4760_v12 = vadd.f32 %v4759_v62, %v9872_v5  ;;  %v4761_v3 = vpop.f32.mrb[154].mxu0 }
 0x48b   : > { %5407 = vst [vmem:[%s9579_s16 + $0x380] sm:$0xff] %v5049_v53  ;;  %v5053_v50 = vadd.f32 %v5052_v2, %v10078_v36  ;;  %v5054_v13 = vpop.f32.mrb[151].mxu1  ;;  %5501 = vst [vmem:[%s9579_s16 + $0x670] sm:$0xff] %v4758_v60  ;;  %v4762_v32 = vadd.f32 %v4761_v3, %v9866_v44  ;;  %v4763_v33 = vpop.f32.mrb[155].mxu0 }
 0x48c   : > { %5408 = vst [vmem:[%s9579_s16 + $0x388] sm:$0xff] %v5051_v63  ;;  %v5055_v15 = vadd.f32 %v5054_v13, %v10081_v52  ;;  %5502 = vst [vmem:[%s9579_s16 + $0x678] sm:$0xff] %v4760_v12  ;;  %v4764_v16 = vadd.f32 %v4763_v33, %v9872_v5 }
 0x48d   : > { %5413 = vst [vmem:[%s9579_s16 + $0x3b0] sm:$0xff] %v5053_v50  ;;  %5507 = vst [vmem:[%s9579_s16 + $0x6a0] sm:$0xff] %v4762_v32 }
 0x48e   : > { %5414 = vst [vmem:[%s9579_s16 + $0x3b8] sm:$0xff] %v5055_v15  ;;  %5508 = vst [vmem:[%s9579_s16 + $0x6a8] sm:$0xff] %v4764_v16 }
 0x490   : > { %v5058_v17 = vpop.f32.mrb[152].mxu1  ;;  %v4767_v18 = vpop.f32.mrb[156].mxu0 }
 0x491   : > { %v5059_v20 = vadd.f32 %v5058_v17, %v10078_v36  ;;  %v5060_v31 = vpop.f32.mrb[153].mxu1  ;;  %v4768_v22 = vadd.f32 %v4767_v18, %v9866_v44  ;;  %v4769_v56 = vpop.f32.mrb[157].mxu0 }
 0x492   : > { %v5061_v47 = vadd.f32 %v5060_v31, %v10081_v52  ;;  %v5062_v23 = vpop.f32.mrb[154].mxu1  ;;  %v4770_v24 = vadd.f32 %v4769_v56, %v9872_v5  ;;  %v4771_v14 = vpop.f32.mrb[158].mxu0 }
 0x493   : > { %5419 = vst [vmem:[%s9579_s16 + $0x3e0] sm:$0xff] %v5059_v20  ;;  %v5063_v1 = vadd.f32 %v5062_v23, %v10078_v36  ;;  %v5064_v19 = vpop.f32.mrb[155].mxu1  ;;  %5513 = vst [vmem:[%s9579_s16 + $0x6d0] sm:$0xff] %v4768_v22  ;;  %v4772_v6 = vadd.f32 %v4771_v14, %v9866_v44  ;;  %v4773_v25 = vpop.f32.mrb[159].mxu0 }
 0x494   : > { %5420 = vst [vmem:[%s9579_s16 + $0x3e8] sm:$0xff] %v5061_v47  ;;  %v5065_v26 = vadd.f32 %v5064_v19, %v10081_v52  ;;  %5514 = vst [vmem:[%s9579_s16 + $0x6d8] sm:$0xff] %v4770_v24  ;;  %v4774_v21 = vadd.f32 %v4773_v25, %v9872_v5 }
 0x495   : > { %5425 = vst [vmem:[%s9579_s16 + $0x410] sm:$0xff] %v5063_v1  ;;  %5519 = vst [vmem:[%s9579_s16 + $0x700] sm:$0xff] %v4772_v6 }
 0x496   : > { %5426 = vst [vmem:[%s9579_s16 + $0x418] sm:$0xff] %v5065_v26  ;;  %5520 = vst [vmem:[%s9579_s16 + $0x708] sm:$0xff] %v4774_v21 }
 0x498   : > { %v5068_v27 = vpop.f32.mrb[156].mxu1  ;;  %v4777_v45 = vpop.f32.mrb[160].mxu0 }
 0x499   : > { %v5069_v28 = vadd.f32 %v5068_v27, %v10078_v36  ;;  %v5070_v0 = vpop.f32.mrb[157].mxu1  ;;  %v4778_v41 = vadd.f32 %v4777_v45, %v9866_v44  ;;  %v4779_v54 = vpop.f32.mrb[161].mxu0 }
 0x49a   : > { %v5071_v46 = vadd.f32 %v5070_v0, %v10081_v52  ;;  %v5072_v39 = vpop.f32.mrb[158].mxu1  ;;  %v4780_v51 = vadd.f32 %v4779_v54, %v9872_v5  ;;  %v4781_v4 = vpop.f32.mrb[162].mxu0 }
 0x49b   : > { %5431 = vst [vmem:[%s9579_s16 + $0x440] sm:$0xff] %v5069_v28  ;;  %v5073_v40 = vadd.f32 %v5072_v39, %v10078_v36  ;;  %v5074_v7 = vpop.f32.mrb[159].mxu1  ;;  %5525 = vst [vmem:[%s9579_s16 + $0x730] sm:$0xff] %v4778_v41  ;;  %v4782_v10 = vadd.f32 %v4781_v4, %v9866_v44  ;;  %v4783_v9 = vpop.f32.mrb[163].mxu0 }
 0x49c   : > { %5432 = vst [vmem:[%s9579_s16 + $0x448] sm:$0xff] %v5071_v46  ;;  %v5075_v29 = vadd.f32 %v5074_v7, %v10081_v52  ;;  %5526 = vst [vmem:[%s9579_s16 + $0x738] sm:$0xff] %v4780_v51  ;;  %v4784_v59 = vadd.f32 %v4783_v9, %v9872_v5 }
 0x49d   : > { %5437 = vst [vmem:[%s9579_s16 + $0x470] sm:$0xff] %v5073_v40  ;;  %5531 = vst [vmem:[%s9579_s16 + $0x760] sm:$0xff] %v4782_v10 }
 0x49e   : > { %5438 = vst [vmem:[%s9579_s16 + $0x478] sm:$0xff] %v5075_v29  ;;  %5532 = vst [vmem:[%s9579_s16 + $0x768] sm:$0xff] %v4784_v59 }
 0x4a0   : > { %v5078_v58 = vpop.f32.mrb[160].mxu1  ;;  %v4787_v57 = vpop.f32.mrb[164].mxu0 }
 0x4a1   : > { %v5079_v34 = vadd.f32 %v5078_v58, %v10078_v36  ;;  %v5080_v8 = vpop.f32.mrb[161].mxu1  ;;  %v4788_v30 = vadd.f32 %v4787_v57, %v9866_v44  ;;  %v4789_v48 = vpop.f32.mrb[165].mxu0 }
 0x4a2   : > { %v5081_v35 = vadd.f32 %v5080_v8, %v10081_v52  ;;  %v5082_v37 = vpop.f32.mrb[162].mxu1  ;;  %v4790_v38 = vadd.f32 %v4789_v48, %v9872_v5  ;;  %v4791_v42 = vpop.f32.mrb[166].mxu0 }
 0x4a3   : > { %5443 = vst [vmem:[%s9579_s16 + $0x4a0] sm:$0xff] %v5079_v34  ;;  %v5083_v43 = vadd.f32 %v5082_v37, %v10078_v36  ;;  %v5084_v61 = vpop.f32.mrb[163].mxu1  ;;  %5537 = vst [vmem:[%s9579_s16 + $0x790] sm:$0xff] %v4788_v30  ;;  %v4792_v49 = vadd.f32 %v4791_v42, %v9866_v44  ;;  %v4793_v11 = vpop.f32.mrb[167].mxu0 }
 0x4a4   : > { %5444 = vst [vmem:[%s9579_s16 + $0x4a8] sm:$0xff] %v5081_v35  ;;  %v5085_v53 = vadd.f32 %v5084_v61, %v10081_v52  ;;  %5538 = vst [vmem:[%s9579_s16 + $0x798] sm:$0xff] %v4790_v38  ;;  %v4794_v55 = vadd.f32 %v4793_v11, %v9872_v5 }
 0x4a5   : > { %5449 = vst [vmem:[%s9579_s16 + $0x4d0] sm:$0xff] %v5083_v43  ;;  %5543 = vst [vmem:[%s9579_s16 + $0x7c0] sm:$0xff] %v4792_v49 }
 0x4a6   : > { %5450 = vst [vmem:[%s9579_s16 + $0x4d8] sm:$0xff] %v5085_v53  ;;  %5544 = vst [vmem:[%s9579_s16 + $0x7c8] sm:$0xff] %v4794_v55 }
 0x4a8   : > { %v5088_v60 = vpop.f32.mrb[164].mxu1  ;;  %v4797_v62 = vpop.f32.mrb[168].mxu0 }
 0x4a9   : > { %v5089_v63 = vadd.f32 %v5088_v60, %v10078_v36  ;;  %v5090_v2 = vpop.f32.mrb[165].mxu1  ;;  %v4798_v12 = vadd.f32 %v4797_v62, %v9866_v44  ;;  %v4799_v3 = vpop.f32.mrb[169].mxu0 }
 0x4aa   : > { %v5091_v50 = vadd.f32 %v5090_v2, %v10081_v52  ;;  %v5092_v13 = vpop.f32.mrb[166].mxu1  ;;  %v4800_v32 = vadd.f32 %v4799_v3, %v9872_v5  ;;  %v4801_v33 = vpop.f32.mrb[170].mxu0 }
 0x4ab   : > { %5455 = vst [vmem:[%s9579_s16 + $0x500] sm:$0xff] %v5089_v63  ;;  %v5093_v15 = vadd.f32 %v5092_v13, %v10078_v36  ;;  %v5094_v16 = vpop.f32.mrb[167].mxu1  ;;  %5549 = vst [vmem:[%s9579_s16 + $0x7f0] sm:$0xff] %v4798_v12  ;;  %v4802_v17 = vadd.f32 %v4801_v33, %v9866_v44  ;;  %v4803_v18 = vpop.f32.mrb[171].mxu0 }
 0x4ac   : > { %5456 = vst [vmem:[%s9579_s16 + $0x508] sm:$0xff] %v5091_v50  ;;  %v5095_v20 = vadd.f32 %v5094_v16, %v10081_v52  ;;  %5550 = vst [vmem:[%s9579_s16 + $0x7f8] sm:$0xff] %v4800_v32  ;;  %v4804_v31 = vadd.f32 %v4803_v18, %v9872_v5 }
 0x4ad   : > { %5461 = vst [vmem:[%s9579_s16 + $0x530] sm:$0xff] %v5093_v15  ;;  %5555 = vst [vmem:[%s9579_s16 + $0x820] sm:$0xff] %v4802_v17 }
 0x4ae   : > { %5462 = vst [vmem:[%s9579_s16 + $0x538] sm:$0xff] %v5095_v20  ;;  %5556 = vst [vmem:[%s9579_s16 + $0x828] sm:$0xff] %v4804_v31 }
 0x4b0   : > { %v5098_v22 = vpop.f32.mrb[168].mxu1  ;;  %v4807_v56 = vpop.f32.mrb[172].mxu0 }
 0x4b1   : > { %v5099_v47 = vadd.f32 %v5098_v22, %v10078_v36  ;;  %v5100_v23 = vpop.f32.mrb[169].mxu1  ;;  %v4808_v24 = vadd.f32 %v4807_v56, %v9866_v44  ;;  %v4809_v14 = vpop.f32.mrb[173].mxu0 }
 0x4b2   : > { %v5101_v1 = vadd.f32 %v5100_v23, %v10081_v52  ;;  %v5102_v19 = vpop.f32.mrb[170].mxu1  ;;  %v4810_v6 = vadd.f32 %v4809_v14, %v9872_v5  ;;  %v4811_v25 = vpop.f32.mrb[174].mxu0 }
 0x4b3   : > { %5467 = vst [vmem:[%s9579_s16 + $0x560] sm:$0xff] %v5099_v47  ;;  %v5103_v26 = vadd.f32 %v5102_v19, %v10078_v36  ;;  %v5104_v21 = vpop.f32.mrb[171].mxu1  ;;  %5561 = vst [vmem:[%s9579_s16 + $0x850] sm:$0xff] %v4808_v24  ;;  %v4812_v27 = vadd.f32 %v4811_v25, %v9866_v44  ;;  %v4813_v45 = vpop.f32.mrb[175].mxu0 }
 0x4b4   : > { %5468 = vst [vmem:[%s9579_s16 + $0x568] sm:$0xff] %v5101_v1  ;;  %v5105_v28 = vadd.f32 %v5104_v21, %v10081_v52  ;;  %5562 = vst [vmem:[%s9579_s16 + $0x858] sm:$0xff] %v4810_v6  ;;  %v4814_v0 = vadd.f32 %v4813_v45, %v9872_v5 }
 0x4b5   : > { %5473 = vst [vmem:[%s9579_s16 + $0x590] sm:$0xff] %v5103_v26  ;;  %5567 = vst [vmem:[%s9579_s16 + $0x880] sm:$0xff] %v4812_v27 }
 0x4b6   : > { %5474 = vst [vmem:[%s9579_s16 + $0x598] sm:$0xff] %v5105_v28  ;;  %5568 = vst [vmem:[%s9579_s16 + $0x888] sm:$0xff] %v4814_v0 }
 0x4b8   : > { %v5108_v41 = vpop.f32.mrb[172].mxu1  ;;  %v4817_v54 = vpop.f32.mrb[176].mxu0 }
 0x4b9   : > { %v5109_v46 = vadd.f32 %v5108_v41, %v10078_v36  ;;  %v5110_v39 = vpop.f32.mrb[173].mxu1  ;;  %v4818_v51 = vadd.f32 %v4817_v54, %v9866_v44  ;;  %v4819_v4 = vpop.f32.mrb[177].mxu0 }
 0x4ba   : > { %v5111_v40 = vadd.f32 %v5110_v39, %v10081_v52  ;;  %v5112_v7 = vpop.f32.mrb[174].mxu1  ;;  %v4820_v10 = vadd.f32 %v4819_v4, %v9872_v5  ;;  %v4821_v9 = vpop.f32.mrb[178].mxu0 }
 0x4bb   : > { %5479 = vst [vmem:[%s9579_s16 + $0x5c0] sm:$0xff] %v5109_v46  ;;  %v5113_v29 = vadd.f32 %v5112_v7, %v10078_v36  ;;  %v5114_v59 = vpop.f32.mrb[175].mxu1  ;;  %5573 = vst [vmem:[%s9579_s16 + $0x8b0] sm:$0xff] %v4818_v51  ;;  %v4822_v58 = vadd.f32 %v4821_v9, %v9866_v44  ;;  %v4823_v57 = vpop.f32.mrb[179].mxu0 }
 0x4bc   : > { %5480 = vst [vmem:[%s9579_s16 + $0x5c8] sm:$0xff] %v5111_v40  ;;  %v5115_v34 = vadd.f32 %v5114_v59, %v10081_v52  ;;  %5574 = vst [vmem:[%s9579_s16 + $0x8b8] sm:$0xff] %v4820_v10  ;;  %v4824_v8 = vadd.f32 %v4823_v57, %v9872_v5 }
 0x4bd   : > { %5485 = vst [vmem:[%s9579_s16 + $0x5f0] sm:$0xff] %v5113_v29  ;;  %5579 = vst [vmem:[%s9579_s16 + $0x8e0] sm:$0xff] %v4822_v58 }
 0x4be   : > { %5486 = vst [vmem:[%s9579_s16 + $0x5f8] sm:$0xff] %v5115_v34  ;;  %5580 = vst [vmem:[%s9579_s16 + $0x8e8] sm:$0xff] %v4824_v8 }
 0x4c0   : > { %v5118_v30 = vpop.f32.mrb[176].mxu1  ;;  %v4827_v48 = vpop.f32.mrb[180].mxu0 }
 0x4c1   : > { %v5119_v35 = vadd.f32 %v5118_v30, %v10078_v36  ;;  %v5120_v37 = vpop.f32.mrb[177].mxu1  ;;  %v4828_v38 = vadd.f32 %v4827_v48, %v9866_v44  ;;  %v4829_v42 = vpop.f32.mrb[181].mxu0 }
 0x4c2   : > { %v5121_v43 = vadd.f32 %v5120_v37, %v10081_v52  ;;  %v5122_v61 = vpop.f32.mrb[178].mxu1  ;;  %v4830_v49 = vadd.f32 %v4829_v42, %v9872_v5  ;;  %v4831_v11 = vpop.f32.mrb[182].mxu0 }
 0x4c3   : > { %5491 = vst [vmem:[%s9579_s16 + $0x620] sm:$0xff] %v5119_v35  ;;  %v5123_v53 = vadd.f32 %v5122_v61, %v10078_v36  ;;  %v5124_v55 = vpop.f32.mrb[179].mxu1  ;;  %5585 = vst [vmem:[%s9579_s16 + $0x910] sm:$0xff] %v4828_v38  ;;  %v4832_v60 = vadd.f32 %v4831_v11, %v9866_v44  ;;  %v4833_v62 = vpop.f32.mrb[183].mxu0 }
 0x4c4   : > { %5492 = vst [vmem:[%s9579_s16 + $0x628] sm:$0xff] %v5121_v43  ;;  %v5125_v63 = vadd.f32 %v5124_v55, %v10081_v52  ;;  %5586 = vst [vmem:[%s9579_s16 + $0x918] sm:$0xff] %v4830_v49  ;;  %v4834_v2 = vadd.f32 %v4833_v62, %v9872_v5 }
 0x4c5   : > { %5497 = vst [vmem:[%s9579_s16 + $0x650] sm:$0xff] %v5123_v53  ;;  %5591 = vst [vmem:[%s9579_s16 + $0x940] sm:$0xff] %v4832_v60 }
 0x4c6   : > { %5498 = vst [vmem:[%s9579_s16 + $0x658] sm:$0xff] %v5125_v63  ;;  %5592 = vst [vmem:[%s9579_s16 + $0x948] sm:$0xff] %v4834_v2 }
 0x4c8   : > { %v5128_v12 = vpop.f32.mrb[180].mxu1  ;;  %v4837_v3 = vpop.f32.mrb[184].mxu0 }
 0x4c9   : > { %v5129_v50 = vadd.f32 %v5128_v12, %v10078_v36  ;;  %v5130_v13 = vpop.f32.mrb[181].mxu1  ;;  %v4838_v32 = vadd.f32 %v4837_v3, %v9866_v44  ;;  %v4839_v33 = vpop.f32.mrb[185].mxu0 }
 0x4ca   : > { %v5131_v15 = vadd.f32 %v5130_v13, %v10081_v52  ;;  %v5132_v16 = vpop.f32.mrb[182].mxu1  ;;  %v4840_v17 = vadd.f32 %v4839_v33, %v9872_v5  ;;  %v4841_v18 = vpop.f32.mrb[186].mxu0 }
 0x4cb   : > { %5503 = vst [vmem:[%s9579_s16 + $0x680] sm:$0xff] %v5129_v50  ;;  %v5133_v20 = vadd.f32 %v5132_v16, %v10078_v36  ;;  %v5134_v31 = vpop.f32.mrb[183].mxu1  ;;  %5597 = vst [vmem:[%s9579_s16 + $0x970] sm:$0xff] %v4838_v32  ;;  %v4842_v22 = vadd.f32 %v4841_v18, %v9866_v44  ;;  %v4843_v56 = vpop.f32.mrb[187].mxu0 }
 0x4cc   : > { %5504 = vst [vmem:[%s9579_s16 + $0x688] sm:$0xff] %v5131_v15  ;;  %v5135_v47 = vadd.f32 %v5134_v31, %v10081_v52  ;;  %5598 = vst [vmem:[%s9579_s16 + $0x978] sm:$0xff] %v4840_v17  ;;  %v4844_v23 = vadd.f32 %v4843_v56, %v9872_v5 }
 0x4cd   : > { %5509 = vst [vmem:[%s9579_s16 + $0x6b0] sm:$0xff] %v5133_v20  ;;  %5603 = vst [vmem:[%s9579_s16 + $0x9a0] sm:$0xff] %v4842_v22 }
 0x4ce   : > { %5510 = vst [vmem:[%s9579_s16 + $0x6b8] sm:$0xff] %v5135_v47  ;;  %5604 = vst [vmem:[%s9579_s16 + $0x9a8] sm:$0xff] %v4844_v23 }
 0x4d0   : > { %v5138_v24 = vpop.f32.mrb[184].mxu1  ;;  %v4847_v14 = vpop.f32.mrb[188].mxu0 }
 0x4d1   : > { %v5139_v1 = vadd.f32 %v5138_v24, %v10078_v36  ;;  %v5140_v19 = vpop.f32.mrb[185].mxu1  ;;  %v4848_v6 = vadd.f32 %v4847_v14, %v9866_v44  ;;  %v4849_v25 = vpop.f32.mrb[189].mxu0 }
 0x4d2   : > { %v5141_v26 = vadd.f32 %v5140_v19, %v10081_v52  ;;  %v5142_v21 = vpop.f32.mrb[186].mxu1  ;;  %v4850_v27 = vadd.f32 %v4849_v25, %v9872_v5  ;;  %v4851_v45 = vpop.f32.mrb[190].mxu0 }
 0x4d3   : > { %5515 = vst [vmem:[%s9579_s16 + $0x6e0] sm:$0xff] %v5139_v1  ;;  %v5143_v28 = vadd.f32 %v5142_v21, %v10078_v36  ;;  %v5144_v0 = vpop.f32.mrb[187].mxu1  ;;  %5609 = vst [vmem:[%s9579_s16 + $0x9d0] sm:$0xff] %v4848_v6  ;;  %v4852_v41 = vadd.f32 %v4851_v45, %v9866_v44  ;;  %v4853_v54 = vpop.f32.mrb[191].mxu0 }
 0x4d4   : > { %5516 = vst [vmem:[%s9579_s16 + $0x6e8] sm:$0xff] %v5141_v26  ;;  %v5145_v46 = vadd.f32 %v5144_v0, %v10081_v52  ;;  %5610 = vst [vmem:[%s9579_s16 + $0x9d8] sm:$0xff] %v4850_v27  ;;  %v4854_v39 = vadd.f32 %v4853_v54, %v9872_v5 }
 0x4d5   : > { %5521 = vst [vmem:[%s9579_s16 + $0x710] sm:$0xff] %v5143_v28  ;;  %5615 = vst [vmem:[%s9579_s16 + $0xa00] sm:$0xff] %v4852_v41 }
 0x4d6   : > { %5522 = vst [vmem:[%s9579_s16 + $0x718] sm:$0xff] %v5145_v46  ;;  %5616 = vst [vmem:[%s9579_s16 + $0xa08] sm:$0xff] %v4854_v39 }
 0x4d8   : > { %v5148_v51 = vpop.f32.mrb[188].mxu1  ;;  %v4857_v4 = vpop.f32.mrb[192].mxu0 }
 0x4d9   : > { %v5149_v40 = vadd.f32 %v5148_v51, %v10078_v36  ;;  %v5150_v7 = vpop.f32.mrb[189].mxu1  ;;  %v4858_v10 = vadd.f32 %v4857_v4, %v9866_v44  ;;  %v4859_v9 = vpop.f32.mrb[193].mxu0 }
 0x4da   : > { %v5151_v29 = vadd.f32 %v5150_v7, %v10081_v52  ;;  %v5152_v59 = vpop.f32.mrb[190].mxu1  ;;  %v4860_v58 = vadd.f32 %v4859_v9, %v9872_v5  ;;  %v4861_v57 = vpop.f32.mrb[194].mxu0 }
 0x4db   : > { %5527 = vst [vmem:[%s9579_s16 + $0x740] sm:$0xff] %v5149_v40  ;;  %v5153_v34 = vadd.f32 %v5152_v59, %v10078_v36  ;;  %v5154_v8 = vpop.f32.mrb[191].mxu1  ;;  %5621 = vst [vmem:[%s9579_s16 + $0xa30] sm:$0xff] %v4858_v10  ;;  %v4862_v30 = vadd.f32 %v4861_v57, %v9866_v44  ;;  %v4863_v48 = vpop.f32.mrb[195].mxu0 }
 0x4dc   : > { %5528 = vst [vmem:[%s9579_s16 + $0x748] sm:$0xff] %v5151_v29  ;;  %v5155_v35 = vadd.f32 %v5154_v8, %v10081_v52  ;;  %5622 = vst [vmem:[%s9579_s16 + $0xa38] sm:$0xff] %v4860_v58  ;;  %v4864_v37 = vadd.f32 %v4863_v48, %v9872_v5 }
 0x4dd   : > { %5533 = vst [vmem:[%s9579_s16 + $0x770] sm:$0xff] %v5153_v34  ;;  %5627 = vst [vmem:[%s9579_s16 + $0xa60] sm:$0xff] %v4862_v30 }
 0x4de   : > { %5534 = vst [vmem:[%s9579_s16 + $0x778] sm:$0xff] %v5155_v35  ;;  %5628 = vst [vmem:[%s9579_s16 + $0xa68] sm:$0xff] %v4864_v37 }
 0x4e0   : > { %v5158_v38 = vpop.f32.mrb[192].mxu1  ;;  %v4867_v42 = vpop.f32.mrb[196].mxu0 }
 0x4e1   : > { %v5159_v43 = vadd.f32 %v5158_v38, %v10078_v36  ;;  %v5160_v61 = vpop.f32.mrb[193].mxu1  ;;  %v4868_v49 = vadd.f32 %v4867_v42, %v9866_v44  ;;  %v4869_v11 = vpop.f32.mrb[197].mxu0 }
 0x4e2   : > { %v5161_v53 = vadd.f32 %v5160_v61, %v10081_v52  ;;  %v5162_v55 = vpop.f32.mrb[194].mxu1  ;;  %v4870_v60 = vadd.f32 %v4869_v11, %v9872_v5  ;;  %v4871_v62 = vpop.f32.mrb[198].mxu0 }
 0x4e3   : > { %5539 = vst [vmem:[%s9579_s16 + $0x7a0] sm:$0xff] %v5159_v43  ;;  %v5163_v63 = vadd.f32 %v5162_v55, %v10078_v36  ;;  %v5164_v2 = vpop.f32.mrb[195].mxu1  ;;  %5633 = vst [vmem:[%s9579_s16 + $0xa90] sm:$0xff] %v4868_v49  ;;  %v4872_v12 = vadd.f32 %v4871_v62, %v9866_v44  ;;  %v4873_v3 = vpop.f32.mrb[199].mxu0 }
 0x4e4   : > { %5540 = vst [vmem:[%s9579_s16 + $0x7a8] sm:$0xff] %v5161_v53  ;;  %v5165_v50 = vadd.f32 %v5164_v2, %v10081_v52  ;;  %5634 = vst [vmem:[%s9579_s16 + $0xa98] sm:$0xff] %v4870_v60  ;;  %v4874_v13 = vadd.f32 %v4873_v3, %v9872_v5 }
 0x4e5   : > { %5545 = vst [vmem:[%s9579_s16 + $0x7d0] sm:$0xff] %v5163_v63  ;;  %5639 = vst [vmem:[%s9579_s16 + $0xac0] sm:$0xff] %v4872_v12 }
 0x4e6   : > { %5546 = vst [vmem:[%s9579_s16 + $0x7d8] sm:$0xff] %v5165_v50  ;;  %5640 = vst [vmem:[%s9579_s16 + $0xac8] sm:$0xff] %v4874_v13 }
 0x4e8   : > { %v5168_v32 = vpop.f32.mrb[196].mxu1  ;;  %v4877_v33 = vpop.f32.mrb[200].mxu0 }
 0x4e9   : > { %v5169_v15 = vadd.f32 %v5168_v32, %v10078_v36  ;;  %v5170_v16 = vpop.f32.mrb[197].mxu1  ;;  %v4878_v17 = vadd.f32 %v4877_v33, %v9866_v44  ;;  %v4879_v18 = vpop.f32.mrb[201].mxu0 }
 0x4ea   : > { %v5171_v20 = vadd.f32 %v5170_v16, %v10081_v52  ;;  %v5172_v31 = vpop.f32.mrb[198].mxu1  ;;  %v4880_v22 = vadd.f32 %v4879_v18, %v9872_v5  ;;  %v4881_v56 = vpop.f32.mrb[202].mxu0 }
 0x4eb   : > { %5551 = vst [vmem:[%s9579_s16 + $0x800] sm:$0xff] %v5169_v15  ;;  %v5173_v47 = vadd.f32 %v5172_v31, %v10078_v36  ;;  %v5174_v23 = vpop.f32.mrb[199].mxu1  ;;  %5645 = vst [vmem:[%s9579_s16 + $0xaf0] sm:$0xff] %v4878_v17  ;;  %v4882_v24 = vadd.f32 %v4881_v56, %v9866_v44  ;;  %v4883_v14 = vpop.f32.mrb[203].mxu0 }
 0x4ec   : > { %5552 = vst [vmem:[%s9579_s16 + $0x808] sm:$0xff] %v5171_v20  ;;  %v5175_v1 = vadd.f32 %v5174_v23, %v10081_v52  ;;  %5646 = vst [vmem:[%s9579_s16 + $0xaf8] sm:$0xff] %v4880_v22  ;;  %v4884_v19 = vadd.f32 %v4883_v14, %v9872_v5 }
 0x4ed   : > { %5557 = vst [vmem:[%s9579_s16 + $0x830] sm:$0xff] %v5173_v47  ;;  %5651 = vst [vmem:[%s9579_s16 + $0xb20] sm:$0xff] %v4882_v24 }
 0x4ee   : > { %5558 = vst [vmem:[%s9579_s16 + $0x838] sm:$0xff] %v5175_v1  ;;  %5652 = vst [vmem:[%s9579_s16 + $0xb28] sm:$0xff] %v4884_v19 }
 0x4f0   : > { %v5178_v6 = vpop.f32.mrb[200].mxu1  ;;  %v4887_v25 = vpop.f32.mrb[204].mxu0 }
 0x4f1   : > { %v5179_v26 = vadd.f32 %v5178_v6, %v10078_v36  ;;  %v5180_v21 = vpop.f32.mrb[201].mxu1  ;;  %v4888_v27 = vadd.f32 %v4887_v25, %v9866_v44  ;;  %v4889_v45 = vpop.f32.mrb[205].mxu0 }
 0x4f2   : > { %v5181_v28 = vadd.f32 %v5180_v21, %v10081_v52  ;;  %v5182_v0 = vpop.f32.mrb[202].mxu1  ;;  %v4890_v41 = vadd.f32 %v4889_v45, %v9872_v5  ;;  %v4891_v54 = vpop.f32.mrb[206].mxu0 }
 0x4f3   : > { %5563 = vst [vmem:[%s9579_s16 + $0x860] sm:$0xff] %v5179_v26  ;;  %v5183_v46 = vadd.f32 %v5182_v0, %v10078_v36  ;;  %v5184_v39 = vpop.f32.mrb[203].mxu1  ;;  %5657 = vst [vmem:[%s9579_s16 + $0xb50] sm:$0xff] %v4888_v27  ;;  %v4892_v51 = vadd.f32 %v4891_v54, %v9866_v44  ;;  %v4893_v4 = vpop.f32.mrb[207].mxu0 }
 0x4f4   : > { %5564 = vst [vmem:[%s9579_s16 + $0x868] sm:$0xff] %v5181_v28  ;;  %v5185_v40 = vadd.f32 %v5184_v39, %v10081_v52  ;;  %5658 = vst [vmem:[%s9579_s16 + $0xb58] sm:$0xff] %v4890_v41  ;;  %v4894_v7 = vadd.f32 %v4893_v4, %v9872_v5 }
 0x4f5   : > { %5569 = vst [vmem:[%s9579_s16 + $0x890] sm:$0xff] %v5183_v46  ;;  %5663 = vst [vmem:[%s9579_s16 + $0xb80] sm:$0xff] %v4892_v51 }
 0x4f6   : > { %5570 = vst [vmem:[%s9579_s16 + $0x898] sm:$0xff] %v5185_v40  ;;  %5664 = vst [vmem:[%s9579_s16 + $0xb88] sm:$0xff] %v4894_v7 }
 0x4f8   : > { %v5188_v10 = vpop.f32.mrb[204].mxu1  ;;  %v4897_v9 = vpop.f32.mrb[208].mxu0 }
 0x4f9   : > { %v5189_v29 = vadd.f32 %v5188_v10, %v10078_v36  ;;  %v5190_v59 = vpop.f32.mrb[205].mxu1  ;;  %v4898_v58 = vadd.f32 %v4897_v9, %v9866_v44  ;;  %v4899_v57 = vpop.f32.mrb[209].mxu0 }
 0x4fa   : > { %v5191_v34 = vadd.f32 %v5190_v59, %v10081_v52  ;;  %v5192_v8 = vpop.f32.mrb[206].mxu1  ;;  %v4900_v30 = vadd.f32 %v4899_v57, %v9872_v5  ;;  %v4901_v48 = vpop.f32.mrb[210].mxu0 }
 0x4fb   : > { %5575 = vst [vmem:[%s9579_s16 + $0x8c0] sm:$0xff] %v5189_v29  ;;  %v5193_v35 = vadd.f32 %v5192_v8, %v10078_v36  ;;  %v5194_v37 = vpop.f32.mrb[207].mxu1  ;;  %5669 = vst [vmem:[%s9579_s16 + $0xbb0] sm:$0xff] %v4898_v58  ;;  %v4902_v38 = vadd.f32 %v4901_v48, %v9866_v44  ;;  %v4903_v42 = vpop.f32.mrb[211].mxu0 }
 0x4fc   : > { %5576 = vst [vmem:[%s9579_s16 + $0x8c8] sm:$0xff] %v5191_v34  ;;  %v5195_v43 = vadd.f32 %v5194_v37, %v10081_v52  ;;  %5670 = vst [vmem:[%s9579_s16 + $0xbb8] sm:$0xff] %v4900_v30  ;;  %v4904_v61 = vadd.f32 %v4903_v42, %v9872_v5 }
 0x4fd   : > { %5581 = vst [vmem:[%s9579_s16 + $0x8f0] sm:$0xff] %v5193_v35  ;;  %5675 = vst [vmem:[%s9579_s16 + $0xbe0] sm:$0xff] %v4902_v38 }
 0x4fe   : > { %5582 = vst [vmem:[%s9579_s16 + $0x8f8] sm:$0xff] %v5195_v43  ;;  %5676 = vst [vmem:[%s9579_s16 + $0xbe8] sm:$0xff] %v4904_v61 }
 0x500   : > { %v5198_v49 = vpop.f32.mrb[208].mxu1  ;;  %v4907_v11 = vpop.f32.mrb[212].mxu0 }
 0x501   : > { %v5199_v53 = vadd.f32 %v5198_v49, %v10078_v36  ;;  %v5200_v55 = vpop.f32.mrb[209].mxu1  ;;  %v4908_v60 = vadd.f32 %v4907_v11, %v9866_v44  ;;  %v4909_v62 = vpop.f32.mrb[213].mxu0 }
 0x502   : > { %v5201_v63 = vadd.f32 %v5200_v55, %v10081_v52  ;;  %v5202_v2 = vpop.f32.mrb[210].mxu1  ;;  %v4910_v12 = vadd.f32 %v4909_v62, %v9872_v5  ;;  %v4911_v3 = vpop.f32.mrb[214].mxu0 }
 0x503   : > { %5587 = vst [vmem:[%s9579_s16 + $0x920] sm:$0xff] %v5199_v53  ;;  %v5203_v50 = vadd.f32 %v5202_v2, %v10078_v36  ;;  %v5204_v13 = vpop.f32.mrb[211].mxu1  ;;  %5681 = vst [vmem:[%s9579_s16 + $0xc10] sm:$0xff] %v4908_v60  ;;  %v4912_v32 = vadd.f32 %v4911_v3, %v9866_v44  ;;  %v4913_v33 = vpop.f32.mrb[215].mxu0 }
 0x504   : > { %5588 = vst [vmem:[%s9579_s16 + $0x928] sm:$0xff] %v5201_v63  ;;  %v5205_v15 = vadd.f32 %v5204_v13, %v10081_v52  ;;  %5682 = vst [vmem:[%s9579_s16 + $0xc18] sm:$0xff] %v4910_v12  ;;  %v4914_v16 = vadd.f32 %v4913_v33, %v9872_v5 }
 0x505   : > { %5593 = vst [vmem:[%s9579_s16 + $0x950] sm:$0xff] %v5203_v50  ;;  %5687 = vst [vmem:[%s9579_s16 + $0xc40] sm:$0xff] %v4912_v32 }
 0x506   : > { %5594 = vst [vmem:[%s9579_s16 + $0x958] sm:$0xff] %v5205_v15  ;;  %5688 = vst [vmem:[%s9579_s16 + $0xc48] sm:$0xff] %v4914_v16 }
 0x508   : > { %v5208_v17 = vpop.f32.mrb[212].mxu1  ;;  %v4917_v18 = vpop.f32.mrb[216].mxu0 }
 0x509   : > { %v5209_v20 = vadd.f32 %v5208_v17, %v10078_v36  ;;  %v5210_v31 = vpop.f32.mrb[213].mxu1  ;;  %v4918_v22 = vadd.f32 %v4917_v18, %v9866_v44  ;;  %v4919_v56 = vpop.f32.mrb[217].mxu0 }
 0x50a   : > { %v5211_v47 = vadd.f32 %v5210_v31, %v10081_v52  ;;  %v5212_v23 = vpop.f32.mrb[214].mxu1  ;;  %v4920_v24 = vadd.f32 %v4919_v56, %v9872_v5  ;;  %v4921_v14 = vpop.f32.mrb[218].mxu0 }
 0x50b   : > { %5599 = vst [vmem:[%s9579_s16 + $0x980] sm:$0xff] %v5209_v20  ;;  %v5213_v1 = vadd.f32 %v5212_v23, %v10078_v36  ;;  %v5214_v19 = vpop.f32.mrb[215].mxu1  ;;  %5693 = vst [vmem:[%s9579_s16 + $0xc70] sm:$0x3] %v4918_v22  ;;  %v4922_v6 = vpop.f32.mrb[219].mxu0 }
 0x50c   : > { %5600 = vst [vmem:[%s9579_s16 + $0x988] sm:$0xff] %v5211_v47  ;;  %v5215_v44 = vadd.f32 %v5214_v19, %v10081_v52  ;;  %5694 = vst [vmem:[%s9579_s16 + $0xc78] sm:$0x3] %v4920_v24 }
 0x50d   : > { %5605 = vst [vmem:[%s9579_s16 + $0x9b0] sm:$0xff] %v5213_v1 }
 0x50e   : > { %5606 = vst [vmem:[%s9579_s16 + $0x9b8] sm:$0xff] %v5215_v44 }
 0x510   : > { %v5218_v25 = vpop.f32.mrb[216].mxu1 }
 0x511   : > { %v5219_v5 = vadd.f32 %v5218_v25, %v10078_v36  ;;  %v5220_v26 = vpop.f32.mrb[217].mxu1 }
 0x512   : > { %v5221_v21 = vadd.f32 %v5220_v26, %v10081_v52  ;;  %v5222_v27 = vpop.f32.mrb[218].mxu1 }
 0x513   : > { %5611 = vst [vmem:[%s9579_s16 + $0x9e0] sm:$0xff] %v5219_v5  ;;  %v5223_v45 = vadd.f32 %v5222_v27, %v10078_v36  ;;  %v5224_v28 = vpop.f32.mrb[219].mxu1 }
 0x514   : > { %5612 = vst [vmem:[%s9579_s16 + $0x9e8] sm:$0xff] %v5221_v21  ;;  %v5225_v0 = vadd.f32 %v5224_v28, %v10081_v52 }
 0x515   : > { %5617 = vst [vmem:[%s9579_s16 + $0xa10] sm:$0xff] %v5223_v45 }
 0x516   : > { %5618 = vst [vmem:[%s9579_s16 + $0xa18] sm:$0xff] %v5225_v0 }
 0x518   : > { %v5228_v41 = vpop.f32.mrb[220].mxu1 }
 0x519   : > { %v5229_v54 = vadd.f32 %v5228_v41, %v10078_v36  ;;  %v5230_v46 = vpop.f32.mrb[221].mxu1 }
 0x51a   : > { %v5231_v39 = vadd.f32 %v5230_v46, %v10081_v52  ;;  %v5232_v51 = vpop.f32.mrb[222].mxu1 }
 0x51b   : > { %5623 = vst [vmem:[%s9579_s16 + $0xa40] sm:$0xff] %v5229_v54  ;;  %v5233_v4 = vadd.f32 %v5232_v51, %v10078_v36  ;;  %v5234_v40 = vpop.f32.mrb[223].mxu1 }
 0x51c   : > { %5624 = vst [vmem:[%s9579_s16 + $0xa48] sm:$0xff] %v5231_v39  ;;  %v5235_v7 = vadd.f32 %v5234_v40, %v10081_v52 }
 0x51d   : > { %5629 = vst [vmem:[%s9579_s16 + $0xa70] sm:$0xff] %v5233_v4 }
 0x51e   : > { %5630 = vst [vmem:[%s9579_s16 + $0xa78] sm:$0xff] %v5235_v7 }
 0x520   : > { %v5238_v10 = vpop.f32.mrb[224].mxu1 }
 0x521   : > { %v5239_v9 = vadd.f32 %v5238_v10, %v10078_v36  ;;  %v5240_v29 = vpop.f32.mrb[225].mxu1 }
 0x522   : > { %v5241_v59 = vadd.f32 %v5240_v29, %v10081_v52  ;;  %v5242_v58 = vpop.f32.mrb[226].mxu1 }
 0x523   : > { %5635 = vst [vmem:[%s9579_s16 + $0xaa0] sm:$0xff] %v5239_v9  ;;  %v5243_v57 = vadd.f32 %v5242_v58, %v10078_v36  ;;  %v5244_v34 = vpop.f32.mrb[227].mxu1 }
 0x524   : > { %5636 = vst [vmem:[%s9579_s16 + $0xaa8] sm:$0xff] %v5241_v59  ;;  %v5245_v8 = vadd.f32 %v5244_v34, %v10081_v52 }
 0x525   : > { %5641 = vst [vmem:[%s9579_s16 + $0xad0] sm:$0xff] %v5243_v57 }
 0x526   : > { %5642 = vst [vmem:[%s9579_s16 + $0xad8] sm:$0xff] %v5245_v8 }
 0x528   : > { %v5248_v30 = vpop.f32.mrb[228].mxu1 }
 0x529   : > { %v5249_v48 = vadd.f32 %v5248_v30, %v10078_v36  ;;  %v5250_v35 = vpop.f32.mrb[229].mxu1 }
 0x52a   : > { %v5251_v37 = vadd.f32 %v5250_v35, %v10081_v52  ;;  %v5252_v38 = vpop.f32.mrb[230].mxu1 }
 0x52b   : > { %5647 = vst [vmem:[%s9579_s16 + $0xb00] sm:$0xff] %v5249_v48  ;;  %v5253_v42 = vadd.f32 %v5252_v38, %v10078_v36  ;;  %v5254_v43 = vpop.f32.mrb[231].mxu1 }
 0x52c   : > { %5648 = vst [vmem:[%s9579_s16 + $0xb08] sm:$0xff] %v5251_v37  ;;  %v5255_v61 = vadd.f32 %v5254_v43, %v10081_v52 }
 0x52d   : > { %5653 = vst [vmem:[%s9579_s16 + $0xb30] sm:$0xff] %v5253_v42 }
 0x52e   : > { %5654 = vst [vmem:[%s9579_s16 + $0xb38] sm:$0xff] %v5255_v61 }
 0x530   : > { %v5258_v49 = vpop.f32.mrb[232].mxu1 }
 0x531   : > { %v5259_v11 = vadd.f32 %v5258_v49, %v10078_v36  ;;  %v5260_v53 = vpop.f32.mrb[233].mxu1 }
 0x532   : > { %v5261_v55 = vadd.f32 %v5260_v53, %v10081_v52  ;;  %v5262_v60 = vpop.f32.mrb[234].mxu1 }
 0x533   : > { %5659 = vst [vmem:[%s9579_s16 + $0xb60] sm:$0xff] %v5259_v11  ;;  %v5263_v62 = vadd.f32 %v5262_v60, %v10078_v36  ;;  %v5264_v63 = vpop.f32.mrb[235].mxu1 }
 0x534   : > { %5660 = vst [vmem:[%s9579_s16 + $0xb68] sm:$0xff] %v5261_v55  ;;  %v5265_v2 = vadd.f32 %v5264_v63, %v10081_v52 }
 0x535   : > { %5665 = vst [vmem:[%s9579_s16 + $0xb90] sm:$0xff] %v5263_v62 }
 0x536   : > { %5666 = vst [vmem:[%s9579_s16 + $0xb98] sm:$0xff] %v5265_v2 }
 0x538   : > { %v5268_v12 = vpop.f32.mrb[236].mxu1 }
 0x539   : > { %v5269_v3 = vadd.f32 %v5268_v12, %v10078_v36  ;;  %v5270_v50 = vpop.f32.mrb[237].mxu1 }
 0x53a   : > { %v5271_v13 = vadd.f32 %v5270_v50, %v10081_v52  ;;  %v5272_v32 = vpop.f32.mrb[238].mxu1 }
 0x53b   : > { %5671 = vst [vmem:[%s9579_s16 + $0xbc0] sm:$0xff] %v5269_v3  ;;  %v5273_v33 = vadd.f32 %v5272_v32, %v10078_v36  ;;  %v5274_v15 = vpop.f32.mrb[239].mxu1 }
 0x53c   : > { %5672 = vst [vmem:[%s9579_s16 + $0xbc8] sm:$0xff] %v5271_v13  ;;  %v5275_v16 = vadd.f32 %v5274_v15, %v10081_v52 }
 0x53d   : > { %5677 = vst [vmem:[%s9579_s16 + $0xbf0] sm:$0xff] %v5273_v33 }
 0x53e   : > { %5678 = vst [vmem:[%s9579_s16 + $0xbf8] sm:$0xff] %v5275_v16 }
 0x540   : > { %v5278_v17 = vpop.f32.mrb[240].mxu1 }
 0x541   : > { %v5279_v18 = vadd.f32 %v5278_v17, %v10078_v36  ;;  %v5280_v20 = vpop.f32.mrb[241].mxu1 }
 0x542   : > { %v5281_v31 = vadd.f32 %v5280_v20, %v10081_v52  ;;  %v5282_v22 = vpop.f32.mrb[242].mxu1 }
 0x543   : > { %5683 = vst [vmem:[%s9579_s16 + $0xc20] sm:$0xff] %v5279_v18  ;;  %v5283_v56 = vadd.f32 %v5282_v22, %v10078_v36  ;;  %v5284_v47 = vpop.f32.mrb[243].mxu1 }
 0x544   : > { %5684 = vst [vmem:[%s9579_s16 + $0xc28] sm:$0xff] %v5281_v31  ;;  %v5285_v23 = vadd.f32 %v5284_v47, %v10081_v52 }
 0x545   : > { %5689 = vst [vmem:[%s9579_s16 + $0xc50] sm:$0xff] %v5283_v56 }
 0x546   : > { %5690 = vst [vmem:[%s9579_s16 + $0xc58] sm:$0xff] %v5285_v23 }
 0x548   : > { %v5288_v24 = vpop.f32.mrb[244].mxu1 }
 0x549   : > { %v5289_v14 = vadd.f32 %v5288_v24, %v10078_v36  ;;  %v5290_v1 = vpop.f32.mrb[245].mxu1 }
 0x54a   : > { %v5291_v19 = vadd.f32 %v5290_v1, %v10081_v52  ;;  %v5292_v6 = vpop.f32.mrb[246].mxu1 }
 0x54b   : > { %5695 = vst [vmem:[%s9579_s16 + $0xc80] sm:$0x3] %v5289_v14  ;;  %v5293_v44 = vpop.f32.mrb[247].mxu1 }
 0x54c   : > { %5696 = vst [vmem:[%s9579_s16 + $0xc88] sm:$0x3] %v5291_v19 }
 0x54d PF: > { %s15_s15 = sadd.s32 1, %s7615_s15  }
 0x54e   : > { %p12_p3 = scmp.ge.s32.totalorder %s15_s15, 4  }
 0x550   :  { %14 = sbr.rel (!%p12_p3) target bundleno = 1 (0x1), region = 75 }
 0x557   :  { %5718 = vsyncpa [#allocation4], 1 }
 0x558   :  { %5720 = vsyncpa [#allocation4 + $0x1], 1 }

</bundles_post_ra>
